<compile_context>
chip_gen: v6e
topology: v6e:2x2x1
jax: 0.10.0
libtpu: 0.0.40
codegen_flags: <defaults>
</compile_context>

<pallas_src>
import functools
import numpy as np
import jax
import jax.numpy as jnp
from jax.experimental import pallas as pl
from jax.experimental.pallas import tpu as pltpu

# ----------------------------- model config (small, synthetic) ----------------
B = 2          # batch
BEAM = 4       # beam size
T = 16         # encoder frames
T2 = 8         # decoder (hyp) length without sos
D_MODEL = 32   # encoder feature dim == decoder d_model
VOCAB = 128
N_HEADS = 4
D_HEAD = D_MODEL // N_HEADS
D_FF = 64
N_LAYERS = 2
CTC_WEIGHT = 0.5
REVERSE_WEIGHT = 0.0     # default in the PyTorch module
NEG_INF = -1e9


# ----------------------------- fused decoder kernel ---------------------------
def _decoder_kernel(
    # scalar-prefetch (SMEM) lengths
    enc_len_ref, hyp_len_ref,
    # per-batch-member data (one grid step == one batch member, all beam hyps)
    x0_ref, mem_ref,
    # stacked per-layer weights (leading dim = layer); matmul weights are bf16
    ln1_g, ln1_b, ln2_g, ln2_b, ln3_g, ln3_b,
    w_sqkv, b_sqkv, w_so, b_so,
    w_cq, b_cq, w_ckv, b_ckv, w_co, b_co,
    w_f1, b_f1, w_f2, b_f2,
    # tail weights
    aft_g, aft_b, w_out, b_out,
    # output: log-softmax'ed logits, lane-dense over V
    out_ref,
    *, n_layers, n_heads, d_head):
    bidx = pl.program_id(0)
    beam, t_dec, d_model = x0_ref.shape
    t_enc = mem_ref.shape[0]
    bt = beam * t_dec
    bf16 = jnp.bfloat16

    x = x0_ref[...].reshape(bt, d_model)      # (beam*T2, D) f32, flattened for matmuls
    mem = mem_ref[...]                        # (T, D)      encoder memory (shared by beam)

    # --- attention biases built in-kernel from SMEM lengths (no mask DMAs) ---
    enc_len = enc_len_ref[bidx]
    kcol = jax.lax.broadcasted_iota(jnp.int32, (1, 1, t_enc), 2)
    cross_bias = jnp.where(kcol < enc_len, 0.0, NEG_INF)          # (1,1,T)

    row = jax.lax.broadcasted_iota(jnp.int32, (beam, t_dec, t_dec), 1)
    col = jax.lax.broadcasted_iota(jnp.int32, (beam, t_dec, t_dec), 2)
    hid = jax.lax.broadcasted_iota(jnp.int32, (beam, t_dec, t_dec), 0)
    hyp_len = jnp.zeros((beam, t_dec, t_dec), jnp.int32)
    for i in range(beam):                      # splat per-hyp length via selects
        hyp_len = jnp.where(hid == i, hyp_len_ref[bidx, i], hyp_len)
    self_bias = jnp.where((col <= row) & (col < hyp_len), 0.0, NEG_INF)  # (beam,T2,T2)

    def layer_norm(v, g, b):
        mu = jnp.mean(v, axis=-1, keepdims=True)
        var = jnp.mean((v - mu) ** 2, axis=-1, keepdims=True)
        return (v - mu) * jax.lax.rsqrt(var + 1e-5) * g + b

    def softmax(s):
        s = s - jnp.max(s, axis=-1, keepdims=True)
        p = jnp.exp(s)
        return p / jnp.sum(p, axis=-1, keepdims=True)

    def mha(q3, k3, v3, bias, w_o):
        # q3: (beam, Tq, D); k3, v3: (beam, Tk, D); bias broadcastable to (beam,Tq,Tk)
        # w_o: (H, Dh, D) bf16 — O-projection folded per head (no lane concat).
        # 1/sqrt(d_head) is already folded into the Q weights.
        tq = q3.shape[1]
        out = jnp.zeros((beam * tq, d_model), jnp.float32)
        for h in range(n_heads):
            sl = slice(h * d_head, (h + 1) * d_head)
            s = jnp.einsum('bqd,bkd->bqk',
                           q3[..., sl].astype(bf16), k3[..., sl].astype(bf16),
                           preferred_element_type=jnp.float32)
            p = softmax(s + bias)
            ctx = jnp.einsum('bqk,bkd->bqd',
                             p.astype(bf16), v3[..., sl].astype(bf16),
                             preferred_element_type=jnp.float32)
            out = out + jnp.dot(ctx.reshape(beam * tq, d_head).astype(bf16),
                                w_o[h], preferred_element_type=jnp.float32)
        return out

    for l in range(n_layers):
        # --- self-attention sub-layer (pre-norm, residual), fused QKV ---
        xn = layer_norm(x, ln1_g[l], ln1_b[l])
        qkv = jnp.dot(xn.astype(bf16), w_sqkv[l],
                      preferred_element_type=jnp.float32) + b_sqkv[l]
        q3 = qkv[:, :d_model].reshape(beam, t_dec, d_model)
        k3 = qkv[:, d_model:2 * d_model].reshape(beam, t_dec, d_model)
        v3 = qkv[:, 2 * d_model:].reshape(beam, t_dec, d_model)
        x = x + mha(q3, k3, v3, self_bias, w_so[l]) + b_so[l]

        # --- cross-attention; K/V computed ONCE per batch member (shared by beam) ---
        xn = layer_norm(x, ln2_g[l], ln2_b[l])
        q3 = (jnp.dot(xn.astype(bf16), w_cq[l],
                      preferred_element_type=jnp.float32) + b_cq[l]
              ).reshape(beam, t_dec, d_model)
        kv = jnp.dot(mem.astype(bf16), w_ckv[l],
                     preferred_element_type=jnp.float32) + b_ckv[l]      # (T, 2D)
        k3 = jnp.broadcast_to(kv[:, :d_model][None], (beam, t_enc, d_model))
        v3 = jnp.broadcast_to(kv[:, d_model:][None], (beam, t_enc, d_model))
        x = x + mha(q3, k3, v3, cross_bias, w_co[l]) + b_co[l]

        # --- position-wise feed-forward ---
        xn = layer_norm(x, ln3_g[l], ln3_b[l])
        h1 = jnp.maximum(jnp.dot(xn.astype(bf16), w_f1[l],
                                 preferred_element_type=jnp.float32) + b_f1[l], 0.0)
        x = x + jnp.dot(h1.astype(bf16), w_f2[l],
                        preferred_element_type=jnp.float32) + b_f2[l]

    # --- final LayerNorm + vocab projection + log_softmax (lane-dense V) ---
    xn = layer_norm(x, aft_g[...], aft_b[...])
    logits = jnp.dot(xn.astype(bf16), w_out[...],
                     preferred_element_type=jnp.float32) + b_out[...]
    m = jnp.max(logits, axis=-1, keepdims=True)
    lse = jnp.log(jnp.sum(jnp.exp(logits - m), axis=-1, keepdims=True)) + m
    out_ref[...] = (logits - lse).reshape(beam, t_dec, logits.shape[-1])


def _full_spec(arr):
    """BlockSpec keeping the whole (tiny) weight array resident in VMEM."""
    zeros = (0,) * arr.ndim
    return pl.BlockSpec(arr.shape, lambda b, *_: zeros)


# ----------------------------- Decoder.forward --------------------------------
def decoder_forward(params, encoder_out, encoder_lens, hyps_pad_sos_eos,
                    hyps_lens_sos, r_hyps_pad_sos_eos, ctc_score,
                    ctc_weight=CTC_WEIGHT, reverse_weight=REVERSE_WEIGHT,
                    beam_size=BEAM, n_heads=N_HEADS):
    Bb, Tt, Dm = encoder_out.shape
    bz = beam_size
    B2 = Bb * bz
    T2_ = hyps_pad_sos_eos.shape[2] - 1
    V = params["wout"].shape[1]
    n_layers = params["w_self_qkv"].shape[0]
    d_head = Dm // n_heads

    hyps_pad = hyps_pad_sos_eos.reshape(B2, T2_ + 1)
    hyps_lens = hyps_lens_sos.reshape(B2).astype(jnp.int32)
    hyps_pad_sos = hyps_pad[:, :-1]
    hyps_pad_eos = hyps_pad[:, 1:]

    # embedding * sqrt(d_model) + sinusoidal PE (eval mode, no dropout)
    x0 = (params["embed"][hyps_pad_sos] * float(np.sqrt(Dm))
          + params["pe"][:T2_][None]).astype(jnp.float32)
    x0 = x0.reshape(Bb, bz, T2_, Dm)                               # (B, beam, T2, D)

    bf16 = jnp.bfloat16
    scale = 1.0 / float(np.sqrt(d_head))
    # fold 1/sqrt(d_head) into the Q projections (removes per-head VPU scales)
    w_sqkv = params["w_self_qkv"].at[:, :, :Dm].multiply(scale)
    b_sqkv = params["b_self_qkv"].at[:, :, :Dm].multiply(scale)
    w_cq = params["w_src_q"] * scale
    b_cq = params["b_src_q"] * scale
    # head-major O-projection weights (L, H, Dh, D): per-head fold, no lane concat
    w_so = params["w_self_o"].reshape(n_layers, n_heads, d_head, Dm)
    w_co = params["w_src_o"].reshape(n_layers, n_heads, d_head, Dm)

    weights = [
        params["ln1_g"], params["ln1_b"], params["ln2_g"], params["ln2_b"],
        params["ln3_g"], params["ln3_b"],
        w_sqkv.astype(bf16), b_sqkv, w_so.astype(bf16), params["b_self_o"],
        w_cq.astype(bf16), b_cq,
        params["w_src_kv"].astype(bf16), params["b_src_kv"],
        w_co.astype(bf16), params["b_src_o"],
        params["w_ff1"].astype(bf16), params["b_ff1"],
        params["w_ff2"].astype(bf16), params["b_ff2"],
        params["aft_g"], params["aft_b"],
        params["wout"].astype(bf16), params["bout"],
    ]

    kern = functools.partial(_decoder_kernel, n_layers=n_layers,
                             n_heads=n_heads, d_head=d_head)

    grid_spec = pltpu.PrefetchScalarGridSpec(
        num_scalar_prefetch=2,
        grid=(Bb,),                                             # 2 steps; parallel for v7x
        in_specs=[
            pl.BlockSpec((None, bz, T2_, Dm), lambda b, *_: (b, 0, 0, 0)),   # x0
            pl.BlockSpec((None, Tt, Dm), lambda b, *_: (b, 0, 0)),           # encoder memory
        ] + [_full_spec(w) for w in weights],
        out_specs=pl.BlockSpec((None, bz, T2_, V), lambda b, *_: (b, 0, 0, 0)),
    )

    logprobs = pl.pallas_call(
        kern,
        out_shape=jax.ShapeDtypeStruct((Bb, bz, T2_, V), jnp.float32),
        grid_spec=grid_spec,
        compiler_params=pltpu.CompilerParams(dimension_semantics=("parallel",)),
    )(encoder_lens.astype(jnp.int32), hyps_lens_sos.astype(jnp.int32),
      x0, encoder_out.astype(jnp.float32), *weights)

    decoder_out = logprobs                                       # (B, beam, T2, V)

    # TODO(synk): reverse_weight > 0 (right-to-left rescoring) branch not
    # implemented; module default reverse_weight=0.0 skips it.

    # token-score gather + CTC mixing + beam argmax: tiny, stays in plain JAX
    logp2 = logprobs.reshape(B2, T2_, V)
    tgt_valid = jnp.arange(T2_)[None, :] < hyps_lens[:, None]
    index = jnp.where(tgt_valid, hyps_pad_eos, 0).astype(jnp.int32)
    tok = jnp.take_along_axis(logp2, index[:, :, None], axis=2)[:, :, 0]
    score = jnp.sum(tok * tgt_valid.astype(jnp.float32), axis=1).reshape(Bb, bz)
    score = score + ctc_weight * ctc_score
    best_index = jnp.argmax(score, axis=1)                       # (B,)
    # decoder_fastertransformer=True path: return (decoder_out, best_index)
    return decoder_out, best_index


# ----------------------------- deterministic params ---------------------------
def make_pe(max_len, d_model):
    pos = np.arange(max_len, dtype=np.float32)[:, None]
    div = np.exp(np.arange(0, d_model, 2, dtype=np.float32)
                 * (-np.log(10000.0) / d_model))
    pe = np.zeros((max_len, d_model), np.float32)
    pe[:, 0::2] = np.sin(pos * div)
    pe[:, 1::2] = np.cos(pos * div)
    return pe


def init_params(key, vocab, d_model, d_ff, n_layers, max_len=64):
    keys = iter(jax.random.split(key, 16))

    def w(shape, scale=0.05):
        return jax.random.normal(next(keys), shape, jnp.float32) * scale

    def zeros(*shape):
        return jnp.zeros(shape, jnp.float32)

    def ones(*shape):
        return jnp.ones(shape, jnp.float32)

    L, D = n_layers, d_model
    return {
        "embed": w((vocab, D), 0.1),
        "pe": jnp.asarray(make_pe(max_len, D)),
        "ln1_g": ones(L, 1, D), "ln1_b": zeros(L, 1, D),
        "ln2_g": ones(L, 1, D), "ln2_b": zeros(L, 1, D),
        "ln3_g": ones(L, 1, D), "ln3_b": zeros(L, 1, D),
        "w_self_qkv": w((L, D, 3 * D)), "b_self_qkv": zeros(L, 1, 3 * D),
        "w_self_o": w((L, D, D)), "b_self_o": zeros(L, 1, D),
        "w_src_q": w((L, D, D)), "b_src_q": zeros(L, 1, D),
        "w_src_kv": w((L, D, 2 * D)), "b_src_kv": zeros(L, 1, 2 * D),
        "w_src_o": w((L, D, D)), "b_src_o": zeros(L, 1, D),
        "w_ff1": w((L, D, d_ff)), "b_ff1": zeros(L, 1, d_ff),
        "w_ff2": w((L, d_ff, D)), "b_ff2": zeros(L, 1, D),
        "aft_g": ones(1, D), "aft_b": zeros(1, D),
        "wout": w((D, vocab)), "bout": zeros(1, vocab),
    }


# ----------------------------- main -------------------------------------------
if __name__ == "__main__":
    key = jax.random.PRNGKey(0)
    k_enc, k_len, k_tok, k_hl, k_ctc, k_par = jax.random.split(key, 6)

    params = init_params(k_par, VOCAB, D_MODEL, D_FF, N_LAYERS)

    encoder_out = jax.random.normal(k_enc, (B, T, D_MODEL), jnp.float32)
    encoder_lens = jnp.array([T, T - 4], dtype=jnp.int32)

    sos = eos = VOCAB - 1
    raw_tokens = np.asarray(jax.random.randint(k_tok, (B, BEAM, T2 - 1), 1, VOCAB - 1))
    content_len = np.asarray(jax.random.randint(k_hl, (B, BEAM), 2, T2))  # in [2, T2-1]

    hyps_pad_sos_eos = np.zeros((B, BEAM, T2 + 1), np.int32)
    r_hyps_pad_sos_eos = np.zeros((B, BEAM, T2 + 1), np.int32)
    for b in range(B):
        for i in range(BEAM):
            L = int(content_len[b, i])
            toks = raw_tokens[b, i, :L]
            hyps_pad_sos_eos[b, i, 0] = sos
            hyps_pad_sos_eos[b, i, 1:1 + L] = toks
            hyps_pad_sos_eos[b, i, 1 + L] = eos
            r_hyps_pad_sos_eos[b, i, 0] = sos
            r_hyps_pad_sos_eos[b, i, 1:1 + L] = toks[::-1]
            r_hyps_pad_sos_eos[b, i, 1 + L] = eos
    hyps_pad_sos_eos = jnp.asarray(hyps_pad_sos_eos)
    r_hyps_pad_sos_eos = jnp.asarray(r_hyps_pad_sos_eos)
    hyps_lens_sos = jnp.asarray(content_len + 1, dtype=jnp.int32)     # includes sos
    ctc_score = jax.random.normal(k_ctc, (B, BEAM), jnp.float32)

    decoder_out, best_index = decoder_forward(
        params, encoder_out, encoder_lens, hyps_pad_sos_eos,
        hyps_lens_sos, r_hyps_pad_sos_eos, ctc_score)

    jax.block_until_ready((decoder_out, best_index))
    assert decoder_out.shape == (B, BEAM, T2, VOCAB)
    assert best_index.shape == (B,)
    print("KERNEL_OK")
</pallas_src>

<mosaic_0001>
module attributes {stable_mosaic.version = 11 : i64} {
  func.func @_decoder_kernel(%arg0: i32, %arg1: memref<2xi32, #tpu.memory_space<smem>>, %arg2: memref<2x4xi32, #tpu.memory_space<smem>>, %arg3: memref<1x4x8x32xf32, #tpu.memory_space<vmem>>, %arg4: memref<1x16x32xf32, #tpu.memory_space<vmem>>, %arg5: memref<2x1x32xf32, #tpu.memory_space<vmem>>, %arg6: memref<2x1x32xf32, #tpu.memory_space<vmem>>, %arg7: memref<2x1x32xf32, #tpu.memory_space<vmem>>, %arg8: memref<2x1x32xf32, #tpu.memory_space<vmem>>, %arg9: memref<2x1x32xf32, #tpu.memory_space<vmem>>, %arg10: memref<2x1x32xf32, #tpu.memory_space<vmem>>, %arg11: memref<2x32x96xbf16, #tpu.memory_space<vmem>>, %arg12: memref<2x1x96xf32, #tpu.memory_space<vmem>>, %arg13: memref<2x4x8x32xbf16, #tpu.memory_space<vmem>>, %arg14: memref<2x1x32xf32, #tpu.memory_space<vmem>>, %arg15: memref<2x32x32xbf16, #tpu.memory_space<vmem>>, %arg16: memref<2x1x32xf32, #tpu.memory_space<vmem>>, %arg17: memref<2x32x64xbf16, #tpu.memory_space<vmem>>, %arg18: memref<2x1x64xf32, #tpu.memory_space<vmem>>, %arg19: memref<2x4x8x32xbf16, #tpu.memory_space<vmem>>, %arg20: memref<2x1x32xf32, #tpu.memory_space<vmem>>, %arg21: memref<2x32x64xbf16, #tpu.memory_space<vmem>>, %arg22: memref<2x1x64xf32, #tpu.memory_space<vmem>>, %arg23: memref<2x64x32xbf16, #tpu.memory_space<vmem>>, %arg24: memref<2x1x32xf32, #tpu.memory_space<vmem>>, %arg25: memref<1x32xf32, #tpu.memory_space<vmem>>, %arg26: memref<1x32xf32, #tpu.memory_space<vmem>>, %arg27: memref<32x128xbf16, #tpu.memory_space<vmem>>, %arg28: memref<1x128xf32, #tpu.memory_space<vmem>>, %arg29: memref<1x4x8x128xf32, #tpu.memory_space<vmem>>) attributes {dimension_semantics = [#tpu.dimension_semantics<parallel>], iteration_bounds = array<i64: 2>, scalar_prefetch = 2 : i64, scratch_operands = 0 : i64, tpu.core_type = #tpu.core_type<tc>, window_params = [{transform_indices = @transform_0, window_bounds = array<i64: 1, 4, 8, 32>}, {transform_indices = @transform_1, window_bounds = array<i64: 1, 16, 32>}, {pipeline_mode = #tpu.pipeline_mode<synchronous>, transform_indices = @transform_2, window_bounds = array<i64: 2, 1, 32>}, {pipeline_mode = #tpu.pipeline_mode<synchronous>, transform_indices = @transform_3, window_bounds = array<i64: 2, 1, 32>}, {pipeline_mode = #tpu.pipeline_mode<synchronous>, transform_indices = @transform_4, window_bounds = array<i64: 2, 1, 32>}, {pipeline_mode = #tpu.pipeline_mode<synchronous>, transform_indices = @transform_5, window_bounds = array<i64: 2, 1, 32>}, {pipeline_mode = #tpu.pipeline_mode<synchronous>, transform_indices = @transform_6, window_bounds = array<i64: 2, 1, 32>}, {pipeline_mode = #tpu.pipeline_mode<synchronous>, transform_indices = @transform_7, window_bounds = array<i64: 2, 1, 32>}, {pipeline_mode = #tpu.pipeline_mode<synchronous>, transform_indices = @transform_8, window_bounds = array<i64: 2, 32, 96>}, {pipeline_mode = #tpu.pipeline_mode<synchronous>, transform_indices = @transform_9, window_bounds = array<i64: 2, 1, 96>}, {pipeline_mode = #tpu.pipeline_mode<synchronous>, transform_indices = @transform_10, window_bounds = array<i64: 2, 4, 8, 32>}, {pipeline_mode = #tpu.pipeline_mode<synchronous>, transform_indices = @transform_11, window_bounds = array<i64: 2, 1, 32>}, {pipeline_mode = #tpu.pipeline_mode<synchronous>, transform_indices = @transform_12, window_bounds = array<i64: 2, 32, 32>}, {pipeline_mode = #tpu.pipeline_mode<synchronous>, transform_indices = @transform_13, window_bounds = array<i64: 2, 1, 32>}, {pipeline_mode = #tpu.pipeline_mode<synchronous>, transform_indices = @transform_14, window_bounds = array<i64: 2, 32, 64>}, {pipeline_mode = #tpu.pipeline_mode<synchronous>, transform_indices = @transform_15, window_bounds = array<i64: 2, 1, 64>}, {pipeline_mode = #tpu.pipeline_mode<synchronous>, transform_indices = @transform_16, window_bounds = array<i64: 2, 4, 8, 32>}, {pipeline_mode = #tpu.pipeline_mode<synchronous>, transform_indices = @transform_17, window_bounds = array<i64: 2, 1, 32>}, {pipeline_mode = #tpu.pipeline_mode<synchronous>, transform_indices = @transform_18, window_bounds = array<i64: 2, 32, 64>}, {pipeline_mode = #tpu.pipeline_mode<synchronous>, transform_indices = @transform_19, window_bounds = array<i64: 2, 1, 64>}, {pipeline_mode = #tpu.pipeline_mode<synchronous>, transform_indices = @transform_20, window_bounds = array<i64: 2, 64, 32>}, {pipeline_mode = #tpu.pipeline_mode<synchronous>, transform_indices = @transform_21, window_bounds = array<i64: 2, 1, 32>}, {pipeline_mode = #tpu.pipeline_mode<synchronous>, transform_indices = @transform_22, window_bounds = array<i64: 1, 32>}, {pipeline_mode = #tpu.pipeline_mode<synchronous>, transform_indices = @transform_23, window_bounds = array<i64: 1, 32>}, {pipeline_mode = #tpu.pipeline_mode<synchronous>, transform_indices = @transform_24, window_bounds = array<i64: 32, 128>}, {pipeline_mode = #tpu.pipeline_mode<synchronous>, transform_indices = @transform_25, window_bounds = array<i64: 1, 128>}, {transform_indices = @transform_26, window_bounds = array<i64: 1, 4, 8, 128>}]} {
    %c0 = arith.constant 0 : index
    %c0_0 = arith.constant 0 : index
    %c0_1 = arith.constant 0 : index
    %c0_2 = arith.constant 0 : index
    %0 = vector.load %arg3[%c0, %c0_0, %c0_1, %c0_2] : memref<1x4x8x32xf32, #tpu.memory_space<vmem>>, vector<1x4x8x32xf32>
    %1 = vector.shape_cast %0 : vector<1x4x8x32xf32> to vector<4x8x32xf32>
    %2 = vector.shape_cast %1 : vector<4x8x32xf32> to vector<32x32xf32>
    %c0_3 = arith.constant 0 : index
    %c0_4 = arith.constant 0 : index
    %c0_5 = arith.constant 0 : index
    %3 = vector.load %arg4[%c0_3, %c0_4, %c0_5] : memref<1x16x32xf32, #tpu.memory_space<vmem>>, vector<1x16x32xf32>
    %4 = vector.shape_cast %3 : vector<1x16x32xf32> to vector<16x32xf32>
    %5 = arith.index_cast %arg0 : i32 to index
    %6 = memref.load %arg1[%5] : memref<2xi32, #tpu.memory_space<smem>>
    %7 = tpu.iota {dimensions = array<i32: 2>} : vector<1x1x16xi32>
    %8 = vector.broadcast %6 : i32 to vector<1x1x16xi32>
    %9 = arith.cmpi slt, %7, %8 : vector<1x1x16xi32>
    %cst = arith.constant 0.000000e+00 : f32
    %cst_6 = arith.constant -1.000000e+09 : f32
    %10 = vector.broadcast %cst : f32 to vector<1x1x16xf32>
    %11 = vector.broadcast %cst_6 : f32 to vector<1x1x16xf32>
    %12 = arith.select %9, %10, %11 : vector<1x1x16xi1>, vector<1x1x16xf32>
    %13 = tpu.iota {dimensions = array<i32: 1>} : vector<4x8x8xi32>
    %14 = tpu.iota {dimensions = array<i32: 2>} : vector<4x8x8xi32>
    %15 = tpu.iota {dimensions = array<i32: 0>} : vector<4x8x8xi32>
    %c0_i32 = arith.constant 0 : i32
    %16 = vector.broadcast %c0_i32 : i32 to vector<4x8x8xi32>
    %c0_i32_7 = arith.constant 0 : i32
    %17 = vector.broadcast %c0_i32_7 : i32 to vector<4x8x8xi32>
    %18 = arith.cmpi eq, %15, %17 : vector<4x8x8xi32>
    %19 = arith.index_cast %arg0 : i32 to index
    %c0_8 = arith.constant 0 : index
    %20 = memref.load %arg2[%19, %c0_8] : memref<2x4xi32, #tpu.memory_space<smem>>
    %21 = vector.broadcast %20 : i32 to vector<4x8x8xi32>
    %22 = arith.select %18, %21, %16 : vector<4x8x8xi1>, vector<4x8x8xi32>
    %c1_i32 = arith.constant 1 : i32
    %23 = vector.broadcast %c1_i32 : i32 to vector<4x8x8xi32>
    %24 = arith.cmpi eq, %15, %23 : vector<4x8x8xi32>
    %25 = arith.index_cast %arg0 : i32 to index
    %c1 = arith.constant 1 : index
    %26 = memref.load %arg2[%25, %c1] : memref<2x4xi32, #tpu.memory_space<smem>>
    %27 = vector.broadcast %26 : i32 to vector<4x8x8xi32>
    %28 = arith.select %24, %27, %22 : vector<4x8x8xi1>, vector<4x8x8xi32>
    %c2_i32 = arith.constant 2 : i32
    %29 = vector.broadcast %c2_i32 : i32 to vector<4x8x8xi32>
    %30 = arith.cmpi eq, %15, %29 : vector<4x8x8xi32>
    %31 = arith.index_cast %arg0 : i32 to index
    %c2 = arith.constant 2 : index
    %32 = memref.load %arg2[%31, %c2] : memref<2x4xi32, #tpu.memory_space<smem>>
    %33 = vector.broadcast %32 : i32 to vector<4x8x8xi32>
    %34 = arith.select %30, %33, %28 : vector<4x8x8xi1>, vector<4x8x8xi32>
    %c3_i32 = arith.constant 3 : i32
    %35 = vector.broadcast %c3_i32 : i32 to vector<4x8x8xi32>
    %36 = arith.cmpi eq, %15, %35 : vector<4x8x8xi32>
    %37 = arith.index_cast %arg0 : i32 to index
    %c3 = arith.constant 3 : index
    %38 = memref.load %arg2[%37, %c3] : memref<2x4xi32, #tpu.memory_space<smem>>
    %39 = vector.broadcast %38 : i32 to vector<4x8x8xi32>
    %40 = arith.select %36, %39, %34 : vector<4x8x8xi1>, vector<4x8x8xi32>
    %41 = arith.cmpi sle, %14, %13 : vector<4x8x8xi32>
    %42 = arith.cmpi slt, %14, %40 : vector<4x8x8xi32>
    %43 = arith.andi %41, %42 : vector<4x8x8xi1>
    %cst_9 = arith.constant 0.000000e+00 : f32
    %cst_10 = arith.constant -1.000000e+09 : f32
    %44 = vector.broadcast %cst_9 : f32 to vector<4x8x8xf32>
    %45 = vector.broadcast %cst_10 : f32 to vector<4x8x8xf32>
    %46 = arith.select %43, %44, %45 : vector<4x8x8xi1>, vector<4x8x8xf32>
    %c0_11 = arith.constant 0 : index
    %c0_12 = arith.constant 0 : index
    %c0_13 = arith.constant 0 : index
    %47 = vector.load %arg5[%c0_11, %c0_12, %c0_13] : memref<2x1x32xf32, #tpu.memory_space<vmem>>, vector<1x1x32xf32>
    %48 = vector.shape_cast %47 : vector<1x1x32xf32> to vector<1x32xf32>
    %c0_14 = arith.constant 0 : index
    %c0_15 = arith.constant 0 : index
    %c0_16 = arith.constant 0 : index
    %49 = vector.load %arg6[%c0_14, %c0_15, %c0_16] : memref<2x1x32xf32, #tpu.memory_space<vmem>>, vector<1x1x32xf32>
    %50 = vector.shape_cast %49 : vector<1x1x32xf32> to vector<1x32xf32>
    %cst_17 = arith.constant dense<0.000000e+00> : vector<32xf32>
    %51 = vector.multi_reduction <add>, %2, %cst_17 [1] : vector<32x32xf32> to vector<32xf32>
    %52 = vector.shape_cast %51 : vector<32xf32> to vector<32x1xf32>
    %cst_18 = arith.constant 3.200000e+01 : f32
    %53 = vector.broadcast %cst_18 : f32 to vector<32x1xf32>
    %54 = arith.divf %52, %53 : vector<32x1xf32>
    %55 = vector.broadcast %54 : vector<32x1xf32> to vector<32x32xf32>
    %56 = arith.subf %2, %55 : vector<32x32xf32>
    %57 = arith.mulf %56, %56 : vector<32x32xf32>
    %cst_19 = arith.constant dense<0.000000e+00> : vector<32xf32>
    %58 = vector.multi_reduction <add>, %57, %cst_19 [1] : vector<32x32xf32> to vector<32xf32>
    %59 = vector.shape_cast %58 : vector<32xf32> to vector<32x1xf32>
    %cst_20 = arith.constant 3.200000e+01 : f32
    %60 = vector.broadcast %cst_20 : f32 to vector<32x1xf32>
    %61 = arith.divf %59, %60 : vector<32x1xf32>
    %62 = vector.broadcast %54 : vector<32x1xf32> to vector<32x32xf32>
    %63 = arith.subf %2, %62 : vector<32x32xf32>
    %cst_21 = arith.constant 9.99999974E-6 : f32
    %64 = vector.broadcast %cst_21 : f32 to vector<32x1xf32>
    %65 = arith.addf %61, %64 : vector<32x1xf32>
    %66 = math.rsqrt %65 : vector<32x1xf32>
    %67 = vector.broadcast %66 : vector<32x1xf32> to vector<32x32xf32>
    %68 = arith.mulf %63, %67 : vector<32x32xf32>
    %69 = vector.broadcast %48 : vector<1x32xf32> to vector<32x32xf32>
    %70 = arith.mulf %68, %69 : vector<32x32xf32>
    %71 = vector.broadcast %50 : vector<1x32xf32> to vector<32x32xf32>
    %72 = arith.addf %70, %71 : vector<32x32xf32>
    %73 = arith.truncf %72 : vector<32x32xf32> to vector<32x32xbf16>
    %c0_22 = arith.constant 0 : index
    %c0_23 = arith.constant 0 : index
    %c0_24 = arith.constant 0 : index
    %74 = vector.load %arg11[%c0_22, %c0_23, %c0_24] : memref<2x32x96xbf16, #tpu.memory_space<vmem>>, vector<1x32x96xbf16>
    %75 = vector.shape_cast %74 : vector<1x32x96xbf16> to vector<32x96xbf16>
    %cst_25 = arith.constant dense<0.000000e+00> : vector<32x96xf32>
    %76 = tpu.matmul %73, %75, %cst_25 {dimension_numbers = #tpu.dot_dimension_numbers<[1], [0], [0], [1], [0, 0, 1, 1], [], []>} : vector<32x32xbf16>, vector<32x96xbf16>, vector<32x96xf32> -> vector<32x96xf32>
    %c0_26 = arith.constant 0 : index
    %c0_27 = arith.constant 0 : index
    %c0_28 = arith.constant 0 : index
    %77 = vector.load %arg12[%c0_26, %c0_27, %c0_28] : memref<2x1x96xf32, #tpu.memory_space<vmem>>, vector<1x1x96xf32>
    %78 = vector.shape_cast %77 : vector<1x1x96xf32> to vector<1x96xf32>
    %79 = vector.broadcast %78 : vector<1x96xf32> to vector<32x96xf32>
    %80 = arith.addf %76, %79 : vector<32x96xf32>
    %81 = vector.extract_strided_slice %80 {offsets = [0, 0], sizes = [32, 32], strides = [1, 1]} : vector<32x96xf32> to vector<32x32xf32>
    %82 = vector.shape_cast %81 : vector<32x32xf32> to vector<4x8x32xf32>
    %83 = vector.extract_strided_slice %80 {offsets = [0, 32], sizes = [32, 32], strides = [1, 1]} : vector<32x96xf32> to vector<32x32xf32>
    %84 = vector.shape_cast %83 : vector<32x32xf32> to vector<4x8x32xf32>
    %85 = vector.extract_strided_slice %80 {offsets = [0, 64], sizes = [32, 32], strides = [1, 1]} : vector<32x96xf32> to vector<32x32xf32>
    %86 = vector.shape_cast %85 : vector<32x32xf32> to vector<4x8x32xf32>
    %c0_29 = arith.constant 0 : index
    %c0_30 = arith.constant 0 : index
    %c0_31 = arith.constant 0 : index
    %c0_32 = arith.constant 0 : index
    %87 = vector.load %arg13[%c0_29, %c0_30, %c0_31, %c0_32] : memref<2x4x8x32xbf16, #tpu.memory_space<vmem>>, vector<1x4x8x32xbf16>
    %88 = vector.shape_cast %87 : vector<1x4x8x32xbf16> to vector<4x8x32xbf16>
    %cst_33 = arith.constant 0.000000e+00 : f32
    %89 = vector.broadcast %cst_33 : f32 to vector<32x32xf32>
    %90 = vector.extract_strided_slice %82 {offsets = [0, 0, 0], sizes = [4, 8, 8], strides = [1, 1, 1]} : vector<4x8x32xf32> to vector<4x8x8xf32>
    %91 = arith.truncf %90 : vector<4x8x8xf32> to vector<4x8x8xbf16>
    %92 = vector.extract_strided_slice %84 {offsets = [0, 0, 0], sizes = [4, 8, 8], strides = [1, 1, 1]} : vector<4x8x32xf32> to vector<4x8x8xf32>
    %93 = arith.truncf %92 : vector<4x8x8xf32> to vector<4x8x8xbf16>
    "tpu.trace_start"() <{level = 10 : i32, message = "bqd,bkd->bqk"}> : () -> ()
    %cst_34 = arith.constant dense<0.000000e+00> : vector<4x8x8xf32>
    %94 = tpu.matmul %91, %93, %cst_34 {dimension_numbers = #tpu.dot_dimension_numbers<[2], [2], [1], [1], [0, 0, 0, 1, 1, 1], [0], [0]>} : vector<4x8x8xbf16>, vector<4x8x8xbf16>, vector<4x8x8xf32> -> vector<4x8x8xf32>
    "tpu.trace_stop"() : () -> ()
    %95 = arith.addf %94, %46 : vector<4x8x8xf32>
    %cst_35 = arith.constant dense<0xFF800000> : vector<4x8xf32>
    %96 = vector.multi_reduction <maximumf>, %95, %cst_35 [2] : vector<4x8x8xf32> to vector<4x8xf32>
    %97 = vector.shape_cast %96 : vector<4x8xf32> to vector<4x8x1xf32>
    %98 = vector.broadcast %97 : vector<4x8x1xf32> to vector<4x8x8xf32>
    %99 = arith.subf %95, %98 : vector<4x8x8xf32>
    %100 = math.exp %99 : vector<4x8x8xf32>
    %cst_36 = arith.constant dense<0.000000e+00> : vector<4x8xf32>
    %101 = vector.multi_reduction <add>, %100, %cst_36 [2] : vector<4x8x8xf32> to vector<4x8xf32>
    %102 = vector.shape_cast %101 : vector<4x8xf32> to vector<4x8x1xf32>
    %103 = vector.broadcast %102 : vector<4x8x1xf32> to vector<4x8x8xf32>
    %104 = arith.divf %100, %103 : vector<4x8x8xf32>
    %105 = arith.truncf %104 : vector<4x8x8xf32> to vector<4x8x8xbf16>
    %106 = vector.extract_strided_slice %86 {offsets = [0, 0, 0], sizes = [4, 8, 8], strides = [1, 1, 1]} : vector<4x8x32xf32> to vector<4x8x8xf32>
    %107 = arith.truncf %106 : vector<4x8x8xf32> to vector<4x8x8xbf16>
    "tpu.trace_start"() <{level = 10 : i32, message = "bqk,bkd->bqd"}> : () -> ()
    %cst_37 = arith.constant dense<0.000000e+00> : vector<4x8x8xf32>
    %108 = tpu.matmul %105, %107, %cst_37 {dimension_numbers = #tpu.dot_dimension_numbers<[2], [1], [1], [2], [0, 0, 0, 1, 1, 2], [0], [0]>} : vector<4x8x8xbf16>, vector<4x8x8xbf16>, vector<4x8x8xf32> -> vector<4x8x8xf32>
    "tpu.trace_stop"() : () -> ()
    %109 = vector.shape_cast %108 : vector<4x8x8xf32> to vector<32x8xf32>
    %110 = arith.truncf %109 : vector<32x8xf32> to vector<32x8xbf16>
    %111 = vector.extract_strided_slice %88 {offsets = [0, 0, 0], sizes = [1, 8, 32], strides = [1, 1, 1]} : vector<4x8x32xbf16> to vector<1x8x32xbf16>
    %112 = vector.shape_cast %111 : vector<1x8x32xbf16> to vector<8x32xbf16>
    %cst_38 = arith.constant dense<0.000000e+00> : vector<32x32xf32>
    %113 = tpu.matmul %110, %112, %cst_38 {dimension_numbers = #tpu.dot_dimension_numbers<[1], [0], [0], [1], [0, 0, 1, 1], [], []>} : vector<32x8xbf16>, vector<8x32xbf16>, vector<32x32xf32> -> vector<32x32xf32>
    %114 = arith.addf %89, %113 : vector<32x32xf32>
    %115 = vector.extract_strided_slice %82 {offsets = [0, 0, 8], sizes = [4, 8, 8], strides = [1, 1, 1]} : vector<4x8x32xf32> to vector<4x8x8xf32>
    %116 = arith.truncf %115 : vector<4x8x8xf32> to vector<4x8x8xbf16>
    %117 = vector.extract_strided_slice %84 {offsets = [0, 0, 8], sizes = [4, 8, 8], strides = [1, 1, 1]} : vector<4x8x32xf32> to vector<4x8x8xf32>
    %118 = arith.truncf %117 : vector<4x8x8xf32> to vector<4x8x8xbf16>
    "tpu.trace_start"() <{level = 10 : i32, message = "bqd,bkd->bqk"}> : () -> ()
    %cst_39 = arith.constant dense<0.000000e+00> : vector<4x8x8xf32>
    %119 = tpu.matmul %116, %118, %cst_39 {dimension_numbers = #tpu.dot_dimension_numbers<[2], [2], [1], [1], [0, 0, 0, 1, 1, 1], [0], [0]>} : vector<4x8x8xbf16>, vector<4x8x8xbf16>, vector<4x8x8xf32> -> vector<4x8x8xf32>
    "tpu.trace_stop"() : () -> ()
    %120 = arith.addf %119, %46 : vector<4x8x8xf32>
    %cst_40 = arith.constant dense<0xFF800000> : vector<4x8xf32>
    %121 = vector.multi_reduction <maximumf>, %120, %cst_40 [2] : vector<4x8x8xf32> to vector<4x8xf32>
    %122 = vector.shape_cast %121 : vector<4x8xf32> to vector<4x8x1xf32>
    %123 = vector.broadcast %122 : vector<4x8x1xf32> to vector<4x8x8xf32>
    %124 = arith.subf %120, %123 : vector<4x8x8xf32>
    %125 = math.exp %124 : vector<4x8x8xf32>
    %cst_41 = arith.constant dense<0.000000e+00> : vector<4x8xf32>
    %126 = vector.multi_reduction <add>, %125, %cst_41 [2] : vector<4x8x8xf32> to vector<4x8xf32>
    %127 = vector.shape_cast %126 : vector<4x8xf32> to vector<4x8x1xf32>
    %128 = vector.broadcast %127 : vector<4x8x1xf32> to vector<4x8x8xf32>
    %129 = arith.divf %125, %128 : vector<4x8x8xf32>
    %130 = arith.truncf %129 : vector<4x8x8xf32> to vector<4x8x8xbf16>
    %131 = vector.extract_strided_slice %86 {offsets = [0, 0, 8], sizes = [4, 8, 8], strides = [1, 1, 1]} : vector<4x8x32xf32> to vector<4x8x8xf32>
    %132 = arith.truncf %131 : vector<4x8x8xf32> to vector<4x8x8xbf16>
    "tpu.trace_start"() <{level = 10 : i32, message = "bqk,bkd->bqd"}> : () -> ()
    %cst_42 = arith.constant dense<0.000000e+00> : vector<4x8x8xf32>
    %133 = tpu.matmul %130, %132, %cst_42 {dimension_numbers = #tpu.dot_dimension_numbers<[2], [1], [1], [2], [0, 0, 0, 1, 1, 2], [0], [0]>} : vector<4x8x8xbf16>, vector<4x8x8xbf16>, vector<4x8x8xf32> -> vector<4x8x8xf32>
    "tpu.trace_stop"() : () -> ()
    %134 = vector.shape_cast %133 : vector<4x8x8xf32> to vector<32x8xf32>
    %135 = arith.truncf %134 : vector<32x8xf32> to vector<32x8xbf16>
    %136 = vector.extract_strided_slice %88 {offsets = [1, 0, 0], sizes = [1, 8, 32], strides = [1, 1, 1]} : vector<4x8x32xbf16> to vector<1x8x32xbf16>
    %137 = vector.shape_cast %136 : vector<1x8x32xbf16> to vector<8x32xbf16>
    %cst_43 = arith.constant dense<0.000000e+00> : vector<32x32xf32>
    %138 = tpu.matmul %135, %137, %cst_43 {dimension_numbers = #tpu.dot_dimension_numbers<[1], [0], [0], [1], [0, 0, 1, 1], [], []>} : vector<32x8xbf16>, vector<8x32xbf16>, vector<32x32xf32> -> vector<32x32xf32>
    %139 = arith.addf %114, %138 : vector<32x32xf32>
    %140 = vector.extract_strided_slice %82 {offsets = [0, 0, 16], sizes = [4, 8, 8], strides = [1, 1, 1]} : vector<4x8x32xf32> to vector<4x8x8xf32>
    %141 = arith.truncf %140 : vector<4x8x8xf32> to vector<4x8x8xbf16>
    %142 = vector.extract_strided_slice %84 {offsets = [0, 0, 16], sizes = [4, 8, 8], strides = [1, 1, 1]} : vector<4x8x32xf32> to vector<4x8x8xf32>
    %143 = arith.truncf %142 : vector<4x8x8xf32> to vector<4x8x8xbf16>
    "tpu.trace_start"() <{level = 10 : i32, message = "bqd,bkd->bqk"}> : () -> ()
    %cst_44 = arith.constant dense<0.000000e+00> : vector<4x8x8xf32>
    %144 = tpu.matmul %141, %143, %cst_44 {dimension_numbers = #tpu.dot_dimension_numbers<[2], [2], [1], [1], [0, 0, 0, 1, 1, 1], [0], [0]>} : vector<4x8x8xbf16>, vector<4x8x8xbf16>, vector<4x8x8xf32> -> vector<4x8x8xf32>
    "tpu.trace_stop"() : () -> ()
    %145 = arith.addf %144, %46 : vector<4x8x8xf32>
    %cst_45 = arith.constant dense<0xFF800000> : vector<4x8xf32>
    %146 = vector.multi_reduction <maximumf>, %145, %cst_45 [2] : vector<4x8x8xf32> to vector<4x8xf32>
    %147 = vector.shape_cast %146 : vector<4x8xf32> to vector<4x8x1xf32>
    %148 = vector.broadcast %147 : vector<4x8x1xf32> to vector<4x8x8xf32>
    %149 = arith.subf %145, %148 : vector<4x8x8xf32>
    %150 = math.exp %149 : vector<4x8x8xf32>
    %cst_46 = arith.constant dense<0.000000e+00> : vector<4x8xf32>
    %151 = vector.multi_reduction <add>, %150, %cst_46 [2] : vector<4x8x8xf32> to vector<4x8xf32>
    %152 = vector.shape_cast %151 : vector<4x8xf32> to vector<4x8x1xf32>
    %153 = vector.broadcast %152 : vector<4x8x1xf32> to vector<4x8x8xf32>
    %154 = arith.divf %150, %153 : vector<4x8x8xf32>
    %155 = arith.truncf %154 : vector<4x8x8xf32> to vector<4x8x8xbf16>
    %156 = vector.extract_strided_slice %86 {offsets = [0, 0, 16], sizes = [4, 8, 8], strides = [1, 1, 1]} : vector<4x8x32xf32> to vector<4x8x8xf32>
    %157 = arith.truncf %156 : vector<4x8x8xf32> to vector<4x8x8xbf16>
    "tpu.trace_start"() <{level = 10 : i32, message = "bqk,bkd->bqd"}> : () -> ()
    %cst_47 = arith.constant dense<0.000000e+00> : vector<4x8x8xf32>
    %158 = tpu.matmul %155, %157, %cst_47 {dimension_numbers = #tpu.dot_dimension_numbers<[2], [1], [1], [2], [0, 0, 0, 1, 1, 2], [0], [0]>} : vector<4x8x8xbf16>, vector<4x8x8xbf16>, vector<4x8x8xf32> -> vector<4x8x8xf32>
    "tpu.trace_stop"() : () -> ()
    %159 = vector.shape_cast %158 : vector<4x8x8xf32> to vector<32x8xf32>
    %160 = arith.truncf %159 : vector<32x8xf32> to vector<32x8xbf16>
    %161 = vector.extract_strided_slice %88 {offsets = [2, 0, 0], sizes = [1, 8, 32], strides = [1, 1, 1]} : vector<4x8x32xbf16> to vector<1x8x32xbf16>
    %162 = vector.shape_cast %161 : vector<1x8x32xbf16> to vector<8x32xbf16>
    %cst_48 = arith.constant dense<0.000000e+00> : vector<32x32xf32>
    %163 = tpu.matmul %160, %162, %cst_48 {dimension_numbers = #tpu.dot_dimension_numbers<[1], [0], [0], [1], [0, 0, 1, 1], [], []>} : vector<32x8xbf16>, vector<8x32xbf16>, vector<32x32xf32> -> vector<32x32xf32>
    %164 = arith.addf %139, %163 : vector<32x32xf32>
    %165 = vector.extract_strided_slice %82 {offsets = [0, 0, 24], sizes = [4, 8, 8], strides = [1, 1, 1]} : vector<4x8x32xf32> to vector<4x8x8xf32>
    %166 = arith.truncf %165 : vector<4x8x8xf32> to vector<4x8x8xbf16>
    %167 = vector.extract_strided_slice %84 {offsets = [0, 0, 24], sizes = [4, 8, 8], strides = [1, 1, 1]} : vector<4x8x32xf32> to vector<4x8x8xf32>
    %168 = arith.truncf %167 : vector<4x8x8xf32> to vector<4x8x8xbf16>
    "tpu.trace_start"() <{level = 10 : i32, message = "bqd,bkd->bqk"}> : () -> ()
    %cst_49 = arith.constant dense<0.000000e+00> : vector<4x8x8xf32>
    %169 = tpu.matmul %166, %168, %cst_49 {dimension_numbers = #tpu.dot_dimension_numbers<[2], [2], [1], [1], [0, 0, 0, 1, 1, 1], [0], [0]>} : vector<4x8x8xbf16>, vector<4x8x8xbf16>, vector<4x8x8xf32> -> vector<4x8x8xf32>
    "tpu.trace_stop"() : () -> ()
    %170 = arith.addf %169, %46 : vector<4x8x8xf32>
    %cst_50 = arith.constant dense<0xFF800000> : vector<4x8xf32>
    %171 = vector.multi_reduction <maximumf>, %170, %cst_50 [2] : vector<4x8x8xf32> to vector<4x8xf32>
    %172 = vector.shape_cast %171 : vector<4x8xf32> to vector<4x8x1xf32>
    %173 = vector.broadcast %172 : vector<4x8x1xf32> to vector<4x8x8xf32>
    %174 = arith.subf %170, %173 : vector<4x8x8xf32>
    %175 = math.exp %174 : vector<4x8x8xf32>
    %cst_51 = arith.constant dense<0.000000e+00> : vector<4x8xf32>
    %176 = vector.multi_reduction <add>, %175, %cst_51 [2] : vector<4x8x8xf32> to vector<4x8xf32>
    %177 = vector.shape_cast %176 : vector<4x8xf32> to vector<4x8x1xf32>
    %178 = vector.broadcast %177 : vector<4x8x1xf32> to vector<4x8x8xf32>
    %179 = arith.divf %175, %178 : vector<4x8x8xf32>
    %180 = arith.truncf %179 : vector<4x8x8xf32> to vector<4x8x8xbf16>
    %181 = vector.extract_strided_slice %86 {offsets = [0, 0, 24], sizes = [4, 8, 8], strides = [1, 1, 1]} : vector<4x8x32xf32> to vector<4x8x8xf32>
    %182 = arith.truncf %181 : vector<4x8x8xf32> to vector<4x8x8xbf16>
    "tpu.trace_start"() <{level = 10 : i32, message = "bqk,bkd->bqd"}> : () -> ()
    %cst_52 = arith.constant dense<0.000000e+00> : vector<4x8x8xf32>
    %183 = tpu.matmul %180, %182, %cst_52 {dimension_numbers = #tpu.dot_dimension_numbers<[2], [1], [1], [2], [0, 0, 0, 1, 1, 2], [0], [0]>} : vector<4x8x8xbf16>, vector<4x8x8xbf16>, vector<4x8x8xf32> -> vector<4x8x8xf32>
    "tpu.trace_stop"() : () -> ()
    %184 = vector.shape_cast %183 : vector<4x8x8xf32> to vector<32x8xf32>
    %185 = arith.truncf %184 : vector<32x8xf32> to vector<32x8xbf16>
    %186 = vector.extract_strided_slice %88 {offsets = [3, 0, 0], sizes = [1, 8, 32], strides = [1, 1, 1]} : vector<4x8x32xbf16> to vector<1x8x32xbf16>
    %187 = vector.shape_cast %186 : vector<1x8x32xbf16> to vector<8x32xbf16>
    %cst_53 = arith.constant dense<0.000000e+00> : vector<32x32xf32>
    %188 = tpu.matmul %185, %187, %cst_53 {dimension_numbers = #tpu.dot_dimension_numbers<[1], [0], [0], [1], [0, 0, 1, 1], [], []>} : vector<32x8xbf16>, vector<8x32xbf16>, vector<32x32xf32> -> vector<32x32xf32>
    %189 = arith.addf %164, %188 : vector<32x32xf32>
    %190 = arith.addf %2, %189 : vector<32x32xf32>
    %c0_54 = arith.constant 0 : index
    %c0_55 = arith.constant 0 : index
    %c0_56 = arith.constant 0 : index
    %191 = vector.load %arg14[%c0_54, %c0_55, %c0_56] : memref<2x1x32xf32, #tpu.memory_space<vmem>>, vector<1x1x32xf32>
    %192 = vector.shape_cast %191 : vector<1x1x32xf32> to vector<1x32xf32>
    %193 = vector.broadcast %192 : vector<1x32xf32> to vector<32x32xf32>
    %194 = arith.addf %190, %193 : vector<32x32xf32>
    %c0_57 = arith.constant 0 : index
    %c0_58 = arith.constant 0 : index
    %c0_59 = arith.constant 0 : index
    %195 = vector.load %arg7[%c0_57, %c0_58, %c0_59] : memref<2x1x32xf32, #tpu.memory_space<vmem>>, vector<1x1x32xf32>
    %196 = vector.shape_cast %195 : vector<1x1x32xf32> to vector<1x32xf32>
    %c0_60 = arith.constant 0 : index
    %c0_61 = arith.constant 0 : index
    %c0_62 = arith.constant 0 : index
    %197 = vector.load %arg8[%c0_60, %c0_61, %c0_62] : memref<2x1x32xf32, #tpu.memory_space<vmem>>, vector<1x1x32xf32>
    %198 = vector.shape_cast %197 : vector<1x1x32xf32> to vector<1x32xf32>
    %cst_63 = arith.constant dense<0.000000e+00> : vector<32xf32>
    %199 = vector.multi_reduction <add>, %194, %cst_63 [1] : vector<32x32xf32> to vector<32xf32>
    %200 = vector.shape_cast %199 : vector<32xf32> to vector<32x1xf32>
    %cst_64 = arith.constant 3.200000e+01 : f32
    %201 = vector.broadcast %cst_64 : f32 to vector<32x1xf32>
    %202 = arith.divf %200, %201 : vector<32x1xf32>
    %203 = vector.broadcast %202 : vector<32x1xf32> to vector<32x32xf32>
    %204 = arith.subf %194, %203 : vector<32x32xf32>
    %205 = arith.mulf %204, %204 : vector<32x32xf32>
    %cst_65 = arith.constant dense<0.000000e+00> : vector<32xf32>
    %206 = vector.multi_reduction <add>, %205, %cst_65 [1] : vector<32x32xf32> to vector<32xf32>
    %207 = vector.shape_cast %206 : vector<32xf32> to vector<32x1xf32>
    %cst_66 = arith.constant 3.200000e+01 : f32
    %208 = vector.broadcast %cst_66 : f32 to vector<32x1xf32>
    %209 = arith.divf %207, %208 : vector<32x1xf32>
    %210 = vector.broadcast %202 : vector<32x1xf32> to vector<32x32xf32>
    %211 = arith.subf %194, %210 : vector<32x32xf32>
    %cst_67 = arith.constant 9.99999974E-6 : f32
    %212 = vector.broadcast %cst_67 : f32 to vector<32x1xf32>
    %213 = arith.addf %209, %212 : vector<32x1xf32>
    %214 = math.rsqrt %213 : vector<32x1xf32>
    %215 = vector.broadcast %214 : vector<32x1xf32> to vector<32x32xf32>
    %216 = arith.mulf %211, %215 : vector<32x32xf32>
    %217 = vector.broadcast %196 : vector<1x32xf32> to vector<32x32xf32>
    %218 = arith.mulf %216, %217 : vector<32x32xf32>
    %219 = vector.broadcast %198 : vector<1x32xf32> to vector<32x32xf32>
    %220 = arith.addf %218, %219 : vector<32x32xf32>
    %221 = arith.truncf %220 : vector<32x32xf32> to vector<32x32xbf16>
    %c0_68 = arith.constant 0 : index
    %c0_69 = arith.constant 0 : index
    %c0_70 = arith.constant 0 : index
    %222 = vector.load %arg15[%c0_68, %c0_69, %c0_70] : memref<2x32x32xbf16, #tpu.memory_space<vmem>>, vector<1x32x32xbf16>
    %223 = vector.shape_cast %222 : vector<1x32x32xbf16> to vector<32x32xbf16>
    %cst_71 = arith.constant dense<0.000000e+00> : vector<32x32xf32>
    %224 = tpu.matmul %221, %223, %cst_71 {dimension_numbers = #tpu.dot_dimension_numbers<[1], [0], [0], [1], [0, 0, 1, 1], [], []>} : vector<32x32xbf16>, vector<32x32xbf16>, vector<32x32xf32> -> vector<32x32xf32>
    %c0_72 = arith.constant 0 : index
    %c0_73 = arith.constant 0 : index
    %c0_74 = arith.constant 0 : index
    %225 = vector.load %arg16[%c0_72, %c0_73, %c0_74] : memref<2x1x32xf32, #tpu.memory_space<vmem>>, vector<1x1x32xf32>
    %226 = vector.shape_cast %225 : vector<1x1x32xf32> to vector<1x32xf32>
    %227 = vector.broadcast %226 : vector<1x32xf32> to vector<32x32xf32>
    %228 = arith.addf %224, %227 : vector<32x32xf32>
    %229 = vector.shape_cast %228 : vector<32x32xf32> to vector<4x8x32xf32>
    %230 = arith.truncf %4 : vector<16x32xf32> to vector<16x32xbf16>
    %c0_75 = arith.constant 0 : index
    %c0_76 = arith.constant 0 : index
    %c0_77 = arith.constant 0 : index
    %231 = vector.load %arg17[%c0_75, %c0_76, %c0_77] : memref<2x32x64xbf16, #tpu.memory_space<vmem>>, vector<1x32x64xbf16>
    %232 = vector.shape_cast %231 : vector<1x32x64xbf16> to vector<32x64xbf16>
    %cst_78 = arith.constant dense<0.000000e+00> : vector<16x64xf32>
    %233 = tpu.matmul %230, %232, %cst_78 {dimension_numbers = #tpu.dot_dimension_numbers<[1], [0], [0], [1], [0, 0, 1, 1], [], []>} : vector<16x32xbf16>, vector<32x64xbf16>, vector<16x64xf32> -> vector<16x64xf32>
    %c0_79 = arith.constant 0 : index
    %c0_80 = arith.constant 0 : index
    %c0_81 = arith.constant 0 : index
    %234 = vector.load %arg18[%c0_79, %c0_80, %c0_81] : memref<2x1x64xf32, #tpu.memory_space<vmem>>, vector<1x1x64xf32>
    %235 = vector.shape_cast %234 : vector<1x1x64xf32> to vector<1x64xf32>
    %236 = vector.broadcast %235 : vector<1x64xf32> to vector<16x64xf32>
    %237 = arith.addf %233, %236 : vector<16x64xf32>
    %238 = vector.extract_strided_slice %237 {offsets = [0, 0], sizes = [16, 32], strides = [1, 1]} : vector<16x64xf32> to vector<16x32xf32>
    %239 = vector.shape_cast %238 : vector<16x32xf32> to vector<1x16x32xf32>
    %240 = vector.shape_cast %239 : vector<1x16x32xf32> to vector<1x16x32xf32>
    %241 = vector.broadcast %240 : vector<1x16x32xf32> to vector<4x16x32xf32>
    %242 = vector.extract_strided_slice %237 {offsets = [0, 32], sizes = [16, 32], strides = [1, 1]} : vector<16x64xf32> to vector<16x32xf32>
    %243 = vector.shape_cast %242 : vector<16x32xf32> to vector<1x16x32xf32>
    %244 = vector.shape_cast %243 : vector<1x16x32xf32> to vector<1x16x32xf32>
    %245 = vector.broadcast %244 : vector<1x16x32xf32> to vector<4x16x32xf32>
    %c0_82 = arith.constant 0 : index
    %c0_83 = arith.constant 0 : index
    %c0_84 = arith.constant 0 : index
    %c0_85 = arith.constant 0 : index
    %246 = vector.load %arg19[%c0_82, %c0_83, %c0_84, %c0_85] : memref<2x4x8x32xbf16, #tpu.memory_space<vmem>>, vector<1x4x8x32xbf16>
    %247 = vector.shape_cast %246 : vector<1x4x8x32xbf16> to vector<4x8x32xbf16>
    %cst_86 = arith.constant 0.000000e+00 : f32
    %248 = vector.broadcast %cst_86 : f32 to vector<32x32xf32>
    %249 = vector.extract_strided_slice %229 {offsets = [0, 0, 0], sizes = [4, 8, 8], strides = [1, 1, 1]} : vector<4x8x32xf32> to vector<4x8x8xf32>
    %250 = arith.truncf %249 : vector<4x8x8xf32> to vector<4x8x8xbf16>
    %251 = vector.extract_strided_slice %241 {offsets = [0, 0, 0], sizes = [4, 16, 8], strides = [1, 1, 1]} : vector<4x16x32xf32> to vector<4x16x8xf32>
    %252 = arith.truncf %251 : vector<4x16x8xf32> to vector<4x16x8xbf16>
    "tpu.trace_start"() <{level = 10 : i32, message = "bqd,bkd->bqk"}> : () -> ()
    %cst_87 = arith.constant dense<0.000000e+00> : vector<4x8x16xf32>
    %253 = tpu.matmul %250, %252, %cst_87 {dimension_numbers = #tpu.dot_dimension_numbers<[2], [2], [1], [1], [0, 0, 0, 1, 1, 1], [0], [0]>} : vector<4x8x8xbf16>, vector<4x16x8xbf16>, vector<4x8x16xf32> -> vector<4x8x16xf32>
    "tpu.trace_stop"() : () -> ()
    %254 = vector.broadcast %12 : vector<1x1x16xf32> to vector<4x8x16xf32>
    %255 = arith.addf %253, %254 : vector<4x8x16xf32>
    %cst_88 = arith.constant dense<0xFF800000> : vector<4x8xf32>
    %256 = vector.multi_reduction <maximumf>, %255, %cst_88 [2] : vector<4x8x16xf32> to vector<4x8xf32>
    %257 = vector.shape_cast %256 : vector<4x8xf32> to vector<4x8x1xf32>
    %258 = vector.broadcast %257 : vector<4x8x1xf32> to vector<4x8x16xf32>
    %259 = arith.subf %255, %258 : vector<4x8x16xf32>
    %260 = math.exp %259 : vector<4x8x16xf32>
    %cst_89 = arith.constant dense<0.000000e+00> : vector<4x8xf32>
    %261 = vector.multi_reduction <add>, %260, %cst_89 [2] : vector<4x8x16xf32> to vector<4x8xf32>
    %262 = vector.shape_cast %261 : vector<4x8xf32> to vector<4x8x1xf32>
    %263 = vector.broadcast %262 : vector<4x8x1xf32> to vector<4x8x16xf32>
    %264 = arith.divf %260, %263 : vector<4x8x16xf32>
    %265 = arith.truncf %264 : vector<4x8x16xf32> to vector<4x8x16xbf16>
    %266 = vector.extract_strided_slice %245 {offsets = [0, 0, 0], sizes = [4, 16, 8], strides = [1, 1, 1]} : vector<4x16x32xf32> to vector<4x16x8xf32>
    %267 = arith.truncf %266 : vector<4x16x8xf32> to vector<4x16x8xbf16>
    "tpu.trace_start"() <{level = 10 : i32, message = "bqk,bkd->bqd"}> : () -> ()
    %cst_90 = arith.constant dense<0.000000e+00> : vector<4x8x8xf32>
    %268 = tpu.matmul %265, %267, %cst_90 {dimension_numbers = #tpu.dot_dimension_numbers<[2], [1], [1], [2], [0, 0, 0, 1, 1, 2], [0], [0]>} : vector<4x8x16xbf16>, vector<4x16x8xbf16>, vector<4x8x8xf32> -> vector<4x8x8xf32>
    "tpu.trace_stop"() : () -> ()
    %269 = vector.shape_cast %268 : vector<4x8x8xf32> to vector<32x8xf32>
    %270 = arith.truncf %269 : vector<32x8xf32> to vector<32x8xbf16>
    %271 = vector.extract_strided_slice %247 {offsets = [0, 0, 0], sizes = [1, 8, 32], strides = [1, 1, 1]} : vector<4x8x32xbf16> to vector<1x8x32xbf16>
    %272 = vector.shape_cast %271 : vector<1x8x32xbf16> to vector<8x32xbf16>
    %cst_91 = arith.constant dense<0.000000e+00> : vector<32x32xf32>
    %273 = tpu.matmul %270, %272, %cst_91 {dimension_numbers = #tpu.dot_dimension_numbers<[1], [0], [0], [1], [0, 0, 1, 1], [], []>} : vector<32x8xbf16>, vector<8x32xbf16>, vector<32x32xf32> -> vector<32x32xf32>
    %274 = arith.addf %248, %273 : vector<32x32xf32>
    %275 = vector.extract_strided_slice %229 {offsets = [0, 0, 8], sizes = [4, 8, 8], strides = [1, 1, 1]} : vector<4x8x32xf32> to vector<4x8x8xf32>
    %276 = arith.truncf %275 : vector<4x8x8xf32> to vector<4x8x8xbf16>
    %277 = vector.extract_strided_slice %241 {offsets = [0, 0, 8], sizes = [4, 16, 8], strides = [1, 1, 1]} : vector<4x16x32xf32> to vector<4x16x8xf32>
    %278 = arith.truncf %277 : vector<4x16x8xf32> to vector<4x16x8xbf16>
    "tpu.trace_start"() <{level = 10 : i32, message = "bqd,bkd->bqk"}> : () -> ()
    %cst_92 = arith.constant dense<0.000000e+00> : vector<4x8x16xf32>
    %279 = tpu.matmul %276, %278, %cst_92 {dimension_numbers = #tpu.dot_dimension_numbers<[2], [2], [1], [1], [0, 0, 0, 1, 1, 1], [0], [0]>} : vector<4x8x8xbf16>, vector<4x16x8xbf16>, vector<4x8x16xf32> -> vector<4x8x16xf32>
    "tpu.trace_stop"() : () -> ()
    %280 = vector.broadcast %12 : vector<1x1x16xf32> to vector<4x8x16xf32>
    %281 = arith.addf %279, %280 : vector<4x8x16xf32>
    %cst_93 = arith.constant dense<0xFF800000> : vector<4x8xf32>
    %282 = vector.multi_reduction <maximumf>, %281, %cst_93 [2] : vector<4x8x16xf32> to vector<4x8xf32>
    %283 = vector.shape_cast %282 : vector<4x8xf32> to vector<4x8x1xf32>
    %284 = vector.broadcast %283 : vector<4x8x1xf32> to vector<4x8x16xf32>
    %285 = arith.subf %281, %284 : vector<4x8x16xf32>
    %286 = math.exp %285 : vector<4x8x16xf32>
    %cst_94 = arith.constant dense<0.000000e+00> : vector<4x8xf32>
    %287 = vector.multi_reduction <add>, %286, %cst_94 [2] : vector<4x8x16xf32> to vector<4x8xf32>
    %288 = vector.shape_cast %287 : vector<4x8xf32> to vector<4x8x1xf32>
    %289 = vector.broadcast %288 : vector<4x8x1xf32> to vector<4x8x16xf32>
    %290 = arith.divf %286, %289 : vector<4x8x16xf32>
    %291 = arith.truncf %290 : vector<4x8x16xf32> to vector<4x8x16xbf16>
    %292 = vector.extract_strided_slice %245 {offsets = [0, 0, 8], sizes = [4, 16, 8], strides = [1, 1, 1]} : vector<4x16x32xf32> to vector<4x16x8xf32>
    %293 = arith.truncf %292 : vector<4x16x8xf32> to vector<4x16x8xbf16>
    "tpu.trace_start"() <{level = 10 : i32, message = "bqk,bkd->bqd"}> : () -> ()
    %cst_95 = arith.constant dense<0.000000e+00> : vector<4x8x8xf32>
    %294 = tpu.matmul %291, %293, %cst_95 {dimension_numbers = #tpu.dot_dimension_numbers<[2], [1], [1], [2], [0, 0, 0, 1, 1, 2], [0], [0]>} : vector<4x8x16xbf16>, vector<4x16x8xbf16>, vector<4x8x8xf32> -> vector<4x8x8xf32>
    "tpu.trace_stop"() : () -> ()
    %295 = vector.shape_cast %294 : vector<4x8x8xf32> to vector<32x8xf32>
    %296 = arith.truncf %295 : vector<32x8xf32> to vector<32x8xbf16>
    %297 = vector.extract_strided_slice %247 {offsets = [1, 0, 0], sizes = [1, 8, 32], strides = [1, 1, 1]} : vector<4x8x32xbf16> to vector<1x8x32xbf16>
    %298 = vector.shape_cast %297 : vector<1x8x32xbf16> to vector<8x32xbf16>
    %cst_96 = arith.constant dense<0.000000e+00> : vector<32x32xf32>
    %299 = tpu.matmul %296, %298, %cst_96 {dimension_numbers = #tpu.dot_dimension_numbers<[1], [0], [0], [1], [0, 0, 1, 1], [], []>} : vector<32x8xbf16>, vector<8x32xbf16>, vector<32x32xf32> -> vector<32x32xf32>
    %300 = arith.addf %274, %299 : vector<32x32xf32>
    %301 = vector.extract_strided_slice %229 {offsets = [0, 0, 16], sizes = [4, 8, 8], strides = [1, 1, 1]} : vector<4x8x32xf32> to vector<4x8x8xf32>
    %302 = arith.truncf %301 : vector<4x8x8xf32> to vector<4x8x8xbf16>
    %303 = vector.extract_strided_slice %241 {offsets = [0, 0, 16], sizes = [4, 16, 8], strides = [1, 1, 1]} : vector<4x16x32xf32> to vector<4x16x8xf32>
    %304 = arith.truncf %303 : vector<4x16x8xf32> to vector<4x16x8xbf16>
    "tpu.trace_start"() <{level = 10 : i32, message = "bqd,bkd->bqk"}> : () -> ()
    %cst_97 = arith.constant dense<0.000000e+00> : vector<4x8x16xf32>
    %305 = tpu.matmul %302, %304, %cst_97 {dimension_numbers = #tpu.dot_dimension_numbers<[2], [2], [1], [1], [0, 0, 0, 1, 1, 1], [0], [0]>} : vector<4x8x8xbf16>, vector<4x16x8xbf16>, vector<4x8x16xf32> -> vector<4x8x16xf32>
    "tpu.trace_stop"() : () -> ()
    %306 = vector.broadcast %12 : vector<1x1x16xf32> to vector<4x8x16xf32>
    %307 = arith.addf %305, %306 : vector<4x8x16xf32>
    %cst_98 = arith.constant dense<0xFF800000> : vector<4x8xf32>
    %308 = vector.multi_reduction <maximumf>, %307, %cst_98 [2] : vector<4x8x16xf32> to vector<4x8xf32>
    %309 = vector.shape_cast %308 : vector<4x8xf32> to vector<4x8x1xf32>
    %310 = vector.broadcast %309 : vector<4x8x1xf32> to vector<4x8x16xf32>
    %311 = arith.subf %307, %310 : vector<4x8x16xf32>
    %312 = math.exp %311 : vector<4x8x16xf32>
    %cst_99 = arith.constant dense<0.000000e+00> : vector<4x8xf32>
    %313 = vector.multi_reduction <add>, %312, %cst_99 [2] : vector<4x8x16xf32> to vector<4x8xf32>
    %314 = vector.shape_cast %313 : vector<4x8xf32> to vector<4x8x1xf32>
    %315 = vector.broadcast %314 : vector<4x8x1xf32> to vector<4x8x16xf32>
    %316 = arith.divf %312, %315 : vector<4x8x16xf32>
    %317 = arith.truncf %316 : vector<4x8x16xf32> to vector<4x8x16xbf16>
    %318 = vector.extract_strided_slice %245 {offsets = [0, 0, 16], sizes = [4, 16, 8], strides = [1, 1, 1]} : vector<4x16x32xf32> to vector<4x16x8xf32>
    %319 = arith.truncf %318 : vector<4x16x8xf32> to vector<4x16x8xbf16>
    "tpu.trace_start"() <{level = 10 : i32, message = "bqk,bkd->bqd"}> : () -> ()
    %cst_100 = arith.constant dense<0.000000e+00> : vector<4x8x8xf32>
    %320 = tpu.matmul %317, %319, %cst_100 {dimension_numbers = #tpu.dot_dimension_numbers<[2], [1], [1], [2], [0, 0, 0, 1, 1, 2], [0], [0]>} : vector<4x8x16xbf16>, vector<4x16x8xbf16>, vector<4x8x8xf32> -> vector<4x8x8xf32>
    "tpu.trace_stop"() : () -> ()
    %321 = vector.shape_cast %320 : vector<4x8x8xf32> to vector<32x8xf32>
    %322 = arith.truncf %321 : vector<32x8xf32> to vector<32x8xbf16>
    %323 = vector.extract_strided_slice %247 {offsets = [2, 0, 0], sizes = [1, 8, 32], strides = [1, 1, 1]} : vector<4x8x32xbf16> to vector<1x8x32xbf16>
    %324 = vector.shape_cast %323 : vector<1x8x32xbf16> to vector<8x32xbf16>
    %cst_101 = arith.constant dense<0.000000e+00> : vector<32x32xf32>
    %325 = tpu.matmul %322, %324, %cst_101 {dimension_numbers = #tpu.dot_dimension_numbers<[1], [0], [0], [1], [0, 0, 1, 1], [], []>} : vector<32x8xbf16>, vector<8x32xbf16>, vector<32x32xf32> -> vector<32x32xf32>
    %326 = arith.addf %300, %325 : vector<32x32xf32>
    %327 = vector.extract_strided_slice %229 {offsets = [0, 0, 24], sizes = [4, 8, 8], strides = [1, 1, 1]} : vector<4x8x32xf32> to vector<4x8x8xf32>
    %328 = arith.truncf %327 : vector<4x8x8xf32> to vector<4x8x8xbf16>
    %329 = vector.extract_strided_slice %241 {offsets = [0, 0, 24], sizes = [4, 16, 8], strides = [1, 1, 1]} : vector<4x16x32xf32> to vector<4x16x8xf32>
    %330 = arith.truncf %329 : vector<4x16x8xf32> to vector<4x16x8xbf16>
    "tpu.trace_start"() <{level = 10 : i32, message = "bqd,bkd->bqk"}> : () -> ()
    %cst_102 = arith.constant dense<0.000000e+00> : vector<4x8x16xf32>
    %331 = tpu.matmul %328, %330, %cst_102 {dimension_numbers = #tpu.dot_dimension_numbers<[2], [2], [1], [1], [0, 0, 0, 1, 1, 1], [0], [0]>} : vector<4x8x8xbf16>, vector<4x16x8xbf16>, vector<4x8x16xf32> -> vector<4x8x16xf32>
    "tpu.trace_stop"() : () -> ()
    %332 = vector.broadcast %12 : vector<1x1x16xf32> to vector<4x8x16xf32>
    %333 = arith.addf %331, %332 : vector<4x8x16xf32>
    %cst_103 = arith.constant dense<0xFF800000> : vector<4x8xf32>
    %334 = vector.multi_reduction <maximumf>, %333, %cst_103 [2] : vector<4x8x16xf32> to vector<4x8xf32>
    %335 = vector.shape_cast %334 : vector<4x8xf32> to vector<4x8x1xf32>
    %336 = vector.broadcast %335 : vector<4x8x1xf32> to vector<4x8x16xf32>
    %337 = arith.subf %333, %336 : vector<4x8x16xf32>
    %338 = math.exp %337 : vector<4x8x16xf32>
    %cst_104 = arith.constant dense<0.000000e+00> : vector<4x8xf32>
    %339 = vector.multi_reduction <add>, %338, %cst_104 [2] : vector<4x8x16xf32> to vector<4x8xf32>
    %340 = vector.shape_cast %339 : vector<4x8xf32> to vector<4x8x1xf32>
    %341 = vector.broadcast %340 : vector<4x8x1xf32> to vector<4x8x16xf32>
    %342 = arith.divf %338, %341 : vector<4x8x16xf32>
    %343 = arith.truncf %342 : vector<4x8x16xf32> to vector<4x8x16xbf16>
    %344 = vector.extract_strided_slice %245 {offsets = [0, 0, 24], sizes = [4, 16, 8], strides = [1, 1, 1]} : vector<4x16x32xf32> to vector<4x16x8xf32>
    %345 = arith.truncf %344 : vector<4x16x8xf32> to vector<4x16x8xbf16>
    "tpu.trace_start"() <{level = 10 : i32, message = "bqk,bkd->bqd"}> : () -> ()
    %cst_105 = arith.constant dense<0.000000e+00> : vector<4x8x8xf32>
    %346 = tpu.matmul %343, %345, %cst_105 {dimension_numbers = #tpu.dot_dimension_numbers<[2], [1], [1], [2], [0, 0, 0, 1, 1, 2], [0], [0]>} : vector<4x8x16xbf16>, vector<4x16x8xbf16>, vector<4x8x8xf32> -> vector<4x8x8xf32>
    "tpu.trace_stop"() : () -> ()
    %347 = vector.shape_cast %346 : vector<4x8x8xf32> to vector<32x8xf32>
    %348 = arith.truncf %347 : vector<32x8xf32> to vector<32x8xbf16>
    %349 = vector.extract_strided_slice %247 {offsets = [3, 0, 0], sizes = [1, 8, 32], strides = [1, 1, 1]} : vector<4x8x32xbf16> to vector<1x8x32xbf16>
    %350 = vector.shape_cast %349 : vector<1x8x32xbf16> to vector<8x32xbf16>
    %cst_106 = arith.constant dense<0.000000e+00> : vector<32x32xf32>
    %351 = tpu.matmul %348, %350, %cst_106 {dimension_numbers = #tpu.dot_dimension_numbers<[1], [0], [0], [1], [0, 0, 1, 1], [], []>} : vector<32x8xbf16>, vector<8x32xbf16>, vector<32x32xf32> -> vector<32x32xf32>
    %352 = arith.addf %326, %351 : vector<32x32xf32>
    %353 = arith.addf %194, %352 : vector<32x32xf32>
    %c0_107 = arith.constant 0 : index
    %c0_108 = arith.constant 0 : index
    %c0_109 = arith.constant 0 : index
    %354 = vector.load %arg20[%c0_107, %c0_108, %c0_109] : memref<2x1x32xf32, #tpu.memory_space<vmem>>, vector<1x1x32xf32>
    %355 = vector.shape_cast %354 : vector<1x1x32xf32> to vector<1x32xf32>
    %356 = vector.broadcast %355 : vector<1x32xf32> to vector<32x32xf32>
    %357 = arith.addf %353, %356 : vector<32x32xf32>
    %c0_110 = arith.constant 0 : index
    %c0_111 = arith.constant 0 : index
    %c0_112 = arith.constant 0 : index
    %358 = vector.load %arg9[%c0_110, %c0_111, %c0_112] : memref<2x1x32xf32, #tpu.memory_space<vmem>>, vector<1x1x32xf32>
    %359 = vector.shape_cast %358 : vector<1x1x32xf32> to vector<1x32xf32>
    %c0_113 = arith.constant 0 : index
    %c0_114 = arith.constant 0 : index
    %c0_115 = arith.constant 0 : index
    %360 = vector.load %arg10[%c0_113, %c0_114, %c0_115] : memref<2x1x32xf32, #tpu.memory_space<vmem>>, vector<1x1x32xf32>
    %361 = vector.shape_cast %360 : vector<1x1x32xf32> to vector<1x32xf32>
    %cst_116 = arith.constant dense<0.000000e+00> : vector<32xf32>
    %362 = vector.multi_reduction <add>, %357, %cst_116 [1] : vector<32x32xf32> to vector<32xf32>
    %363 = vector.shape_cast %362 : vector<32xf32> to vector<32x1xf32>
    %cst_117 = arith.constant 3.200000e+01 : f32
    %364 = vector.broadcast %cst_117 : f32 to vector<32x1xf32>
    %365 = arith.divf %363, %364 : vector<32x1xf32>
    %366 = vector.broadcast %365 : vector<32x1xf32> to vector<32x32xf32>
    %367 = arith.subf %357, %366 : vector<32x32xf32>
    %368 = arith.mulf %367, %367 : vector<32x32xf32>
    %cst_118 = arith.constant dense<0.000000e+00> : vector<32xf32>
    %369 = vector.multi_reduction <add>, %368, %cst_118 [1] : vector<32x32xf32> to vector<32xf32>
    %370 = vector.shape_cast %369 : vector<32xf32> to vector<32x1xf32>
    %cst_119 = arith.constant 3.200000e+01 : f32
    %371 = vector.broadcast %cst_119 : f32 to vector<32x1xf32>
    %372 = arith.divf %370, %371 : vector<32x1xf32>
    %373 = vector.broadcast %365 : vector<32x1xf32> to vector<32x32xf32>
    %374 = arith.subf %357, %373 : vector<32x32xf32>
    %cst_120 = arith.constant 9.99999974E-6 : f32
    %375 = vector.broadcast %cst_120 : f32 to vector<32x1xf32>
    %376 = arith.addf %372, %375 : vector<32x1xf32>
    %377 = math.rsqrt %376 : vector<32x1xf32>
    %378 = vector.broadcast %377 : vector<32x1xf32> to vector<32x32xf32>
    %379 = arith.mulf %374, %378 : vector<32x32xf32>
    %380 = vector.broadcast %359 : vector<1x32xf32> to vector<32x32xf32>
    %381 = arith.mulf %379, %380 : vector<32x32xf32>
    %382 = vector.broadcast %361 : vector<1x32xf32> to vector<32x32xf32>
    %383 = arith.addf %381, %382 : vector<32x32xf32>
    %384 = arith.truncf %383 : vector<32x32xf32> to vector<32x32xbf16>
    %c0_121 = arith.constant 0 : index
    %c0_122 = arith.constant 0 : index
    %c0_123 = arith.constant 0 : index
    %385 = vector.load %arg21[%c0_121, %c0_122, %c0_123] : memref<2x32x64xbf16, #tpu.memory_space<vmem>>, vector<1x32x64xbf16>
    %386 = vector.shape_cast %385 : vector<1x32x64xbf16> to vector<32x64xbf16>
    %cst_124 = arith.constant dense<0.000000e+00> : vector<32x64xf32>
    %387 = tpu.matmul %384, %386, %cst_124 {dimension_numbers = #tpu.dot_dimension_numbers<[1], [0], [0], [1], [0, 0, 1, 1], [], []>} : vector<32x32xbf16>, vector<32x64xbf16>, vector<32x64xf32> -> vector<32x64xf32>
    %c0_125 = arith.constant 0 : index
    %c0_126 = arith.constant 0 : index
    %c0_127 = arith.constant 0 : index
    %388 = vector.load %arg22[%c0_125, %c0_126, %c0_127] : memref<2x1x64xf32, #tpu.memory_space<vmem>>, vector<1x1x64xf32>
    %389 = vector.shape_cast %388 : vector<1x1x64xf32> to vector<1x64xf32>
    %390 = vector.broadcast %389 : vector<1x64xf32> to vector<32x64xf32>
    %391 = arith.addf %387, %390 : vector<32x64xf32>
    %cst_128 = arith.constant 0.000000e+00 : f32
    %392 = vector.broadcast %cst_128 : f32 to vector<32x64xf32>
    %393 = arith.maximumf %391, %392 : vector<32x64xf32>
    %394 = arith.truncf %393 : vector<32x64xf32> to vector<32x64xbf16>
    %c0_129 = arith.constant 0 : index
    %c0_130 = arith.constant 0 : index
    %c0_131 = arith.constant 0 : index
    %395 = vector.load %arg23[%c0_129, %c0_130, %c0_131] : memref<2x64x32xbf16, #tpu.memory_space<vmem>>, vector<1x64x32xbf16>
    %396 = vector.shape_cast %395 : vector<1x64x32xbf16> to vector<64x32xbf16>
    %cst_132 = arith.constant dense<0.000000e+00> : vector<32x32xf32>
    %397 = tpu.matmul %394, %396, %cst_132 {dimension_numbers = #tpu.dot_dimension_numbers<[1], [0], [0], [1], [0, 0, 1, 1], [], []>} : vector<32x64xbf16>, vector<64x32xbf16>, vector<32x32xf32> -> vector<32x32xf32>
    %398 = arith.addf %357, %397 : vector<32x32xf32>
    %c0_133 = arith.constant 0 : index
    %c0_134 = arith.constant 0 : index
    %c0_135 = arith.constant 0 : index
    %399 = vector.load %arg24[%c0_133, %c0_134, %c0_135] : memref<2x1x32xf32, #tpu.memory_space<vmem>>, vector<1x1x32xf32>
    %400 = vector.shape_cast %399 : vector<1x1x32xf32> to vector<1x32xf32>
    %401 = vector.broadcast %400 : vector<1x32xf32> to vector<32x32xf32>
    %402 = arith.addf %398, %401 : vector<32x32xf32>
    %c1_136 = arith.constant 1 : index
    %c0_137 = arith.constant 0 : index
    %c0_138 = arith.constant 0 : index
    %403 = vector.load %arg5[%c1_136, %c0_137, %c0_138] : memref<2x1x32xf32, #tpu.memory_space<vmem>>, vector<1x1x32xf32>
    %404 = vector.shape_cast %403 : vector<1x1x32xf32> to vector<1x32xf32>
    %c1_139 = arith.constant 1 : index
    %c0_140 = arith.constant 0 : index
    %c0_141 = arith.constant 0 : index
    %405 = vector.load %arg6[%c1_139, %c0_140, %c0_141] : memref<2x1x32xf32, #tpu.memory_space<vmem>>, vector<1x1x32xf32>
    %406 = vector.shape_cast %405 : vector<1x1x32xf32> to vector<1x32xf32>
    %cst_142 = arith.constant dense<0.000000e+00> : vector<32xf32>
    %407 = vector.multi_reduction <add>, %402, %cst_142 [1] : vector<32x32xf32> to vector<32xf32>
    %408 = vector.shape_cast %407 : vector<32xf32> to vector<32x1xf32>
    %cst_143 = arith.constant 3.200000e+01 : f32
    %409 = vector.broadcast %cst_143 : f32 to vector<32x1xf32>
    %410 = arith.divf %408, %409 : vector<32x1xf32>
    %411 = vector.broadcast %410 : vector<32x1xf32> to vector<32x32xf32>
    %412 = arith.subf %402, %411 : vector<32x32xf32>
    %413 = arith.mulf %412, %412 : vector<32x32xf32>
    %cst_144 = arith.constant dense<0.000000e+00> : vector<32xf32>
    %414 = vector.multi_reduction <add>, %413, %cst_144 [1] : vector<32x32xf32> to vector<32xf32>
    %415 = vector.shape_cast %414 : vector<32xf32> to vector<32x1xf32>
    %cst_145 = arith.constant 3.200000e+01 : f32
    %416 = vector.broadcast %cst_145 : f32 to vector<32x1xf32>
    %417 = arith.divf %415, %416 : vector<32x1xf32>
    %418 = vector.broadcast %410 : vector<32x1xf32> to vector<32x32xf32>
    %419 = arith.subf %402, %418 : vector<32x32xf32>
    %cst_146 = arith.constant 9.99999974E-6 : f32
    %420 = vector.broadcast %cst_146 : f32 to vector<32x1xf32>
    %421 = arith.addf %417, %420 : vector<32x1xf32>
    %422 = math.rsqrt %421 : vector<32x1xf32>
    %423 = vector.broadcast %422 : vector<32x1xf32> to vector<32x32xf32>
    %424 = arith.mulf %419, %423 : vector<32x32xf32>
    %425 = vector.broadcast %404 : vector<1x32xf32> to vector<32x32xf32>
    %426 = arith.mulf %424, %425 : vector<32x32xf32>
    %427 = vector.broadcast %406 : vector<1x32xf32> to vector<32x32xf32>
    %428 = arith.addf %426, %427 : vector<32x32xf32>
    %429 = arith.truncf %428 : vector<32x32xf32> to vector<32x32xbf16>
    %c1_147 = arith.constant 1 : index
    %c0_148 = arith.constant 0 : index
    %c0_149 = arith.constant 0 : index
    %430 = vector.load %arg11[%c1_147, %c0_148, %c0_149] : memref<2x32x96xbf16, #tpu.memory_space<vmem>>, vector<1x32x96xbf16>
    %431 = vector.shape_cast %430 : vector<1x32x96xbf16> to vector<32x96xbf16>
    %cst_150 = arith.constant dense<0.000000e+00> : vector<32x96xf32>
    %432 = tpu.matmul %429, %431, %cst_150 {dimension_numbers = #tpu.dot_dimension_numbers<[1], [0], [0], [1], [0, 0, 1, 1], [], []>} : vector<32x32xbf16>, vector<32x96xbf16>, vector<32x96xf32> -> vector<32x96xf32>
    %c1_151 = arith.constant 1 : index
    %c0_152 = arith.constant 0 : index
    %c0_153 = arith.constant 0 : index
    %433 = vector.load %arg12[%c1_151, %c0_152, %c0_153] : memref<2x1x96xf32, #tpu.memory_space<vmem>>, vector<1x1x96xf32>
    %434 = vector.shape_cast %433 : vector<1x1x96xf32> to vector<1x96xf32>
    %435 = vector.broadcast %434 : vector<1x96xf32> to vector<32x96xf32>
    %436 = arith.addf %432, %435 : vector<32x96xf32>
    %437 = vector.extract_strided_slice %436 {offsets = [0, 0], sizes = [32, 32], strides = [1, 1]} : vector<32x96xf32> to vector<32x32xf32>
    %438 = vector.shape_cast %437 : vector<32x32xf32> to vector<4x8x32xf32>
    %439 = vector.extract_strided_slice %436 {offsets = [0, 32], sizes = [32, 32], strides = [1, 1]} : vector<32x96xf32> to vector<32x32xf32>
    %440 = vector.shape_cast %439 : vector<32x32xf32> to vector<4x8x32xf32>
    %441 = vector.extract_strided_slice %436 {offsets = [0, 64], sizes = [32, 32], strides = [1, 1]} : vector<32x96xf32> to vector<32x32xf32>
    %442 = vector.shape_cast %441 : vector<32x32xf32> to vector<4x8x32xf32>
    %c1_154 = arith.constant 1 : index
    %c0_155 = arith.constant 0 : index
    %c0_156 = arith.constant 0 : index
    %c0_157 = arith.constant 0 : index
    %443 = vector.load %arg13[%c1_154, %c0_155, %c0_156, %c0_157] : memref<2x4x8x32xbf16, #tpu.memory_space<vmem>>, vector<1x4x8x32xbf16>
    %444 = vector.shape_cast %443 : vector<1x4x8x32xbf16> to vector<4x8x32xbf16>
    %cst_158 = arith.constant 0.000000e+00 : f32
    %445 = vector.broadcast %cst_158 : f32 to vector<32x32xf32>
    %446 = vector.extract_strided_slice %438 {offsets = [0, 0, 0], sizes = [4, 8, 8], strides = [1, 1, 1]} : vector<4x8x32xf32> to vector<4x8x8xf32>
    %447 = arith.truncf %446 : vector<4x8x8xf32> to vector<4x8x8xbf16>
    %448 = vector.extract_strided_slice %440 {offsets = [0, 0, 0], sizes = [4, 8, 8], strides = [1, 1, 1]} : vector<4x8x32xf32> to vector<4x8x8xf32>
    %449 = arith.truncf %448 : vector<4x8x8xf32> to vector<4x8x8xbf16>
    "tpu.trace_start"() <{level = 10 : i32, message = "bqd,bkd->bqk"}> : () -> ()
    %cst_159 = arith.constant dense<0.000000e+00> : vector<4x8x8xf32>
    %450 = tpu.matmul %447, %449, %cst_159 {dimension_numbers = #tpu.dot_dimension_numbers<[2], [2], [1], [1], [0, 0, 0, 1, 1, 1], [0], [0]>} : vector<4x8x8xbf16>, vector<4x8x8xbf16>, vector<4x8x8xf32> -> vector<4x8x8xf32>
    "tpu.trace_stop"() : () -> ()
    %451 = arith.addf %450, %46 : vector<4x8x8xf32>
    %cst_160 = arith.constant dense<0xFF800000> : vector<4x8xf32>
    %452 = vector.multi_reduction <maximumf>, %451, %cst_160 [2] : vector<4x8x8xf32> to vector<4x8xf32>
    %453 = vector.shape_cast %452 : vector<4x8xf32> to vector<4x8x1xf32>
    %454 = vector.broadcast %453 : vector<4x8x1xf32> to vector<4x8x8xf32>
    %455 = arith.subf %451, %454 : vector<4x8x8xf32>
    %456 = math.exp %455 : vector<4x8x8xf32>
    %cst_161 = arith.constant dense<0.000000e+00> : vector<4x8xf32>
    %457 = vector.multi_reduction <add>, %456, %cst_161 [2] : vector<4x8x8xf32> to vector<4x8xf32>
    %458 = vector.shape_cast %457 : vector<4x8xf32> to vector<4x8x1xf32>
    %459 = vector.broadcast %458 : vector<4x8x1xf32> to vector<4x8x8xf32>
    %460 = arith.divf %456, %459 : vector<4x8x8xf32>
    %461 = arith.truncf %460 : vector<4x8x8xf32> to vector<4x8x8xbf16>
    %462 = vector.extract_strided_slice %442 {offsets = [0, 0, 0], sizes = [4, 8, 8], strides = [1, 1, 1]} : vector<4x8x32xf32> to vector<4x8x8xf32>
    %463 = arith.truncf %462 : vector<4x8x8xf32> to vector<4x8x8xbf16>
    "tpu.trace_start"() <{level = 10 : i32, message = "bqk,bkd->bqd"}> : () -> ()
    %cst_162 = arith.constant dense<0.000000e+00> : vector<4x8x8xf32>
    %464 = tpu.matmul %461, %463, %cst_162 {dimension_numbers = #tpu.dot_dimension_numbers<[2], [1], [1], [2], [0, 0, 0, 1, 1, 2], [0], [0]>} : vector<4x8x8xbf16>, vector<4x8x8xbf16>, vector<4x8x8xf32> -> vector<4x8x8xf32>
    "tpu.trace_stop"() : () -> ()
    %465 = vector.shape_cast %464 : vector<4x8x8xf32> to vector<32x8xf32>
    %466 = arith.truncf %465 : vector<32x8xf32> to vector<32x8xbf16>
    %467 = vector.extract_strided_slice %444 {offsets = [0, 0, 0], sizes = [1, 8, 32], strides = [1, 1, 1]} : vector<4x8x32xbf16> to vector<1x8x32xbf16>
    %468 = vector.shape_cast %467 : vector<1x8x32xbf16> to vector<8x32xbf16>
    %cst_163 = arith.constant dense<0.000000e+00> : vector<32x32xf32>
    %469 = tpu.matmul %466, %468, %cst_163 {dimension_numbers = #tpu.dot_dimension_numbers<[1], [0], [0], [1], [0, 0, 1, 1], [], []>} : vector<32x8xbf16>, vector<8x32xbf16>, vector<32x32xf32> -> vector<32x32xf32>
    %470 = arith.addf %445, %469 : vector<32x32xf32>
    %471 = vector.extract_strided_slice %438 {offsets = [0, 0, 8], sizes = [4, 8, 8], strides = [1, 1, 1]} : vector<4x8x32xf32> to vector<4x8x8xf32>
    %472 = arith.truncf %471 : vector<4x8x8xf32> to vector<4x8x8xbf16>
    %473 = vector.extract_strided_slice %440 {offsets = [0, 0, 8], sizes = [4, 8, 8], strides = [1, 1, 1]} : vector<4x8x32xf32> to vector<4x8x8xf32>
    %474 = arith.truncf %473 : vector<4x8x8xf32> to vector<4x8x8xbf16>
    "tpu.trace_start"() <{level = 10 : i32, message = "bqd,bkd->bqk"}> : () -> ()
    %cst_164 = arith.constant dense<0.000000e+00> : vector<4x8x8xf32>
    %475 = tpu.matmul %472, %474, %cst_164 {dimension_numbers = #tpu.dot_dimension_numbers<[2], [2], [1], [1], [0, 0, 0, 1, 1, 1], [0], [0]>} : vector<4x8x8xbf16>, vector<4x8x8xbf16>, vector<4x8x8xf32> -> vector<4x8x8xf32>
    "tpu.trace_stop"() : () -> ()
    %476 = arith.addf %475, %46 : vector<4x8x8xf32>
    %cst_165 = arith.constant dense<0xFF800000> : vector<4x8xf32>
    %477 = vector.multi_reduction <maximumf>, %476, %cst_165 [2] : vector<4x8x8xf32> to vector<4x8xf32>
    %478 = vector.shape_cast %477 : vector<4x8xf32> to vector<4x8x1xf32>
    %479 = vector.broadcast %478 : vector<4x8x1xf32> to vector<4x8x8xf32>
    %480 = arith.subf %476, %479 : vector<4x8x8xf32>
    %481 = math.exp %480 : vector<4x8x8xf32>
    %cst_166 = arith.constant dense<0.000000e+00> : vector<4x8xf32>
    %482 = vector.multi_reduction <add>, %481, %cst_166 [2] : vector<4x8x8xf32> to vector<4x8xf32>
    %483 = vector.shape_cast %482 : vector<4x8xf32> to vector<4x8x1xf32>
    %484 = vector.broadcast %483 : vector<4x8x1xf32> to vector<4x8x8xf32>
    %485 = arith.divf %481, %484 : vector<4x8x8xf32>
    %486 = arith.truncf %485 : vector<4x8x8xf32> to vector<4x8x8xbf16>
    %487 = vector.extract_strided_slice %442 {offsets = [0, 0, 8], sizes = [4, 8, 8], strides = [1, 1, 1]} : vector<4x8x32xf32> to vector<4x8x8xf32>
    %488 = arith.truncf %487 : vector<4x8x8xf32> to vector<4x8x8xbf16>
    "tpu.trace_start"() <{level = 10 : i32, message = "bqk,bkd->bqd"}> : () -> ()
    %cst_167 = arith.constant dense<0.000000e+00> : vector<4x8x8xf32>
    %489 = tpu.matmul %486, %488, %cst_167 {dimension_numbers = #tpu.dot_dimension_numbers<[2], [1], [1], [2], [0, 0, 0, 1, 1, 2], [0], [0]>} : vector<4x8x8xbf16>, vector<4x8x8xbf16>, vector<4x8x8xf32> -> vector<4x8x8xf32>
    "tpu.trace_stop"() : () -> ()
    %490 = vector.shape_cast %489 : vector<4x8x8xf32> to vector<32x8xf32>
    %491 = arith.truncf %490 : vector<32x8xf32> to vector<32x8xbf16>
    %492 = vector.extract_strided_slice %444 {offsets = [1, 0, 0], sizes = [1, 8, 32], strides = [1, 1, 1]} : vector<4x8x32xbf16> to vector<1x8x32xbf16>
    %493 = vector.shape_cast %492 : vector<1x8x32xbf16> to vector<8x32xbf16>
    %cst_168 = arith.constant dense<0.000000e+00> : vector<32x32xf32>
    %494 = tpu.matmul %491, %493, %cst_168 {dimension_numbers = #tpu.dot_dimension_numbers<[1], [0], [0], [1], [0, 0, 1, 1], [], []>} : vector<32x8xbf16>, vector<8x32xbf16>, vector<32x32xf32> -> vector<32x32xf32>
    %495 = arith.addf %470, %494 : vector<32x32xf32>
    %496 = vector.extract_strided_slice %438 {offsets = [0, 0, 16], sizes = [4, 8, 8], strides = [1, 1, 1]} : vector<4x8x32xf32> to vector<4x8x8xf32>
    %497 = arith.truncf %496 : vector<4x8x8xf32> to vector<4x8x8xbf16>
    %498 = vector.extract_strided_slice %440 {offsets = [0, 0, 16], sizes = [4, 8, 8], strides = [1, 1, 1]} : vector<4x8x32xf32> to vector<4x8x8xf32>
    %499 = arith.truncf %498 : vector<4x8x8xf32> to vector<4x8x8xbf16>
    "tpu.trace_start"() <{level = 10 : i32, message = "bqd,bkd->bqk"}> : () -> ()
    %cst_169 = arith.constant dense<0.000000e+00> : vector<4x8x8xf32>
    %500 = tpu.matmul %497, %499, %cst_169 {dimension_numbers = #tpu.dot_dimension_numbers<[2], [2], [1], [1], [0, 0, 0, 1, 1, 1], [0], [0]>} : vector<4x8x8xbf16>, vector<4x8x8xbf16>, vector<4x8x8xf32> -> vector<4x8x8xf32>
    "tpu.trace_stop"() : () -> ()
    %501 = arith.addf %500, %46 : vector<4x8x8xf32>
    %cst_170 = arith.constant dense<0xFF800000> : vector<4x8xf32>
    %502 = vector.multi_reduction <maximumf>, %501, %cst_170 [2] : vector<4x8x8xf32> to vector<4x8xf32>
    %503 = vector.shape_cast %502 : vector<4x8xf32> to vector<4x8x1xf32>
    %504 = vector.broadcast %503 : vector<4x8x1xf32> to vector<4x8x8xf32>
    %505 = arith.subf %501, %504 : vector<4x8x8xf32>
    %506 = math.exp %505 : vector<4x8x8xf32>
    %cst_171 = arith.constant dense<0.000000e+00> : vector<4x8xf32>
    %507 = vector.multi_reduction <add>, %506, %cst_171 [2] : vector<4x8x8xf32> to vector<4x8xf32>
    %508 = vector.shape_cast %507 : vector<4x8xf32> to vector<4x8x1xf32>
    %509 = vector.broadcast %508 : vector<4x8x1xf32> to vector<4x8x8xf32>
    %510 = arith.divf %506, %509 : vector<4x8x8xf32>
    %511 = arith.truncf %510 : vector<4x8x8xf32> to vector<4x8x8xbf16>
    %512 = vector.extract_strided_slice %442 {offsets = [0, 0, 16], sizes = [4, 8, 8], strides = [1, 1, 1]} : vector<4x8x32xf32> to vector<4x8x8xf32>
    %513 = arith.truncf %512 : vector<4x8x8xf32> to vector<4x8x8xbf16>
    "tpu.trace_start"() <{level = 10 : i32, message = "bqk,bkd->bqd"}> : () -> ()
    %cst_172 = arith.constant dense<0.000000e+00> : vector<4x8x8xf32>
    %514 = tpu.matmul %511, %513, %cst_172 {dimension_numbers = #tpu.dot_dimension_numbers<[2], [1], [1], [2], [0, 0, 0, 1, 1, 2], [0], [0]>} : vector<4x8x8xbf16>, vector<4x8x8xbf16>, vector<4x8x8xf32> -> vector<4x8x8xf32>
    "tpu.trace_stop"() : () -> ()
    %515 = vector.shape_cast %514 : vector<4x8x8xf32> to vector<32x8xf32>
    %516 = arith.truncf %515 : vector<32x8xf32> to vector<32x8xbf16>
    %517 = vector.extract_strided_slice %444 {offsets = [2, 0, 0], sizes = [1, 8, 32], strides = [1, 1, 1]} : vector<4x8x32xbf16> to vector<1x8x32xbf16>
    %518 = vector.shape_cast %517 : vector<1x8x32xbf16> to vector<8x32xbf16>
    %cst_173 = arith.constant dense<0.000000e+00> : vector<32x32xf32>
    %519 = tpu.matmul %516, %518, %cst_173 {dimension_numbers = #tpu.dot_dimension_numbers<[1], [0], [0], [1], [0, 0, 1, 1], [], []>} : vector<32x8xbf16>, vector<8x32xbf16>, vector<32x32xf32> -> vector<32x32xf32>
    %520 = arith.addf %495, %519 : vector<32x32xf32>
    %521 = vector.extract_strided_slice %438 {offsets = [0, 0, 24], sizes = [4, 8, 8], strides = [1, 1, 1]} : vector<4x8x32xf32> to vector<4x8x8xf32>
    %522 = arith.truncf %521 : vector<4x8x8xf32> to vector<4x8x8xbf16>
    %523 = vector.extract_strided_slice %440 {offsets = [0, 0, 24], sizes = [4, 8, 8], strides = [1, 1, 1]} : vector<4x8x32xf32> to vector<4x8x8xf32>
    %524 = arith.truncf %523 : vector<4x8x8xf32> to vector<4x8x8xbf16>
    "tpu.trace_start"() <{level = 10 : i32, message = "bqd,bkd->bqk"}> : () -> ()
    %cst_174 = arith.constant dense<0.000000e+00> : vector<4x8x8xf32>
    %525 = tpu.matmul %522, %524, %cst_174 {dimension_numbers = #tpu.dot_dimension_numbers<[2], [2], [1], [1], [0, 0, 0, 1, 1, 1], [0], [0]>} : vector<4x8x8xbf16>, vector<4x8x8xbf16>, vector<4x8x8xf32> -> vector<4x8x8xf32>
    "tpu.trace_stop"() : () -> ()
    %526 = arith.addf %525, %46 : vector<4x8x8xf32>
    %cst_175 = arith.constant dense<0xFF800000> : vector<4x8xf32>
    %527 = vector.multi_reduction <maximumf>, %526, %cst_175 [2] : vector<4x8x8xf32> to vector<4x8xf32>
    %528 = vector.shape_cast %527 : vector<4x8xf32> to vector<4x8x1xf32>
    %529 = vector.broadcast %528 : vector<4x8x1xf32> to vector<4x8x8xf32>
    %530 = arith.subf %526, %529 : vector<4x8x8xf32>
    %531 = math.exp %530 : vector<4x8x8xf32>
    %cst_176 = arith.constant dense<0.000000e+00> : vector<4x8xf32>
    %532 = vector.multi_reduction <add>, %531, %cst_176 [2] : vector<4x8x8xf32> to vector<4x8xf32>
    %533 = vector.shape_cast %532 : vector<4x8xf32> to vector<4x8x1xf32>
    %534 = vector.broadcast %533 : vector<4x8x1xf32> to vector<4x8x8xf32>
    %535 = arith.divf %531, %534 : vector<4x8x8xf32>
    %536 = arith.truncf %535 : vector<4x8x8xf32> to vector<4x8x8xbf16>
    %537 = vector.extract_strided_slice %442 {offsets = [0, 0, 24], sizes = [4, 8, 8], strides = [1, 1, 1]} : vector<4x8x32xf32> to vector<4x8x8xf32>
    %538 = arith.truncf %537 : vector<4x8x8xf32> to vector<4x8x8xbf16>
    "tpu.trace_start"() <{level = 10 : i32, message = "bqk,bkd->bqd"}> : () -> ()
    %cst_177 = arith.constant dense<0.000000e+00> : vector<4x8x8xf32>
    %539 = tpu.matmul %536, %538, %cst_177 {dimension_numbers = #tpu.dot_dimension_numbers<[2], [1], [1], [2], [0, 0, 0, 1, 1, 2], [0], [0]>} : vector<4x8x8xbf16>, vector<4x8x8xbf16>, vector<4x8x8xf32> -> vector<4x8x8xf32>
    "tpu.trace_stop"() : () -> ()
    %540 = vector.shape_cast %539 : vector<4x8x8xf32> to vector<32x8xf32>
    %541 = arith.truncf %540 : vector<32x8xf32> to vector<32x8xbf16>
    %542 = vector.extract_strided_slice %444 {offsets = [3, 0, 0], sizes = [1, 8, 32], strides = [1, 1, 1]} : vector<4x8x32xbf16> to vector<1x8x32xbf16>
    %543 = vector.shape_cast %542 : vector<1x8x32xbf16> to vector<8x32xbf16>
    %cst_178 = arith.constant dense<0.000000e+00> : vector<32x32xf32>
    %544 = tpu.matmul %541, %543, %cst_178 {dimension_numbers = #tpu.dot_dimension_numbers<[1], [0], [0], [1], [0, 0, 1, 1], [], []>} : vector<32x8xbf16>, vector<8x32xbf16>, vector<32x32xf32> -> vector<32x32xf32>
    %545 = arith.addf %520, %544 : vector<32x32xf32>
    %546 = arith.addf %402, %545 : vector<32x32xf32>
    %c1_179 = arith.constant 1 : index
    %c0_180 = arith.constant 0 : index
    %c0_181 = arith.constant 0 : index
    %547 = vector.load %arg14[%c1_179, %c0_180, %c0_181] : memref<2x1x32xf32, #tpu.memory_space<vmem>>, vector<1x1x32xf32>
    %548 = vector.shape_cast %547 : vector<1x1x32xf32> to vector<1x32xf32>
    %549 = vector.broadcast %548 : vector<1x32xf32> to vector<32x32xf32>
    %550 = arith.addf %546, %549 : vector<32x32xf32>
    %c1_182 = arith.constant 1 : index
    %c0_183 = arith.constant 0 : index
    %c0_184 = arith.constant 0 : index
    %551 = vector.load %arg7[%c1_182, %c0_183, %c0_184] : memref<2x1x32xf32, #tpu.memory_space<vmem>>, vector<1x1x32xf32>
    %552 = vector.shape_cast %551 : vector<1x1x32xf32> to vector<1x32xf32>
    %c1_185 = arith.constant 1 : index
    %c0_186 = arith.constant 0 : index
    %c0_187 = arith.constant 0 : index
    %553 = vector.load %arg8[%c1_185, %c0_186, %c0_187] : memref<2x1x32xf32, #tpu.memory_space<vmem>>, vector<1x1x32xf32>
    %554 = vector.shape_cast %553 : vector<1x1x32xf32> to vector<1x32xf32>
    %cst_188 = arith.constant dense<0.000000e+00> : vector<32xf32>
    %555 = vector.multi_reduction <add>, %550, %cst_188 [1] : vector<32x32xf32> to vector<32xf32>
    %556 = vector.shape_cast %555 : vector<32xf32> to vector<32x1xf32>
    %cst_189 = arith.constant 3.200000e+01 : f32
    %557 = vector.broadcast %cst_189 : f32 to vector<32x1xf32>
    %558 = arith.divf %556, %557 : vector<32x1xf32>
    %559 = vector.broadcast %558 : vector<32x1xf32> to vector<32x32xf32>
    %560 = arith.subf %550, %559 : vector<32x32xf32>
    %561 = arith.mulf %560, %560 : vector<32x32xf32>
    %cst_190 = arith.constant dense<0.000000e+00> : vector<32xf32>
    %562 = vector.multi_reduction <add>, %561, %cst_190 [1] : vector<32x32xf32> to vector<32xf32>
    %563 = vector.shape_cast %562 : vector<32xf32> to vector<32x1xf32>
    %cst_191 = arith.constant 3.200000e+01 : f32
    %564 = vector.broadcast %cst_191 : f32 to vector<32x1xf32>
    %565 = arith.divf %563, %564 : vector<32x1xf32>
    %566 = vector.broadcast %558 : vector<32x1xf32> to vector<32x32xf32>
    %567 = arith.subf %550, %566 : vector<32x32xf32>
    %cst_192 = arith.constant 9.99999974E-6 : f32
    %568 = vector.broadcast %cst_192 : f32 to vector<32x1xf32>
    %569 = arith.addf %565, %568 : vector<32x1xf32>
    %570 = math.rsqrt %569 : vector<32x1xf32>
    %571 = vector.broadcast %570 : vector<32x1xf32> to vector<32x32xf32>
    %572 = arith.mulf %567, %571 : vector<32x32xf32>
    %573 = vector.broadcast %552 : vector<1x32xf32> to vector<32x32xf32>
    %574 = arith.mulf %572, %573 : vector<32x32xf32>
    %575 = vector.broadcast %554 : vector<1x32xf32> to vector<32x32xf32>
    %576 = arith.addf %574, %575 : vector<32x32xf32>
    %577 = arith.truncf %576 : vector<32x32xf32> to vector<32x32xbf16>
    %c1_193 = arith.constant 1 : index
    %c0_194 = arith.constant 0 : index
    %c0_195 = arith.constant 0 : index
    %578 = vector.load %arg15[%c1_193, %c0_194, %c0_195] : memref<2x32x32xbf16, #tpu.memory_space<vmem>>, vector<1x32x32xbf16>
    %579 = vector.shape_cast %578 : vector<1x32x32xbf16> to vector<32x32xbf16>
    %cst_196 = arith.constant dense<0.000000e+00> : vector<32x32xf32>
    %580 = tpu.matmul %577, %579, %cst_196 {dimension_numbers = #tpu.dot_dimension_numbers<[1], [0], [0], [1], [0, 0, 1, 1], [], []>} : vector<32x32xbf16>, vector<32x32xbf16>, vector<32x32xf32> -> vector<32x32xf32>
    %c1_197 = arith.constant 1 : index
    %c0_198 = arith.constant 0 : index
    %c0_199 = arith.constant 0 : index
    %581 = vector.load %arg16[%c1_197, %c0_198, %c0_199] : memref<2x1x32xf32, #tpu.memory_space<vmem>>, vector<1x1x32xf32>
    %582 = vector.shape_cast %581 : vector<1x1x32xf32> to vector<1x32xf32>
    %583 = vector.broadcast %582 : vector<1x32xf32> to vector<32x32xf32>
    %584 = arith.addf %580, %583 : vector<32x32xf32>
    %585 = vector.shape_cast %584 : vector<32x32xf32> to vector<4x8x32xf32>
    %586 = arith.truncf %4 : vector<16x32xf32> to vector<16x32xbf16>
    %c1_200 = arith.constant 1 : index
    %c0_201 = arith.constant 0 : index
    %c0_202 = arith.constant 0 : index
    %587 = vector.load %arg17[%c1_200, %c0_201, %c0_202] : memref<2x32x64xbf16, #tpu.memory_space<vmem>>, vector<1x32x64xbf16>
    %588 = vector.shape_cast %587 : vector<1x32x64xbf16> to vector<32x64xbf16>
    %cst_203 = arith.constant dense<0.000000e+00> : vector<16x64xf32>
    %589 = tpu.matmul %586, %588, %cst_203 {dimension_numbers = #tpu.dot_dimension_numbers<[1], [0], [0], [1], [0, 0, 1, 1], [], []>} : vector<16x32xbf16>, vector<32x64xbf16>, vector<16x64xf32> -> vector<16x64xf32>
    %c1_204 = arith.constant 1 : index
    %c0_205 = arith.constant 0 : index
    %c0_206 = arith.constant 0 : index
    %590 = vector.load %arg18[%c1_204, %c0_205, %c0_206] : memref<2x1x64xf32, #tpu.memory_space<vmem>>, vector<1x1x64xf32>
    %591 = vector.shape_cast %590 : vector<1x1x64xf32> to vector<1x64xf32>
    %592 = vector.broadcast %591 : vector<1x64xf32> to vector<16x64xf32>
    %593 = arith.addf %589, %592 : vector<16x64xf32>
    %594 = vector.extract_strided_slice %593 {offsets = [0, 0], sizes = [16, 32], strides = [1, 1]} : vector<16x64xf32> to vector<16x32xf32>
    %595 = vector.shape_cast %594 : vector<16x32xf32> to vector<1x16x32xf32>
    %596 = vector.shape_cast %595 : vector<1x16x32xf32> to vector<1x16x32xf32>
    %597 = vector.broadcast %596 : vector<1x16x32xf32> to vector<4x16x32xf32>
    %598 = vector.extract_strided_slice %593 {offsets = [0, 32], sizes = [16, 32], strides = [1, 1]} : vector<16x64xf32> to vector<16x32xf32>
    %599 = vector.shape_cast %598 : vector<16x32xf32> to vector<1x16x32xf32>
    %600 = vector.shape_cast %599 : vector<1x16x32xf32> to vector<1x16x32xf32>
    %601 = vector.broadcast %600 : vector<1x16x32xf32> to vector<4x16x32xf32>
    %c1_207 = arith.constant 1 : index
    %c0_208 = arith.constant 0 : index
    %c0_209 = arith.constant 0 : index
    %c0_210 = arith.constant 0 : index
    %602 = vector.load %arg19[%c1_207, %c0_208, %c0_209, %c0_210] : memref<2x4x8x32xbf16, #tpu.memory_space<vmem>>, vector<1x4x8x32xbf16>
    %603 = vector.shape_cast %602 : vector<1x4x8x32xbf16> to vector<4x8x32xbf16>
    %cst_211 = arith.constant 0.000000e+00 : f32
    %604 = vector.broadcast %cst_211 : f32 to vector<32x32xf32>
    %605 = vector.extract_strided_slice %585 {offsets = [0, 0, 0], sizes = [4, 8, 8], strides = [1, 1, 1]} : vector<4x8x32xf32> to vector<4x8x8xf32>
    %606 = arith.truncf %605 : vector<4x8x8xf32> to vector<4x8x8xbf16>
    %607 = vector.extract_strided_slice %597 {offsets = [0, 0, 0], sizes = [4, 16, 8], strides = [1, 1, 1]} : vector<4x16x32xf32> to vector<4x16x8xf32>
    %608 = arith.truncf %607 : vector<4x16x8xf32> to vector<4x16x8xbf16>
    "tpu.trace_start"() <{level = 10 : i32, message = "bqd,bkd->bqk"}> : () -> ()
    %cst_212 = arith.constant dense<0.000000e+00> : vector<4x8x16xf32>
    %609 = tpu.matmul %606, %608, %cst_212 {dimension_numbers = #tpu.dot_dimension_numbers<[2], [2], [1], [1], [0, 0, 0, 1, 1, 1], [0], [0]>} : vector<4x8x8xbf16>, vector<4x16x8xbf16>, vector<4x8x16xf32> -> vector<4x8x16xf32>
    "tpu.trace_stop"() : () -> ()
    %610 = vector.broadcast %12 : vector<1x1x16xf32> to vector<4x8x16xf32>
    %611 = arith.addf %609, %610 : vector<4x8x16xf32>
    %cst_213 = arith.constant dense<0xFF800000> : vector<4x8xf32>
    %612 = vector.multi_reduction <maximumf>, %611, %cst_213 [2] : vector<4x8x16xf32> to vector<4x8xf32>
    %613 = vector.shape_cast %612 : vector<4x8xf32> to vector<4x8x1xf32>
    %614 = vector.broadcast %613 : vector<4x8x1xf32> to vector<4x8x16xf32>
    %615 = arith.subf %611, %614 : vector<4x8x16xf32>
    %616 = math.exp %615 : vector<4x8x16xf32>
    %cst_214 = arith.constant dense<0.000000e+00> : vector<4x8xf32>
    %617 = vector.multi_reduction <add>, %616, %cst_214 [2] : vector<4x8x16xf32> to vector<4x8xf32>
    %618 = vector.shape_cast %617 : vector<4x8xf32> to vector<4x8x1xf32>
    %619 = vector.broadcast %618 : vector<4x8x1xf32> to vector<4x8x16xf32>
    %620 = arith.divf %616, %619 : vector<4x8x16xf32>
    %621 = arith.truncf %620 : vector<4x8x16xf32> to vector<4x8x16xbf16>
    %622 = vector.extract_strided_slice %601 {offsets = [0, 0, 0], sizes = [4, 16, 8], strides = [1, 1, 1]} : vector<4x16x32xf32> to vector<4x16x8xf32>
    %623 = arith.truncf %622 : vector<4x16x8xf32> to vector<4x16x8xbf16>
    "tpu.trace_start"() <{level = 10 : i32, message = "bqk,bkd->bqd"}> : () -> ()
    %cst_215 = arith.constant dense<0.000000e+00> : vector<4x8x8xf32>
    %624 = tpu.matmul %621, %623, %cst_215 {dimension_numbers = #tpu.dot_dimension_numbers<[2], [1], [1], [2], [0, 0, 0, 1, 1, 2], [0], [0]>} : vector<4x8x16xbf16>, vector<4x16x8xbf16>, vector<4x8x8xf32> -> vector<4x8x8xf32>
    "tpu.trace_stop"() : () -> ()
    %625 = vector.shape_cast %624 : vector<4x8x8xf32> to vector<32x8xf32>
    %626 = arith.truncf %625 : vector<32x8xf32> to vector<32x8xbf16>
    %627 = vector.extract_strided_slice %603 {offsets = [0, 0, 0], sizes = [1, 8, 32], strides = [1, 1, 1]} : vector<4x8x32xbf16> to vector<1x8x32xbf16>
    %628 = vector.shape_cast %627 : vector<1x8x32xbf16> to vector<8x32xbf16>
    %cst_216 = arith.constant dense<0.000000e+00> : vector<32x32xf32>
    %629 = tpu.matmul %626, %628, %cst_216 {dimension_numbers = #tpu.dot_dimension_numbers<[1], [0], [0], [1], [0, 0, 1, 1], [], []>} : vector<32x8xbf16>, vector<8x32xbf16>, vector<32x32xf32> -> vector<32x32xf32>
    %630 = arith.addf %604, %629 : vector<32x32xf32>
    %631 = vector.extract_strided_slice %585 {offsets = [0, 0, 8], sizes = [4, 8, 8], strides = [1, 1, 1]} : vector<4x8x32xf32> to vector<4x8x8xf32>
    %632 = arith.truncf %631 : vector<4x8x8xf32> to vector<4x8x8xbf16>
    %633 = vector.extract_strided_slice %597 {offsets = [0, 0, 8], sizes = [4, 16, 8], strides = [1, 1, 1]} : vector<4x16x32xf32> to vector<4x16x8xf32>
    %634 = arith.truncf %633 : vector<4x16x8xf32> to vector<4x16x8xbf16>
    "tpu.trace_start"() <{level = 10 : i32, message = "bqd,bkd->bqk"}> : () -> ()
    %cst_217 = arith.constant dense<0.000000e+00> : vector<4x8x16xf32>
    %635 = tpu.matmul %632, %634, %cst_217 {dimension_numbers = #tpu.dot_dimension_numbers<[2], [2], [1], [1], [0, 0, 0, 1, 1, 1], [0], [0]>} : vector<4x8x8xbf16>, vector<4x16x8xbf16>, vector<4x8x16xf32> -> vector<4x8x16xf32>
    "tpu.trace_stop"() : () -> ()
    %636 = vector.broadcast %12 : vector<1x1x16xf32> to vector<4x8x16xf32>
    %637 = arith.addf %635, %636 : vector<4x8x16xf32>
    %cst_218 = arith.constant dense<0xFF800000> : vector<4x8xf32>
    %638 = vector.multi_reduction <maximumf>, %637, %cst_218 [2] : vector<4x8x16xf32> to vector<4x8xf32>
    %639 = vector.shape_cast %638 : vector<4x8xf32> to vector<4x8x1xf32>
    %640 = vector.broadcast %639 : vector<4x8x1xf32> to vector<4x8x16xf32>
    %641 = arith.subf %637, %640 : vector<4x8x16xf32>
    %642 = math.exp %641 : vector<4x8x16xf32>
    %cst_219 = arith.constant dense<0.000000e+00> : vector<4x8xf32>
    %643 = vector.multi_reduction <add>, %642, %cst_219 [2] : vector<4x8x16xf32> to vector<4x8xf32>
    %644 = vector.shape_cast %643 : vector<4x8xf32> to vector<4x8x1xf32>
    %645 = vector.broadcast %644 : vector<4x8x1xf32> to vector<4x8x16xf32>
    %646 = arith.divf %642, %645 : vector<4x8x16xf32>
    %647 = arith.truncf %646 : vector<4x8x16xf32> to vector<4x8x16xbf16>
    %648 = vector.extract_strided_slice %601 {offsets = [0, 0, 8], sizes = [4, 16, 8], strides = [1, 1, 1]} : vector<4x16x32xf32> to vector<4x16x8xf32>
    %649 = arith.truncf %648 : vector<4x16x8xf32> to vector<4x16x8xbf16>
    "tpu.trace_start"() <{level = 10 : i32, message = "bqk,bkd->bqd"}> : () -> ()
    %cst_220 = arith.constant dense<0.000000e+00> : vector<4x8x8xf32>
    %650 = tpu.matmul %647, %649, %cst_220 {dimension_numbers = #tpu.dot_dimension_numbers<[2], [1], [1], [2], [0, 0, 0, 1, 1, 2], [0], [0]>} : vector<4x8x16xbf16>, vector<4x16x8xbf16>, vector<4x8x8xf32> -> vector<4x8x8xf32>
    "tpu.trace_stop"() : () -> ()
    %651 = vector.shape_cast %650 : vector<4x8x8xf32> to vector<32x8xf32>
    %652 = arith.truncf %651 : vector<32x8xf32> to vector<32x8xbf16>
    %653 = vector.extract_strided_slice %603 {offsets = [1, 0, 0], sizes = [1, 8, 32], strides = [1, 1, 1]} : vector<4x8x32xbf16> to vector<1x8x32xbf16>
    %654 = vector.shape_cast %653 : vector<1x8x32xbf16> to vector<8x32xbf16>
    %cst_221 = arith.constant dense<0.000000e+00> : vector<32x32xf32>
    %655 = tpu.matmul %652, %654, %cst_221 {dimension_numbers = #tpu.dot_dimension_numbers<[1], [0], [0], [1], [0, 0, 1, 1], [], []>} : vector<32x8xbf16>, vector<8x32xbf16>, vector<32x32xf32> -> vector<32x32xf32>
    %656 = arith.addf %630, %655 : vector<32x32xf32>
    %657 = vector.extract_strided_slice %585 {offsets = [0, 0, 16], sizes = [4, 8, 8], strides = [1, 1, 1]} : vector<4x8x32xf32> to vector<4x8x8xf32>
    %658 = arith.truncf %657 : vector<4x8x8xf32> to vector<4x8x8xbf16>
    %659 = vector.extract_strided_slice %597 {offsets = [0, 0, 16], sizes = [4, 16, 8], strides = [1, 1, 1]} : vector<4x16x32xf32> to vector<4x16x8xf32>
    %660 = arith.truncf %659 : vector<4x16x8xf32> to vector<4x16x8xbf16>
    "tpu.trace_start"() <{level = 10 : i32, message = "bqd,bkd->bqk"}> : () -> ()
    %cst_222 = arith.constant dense<0.000000e+00> : vector<4x8x16xf32>
    %661 = tpu.matmul %658, %660, %cst_222 {dimension_numbers = #tpu.dot_dimension_numbers<[2], [2], [1], [1], [0, 0, 0, 1, 1, 1], [0], [0]>} : vector<4x8x8xbf16>, vector<4x16x8xbf16>, vector<4x8x16xf32> -> vector<4x8x16xf32>
    "tpu.trace_stop"() : () -> ()
    %662 = vector.broadcast %12 : vector<1x1x16xf32> to vector<4x8x16xf32>
    %663 = arith.addf %661, %662 : vector<4x8x16xf32>
    %cst_223 = arith.constant dense<0xFF800000> : vector<4x8xf32>
    %664 = vector.multi_reduction <maximumf>, %663, %cst_223 [2] : vector<4x8x16xf32> to vector<4x8xf32>
    %665 = vector.shape_cast %664 : vector<4x8xf32> to vector<4x8x1xf32>
    %666 = vector.broadcast %665 : vector<4x8x1xf32> to vector<4x8x16xf32>
    %667 = arith.subf %663, %666 : vector<4x8x16xf32>
    %668 = math.exp %667 : vector<4x8x16xf32>
    %cst_224 = arith.constant dense<0.000000e+00> : vector<4x8xf32>
    %669 = vector.multi_reduction <add>, %668, %cst_224 [2] : vector<4x8x16xf32> to vector<4x8xf32>
    %670 = vector.shape_cast %669 : vector<4x8xf32> to vector<4x8x1xf32>
    %671 = vector.broadcast %670 : vector<4x8x1xf32> to vector<4x8x16xf32>
    %672 = arith.divf %668, %671 : vector<4x8x16xf32>
    %673 = arith.truncf %672 : vector<4x8x16xf32> to vector<4x8x16xbf16>
    %674 = vector.extract_strided_slice %601 {offsets = [0, 0, 16], sizes = [4, 16, 8], strides = [1, 1, 1]} : vector<4x16x32xf32> to vector<4x16x8xf32>
    %675 = arith.truncf %674 : vector<4x16x8xf32> to vector<4x16x8xbf16>
    "tpu.trace_start"() <{level = 10 : i32, message = "bqk,bkd->bqd"}> : () -> ()
    %cst_225 = arith.constant dense<0.000000e+00> : vector<4x8x8xf32>
    %676 = tpu.matmul %673, %675, %cst_225 {dimension_numbers = #tpu.dot_dimension_numbers<[2], [1], [1], [2], [0, 0, 0, 1, 1, 2], [0], [0]>} : vector<4x8x16xbf16>, vector<4x16x8xbf16>, vector<4x8x8xf32> -> vector<4x8x8xf32>
    "tpu.trace_stop"() : () -> ()
    %677 = vector.shape_cast %676 : vector<4x8x8xf32> to vector<32x8xf32>
    %678 = arith.truncf %677 : vector<32x8xf32> to vector<32x8xbf16>
    %679 = vector.extract_strided_slice %603 {offsets = [2, 0, 0], sizes = [1, 8, 32], strides = [1, 1, 1]} : vector<4x8x32xbf16> to vector<1x8x32xbf16>
    %680 = vector.shape_cast %679 : vector<1x8x32xbf16> to vector<8x32xbf16>
    %cst_226 = arith.constant dense<0.000000e+00> : vector<32x32xf32>
    %681 = tpu.matmul %678, %680, %cst_226 {dimension_numbers = #tpu.dot_dimension_numbers<[1], [0], [0], [1], [0, 0, 1, 1], [], []>} : vector<32x8xbf16>, vector<8x32xbf16>, vector<32x32xf32> -> vector<32x32xf32>
    %682 = arith.addf %656, %681 : vector<32x32xf32>
    %683 = vector.extract_strided_slice %585 {offsets = [0, 0, 24], sizes = [4, 8, 8], strides = [1, 1, 1]} : vector<4x8x32xf32> to vector<4x8x8xf32>
    %684 = arith.truncf %683 : vector<4x8x8xf32> to vector<4x8x8xbf16>
    %685 = vector.extract_strided_slice %597 {offsets = [0, 0, 24], sizes = [4, 16, 8], strides = [1, 1, 1]} : vector<4x16x32xf32> to vector<4x16x8xf32>
    %686 = arith.truncf %685 : vector<4x16x8xf32> to vector<4x16x8xbf16>
    "tpu.trace_start"() <{level = 10 : i32, message = "bqd,bkd->bqk"}> : () -> ()
    %cst_227 = arith.constant dense<0.000000e+00> : vector<4x8x16xf32>
    %687 = tpu.matmul %684, %686, %cst_227 {dimension_numbers = #tpu.dot_dimension_numbers<[2], [2], [1], [1], [0, 0, 0, 1, 1, 1], [0], [0]>} : vector<4x8x8xbf16>, vector<4x16x8xbf16>, vector<4x8x16xf32> -> vector<4x8x16xf32>
    "tpu.trace_stop"() : () -> ()
    %688 = vector.broadcast %12 : vector<1x1x16xf32> to vector<4x8x16xf32>
    %689 = arith.addf %687, %688 : vector<4x8x16xf32>
    %cst_228 = arith.constant dense<0xFF800000> : vector<4x8xf32>
    %690 = vector.multi_reduction <maximumf>, %689, %cst_228 [2] : vector<4x8x16xf32> to vector<4x8xf32>
    %691 = vector.shape_cast %690 : vector<4x8xf32> to vector<4x8x1xf32>
    %692 = vector.broadcast %691 : vector<4x8x1xf32> to vector<4x8x16xf32>
    %693 = arith.subf %689, %692 : vector<4x8x16xf32>
    %694 = math.exp %693 : vector<4x8x16xf32>
    %cst_229 = arith.constant dense<0.000000e+00> : vector<4x8xf32>
    %695 = vector.multi_reduction <add>, %694, %cst_229 [2] : vector<4x8x16xf32> to vector<4x8xf32>
    %696 = vector.shape_cast %695 : vector<4x8xf32> to vector<4x8x1xf32>
    %697 = vector.broadcast %696 : vector<4x8x1xf32> to vector<4x8x16xf32>
    %698 = arith.divf %694, %697 : vector<4x8x16xf32>
    %699 = arith.truncf %698 : vector<4x8x16xf32> to vector<4x8x16xbf16>
    %700 = vector.extract_strided_slice %601 {offsets = [0, 0, 24], sizes = [4, 16, 8], strides = [1, 1, 1]} : vector<4x16x32xf32> to vector<4x16x8xf32>
    %701 = arith.truncf %700 : vector<4x16x8xf32> to vector<4x16x8xbf16>
    "tpu.trace_start"() <{level = 10 : i32, message = "bqk,bkd->bqd"}> : () -> ()
    %cst_230 = arith.constant dense<0.000000e+00> : vector<4x8x8xf32>
    %702 = tpu.matmul %699, %701, %cst_230 {dimension_numbers = #tpu.dot_dimension_numbers<[2], [1], [1], [2], [0, 0, 0, 1, 1, 2], [0], [0]>} : vector<4x8x16xbf16>, vector<4x16x8xbf16>, vector<4x8x8xf32> -> vector<4x8x8xf32>
    "tpu.trace_stop"() : () -> ()
    %703 = vector.shape_cast %702 : vector<4x8x8xf32> to vector<32x8xf32>
    %704 = arith.truncf %703 : vector<32x8xf32> to vector<32x8xbf16>
    %705 = vector.extract_strided_slice %603 {offsets = [3, 0, 0], sizes = [1, 8, 32], strides = [1, 1, 1]} : vector<4x8x32xbf16> to vector<1x8x32xbf16>
    %706 = vector.shape_cast %705 : vector<1x8x32xbf16> to vector<8x32xbf16>
    %cst_231 = arith.constant dense<0.000000e+00> : vector<32x32xf32>
    %707 = tpu.matmul %704, %706, %cst_231 {dimension_numbers = #tpu.dot_dimension_numbers<[1], [0], [0], [1], [0, 0, 1, 1], [], []>} : vector<32x8xbf16>, vector<8x32xbf16>, vector<32x32xf32> -> vector<32x32xf32>
    %708 = arith.addf %682, %707 : vector<32x32xf32>
    %709 = arith.addf %550, %708 : vector<32x32xf32>
    %c1_232 = arith.constant 1 : index
    %c0_233 = arith.constant 0 : index
    %c0_234 = arith.constant 0 : index
    %710 = vector.load %arg20[%c1_232, %c0_233, %c0_234] : memref<2x1x32xf32, #tpu.memory_space<vmem>>, vector<1x1x32xf32>
    %711 = vector.shape_cast %710 : vector<1x1x32xf32> to vector<1x32xf32>
    %712 = vector.broadcast %711 : vector<1x32xf32> to vector<32x32xf32>
    %713 = arith.addf %709, %712 : vector<32x32xf32>
    %c1_235 = arith.constant 1 : index
    %c0_236 = arith.constant 0 : index
    %c0_237 = arith.constant 0 : index
    %714 = vector.load %arg9[%c1_235, %c0_236, %c0_237] : memref<2x1x32xf32, #tpu.memory_space<vmem>>, vector<1x1x32xf32>
    %715 = vector.shape_cast %714 : vector<1x1x32xf32> to vector<1x32xf32>
    %c1_238 = arith.constant 1 : index
    %c0_239 = arith.constant 0 : index
    %c0_240 = arith.constant 0 : index
    %716 = vector.load %arg10[%c1_238, %c0_239, %c0_240] : memref<2x1x32xf32, #tpu.memory_space<vmem>>, vector<1x1x32xf32>
    %717 = vector.shape_cast %716 : vector<1x1x32xf32> to vector<1x32xf32>
    %cst_241 = arith.constant dense<0.000000e+00> : vector<32xf32>
    %718 = vector.multi_reduction <add>, %713, %cst_241 [1] : vector<32x32xf32> to vector<32xf32>
    %719 = vector.shape_cast %718 : vector<32xf32> to vector<32x1xf32>
    %cst_242 = arith.constant 3.200000e+01 : f32
    %720 = vector.broadcast %cst_242 : f32 to vector<32x1xf32>
    %721 = arith.divf %719, %720 : vector<32x1xf32>
    %722 = vector.broadcast %721 : vector<32x1xf32> to vector<32x32xf32>
    %723 = arith.subf %713, %722 : vector<32x32xf32>
    %724 = arith.mulf %723, %723 : vector<32x32xf32>
    %cst_243 = arith.constant dense<0.000000e+00> : vector<32xf32>
    %725 = vector.multi_reduction <add>, %724, %cst_243 [1] : vector<32x32xf32> to vector<32xf32>
    %726 = vector.shape_cast %725 : vector<32xf32> to vector<32x1xf32>
    %cst_244 = arith.constant 3.200000e+01 : f32
    %727 = vector.broadcast %cst_244 : f32 to vector<32x1xf32>
    %728 = arith.divf %726, %727 : vector<32x1xf32>
    %729 = vector.broadcast %721 : vector<32x1xf32> to vector<32x32xf32>
    %730 = arith.subf %713, %729 : vector<32x32xf32>
    %cst_245 = arith.constant 9.99999974E-6 : f32
    %731 = vector.broadcast %cst_245 : f32 to vector<32x1xf32>
    %732 = arith.addf %728, %731 : vector<32x1xf32>
    %733 = math.rsqrt %732 : vector<32x1xf32>
    %734 = vector.broadcast %733 : vector<32x1xf32> to vector<32x32xf32>
    %735 = arith.mulf %730, %734 : vector<32x32xf32>
    %736 = vector.broadcast %715 : vector<1x32xf32> to vector<32x32xf32>
    %737 = arith.mulf %735, %736 : vector<32x32xf32>
    %738 = vector.broadcast %717 : vector<1x32xf32> to vector<32x32xf32>
    %739 = arith.addf %737, %738 : vector<32x32xf32>
    %740 = arith.truncf %739 : vector<32x32xf32> to vector<32x32xbf16>
    %c1_246 = arith.constant 1 : index
    %c0_247 = arith.constant 0 : index
    %c0_248 = arith.constant 0 : index
    %741 = vector.load %arg21[%c1_246, %c0_247, %c0_248] : memref<2x32x64xbf16, #tpu.memory_space<vmem>>, vector<1x32x64xbf16>
    %742 = vector.shape_cast %741 : vector<1x32x64xbf16> to vector<32x64xbf16>
    %cst_249 = arith.constant dense<0.000000e+00> : vector<32x64xf32>
    %743 = tpu.matmul %740, %742, %cst_249 {dimension_numbers = #tpu.dot_dimension_numbers<[1], [0], [0], [1], [0, 0, 1, 1], [], []>} : vector<32x32xbf16>, vector<32x64xbf16>, vector<32x64xf32> -> vector<32x64xf32>
    %c1_250 = arith.constant 1 : index
    %c0_251 = arith.constant 0 : index
    %c0_252 = arith.constant 0 : index
    %744 = vector.load %arg22[%c1_250, %c0_251, %c0_252] : memref<2x1x64xf32, #tpu.memory_space<vmem>>, vector<1x1x64xf32>
    %745 = vector.shape_cast %744 : vector<1x1x64xf32> to vector<1x64xf32>
    %746 = vector.broadcast %745 : vector<1x64xf32> to vector<32x64xf32>
    %747 = arith.addf %743, %746 : vector<32x64xf32>
    %cst_253 = arith.constant 0.000000e+00 : f32
    %748 = vector.broadcast %cst_253 : f32 to vector<32x64xf32>
    %749 = arith.maximumf %747, %748 : vector<32x64xf32>
    %750 = arith.truncf %749 : vector<32x64xf32> to vector<32x64xbf16>
    %c1_254 = arith.constant 1 : index
    %c0_255 = arith.constant 0 : index
    %c0_256 = arith.constant 0 : index
    %751 = vector.load %arg23[%c1_254, %c0_255, %c0_256] : memref<2x64x32xbf16, #tpu.memory_space<vmem>>, vector<1x64x32xbf16>
    %752 = vector.shape_cast %751 : vector<1x64x32xbf16> to vector<64x32xbf16>
    %cst_257 = arith.constant dense<0.000000e+00> : vector<32x32xf32>
    %753 = tpu.matmul %750, %752, %cst_257 {dimension_numbers = #tpu.dot_dimension_numbers<[1], [0], [0], [1], [0, 0, 1, 1], [], []>} : vector<32x64xbf16>, vector<64x32xbf16>, vector<32x32xf32> -> vector<32x32xf32>
    %754 = arith.addf %713, %753 : vector<32x32xf32>
    %c1_258 = arith.constant 1 : index
    %c0_259 = arith.constant 0 : index
    %c0_260 = arith.constant 0 : index
    %755 = vector.load %arg24[%c1_258, %c0_259, %c0_260] : memref<2x1x32xf32, #tpu.memory_space<vmem>>, vector<1x1x32xf32>
    %756 = vector.shape_cast %755 : vector<1x1x32xf32> to vector<1x32xf32>
    %757 = vector.broadcast %756 : vector<1x32xf32> to vector<32x32xf32>
    %758 = arith.addf %754, %757 : vector<32x32xf32>
    %c0_261 = arith.constant 0 : index
    %c0_262 = arith.constant 0 : index
    %759 = vector.load %arg25[%c0_261, %c0_262] : memref<1x32xf32, #tpu.memory_space<vmem>>, vector<1x32xf32>
    %c0_263 = arith.constant 0 : index
    %c0_264 = arith.constant 0 : index
    %760 = vector.load %arg26[%c0_263, %c0_264] : memref<1x32xf32, #tpu.memory_space<vmem>>, vector<1x32xf32>
    %cst_265 = arith.constant dense<0.000000e+00> : vector<32xf32>
    %761 = vector.multi_reduction <add>, %758, %cst_265 [1] : vector<32x32xf32> to vector<32xf32>
    %762 = vector.shape_cast %761 : vector<32xf32> to vector<32x1xf32>
    %cst_266 = arith.constant 3.200000e+01 : f32
    %763 = vector.broadcast %cst_266 : f32 to vector<32x1xf32>
    %764 = arith.divf %762, %763 : vector<32x1xf32>
    %765 = vector.broadcast %764 : vector<32x1xf32> to vector<32x32xf32>
    %766 = arith.subf %758, %765 : vector<32x32xf32>
    %767 = arith.mulf %766, %766 : vector<32x32xf32>
    %cst_267 = arith.constant dense<0.000000e+00> : vector<32xf32>
    %768 = vector.multi_reduction <add>, %767, %cst_267 [1] : vector<32x32xf32> to vector<32xf32>
    %769 = vector.shape_cast %768 : vector<32xf32> to vector<32x1xf32>
    %cst_268 = arith.constant 3.200000e+01 : f32
    %770 = vector.broadcast %cst_268 : f32 to vector<32x1xf32>
    %771 = arith.divf %769, %770 : vector<32x1xf32>
    %772 = vector.broadcast %764 : vector<32x1xf32> to vector<32x32xf32>
    %773 = arith.subf %758, %772 : vector<32x32xf32>
    %cst_269 = arith.constant 9.99999974E-6 : f32
    %774 = vector.broadcast %cst_269 : f32 to vector<32x1xf32>
    %775 = arith.addf %771, %774 : vector<32x1xf32>
    %776 = math.rsqrt %775 : vector<32x1xf32>
    %777 = vector.broadcast %776 : vector<32x1xf32> to vector<32x32xf32>
    %778 = arith.mulf %773, %777 : vector<32x32xf32>
    %779 = vector.broadcast %759 : vector<1x32xf32> to vector<32x32xf32>
    %780 = arith.mulf %778, %779 : vector<32x32xf32>
    %781 = vector.broadcast %760 : vector<1x32xf32> to vector<32x32xf32>
    %782 = arith.addf %780, %781 : vector<32x32xf32>
    %783 = arith.truncf %782 : vector<32x32xf32> to vector<32x32xbf16>
    %c0_270 = arith.constant 0 : index
    %c0_271 = arith.constant 0 : index
    %784 = vector.load %arg27[%c0_270, %c0_271] : memref<32x128xbf16, #tpu.memory_space<vmem>>, vector<32x128xbf16>
    %cst_272 = arith.constant dense<0.000000e+00> : vector<32x128xf32>
    %785 = tpu.matmul %783, %784, %cst_272 {dimension_numbers = #tpu.dot_dimension_numbers<[1], [0], [0], [1], [0, 0, 1, 1], [], []>} : vector<32x32xbf16>, vector<32x128xbf16>, vector<32x128xf32> -> vector<32x128xf32>
    %c0_273 = arith.constant 0 : index
    %c0_274 = arith.constant 0 : index
    %786 = vector.load %arg28[%c0_273, %c0_274] : memref<1x128xf32, #tpu.memory_space<vmem>>, vector<1x128xf32>
    %787 = vector.broadcast %786 : vector<1x128xf32> to vector<32x128xf32>
    %788 = arith.addf %785, %787 : vector<32x128xf32>
    %cst_275 = arith.constant dense<0xFF800000> : vector<32xf32>
    %789 = vector.multi_reduction <maximumf>, %788, %cst_275 [1] : vector<32x128xf32> to vector<32xf32>
    %790 = vector.shape_cast %789 : vector<32xf32> to vector<32x1xf32>
    %791 = vector.broadcast %790 : vector<32x1xf32> to vector<32x128xf32>
    %792 = arith.subf %788, %791 : vector<32x128xf32>
    %793 = math.exp %792 : vector<32x128xf32>
    %cst_276 = arith.constant dense<0.000000e+00> : vector<32xf32>
    %794 = vector.multi_reduction <add>, %793, %cst_276 [1] : vector<32x128xf32> to vector<32xf32>
    %795 = vector.shape_cast %794 : vector<32xf32> to vector<32x1xf32>
    %796 = math.log %795 : vector<32x1xf32>
    %797 = arith.addf %796, %790 : vector<32x1xf32>
    %798 = vector.broadcast %797 : vector<32x1xf32> to vector<32x128xf32>
    %799 = arith.subf %788, %798 : vector<32x128xf32>
    %800 = vector.shape_cast %799 : vector<32x128xf32> to vector<4x8x128xf32>
    %c0_277 = arith.constant 0 : index
    %c0_278 = arith.constant 0 : index
    %c0_279 = arith.constant 0 : index
    %c0_280 = arith.constant 0 : index
    %801 = vector.load %arg29[%c0_277, %c0_278, %c0_279, %c0_280] : memref<1x4x8x128xf32, #tpu.memory_space<vmem>>, vector<1x4x8x128xf32>
    %802 = vector.shape_cast %801 : vector<1x4x8x128xf32> to vector<4x8x128xf32>
    %803 = vector.shape_cast %800 : vector<4x8x128xf32> to vector<1x4x8x128xf32>
    tpu.vector_store %arg29[%c0_277, %c0_278, %c0_279, %c0_280], %803 {strides = array<i32>} : memref<1x4x8x128xf32, #tpu.memory_space<vmem>>, vector<1x4x8x128xf32>,
    return
  }
  func.func @transform_0(%arg0: i32, %arg1: memref<2xi32, #tpu.memory_space<smem>>, %arg2: memref<2x4xi32, #tpu.memory_space<smem>>) -> (i32, i32, i32, i32) {
    %c0_i32 = arith.constant 0 : i32
    %c0_i32_0 = arith.constant 0 : i32
    %c0_i32_1 = arith.constant 0 : i32
    %c0_i32_2 = arith.constant 0 : i32
    return %arg0, %c0_i32, %c0_i32_0, %c0_i32_1 : i32, i32, i32, i32
  }
  func.func @transform_1(%arg0: i32, %arg1: memref<2xi32, #tpu.memory_space<smem>>, %arg2: memref<2x4xi32, #tpu.memory_space<smem>>) -> (i32, i32, i32) {
    %c0_i32 = arith.constant 0 : i32
    %c0_i32_0 = arith.constant 0 : i32
    %c0_i32_1 = arith.constant 0 : i32
    return %arg0, %c0_i32, %c0_i32_0 : i32, i32, i32
  }
  func.func @transform_2(%arg0: i32, %arg1: memref<2xi32, #tpu.memory_space<smem>>, %arg2: memref<2x4xi32, #tpu.memory_space<smem>>) -> (i32, i32, i32) {
    %c0_i32 = arith.constant 0 : i32
    %c0_i32_0 = arith.constant 0 : i32
    %c0_i32_1 = arith.constant 0 : i32
    %c0_i32_2 = arith.constant 0 : i32
    return %c0_i32, %c0_i32_0, %c0_i32_1 : i32, i32, i32
  }
  func.func @transform_3(%arg0: i32, %arg1: memref<2xi32, #tpu.memory_space<smem>>, %arg2: memref<2x4xi32, #tpu.memory_space<smem>>) -> (i32, i32, i32) {
    %c0_i32 = arith.constant 0 : i32
    %c0_i32_0 = arith.constant 0 : i32
    %c0_i32_1 = arith.constant 0 : i32
    %c0_i32_2 = arith.constant 0 : i32
    return %c0_i32, %c0_i32_0, %c0_i32_1 : i32, i32, i32
  }
  func.func @transform_4(%arg0: i32, %arg1: memref<2xi32, #tpu.memory_space<smem>>, %arg2: memref<2x4xi32, #tpu.memory_space<smem>>) -> (i32, i32, i32) {
    %c0_i32 = arith.constant 0 : i32
    %c0_i32_0 = arith.constant 0 : i32
    %c0_i32_1 = arith.constant 0 : i32
    %c0_i32_2 = arith.constant 0 : i32
    return %c0_i32, %c0_i32_0, %c0_i32_1 : i32, i32, i32
  }
  func.func @transform_5(%arg0: i32, %arg1: memref<2xi32, #tpu.memory_space<smem>>, %arg2: memref<2x4xi32, #tpu.memory_space<smem>>) -> (i32, i32, i32) {
    %c0_i32 = arith.constant 0 : i32
    %c0_i32_0 = arith.constant 0 : i32
    %c0_i32_1 = arith.constant 0 : i32
    %c0_i32_2 = arith.constant 0 : i32
    return %c0_i32, %c0_i32_0, %c0_i32_1 : i32, i32, i32
  }
  func.func @transform_6(%arg0: i32, %arg1: memref<2xi32, #tpu.memory_space<smem>>, %arg2: memref<2x4xi32, #tpu.memory_space<smem>>) -> (i32, i32, i32) {
    %c0_i32 = arith.constant 0 : i32
    %c0_i32_0 = arith.constant 0 : i32
    %c0_i32_1 = arith.constant 0 : i32
    %c0_i32_2 = arith.constant 0 : i32
    return %c0_i32, %c0_i32_0, %c0_i32_1 : i32, i32, i32
  }
  func.func @transform_7(%arg0: i32, %arg1: memref<2xi32, #tpu.memory_space<smem>>, %arg2: memref<2x4xi32, #tpu.memory_space<smem>>) -> (i32, i32, i32) {
    %c0_i32 = arith.constant 0 : i32
    %c0_i32_0 = arith.constant 0 : i32
    %c0_i32_1 = arith.constant 0 : i32
    %c0_i32_2 = arith.constant 0 : i32
    return %c0_i32, %c0_i32_0, %c0_i32_1 : i32, i32, i32
  }
  func.func @transform_8(%arg0: i32, %arg1: memref<2xi32, #tpu.memory_space<smem>>, %arg2: memref<2x4xi32, #tpu.memory_space<smem>>) -> (i32, i32, i32) {
    %c0_i32 = arith.constant 0 : i32
    %c0_i32_0 = arith.constant 0 : i32
    %c0_i32_1 = arith.constant 0 : i32
    %c0_i32_2 = arith.constant 0 : i32
    return %c0_i32, %c0_i32_0, %c0_i32_1 : i32, i32, i32
  }
  func.func @transform_9(%arg0: i32, %arg1: memref<2xi32, #tpu.memory_space<smem>>, %arg2: memref<2x4xi32, #tpu.memory_space<smem>>) -> (i32, i32, i32) {
    %c0_i32 = arith.constant 0 : i32
    %c0_i32_0 = arith.constant 0 : i32
    %c0_i32_1 = arith.constant 0 : i32
    %c0_i32_2 = arith.constant 0 : i32
    return %c0_i32, %c0_i32_0, %c0_i32_1 : i32, i32, i32
  }
  func.func @transform_10(%arg0: i32, %arg1: memref<2xi32, #tpu.memory_space<smem>>, %arg2: memref<2x4xi32, #tpu.memory_space<smem>>) -> (i32, i32, i32, i32) {
    %c0_i32 = arith.constant 0 : i32
    %c0_i32_0 = arith.constant 0 : i32
    %c0_i32_1 = arith.constant 0 : i32
    %c0_i32_2 = arith.constant 0 : i32
    %c0_i32_3 = arith.constant 0 : i32
    return %c0_i32, %c0_i32_0, %c0_i32_1, %c0_i32_2 : i32, i32, i32, i32
  }
  func.func @transform_11(%arg0: i32, %arg1: memref<2xi32, #tpu.memory_space<smem>>, %arg2: memref<2x4xi32, #tpu.memory_space<smem>>) -> (i32, i32, i32) {
    %c0_i32 = arith.constant 0 : i32
    %c0_i32_0 = arith.constant 0 : i32
    %c0_i32_1 = arith.constant 0 : i32
    %c0_i32_2 = arith.constant 0 : i32
    return %c0_i32, %c0_i32_0, %c0_i32_1 : i32, i32, i32
  }
  func.func @transform_12(%arg0: i32, %arg1: memref<2xi32, #tpu.memory_space<smem>>, %arg2: memref<2x4xi32, #tpu.memory_space<smem>>) -> (i32, i32, i32) {
    %c0_i32 = arith.constant 0 : i32
    %c0_i32_0 = arith.constant 0 : i32
    %c0_i32_1 = arith.constant 0 : i32
    %c0_i32_2 = arith.constant 0 : i32
    return %c0_i32, %c0_i32_0, %c0_i32_1 : i32, i32, i32
  }
  func.func @transform_13(%arg0: i32, %arg1: memref<2xi32, #tpu.memory_space<smem>>, %arg2: memref<2x4xi32, #tpu.memory_space<smem>>) -> (i32, i32, i32) {
    %c0_i32 = arith.constant 0 : i32
    %c0_i32_0 = arith.constant 0 : i32
    %c0_i32_1 = arith.constant 0 : i32
    %c0_i32_2 = arith.constant 0 : i32
    return %c0_i32, %c0_i32_0, %c0_i32_1 : i32, i32, i32
  }
  func.func @transform_14(%arg0: i32, %arg1: memref<2xi32, #tpu.memory_space<smem>>, %arg2: memref<2x4xi32, #tpu.memory_space<smem>>) -> (i32, i32, i32) {
    %c0_i32 = arith.constant 0 : i32
    %c0_i32_0 = arith.constant 0 : i32
    %c0_i32_1 = arith.constant 0 : i32
    %c0_i32_2 = arith.constant 0 : i32
    return %c0_i32, %c0_i32_0, %c0_i32_1 : i32, i32, i32
  }
  func.func @transform_15(%arg0: i32, %arg1: memref<2xi32, #tpu.memory_space<smem>>, %arg2: memref<2x4xi32, #tpu.memory_space<smem>>) -> (i32, i32, i32) {
    %c0_i32 = arith.constant 0 : i32
    %c0_i32_0 = arith.constant 0 : i32
    %c0_i32_1 = arith.constant 0 : i32
    %c0_i32_2 = arith.constant 0 : i32
    return %c0_i32, %c0_i32_0, %c0_i32_1 : i32, i32, i32
  }
  func.func @transform_16(%arg0: i32, %arg1: memref<2xi32, #tpu.memory_space<smem>>, %arg2: memref<2x4xi32, #tpu.memory_space<smem>>) -> (i32, i32, i32, i32) {
    %c0_i32 = arith.constant 0 : i32
    %c0_i32_0 = arith.constant 0 : i32
    %c0_i32_1 = arith.constant 0 : i32
    %c0_i32_2 = arith.constant 0 : i32
    %c0_i32_3 = arith.constant 0 : i32
    return %c0_i32, %c0_i32_0, %c0_i32_1, %c0_i32_2 : i32, i32, i32, i32
  }
  func.func @transform_17(%arg0: i32, %arg1: memref<2xi32, #tpu.memory_space<smem>>, %arg2: memref<2x4xi32, #tpu.memory_space<smem>>) -> (i32, i32, i32) {
    %c0_i32 = arith.constant 0 : i32
    %c0_i32_0 = arith.constant 0 : i32
    %c0_i32_1 = arith.constant 0 : i32
    %c0_i32_2 = arith.constant 0 : i32
    return %c0_i32, %c0_i32_0, %c0_i32_1 : i32, i32, i32
  }
  func.func @transform_18(%arg0: i32, %arg1: memref<2xi32, #tpu.memory_space<smem>>, %arg2: memref<2x4xi32, #tpu.memory_space<smem>>) -> (i32, i32, i32) {
    %c0_i32 = arith.constant 0 : i32
    %c0_i32_0 = arith.constant 0 : i32
    %c0_i32_1 = arith.constant 0 : i32
    %c0_i32_2 = arith.constant 0 : i32
    return %c0_i32, %c0_i32_0, %c0_i32_1 : i32, i32, i32
  }
  func.func @transform_19(%arg0: i32, %arg1: memref<2xi32, #tpu.memory_space<smem>>, %arg2: memref<2x4xi32, #tpu.memory_space<smem>>) -> (i32, i32, i32) {
    %c0_i32 = arith.constant 0 : i32
    %c0_i32_0 = arith.constant 0 : i32
    %c0_i32_1 = arith.constant 0 : i32
    %c0_i32_2 = arith.constant 0 : i32
    return %c0_i32, %c0_i32_0, %c0_i32_1 : i32, i32, i32
  }
  func.func @transform_20(%arg0: i32, %arg1: memref<2xi32, #tpu.memory_space<smem>>, %arg2: memref<2x4xi32, #tpu.memory_space<smem>>) -> (i32, i32, i32) {
    %c0_i32 = arith.constant 0 : i32
    %c0_i32_0 = arith.constant 0 : i32
    %c0_i32_1 = arith.constant 0 : i32
    %c0_i32_2 = arith.constant 0 : i32
    return %c0_i32, %c0_i32_0, %c0_i32_1 : i32, i32, i32
  }
  func.func @transform_21(%arg0: i32, %arg1: memref<2xi32, #tpu.memory_space<smem>>, %arg2: memref<2x4xi32, #tpu.memory_space<smem>>) -> (i32, i32, i32) {
    %c0_i32 = arith.constant 0 : i32
    %c0_i32_0 = arith.constant 0 : i32
    %c0_i32_1 = arith.constant 0 : i32
    %c0_i32_2 = arith.constant 0 : i32
    return %c0_i32, %c0_i32_0, %c0_i32_1 : i32, i32, i32
  }
  func.func @transform_22(%arg0: i32, %arg1: memref<2xi32, #tpu.memory_space<smem>>, %arg2: memref<2x4xi32, #tpu.memory_space<smem>>) -> (i32, i32) {
    %c0_i32 = arith.constant 0 : i32
    %c0_i32_0 = arith.constant 0 : i32
    %c0_i32_1 = arith.constant 0 : i32
    return %c0_i32, %c0_i32_0 : i32, i32
  }
  func.func @transform_23(%arg0: i32, %arg1: memref<2xi32, #tpu.memory_space<smem>>, %arg2: memref<2x4xi32, #tpu.memory_space<smem>>) -> (i32, i32) {
    %c0_i32 = arith.constant 0 : i32
    %c0_i32_0 = arith.constant 0 : i32
    %c0_i32_1 = arith.constant 0 : i32
    return %c0_i32, %c0_i32_0 : i32, i32
  }
  func.func @transform_24(%arg0: i32, %arg1: memref<2xi32, #tpu.memory_space<smem>>, %arg2: memref<2x4xi32, #tpu.memory_space<smem>>) -> (i32, i32) {
    %c0_i32 = arith.constant 0 : i32
    %c0_i32_0 = arith.constant 0 : i32
    %c0_i32_1 = arith.constant 0 : i32
    return %c0_i32, %c0_i32_0 : i32, i32
  }
  func.func @transform_25(%arg0: i32, %arg1: memref<2xi32, #tpu.memory_space<smem>>, %arg2: memref<2x4xi32, #tpu.memory_space<smem>>) -> (i32, i32) {
    %c0_i32 = arith.constant 0 : i32
    %c0_i32_0 = arith.constant 0 : i32
    %c0_i32_1 = arith.constant 0 : i32
    return %c0_i32, %c0_i32_0 : i32, i32
  }
  func.func @transform_26(%arg0: i32, %arg1: memref<2xi32, #tpu.memory_space<smem>>, %arg2: memref<2x4xi32, #tpu.memory_space<smem>>) -> (i32, i32, i32, i32) {
    %c0_i32 = arith.constant 0 : i32
    %c0_i32_0 = arith.constant 0 : i32
    %c0_i32_1 = arith.constant 0 : i32
    %c0_i32_2 = arith.constant 0 : i32
    return %arg0, %c0_i32, %c0_i32_0, %c0_i32_1 : i32, i32, i32, i32
  }
}

</mosaic_0001>

<bundles_post_ra>
// kernel: tpu_custom_call.1
= control target key start
LH: loop header
LB: loop body
LE: loop exit
PB: predicated region body
PF: predicated region fallthrough
CT: control target
= control target key end

     0   :  { %s13425_s30 = smov [#allocation4]   ;;  %s15612_s0 = inlined_call_operand.hbm [shape: s32[2], index: 0, kind: input, shape index: {}]   ;;  %s15613_s2 = inlined_call_operand.vmem [shape: f32[2,4,8,32], index: 2, kind: input, shape index: {}]   ;;  %s15614_s3 = inlined_call_operand.vmem [shape: f32[2,16,32], index: 3, kind: input, shape index: {}]   ;;  %s15615_s4 = inlined_call_operand.hbm [shape: f32[2,1,32], index: 4, kind: input, shape index: {}]   ;;  %s15616_s5 = inlined_call_operand.hbm [shape: f32[2,1,32], index: 5, kind: input, shape index: {}]   ;;  %s15617_s6 = inlined_call_operand.hbm [shape: f32[2,1,32], index: 6, kind: input, shape index: {}]   ;;  %s15618_s7 = inlined_call_operand.hbm [shape: f32[2,1,32], index: 7, kind: input, shape index: {}]   ;;  %s15619_s8 = inlined_call_operand.hbm [shape: f32[2,1,32], index: 8, kind: input, shape index: {}]   ;;  %s15620_s9 = inlined_call_operand.hbm [shape: f32[2,1,32], index: 9, kind: input, shape index: {}]   ;;  %s15621_s10 = inlined_call_operand.hbm [shape: bf16[2,32,96], index: 10, kind: input, shape index: {}]   ;;  %s15622_s11 = inlined_call_operand.hbm [shape: f32[2,1,96], index: 11, kind: input, shape index: {}]   ;;  %s15623_s12 = inlined_call_operand.hbm [shape: bf16[2,4,8,32], index: 12, kind: input, shape index: {}]   ;;  %s15624_s13 = inlined_call_operand.hbm [shape: f32[2,1,32], index: 13, kind: input, shape index: {}]   ;;  %s15625_s14 = inlined_call_operand.hbm [shape: bf16[2,32,32], index: 14, kind: input, shape index: {}]   ;;  %s15626_s15 = inlined_call_operand.hbm [shape: f32[2,1,32], index: 15, kind: input, shape index: {}]   ;;  %s15627_s16 = inlined_call_operand.hbm [shape: bf16[2,32,64], index: 16, kind: input, shape index: {}]   ;;  %s15628_s17 = inlined_call_operand.hbm [shape: f32[2,1,64], index: 17, kind: input, shape index: {}]   ;;  %s15629_s18 = inlined_call_operand.vmem [shape: bf16[2,4,8,32], index: 18, kind: input, shape index: {}]   ;;  %s15630_s19 = inlined_call_operand.vmem [shape: f32[2,1,32], index: 19, kind: input, shape index: {}]   ;;  %s15631_s20 = inlined_call_operand.hbm [shape: bf16[2,32,64], index: 20, kind: input, shape index: {}]   ;;  %s15632_s21 = inlined_call_operand.vmem [shape: f32[2,1,64], index: 21, kind: input, shape index: {}]   ;;  %s15633_s22 = inlined_call_operand.vmem [shape: bf16[2,64,32], index: 22, kind: input, shape index: {}]   ;;  %s15634_s23 = inlined_call_operand.vmem [shape: f32[2,1,32], index: 23, kind: input, shape index: {}]   ;;  %s15635_s24 = inlined_call_operand.vmem [shape: f32[1,32], index: 24, kind: input, shape index: {}]   ;;  %s15636_s25 = inlined_call_operand.vmem [shape: f32[1,32], index: 25, kind: input, shape index: {}]   ;;  %s15637_s26 = inlined_call_operand.hbm [shape: bf16[32,128], index: 26, kind: input, shape index: {}]   ;;  %s15638_s27 = inlined_call_operand.vmem [shape: f32[1,128], index: 27, kind: input, shape index: {}]   ;;  %s15639_s28 = inlined_call_operand.hbm [shape: f32[2,4,8,128], index: 28, kind: output, shape index: {}]   ;;  %s15640_s1 = inlined_call_operand.hbm [shape: s32[2,4], index: 1, kind: input, shape index: {}]  }
   0x1   :  { %15654 = sst [smem:[#allocation49_spill]] %s15612_s0 }
   0x2   :  { %15655 = sst [smem:[#allocation50_spill]] %s15613_s2 }
   0x3   :  { %15656 = sst [smem:[#allocation51_spill]] %s15614_s3 }
   0x4   :  { %15657 = sst [smem:[#allocation52_spill]] %s15615_s4 }
   0x5   :  { %15658 = sst [smem:[#allocation53_spill]] %s15616_s5 }
   0x6   :  { %15659 = sst [smem:[#allocation54_spill]] %s15617_s6 }
   0x7   :  { %15660 = sst [smem:[#allocation55_spill]] %s15618_s7 }
   0x8   :  { %15661 = sst [smem:[#allocation56_spill]] %s15619_s8 }
   0x9   :  { %15662 = sst [smem:[#allocation57_spill]] %s15620_s9  ;;  %s13424_s9 = smov [#allocation3]  }
   0xa   :  { %15663 = sst [smem:[#allocation58_spill]] %s15621_s10 }
   0xb   :  { %15664 = sst [smem:[#allocation59_spill]] %s15622_s11 }
   0xc   :  { %15665 = sst [smem:[#allocation60_spill]] %s15623_s12 }
   0xd   :  { %15666 = sst [smem:[#allocation61_spill]] %s15624_s13 }
   0xe   :  { %15667 = sst [smem:[#allocation62_spill]] %s15634_s23 }
   0xf   :  { %15668 = sst [smem:[#allocation63_spill]] %s15639_s28 }
  0x10   :  { %s15669_s23 = sld [smem:[#allocation49_spill]] }
  0x16   :  { %34 = dma.hbm_to_smem %s15669_s23, 16, %s13424_s9, [#allocation2] }
  0x17   :  { %36 = dma.hbm_to_smem %s15640_s1, 32, %s13425_s30, [#allocation2] }
  0x18   :  { %13366 = dma.done.wait [#allocation2], 48 }
  0x19   :  { %13367 = vsyncadd [#allocation2], 4294967248 }
  0x1a   :  { %38 = sfence }
  0x1b   :  { %39 = vsyncpa [#allocation6], 0 }
  0x1c   :  { %40 = vsyncpa [#allocation9], 0 }
  0x1d   :  { %41 = vsyncpa [#allocation12], 0 }
  0x1e   :  { %42 = vsyncpa [#allocation15], 0 }
  0x1f   :  { %43 = vsyncpa [#allocation18], 0 }
  0x20   :  { %44 = vsyncpa [#allocation21], 0 }
  0x21   :  { %45 = vsyncpa [#allocation24], 0 }
  0x22   :  { %46 = vsyncpa [#allocation27], 0 }
  0x23   :  { %47 = vsyncpa [#allocation30], 0 }
  0x24   :  { %48 = vsyncpa [#allocation7], 0 }
  0x25   :  { %50 = vsyncpa [#allocation7 + $0x1], 0  ;;  %s13614_s23 = smov 0   ;;  %s13616_s11 = smov 0  }
  0x26   :  { %s13618_s0 = smov 0   ;;  %s13620_s1 = smov 0  }
  0x27 LB: > { %15670 = sst [smem:[#allocation43_spill]] %s13410_s23  ;;  %s13635_s12 = sadd.s32 4294967295, %s13422_s1   ;;  %s13422_s1 = sphi %s13620_s1, %s15718_s1   ;;  %s13418_s0 = sphi %s13618_s0, %s15720_s0   ;;  %s13414_s11 = sphi %s13616_s11, %s15722_s11   ;;  %s13410_s23 = sphi %s13614_s23, %s15721_s23  }
  0x28   : > { %15671 = sst [smem:[#allocation44_spill]] %s13418_s0  ;;  %s10686_s29 = sadd.s32 4294967294, %s13422_s1  }
  0x29   : > { %15672 = sst [smem:[#allocation45_spill]] %s13422_s1  ;;  %s13639_s3 = sadd.s32 1, %s13422_s1  }
  0x2a   : > { %15673 = sst [smem:[#allocation46_spill]] %s13639_s3  ;;  %s619_s8 = sadd.s32 1, %s13418_s0 }
  0x2b   : > { %s616_s13 = ssub.s32 %s13422_s1, %s13639_s3  ;;  %p629_p0 = scmp.ne.s32.totalorder %s13418_s0, %s13414_s11 }
  0x2c   : > { %p617_p1 = scmp.eq.s32.totalorder %s616_s13, 0  ;;  %p630_p2 = scmp.eq.s32.totalorder %s13635_s12, 1 }
  0x2d   : > { %p635_p3 = scmp.ne.s32.totalorder %s13414_s11, %s13410_s23  ;;  %p636_p4 = scmp.eq.s32.totalorder %s10686_s29, 1 }
  0x2e   : > { %s13650_s2 = scalar_select %p617_p1, %s13418_s0, %s619_s8  }
  0x2f   : > { %p13652_p5 = por %p630_p2, %p629_p0  ;;  %p13656_p6 = por %p636_p4, %p635_p3 }
  0x30   : > { %15674 = sst [smem:[#allocation47_spill]] %s13650_s2  ;;  %p10687_p7 = scmp.ge.s32.totalorder %s13422_s1, 1 }
  0x31   : > { %s15676_s9 = scalar_select %p13656_p6, 1, 0 }
  0x32   : > { %p643_p8 = scmp.lt.s32.totalorder %s13422_s1, 3  ;;  %p15649_p9 = scmp.eq.s32.totalorder %s13635_s12, 0 }
  0x33   : > { %15677 = sst [smem:[#allocation48_spill]] %s15676_s9  ;;  %s13426_s10 = smov [#allocation8]  }
  0x34   : > { %p13663_p10 = pnand %p10687_p7, %p643_p8  ;;  %s668_s30 = sshll.u32 %s13426_s10, 4  ;;  %s669_s30 = int_to_ptr.vmem [resolvable:$true] %s668_s30 }
  0x35   : > { %s13427_s7 = smov [#allocation11]   ;;  %s13428_s8 = smov [#allocation14]  }
  0x36   : > { %p12378_p11 = pneg %p13663_p10  ;;  %s694_s29 = sshll.u32 %s13427_s7, 4  ;;  %s695_s29 = int_to_ptr.vmem [resolvable:$true] %s694_s29 }
  0x37   : > { %s720_s13 = sshll.u32 %s13428_s8, 4  ;;  %s12919_s0 = scalar_lea.vmem %s669_s30, 32  ;;  %s721_s13 = int_to_ptr.vmem [resolvable:$true] %s720_s13 }
  0x38   : > { %p13671_p12 = pnand %p15649_p9, %p12378_p11  ;;  %p12920_p0 = scmp.ne.s32.totalorder %s669_s30, %s12919_s0 }
  0x39   : > { %p12927_p3 = scmp.lt.s32.totalorder %s669_s30, %s669_s30  ;;  %p12928_p4 = scmp.lt.s32.totalorder %s12919_s0, %s12919_s0 }
  0x3a   : > { %p13677_p13 = pneg %p13671_p12 }
  0x3b   : > { %p12929_p7 = por %p12928_p4, %p12927_p3 }
  0x3c   : > { %p12922_p1 = pnand %p12920_p0, %p13677_p13 }
  0x3e   : > { %p12923_p2 = pneg %p12922_p1 }
  0x40   : > { %p12930_p8 = pnand %p12929_p7, %p12923_p2 }
  0x42   : > { %12933 = shalt.err (!%p12930_p8)
}
  0x43   : > { %s13429_s10 = smov 16   ;;  %s13430_s7 = smov 1  }
  0x44   : > { %s15681_s9 = sld [smem:[#allocation53_spill]]  ;;  %s12945_s23 = scalar_lea.vmem %s695_s29, 32 }
  0x45   : > { %p12946_p11 = scmp.ne.s32.totalorder %s695_s29, %s12945_s23  ;;  %p12953_p3 = scmp.lt.s32.totalorder %s695_s29, %s695_s29 }
  0x46   : > { %p12954_p2 = scmp.lt.s32.totalorder %s12945_s23, %s12945_s23 }
  0x47   : > { %p12948_p0 = pnand %p12946_p11, %p13677_p13 }
  0x48   : > { %p12955_p4 = por %p12954_p2, %p12953_p3 }
  0x49   : > { %p12949_p1 = pneg %p12948_p0 }
  0x4a   : > { %12384 = dma.hbm_to_vmem [thread:$0]  (!%p13671_p12), %s15681_s9, 32, %s669_s30, [#allocation9], %s13429_s10, %s13429_s10, %s13430_s7  }
  0x4b   : > { %p12956_p7 = pnand %p12955_p4, %p12949_p1 }
  0x4d   : > { %12959 = shalt.err (!%p12956_p7)
}
  0x4e   : > { %s15682_s28 = sld [smem:[#allocation55_spill]]  ;;  %s12971_s3 = scalar_lea.vmem %s721_s13, 32 }
  0x4f   : > { %p12972_p8 = scmp.ne.s32.totalorder %s721_s13, %s12971_s3  ;;  %p12979_p9 = scmp.lt.s32.totalorder %s721_s13, %s721_s13 }
  0x50   : > { %p12980_p3 = scmp.lt.s32.totalorder %s12971_s3, %s12971_s3 }
  0x51   : > { %p12974_p11 = pnand %p12972_p8, %p13677_p13 }
  0x52   : > { %p12981_p1 = por %p12980_p3, %p12979_p9 }
  0x53   : > { %p12975_p0 = pneg %p12974_p11 }
  0x54   : > { %12390 = dma.hbm_to_vmem [thread:$0]  (!%p13671_p12), %s15682_s28, 32, %s695_s29, [#allocation12], %s13429_s10, %s13429_s10, %s13430_s7  }
  0x55   : > { %p12982_p2 = pnand %p12981_p1, %p12975_p0 }
  0x57   : > { %12985 = shalt.err (!%p12982_p2)
}
  0x58   : > { %s15683_s9 = sld [smem:[#allocation57_spill]]  ;;  %s13431_s28 = smov [#allocation17]  }
  0x59   : > { %s746_s30 = sshll.u32 %s13431_s28, 4  ;;  %s13432_s29 = smov [#allocation20]   ;;  %s747_s30 = int_to_ptr.vmem [resolvable:$true] %s746_s30 }
  0x5a   : > { %s772_s8 = sshll.u32 %s13432_s29, 4  ;;  %s12997_s0 = scalar_lea.vmem %s747_s30, 32  ;;  %s773_s8 = int_to_ptr.vmem [resolvable:$true] %s772_s8 }
  0x5b   : > { %p12998_p4 = scmp.ne.s32.totalorder %s747_s30, %s12997_s0  ;;  %p13005_p8 = scmp.lt.s32.totalorder %s747_s30, %s747_s30 }
  0x5c   : > { %p13006_p11 = scmp.lt.s32.totalorder %s12997_s0, %s12997_s0 }
  0x5d   : > { %p13000_p9 = pnand %p12998_p4, %p13677_p13 }
  0x5e   : > { %12396 = dma.hbm_to_vmem [thread:$0]  (!%p13671_p12), %s15683_s9, 32, %s721_s13, [#allocation15], %s13429_s10, %s13429_s10, %s13430_s7  }
  0x5f   : > { %p13001_p7 = pneg %p13000_p9  ;;  %p13007_p0 = por %p13006_p11, %p13005_p8 }
  0x61   : > { %p13008_p3 = pnand %p13007_p0, %p13001_p7 }
  0x63   : > { %13011 = shalt.err (!%p13008_p3)
}
  0x64   : > { %s15684_s23 = sld [smem:[#allocation59_spill]]  ;;  %s13023_s1 = scalar_lea.vmem %s773_s8, 32 }
  0x65   : > { %p13024_p1 = scmp.ne.s32.totalorder %s773_s8, %s13023_s1  ;;  %p13031_p9 = scmp.lt.s32.totalorder %s773_s8, %s773_s8 }
  0x66   : > { %p13032_p8 = scmp.lt.s32.totalorder %s13023_s1, %s13023_s1 }
  0x67   : > { %p13026_p2 = pnand %p13024_p1, %p13677_p13 }
  0x68   : > { %p13033_p7 = por %p13032_p8, %p13031_p9 }
  0x69   : > { %p13027_p4 = pneg %p13026_p2 }
  0x6a   : > { %12402 = dma.hbm_to_vmem [thread:$0]  (!%p13671_p12), %s15684_s23, 32, %s747_s30, [#allocation18], %s13429_s10, %s13429_s10, %s13430_s7  }
  0x6b   : > { %p13034_p11 = pnand %p13033_p7, %p13027_p4 }
  0x6d   : > { %13037 = shalt.err (!%p13034_p11)
}
  0x6e   : > { %s15685_s29 = sld [smem:[#allocation61_spill]]  ;;  %s13433_s30 = smov [#allocation23]  }
  0x6f   : > { %s798_s0 = sshll.u32 %s13433_s30, 4  ;;  %s13434_s13 = smov [#allocation26]   ;;  %s799_s0 = int_to_ptr.vmem [resolvable:$true] %s798_s0 }
  0x70   : > { %s824_s3 = sshll.u32 %s13434_s13, 4  ;;  %s13049_s23 = scalar_lea.vmem %s799_s0, 32  ;;  %s825_s3 = int_to_ptr.vmem [resolvable:$true] %s824_s3 }
  0x71   : > { %p13050_p0 = scmp.ne.s32.totalorder %s799_s0, %s13049_s23  ;;  %p13057_p2 = scmp.lt.s32.totalorder %s799_s0, %s799_s0 }
  0x72   : > { %p13058_p4 = scmp.lt.s32.totalorder %s13049_s23, %s13049_s23 }
  0x73   : > { %p13052_p3 = pnand %p13050_p0, %p13677_p13 }
  0x74   : > { %12408 = dma.hbm_to_vmem [thread:$0]  (!%p13671_p12), %s15685_s29, 32, %s773_s8, [#allocation21], %s13429_s10, %s13429_s10, %s13430_s7  }
  0x75   : > { %p13053_p1 = pneg %p13052_p3  ;;  %p13059_p9 = por %p13058_p4, %p13057_p2 }
  0x77   : > { %p13060_p8 = pnand %p13059_p9, %p13053_p1 }
  0x79   : > { %13063 = shalt.err (!%p13060_p8)
}
  0x7a   : > { %12414 = dma.hbm_to_vmem [thread:$0]  (!%p13671_p12), %s15626_s15, 32, %s799_s0, [#allocation24], %s13429_s10, %s13429_s10, %s13430_s7  }
  0x7b   : > { %s13075_s9 = scalar_lea.vmem %s825_s3, 32  ;;  %p13083_p3 = scmp.lt.s32.totalorder %s825_s3, %s825_s3 }
  0x7c   : > { %p13076_p7 = scmp.ne.s32.totalorder %s825_s3, %s13075_s9  ;;  %p13084_p2 = scmp.lt.s32.totalorder %s13075_s9, %s13075_s9 }
  0x7e   : > { %p13078_p11 = pnand %p13076_p7, %p13677_p13  ;;  %p13085_p1 = por %p13084_p2, %p13083_p3 }
  0x80   : > { %p13079_p0 = pneg %p13078_p11 }
  0x82   : > { %p13086_p4 = pnand %p13085_p1, %p13079_p0 }
  0x84   : > { %13089 = shalt.err (!%p13086_p4)
}
  0x85   : > { %12420 = dma.hbm_to_vmem [thread:$0]  (!%p13671_p12), %s15628_s17, 32, %s825_s3, [#allocation27], %s13429_s10, %s13429_s10, %s13430_s7  }
  0x86   : > { %s13435_s30 = smov [#allocation5]   ;;  %s13436_s13 = smov [#allocation10]  }
  0x87   : > { %s655_s0 = sshll.u32 %s13435_s30, 4  ;;  %s681_s23 = sshll.u32 %s13436_s13, 4  ;;  %s656_s0 = int_to_ptr.vmem [resolvable:$true] %s655_s0  ;;  %s682_s23 = int_to_ptr.vmem [resolvable:$true] %s681_s23 }
  0x88   : > { %s13101_s8 = scalar_lea.vmem %s656_s0, 32  ;;  %p13109_p11 = scmp.lt.s32.totalorder %s656_s0, %s656_s0 }
  0x89   : > { %p13102_p9 = scmp.ne.s32.totalorder %s656_s0, %s13101_s8  ;;  %p13110_p0 = scmp.lt.s32.totalorder %s13101_s8, %s13101_s8 }
  0x8b   : > { %p13104_p8 = pnand %p13102_p9, %p13677_p13  ;;  %p13111_p3 = por %p13110_p0, %p13109_p11 }
  0x8d   : > { %p13105_p7 = pneg %p13104_p8 }
  0x8f   : > { %p13112_p2 = pnand %p13111_p3, %p13105_p7 }
  0x91   : > { %13115 = shalt.err (!%p13112_p2)
}
  0x92   : > { %s15686_s9 = sld [smem:[#allocation52_spill]]  ;;  %s13127_s28 = scalar_lea.vmem %s682_s23, 32 }
  0x93   : > { %p13128_p1 = scmp.ne.s32.totalorder %s682_s23, %s13127_s28  ;;  %p13135_p8 = scmp.lt.s32.totalorder %s682_s23, %s682_s23 }
  0x94   : > { %p13136_p11 = scmp.lt.s32.totalorder %s13127_s28, %s13127_s28 }
  0x95   : > { %p13130_p4 = pnand %p13128_p1, %p13677_p13 }
  0x96   : > { %p13137_p7 = por %p13136_p11, %p13135_p8 }
  0x97   : > { %p13131_p9 = pneg %p13130_p4 }
  0x98   : > { %12381 = dma.hbm_to_vmem [thread:$0]  (!%p13671_p12), %s15686_s9, 32, %s656_s0, [#allocation6], %s13429_s10, %s13429_s10, %s13430_s7  }
  0x99   : > { %p13138_p0 = pnand %p13137_p7, %p13131_p9 }
  0x9b   : > { %13141 = shalt.err (!%p13138_p0)
}
  0x9c   : > { %s15687_s13 = sld [smem:[#allocation54_spill]]  ;;  %s13437_s0 = smov [#allocation13]  }
  0x9d   : > { %s707_s8 = sshll.u32 %s13437_s0, 4  ;;  %s13438_s3 = smov [#allocation16]   ;;  %s708_s8 = int_to_ptr.vmem [resolvable:$true] %s707_s8 }
  0x9e   : > { %s733_s1 = sshll.u32 %s13438_s3, 4  ;;  %s13153_s9 = scalar_lea.vmem %s708_s8, 32  ;;  %s734_s1 = int_to_ptr.vmem [resolvable:$true] %s733_s1 }
  0x9f   : > { %p13154_p3 = scmp.ne.s32.totalorder %s708_s8, %s13153_s9  ;;  %p13161_p4 = scmp.lt.s32.totalorder %s708_s8, %s708_s8 }
  0xa0   : > { %p13162_p9 = scmp.lt.s32.totalorder %s13153_s9, %s13153_s9 }
  0xa1   : > { %p13156_p2 = pnand %p13154_p3, %p13677_p13 }
  0xa2   : > { %12387 = dma.hbm_to_vmem [thread:$0]  (!%p13671_p12), %s15687_s13, 32, %s682_s23, [#allocation9], %s13429_s10, %s13429_s10, %s13430_s7  }
  0xa3   : > { %p13157_p1 = pneg %p13156_p2  ;;  %p13163_p8 = por %p13162_p9, %p13161_p4 }
  0xa5   : > { %p13164_p11 = pnand %p13163_p8, %p13157_p1 }
  0xa7   : > { %13167 = shalt.err (!%p13164_p11)
}
  0xa8   : > { %s15688_s29 = sld [smem:[#allocation56_spill]]  ;;  %s13179_s30 = scalar_lea.vmem %s734_s1, 512 }
  0xa9   : > { %p13180_p7 = scmp.ne.s32.totalorder %s734_s1, %s13179_s30  ;;  %p13187_p2 = scmp.lt.s32.totalorder %s734_s1, %s734_s1 }
  0xaa   : > { %p13188_p4 = scmp.lt.s32.totalorder %s13179_s30, %s13179_s30 }
  0xab   : > { %p13182_p0 = pnand %p13180_p7, %p13677_p13 }
  0xac   : > { %p13189_p1 = por %p13188_p4, %p13187_p2 }
  0xad   : > { %p13183_p3 = pneg %p13182_p0 }
  0xae   : > { %12393 = dma.hbm_to_vmem [thread:$0]  (!%p13671_p12), %s15688_s29, 32, %s708_s8, [#allocation12], %s13429_s10, %s13429_s10, %s13430_s7  }
  0xaf   : > { %p13190_p9 = pnand %p13189_p1, %p13183_p3 }
  0xb1   : > { %13193 = shalt.err (!%p13190_p9)
}
  0xb2   : > { %s13439_s13 = smov 64   ;;  %s13440_s0 = smov 4  }
  0xb3   : > { %s15689_s8 = sld [smem:[#allocation58_spill]]  ;;  %s13441_s3 = smov [#allocation19]  }
  0xb4   : > { %s759_s9 = sshll.u32 %s13441_s3, 4  ;;  %s13442_s23 = smov [#allocation22]   ;;  %s760_s9 = int_to_ptr.vmem [resolvable:$true] %s759_s9 }
  0xb5   : > { %s785_s28 = sshll.u32 %s13442_s23, 4  ;;  %s13205_s29 = scalar_lea.vmem %s760_s9, 512  ;;  %s786_s28 = int_to_ptr.vmem [resolvable:$true] %s785_s28 }
  0xb6   : > { %p13206_p8 = scmp.ne.s32.totalorder %s760_s9, %s13205_s29  ;;  %p13213_p0 = scmp.lt.s32.totalorder %s760_s9, %s760_s9 }
  0xb7   : > { %p13214_p3 = scmp.lt.s32.totalorder %s13205_s29, %s13205_s29 }
  0xb8   : > { %p13208_p11 = pnand %p13206_p8, %p13677_p13 }
  0xb9   : > { %12399 = dma.hbm_to_vmem [thread:$0]  (!%p13671_p12), %s15689_s8, 512, %s734_s1, [#allocation15], %s13439_s13, %s13439_s13, %s13440_s0  }
  0xba   : > { %p13209_p7 = pneg %p13208_p11  ;;  %p13215_p2 = por %p13214_p3, %p13213_p0 }
  0xbc   : > { %p13216_p4 = pnand %p13215_p2, %p13209_p7 }
  0xbe   : > { %13219 = shalt.err (!%p13216_p4)
}
  0xbf   : > { %s15690_s10 = sld [smem:[#allocation60_spill]]  ;;  %s13231_s7 = scalar_lea.vmem %s786_s28, 512 }
  0xc0   : > { %p13232_p1 = scmp.ne.s32.totalorder %s786_s28, %s13231_s7  ;;  %p13239_p11 = scmp.lt.s32.totalorder %s786_s28, %s786_s28 }
  0xc1   : > { %p13240_p0 = scmp.lt.s32.totalorder %s13231_s7, %s13231_s7 }
  0xc2   : > { %p13234_p9 = pnand %p13232_p1, %p13677_p13 }
  0xc3   : > { %p13241_p7 = por %p13240_p0, %p13239_p11 }
  0xc4   : > { %p13235_p8 = pneg %p13234_p9 }
  0xc5   : > { %12405 = dma.hbm_to_vmem [thread:$0]  (!%p13671_p12), %s15690_s10, 512, %s760_s9, [#allocation18], %s13439_s13, %s13439_s13, %s13440_s0  }
  0xc6   : > { %p13242_p3 = pnand %p13241_p7, %p13235_p8 }
  0xc8   : > { %13245 = shalt.err (!%p13242_p3)
}
  0xc9   : > { %12411 = dma.hbm_to_vmem [thread:$0]  (!%p13671_p12), %s15625_s14, 512, %s786_s28, [#allocation21], %s13439_s13, %s13439_s13, %s13440_s0  }
  0xca   : > { %s13443_s9 = smov [#allocation25]   ;;  %s13444_s29 = smov [#allocation28]  }
  0xcb   : > { %s811_s23 = sshll.u32 %s13443_s9, 4  ;;  %s843_s1 = sshll.u32 %s13444_s29, 4  ;;  %s812_s23 = int_to_ptr.vmem [resolvable:$true] %s811_s23  ;;  %s844_s1 = int_to_ptr.vmem [resolvable:$true] %s843_s1 }
  0xcc   : > { %s13257_s30 = scalar_lea.vmem %s812_s23, 512  ;;  %p13265_p9 = scmp.lt.s32.totalorder %s812_s23, %s812_s23 }
  0xcd   : > { %p13258_p2 = scmp.ne.s32.totalorder %s812_s23, %s13257_s30  ;;  %p13266_p8 = scmp.lt.s32.totalorder %s13257_s30, %s13257_s30 }
  0xcf   : > { %p13260_p4 = pnand %p13258_p2, %p13677_p13  ;;  %p13267_p11 = por %p13266_p8, %p13265_p9 }
  0xd1   : > { %p13261_p1 = pneg %p13260_p4 }
  0xd3   : > { %p13268_p0 = pnand %p13267_p11, %p13261_p1 }
  0xd5   : > { %13271 = shalt.err (!%p13268_p0)
}
  0xd6   : > { %12417 = dma.hbm_to_vmem [thread:$0]  (!%p13671_p12), %s15627_s16, 512, %s812_s23, [#allocation24], %s13439_s13, %s13439_s13, %s13440_s0  }
  0xd7   : > { %s13283_s7 = scalar_lea.vmem %s844_s1, 512  ;;  %p13291_p4 = scmp.lt.s32.totalorder %s844_s1, %s844_s1 }
  0xd8   : > { %p13284_p7 = scmp.ne.s32.totalorder %s844_s1, %s13283_s7  ;;  %p13292_p9 = scmp.lt.s32.totalorder %s13283_s7, %s13283_s7 }
  0xda   : > { %p13286_p3 = pnand %p13284_p7, %p13677_p13  ;;  %p13293_p1 = por %p13292_p9, %p13291_p4 }
  0xdc   : > { %p13287_p2 = pneg %p13286_p3 }
  0xde   : > { %p13294_p8 = pnand %p13293_p1, %p13287_p2 }
  0xe0   : > { %13297 = shalt.err (!%p13294_p8)
}
  0xe1   : > { %12423 = dma.hbm_to_vmem [thread:$0]  (!%p13671_p12), %s15631_s20, 512, %s844_s1, [#allocation27], %s13439_s13, %s13439_s13, %s13440_s0  }
  0xe2   : > { %s13445_s9 = smov [#allocation29]  }
  0xe3   : > { %s871_s23 = sshll.u32 %s13445_s9, 4  ;;  %s872_s23 = int_to_ptr.vmem [resolvable:$true] %s871_s23 }
  0xe4   : > { %s13309_s29 = scalar_lea.vmem %s872_s23, 256  ;;  %p13317_p3 = scmp.lt.s32.totalorder %s872_s23, %s872_s23 }
  0xe5   : > { %p13310_p11 = scmp.ne.s32.totalorder %s872_s23, %s13309_s29  ;;  %p13318_p2 = scmp.lt.s32.totalorder %s13309_s29, %s13309_s29 }
  0xe7   : > { %p13312_p0 = pnand %p13310_p11, %p13677_p13  ;;  %p13319_p4 = por %p13318_p2, %p13317_p3 }
  0xe9   : > { %p13313_p7 = pneg %p13312_p0 }
  0xeb   : > { %p13320_p9 = pnand %p13319_p4, %p13313_p7 }
  0xed   : > { %13323 = shalt.err (!%p13320_p9)
}
  0xee   : > { %12426 = dma.hbm_to_vmem [thread:$0]  (!%p13671_p12), %s15637_s26, 256, %s872_s23, [#allocation30], %s13439_s13, %s13439_s13, %s13440_s0  }
  0xef   : > { %906 = sbr.rel (%p13663_p10) target bundleno = 16677 (0x4125), region = 124  ;;  %p15691_p13 = scmp.eq.s32.totalorder (!%p13663_p10), %s13635_s12, 0 }
  0xf4   : > { %13369 = dma.done.wait (%p15691_p13), [#allocation6], 32   ;;  %p15692_p1 = pmov %p15691_p13 }
  0xf6   : > { %13371 = vsyncadd (%p15692_p1), [#allocation6], 4294967264  ;;  %p15693_p8 = pmov %p15692_p1 }
  0xf7   : > { %p15694_p11 = pmov %p15692_p1 }
  0xf8   : > { %13373 = dma.done.wait (%p15693_p8), [#allocation9], 64  }
  0xf9   : > { %13375 = vsyncadd (%p15694_p11), [#allocation9], 4294967232  ;;  %p15695_p0 = pmov %p15692_p1 }
  0xfb   : > { %13377 = dma.done.wait (%p15695_p0), [#allocation12], 64   ;;  %p15696_p12 = pmov %p15695_p0 }
  0xfc   : > { %p15697_p10 = pmov %p15695_p0 }
  0xfd   : > { %13379 = vsyncadd (%p15696_p12), [#allocation12], 4294967232 }
  0xfe   : > { %13381 = dma.done.wait (%p15697_p10), [#allocation15], 544   ;;  %p15698_p7 = pmov %p15695_p0 }
  0xff   : > { %p15699_p3 = pmov %p15695_p0 }
 0x100   : > { %13383 = vsyncadd (%p15698_p7), [#allocation15], 4294966752 }
 0x101   : > { %13385 = dma.done.wait (%p15699_p3), [#allocation18], 544   ;;  %p15700_p2 = pmov %p15695_p0 }
 0x102   : > { %p15701_p4 = pmov %p15695_p0 }
 0x103   : > { %13387 = vsyncadd (%p15700_p2), [#allocation18], 4294966752 }
 0x104   : > { %13389 = dma.done.wait (%p15701_p4), [#allocation21], 544   ;;  %p15702_p9 = pmov %p15695_p0 }
 0x105   : > { %p15703_p13 = pmov %p15695_p0 }
 0x106   : > { %13391 = vsyncadd (%p15702_p9), [#allocation21], 4294966752 }
 0x107   : > { %13393 = dma.done.wait (%p15703_p13), [#allocation24], 544   ;;  %p15704_p1 = pmov %p15695_p0 }
 0x108   : > { %p15705_p8 = pmov %p15695_p0 }
 0x109   : > { %13395 = vsyncadd (%p15704_p1), [#allocation24], 4294966752 }
 0x10a   : > { %13397 = dma.done.wait (%p15705_p8), [#allocation27], 544   ;;  %p15706_p11 = pmov %p15695_p0 }
 0x10c   : > { %13399 = vsyncadd (%p15706_p11), [#allocation27], 4294966752 }
 0x10d   : > { %13401 = dma.done.wait (%p15695_p0), [#allocation30], 256   ;;  %p15707_p12 = pmov %p15695_p0 }
 0x10e   : > { %p1041_p10 = scmp.lt.s32.totalorder %s13635_s12, 1  ;;  %s15708_s0 = sld [smem:[#allocation50_spill]]  ;;  %vm1093_vm0 = vcmask 261120   ;;  %v12534_v28 = vld [vmem:[#allocation16 + $0x8] sm:$0xff]   ;;  %v12535_v29 = vld [vmem:[#allocation16] sm:$0xff]   ;;  %v13446_v62 = vmov 0.0  }
 0x10f   : > { %13403 = vsyncadd (%p15707_p12), [#allocation30], 4294967040  ;;  %11336 = vmatprep.subr.bf16.mxu0 %v12534_v28  ;;  %v10728_v44 = vld [vmem:[#allocation5] ss:$0 sm:$0xff]  ;;  %v10729_v49 = vld [vmem:[#allocation8] ss:$0 sm:$0xff]  ;;  %11344 = vmatprep.subr.bf16.mxu1 %v13446_v62 }
 0x110   : > { %s13881_s2 = scalar_select %p1041_p10, %s13635_s12, 1  ;;  %11337 = vmatpush3.bf16.msra.mxu0 %v12534_v28  ;;  %vm13447_vm1 = vmmov 0   ;;  %vm1258_vm2 = vcmask 64512   ;;  %vm1505_vm12 = vcmask 1043456   ;;  %vm3682_vm14 = vcmask 130048  }
 0x111   : > { %11338 = vmatprep.subr.bf16.mxu0 %v12535_v29  ;;  %11346 = vmatprep.mubr.msk.bf16.mxu1 %vm13447_vm1, %v13446_v62  ;;  %s13448_s10 = smov 96   ;;  %s10727_s7 = sshll.u32 %s13635_s12, 7  ;;  %vm5590_vm15 = vcmask 523264  }
 0x112   : > { %s10983_s6 = sshll.u32 %s13881_s2, 5  ;;  %s1067_s8 = sld [smem:[#allocation4 + %s10727_s7]] }
 0x113   : > { %s1069_s3 = sadd.s32 1, %s10727_s7  ;;  %s1072_s23 = sadd.s32 2, %s10727_s7 }
 0x114   : > { %s13887_s28 = scalar_lea.vmem %s15708_s0, %s10983_s6  ;;  %11339 = vmatpush3.bf16.msra.mxu0 %v12535_v29  ;;  %s1070_s9 = sld [smem:[#allocation4 + %s1069_s3]] }
 0x115   : > { %v1052_v0 = vld [vmem:[%s13887_s28] sm:$0xff]  ;;  %v1054_v2 = vld [vmem:[%s13887_s28 + $0x10] sm:$0xff]  ;;  %v1053_v3 = vld [vmem:[%s13887_s28 + $0x8] sm:$0xff]  ;;  %11350 = vmatprep.subr.bf16.mxu0 %v13446_v62  ;;  %s1073_s29 = sld [smem:[#allocation4 + %s1072_s23]]  ;;  %s1075_s30 = sadd.s32 3, %s10727_s7 }
 0x116   : > { %v1094_v1 = vsel %vm1093_vm0, %v1052_v0, 0.0  ;;  %v1055_v4 = vld [vmem:[%s13887_s28 + $0x18] sm:$0xff]  ;;  %v1100_v5 = vsel %vm1093_vm0, %v1054_v2, 0.0  ;;  %v1097_v6 = vsel %vm1093_vm0, %v1053_v3, 0.0  ;;  %s1076_s1 = sld [smem:[#allocation4 + %s1075_s30]]  ;;  %s13450_s6 = smov 64  }
 0x117   : > { %1095 = vadd.xlane.f32.xlu0 %v1094_v1  ;;  %v1103_v7 = vsel %vm1093_vm0, %v1055_v4, 0.0  ;;  %1101 = vadd.xlane.f32.xlu1 %v1100_v5  ;;  %s13451_s4 = smov 88   ;;  %s13452_s13 = smov 120  }
 0x118   : > { %s13453_s0 = smov 56   ;;  %s13454_s7 = smov 80  }
 0x119   : > { %s15652_s3 = smov 48   ;;  %s13458_s23 = smov 104  }
 0x11a   : > { %s13460_s30 = smov [#allocation31]  }
 0x11b   : > { %1098 = vadd.xlane.f32.xlu0 %v1097_v6  ;;  %1104 = vadd.xlane.f32.xlu1 %v1103_v7 }
 0x1a0   : > { %v1096_v8 = vpop.xlane.xlu0 %1095  ;;  %v1102_v10 = vpop.xlane.xlu1 %1101 }
 0x1a1   : > { %v1107_v9 = vmul.f32 0.03125, %v1096_v8  ;;  %v1109_v11 = vmul.f32 0.03125, %v1102_v10 }
 0x1a3   : > { %v1111_v12 = vsub.f32 %v1052_v0, %v1107_v9  ;;  %v1113_v13 = vsub.f32 %v1054_v2, %v1109_v11  ;;  %v10730_v0 = vld [vmem:[#allocation17] ss:$0 sm:$0xff] }
 0x1a4   : > { %v1099_v14 = vpop.xlane.xlu0 %1098  ;;  %v1105_v16 = vpop.xlane.xlu1 %1104 }
 0x1a5   : > { %v1108_v15 = vmul.f32 0.03125, %v1099_v14  ;;  %v1115_v17 = vmul.f32 %v1111_v12, %v1111_v12  ;;  %v1110_v18 = vmul.f32 0.03125, %v1105_v16  ;;  %v1117_v19 = vmul.f32 %v1113_v13, %v1113_v13 }
 0x1a7   : > { %v1112_v20 = vsub.f32 %v1053_v3, %v1108_v15  ;;  %v1119_v21 = vsel %vm1093_vm0, %v1115_v17, 0.0  ;;  %v1114_v22 = vsub.f32 %v1055_v4, %v1110_v18  ;;  %v1125_v23 = vsel %vm1093_vm0, %v1117_v19, 0.0 }
 0x1a8   : > { %1120 = vadd.xlane.f32.xlu0 %v1119_v21 }
 0x1a9   : > { %v1116_v24 = vmul.f32 %v1112_v20, %v1112_v20  ;;  %v1118_v25 = vmul.f32 %v1114_v22, %v1114_v22 }
 0x1ab   : > { %v1122_v26 = vsel %vm1093_vm0, %v1116_v24, 0.0  ;;  %v1128_v27 = vsel %vm1093_vm0, %v1118_v25, 0.0  ;;  %v1071_v24 = vstv %s1070_s9  ;;  %v1074_v25 = vstv %s1073_s29  ;;  %s13457_s9 = smov 72   ;;  %s15650_s29 = smov 40  }
 0x1ac   : > { %1126 = vadd.xlane.f32.xlu0 %v1125_v23  ;;  %1123 = vadd.xlane.f32.xlu1 %v1122_v26  ;;  %v1068_v23 = vstv %s1067_s8  ;;  %v13449_v26 = vmov -1e+09   ;;  %s13455_s8 = smov 112  }
 0x1b0   : > { %1129 = vadd.xlane.f32.xlu1 %v1128_v27 }
 0x231   : > { %v1121_v30 = vpop.xlane.xlu0 %1120 }
 0x232   : > { %v1131_v31 = vmul.f32 0.03125, %v1121_v30  ;;  %v1077_v30 = vstv %s1076_s1  ;;  %s15710_s1 = sld [smem:[#allocation62_spill]] }
 0x234   : > { %v1135_v32 = vadd.f32 1e-05, %v1131_v31 }
 0x235   : > { %v1124_v33 = vpop.xlane.xlu1 %1123  ;;  %v1127_v34 = vpop.xlane.xlu0 %1126 }
 0x236   : > { %12560 = vrsqrt.f32 %v1135_v32  ;;  %v1132_v35 = vmul.f32 0.03125, %v1124_v33  ;;  %v1133_v36 = vmul.f32 0.03125, %v1127_v34 }
 0x238   : > { %v1136_v37 = vadd.f32 1e-05, %v1132_v35  ;;  %v1137_v38 = vadd.f32 1e-05, %v1133_v36 }
 0x239   : > { %v1130_v39 = vpop.xlane.xlu1 %1129 }
 0x23a   : > { %12562 = vrsqrt.f32 %v1136_v37  ;;  %v1134_v40 = vmul.f32 0.03125, %v1130_v39 }
 0x23b   : > { %12564 = vrsqrt.f32 %v1137_v38 }
 0x23c   : > { %v1138_v41 = vadd.f32 1e-05, %v1134_v40 }
 0x23e   : > { %12566 = vrsqrt.f32 %v1138_v41 }
 0x243   : > { %v12561_v42 = vpop.eup %12560 }
 0x244   : > { %v1143_v43 = vmul.f32 %v12561_v42, %v1111_v12 }
 0x246   : > { %v1153_v48 = vmul.f32 %v10728_v44, %v1143_v43 }
 0x247   : > { %v12563_v45 = vpop.eup %12562 }
 0x248   : > { %v12565_v46 = vpop.eup %12564  ;;  %v1144_v47 = vmul.f32 %v12563_v45, %v1112_v20  ;;  %v1163_v53 = vadd.f32 %v10729_v49, %v1153_v48  ;;  %v1059_v20 = vlaneseq }
 0x249   : > { %v1145_v50 = vmul.f32 %v12565_v46, %v1113_v13 }
 0x24a   : > { %v1154_v51 = vmul.f32 %v10728_v44, %v1144_v47  ;;  %v13950_v21 = vand.u32 127, %v1059_v20 }
 0x24b   : > { %v12567_v52 = vpop.eup %12566  ;;  %v1155_v56 = vmul.f32 %v10728_v44, %v1145_v50 }
 0x24c   : > { %v1164_v54 = vadd.f32 %v10729_v49, %v1154_v51  ;;  %v1146_v55 = vmul.f32 %v12567_v52, %v1114_v22  ;;  %v1065_v22 = vshrl.u32 %v1059_v20, 7  ;;  %vm1079_vm4 = vcmp.lt.s32.totalorder %v13950_v21, %v1068_v23 }
 0x24d   : > { %v1165_v59 = vadd.f32 %v10729_v49, %v1155_v56  ;;  %vm1080_vm6 = vcmp.lt.s32.totalorder %v13950_v21, %v1071_v24  ;;  %vm1081_vm8 = vcmp.lt.s32.totalorder %v13950_v21, %v1074_v25  ;;  %vm1082_vm10 = vcmp.lt.s32.totalorder %v13950_v21, %v1077_v30 }
 0x24e   : > { %v1167_v57 = vpack.c.bf16 %v1164_v54, %v1163_v53  ;;  %v1156_v58 = vmul.f32 %v10728_v44, %v1146_v55  ;;  %vm1078_vm3 = vcmp.le.s32.totalorder %v13950_v21, %v1065_v22 }
 0x24f   : > { %vm1083_vm5 = vmand %vm1078_vm3, %vm1079_vm4 }
 0x250   : > { %11340 = vmatprep.mubr.msk.bf16.mxu0 %vm1093_vm0, %v1167_v57  ;;  %v1166_v60 = vadd.f32 %v10729_v49, %v1156_v58  ;;  %v13958_v27 = vsel %vm1083_vm5, 0.0, %v13449_v26  ;;  %vm1084_vm7 = vmand %vm1078_vm3, %vm1080_vm6 }
 0x251   : > { %v13965_v32 = vsel %vm1084_vm7, 0.0, %v13449_v26  ;;  %vm1085_vm9 = vmand %vm1078_vm3, %vm1081_vm8 }
 0x252   : > { %v1168_v61 = vpack.c.bf16 %v1166_v60, %v1165_v59  ;;  %v13973_v39 = vsel %vm1085_vm9, 0.0, %v13449_v26  ;;  %vm1086_vm11 = vmand %vm1078_vm3, %vm1082_vm10 }
 0x253   : > { %v13980_v46 = vsel %vm1086_vm11, 0.0, %v13449_v26 }
 0x254   : > { %11341 = vmatmul.mubr.msk.bf16.vlgmr.msra.gmra.mxu0 %vm1093_vm0, %v1168_v61 }
 0x255   : > { %11352 = vmatprep.mubr.msk.bf16.mxu0 %vm13447_vm1, %v13446_v62 }
 0x314   : > { %v11342_v63 = vpop.f32.mrf.mxu0 }
 0x315   : > { %v1241_v7 = vadd.f32 %v11342_v63, %v10730_v0 }
 0x316   : > { %v1232_v1 = vpop.f32.mrf.mxu0 }
 0x317   : > { %v1233_v2 = vadd.f32 %v10730_v0, %v1232_v1  ;;  %v13917_v9 = vpack.c.bf16 %v1241_v7, %v1241_v7 }
 0x318   : > { %v11343_v3 = vpop.f32.mrf.mxu0 }
 0x319   : > { %v13909_v4 = vpack.c.bf16 %v1233_v2, %v1233_v2  ;;  %v1244_v10 = vadd.f32 %v11343_v3, %v10730_v0 }
 0x31a   : > { %v1235_v5 = vpop.f32.mrf.mxu0 }
 0x31b   : > { %v1236_v6 = vadd.f32 %v10730_v0, %v1235_v5  ;;  %1256 = vrot.lane.b32.xlu0 %v13909_v4, %s13448_s10  ;;  %v13921_v11 = vpack.c.bf16 %v1244_v10, %v1244_v10 }
 0x31d   : > { %v13913_v8 = vpack.c.bf16 %v1236_v6, %v1236_v6 }
 0x31f   : > { %1306 = vrot.lane.b32.xlu1 %v13913_v8, %s13448_s10 }
 0x323   : > { %1355 = vrot.lane.b32.xlu1 %v13917_v9, %s13448_s10 }
 0x327   : > { %1404 = vrot.lane.b32.xlu1 %v13921_v11, %s13448_s10 }
 0x38d   : > { %v1257_v12 = vpop.permute.xlu0 %1256 }
 0x38e   : > { %v1263_v13 = vsel %vm1258_vm2, %v1257_v12, 0 }
 0x38f   : > { %11345 = vmatpush3.bf16.xpose.msra.mxu1 %v1263_v13 }
 0x390   : > { %11356 = vmatprep.subr.bf16.mxu1 %v13446_v62 }
 0x391   : > { %v1307_v14 = vpop.permute.xlu1 %1306 }
 0x392   : > { %v1312_v15 = vsel %vm1258_vm2, %v1307_v14, 0 }
 0x393   : > { %11351 = vmatpush3.bf16.xpose.msra.mxu0 %v1312_v15 }
 0x394   : > { %11362 = vmatprep.subr.bf16.mxu0 %v13446_v62 }
 0x395   : > { %v1356_v16 = vpop.permute.xlu1 %1355 }
 0x396   : > { %v1361_v17 = vsel %vm1258_vm2, %v1356_v16, 0  ;;  %11347 = vmatmul.mubr.msk.bf16.vlgmr.msra.gmra.mxu1 %vm1258_vm2, %v13909_v4 }
 0x397   : > { %11357 = vmatpush3.bf16.xpose.msra.mxu1 %v1361_v17  ;;  %11358 = vmatprep.mubr.msk.bf16.mxu1 %vm13447_vm1, %v13446_v62 }
 0x398   : > { %11368 = vmatprep.subr.bf16.mxu1 %v13446_v62 }
 0x399   : > { %v1405_v18 = vpop.permute.xlu1 %1404 }
 0x39a   : > { %v1410_v19 = vsel %vm1258_vm2, %v1405_v18, 0  ;;  %11353 = vmatmul.mubr.msk.bf16.vlgmr.msra.gmra.mxu0 %vm1258_vm2, %v13913_v8 }
 0x39b   : > { %11363 = vmatpush3.bf16.xpose.msra.mxu0 %v1410_v19  ;;  %11364 = vmatprep.mubr.msk.bf16.mxu0 %vm13447_vm1, %v13446_v62 }
 0x39c   : > { %11374 = vmatprep.subr.bf16.mxu0 %v13446_v62 }
 0x39e   : > { %11359 = vmatmul.mubr.msk.bf16.vlgmr.msra.gmra.mxu1 %vm1258_vm2, %v13917_v9 }
 0x39f   : > { %11370 = vmatprep.mubr.msk.bf16.mxu1 %vm13447_vm1, %v13446_v62 }
 0x3a2   : > { %11365 = vmatmul.mubr.msk.bf16.vlgmr.msra.gmra.mxu0 %vm1258_vm2, %v13921_v11 }
 0x3a3   : > { %11376 = vmatprep.mubr.msk.bf16.mxu0 %vm13447_vm1, %v13446_v62 }
 0x456   : > { %v1299_v28 = vpop.f32.mrf.mxu1 }
 0x457   : > { %v1300_v29 = vadd.f32 %v1299_v28, %v13958_v27 }
 0x458   : > { %v11348_v31 = vpop.f32.mrf.mxu1 }
 0x459   : > { %v1452_v33 = vsel %vm1258_vm2, %v1300_v29, -inf }
 0x45a   : > { %v1348_v34 = vpop.f32.mrf.mxu0  ;;  %1453 = vmax.xlane.f32.xlu0 %v1452_v33  ;;  %v1302_v35 = vpop.f32.mrf.mxu1 }
 0x45b   : > { %v1349_v36 = vadd.f32 %v1348_v34, %v13965_v32 }
 0x45c   : > { %v11349_v37 = vpop.f32.mrf.mxu1  ;;  %v11354_v38 = vpop.f32.mrf.mxu0 }
 0x45d   : > { %v1455_v40 = vsel %vm1258_vm2, %v1349_v36, -inf }
 0x45e   : > { %1456 = vmax.xlane.f32.xlu1 %v1455_v40  ;;  %v1351_v41 = vpop.f32.mrf.mxu0  ;;  %v1397_v42 = vpop.f32.mrf.mxu1 }
 0x45f   : > { %v1398_v43 = vadd.f32 %v1397_v42, %v13973_v39 }
 0x460   : > { %v11355_v44 = vpop.f32.mrf.mxu0  ;;  %v11360_v45 = vpop.f32.mrf.mxu1 }
 0x461   : > { %v1458_v47 = vsel %vm1258_vm2, %v1398_v43, -inf }
 0x462   : > { %v1446_v48 = vpop.f32.mrf.mxu0  ;;  %1459 = vmax.xlane.f32.xlu0 %v1458_v47  ;;  %v1400_v49 = vpop.f32.mrf.mxu1 }
 0x463   : > { %v1447_v50 = vadd.f32 %v1446_v48, %v13980_v46 }
 0x464   : > { %v11361_v51 = vpop.f32.mrf.mxu1  ;;  %v11366_v52 = vpop.f32.mrf.mxu0 }
 0x465   : > { %v1461_v53 = vsel %vm1258_vm2, %v1447_v50, -inf }
 0x466   : > { %v1449_v54 = vpop.f32.mrf.mxu0  ;;  %1462 = vmax.xlane.f32.xlu0 %v1461_v53 }
 0x468   : > { %v11367_v55 = vpop.f32.mrf.mxu0 }
 0x46f   : > { %1549 = vrot.lane.b32.xlu1 %v13913_v8, %s13450_s6 }
 0x473   : > { %1597 = vrot.lane.b32.xlu1 %v13917_v9, %s13450_s6 }
 0x477   : > { %1645 = vrot.lane.b32.xlu1 %v13921_v11, %s13450_s6 }
 0x4e3   : > { %v1454_v56 = vpop.xlane.xlu0 %1453 }
 0x4e4   : > { %v1464_v57 = vsub.f32 %v1300_v29, %v1454_v56 }
 0x4e6   : > { %v1468_v58 = vmul.f32 1.442695, %v1464_v57 }
 0x4e7   : > { %v1457_v59 = vpop.xlane.xlu1 %1456 }
 0x4e8   : > { %12568 = vpow2.f32 %v1468_v58  ;;  %v1465_v60 = vsub.f32 %v1349_v36, %v1457_v59 }
 0x4ea   : > { %v1470_v61 = vmul.f32 1.442695, %v1465_v60 }
 0x4eb   : > { %v1550_v63 = vpop.permute.xlu1 %1549  ;;  %v1460_v6 = vpop.xlane.xlu0 %1459 }
 0x4ec   : > { %12570 = vpow2.f32 %v1470_v61  ;;  %v1555_v0 = vsel %vm1505_vm12, %v1550_v63, 0  ;;  %v1466_v7 = vsub.f32 %v1398_v43, %v1460_v6 }
 0x4ed   : > { %11375 = vmatpush3.bf16.msra.mxu0 %v1555_v0 }
 0x4ee   : > { %11386 = vmatprep.subr.bf16.mxu0 %v13446_v62  ;;  %v1472_v12 = vmul.f32 1.442695, %v1466_v7 }
 0x4ef   : > { %v1463_v10 = vpop.xlane.xlu0 %1462  ;;  %v1598_v19 = vpop.permute.xlu1 %1597 }
 0x4f0   : > { %v1467_v13 = vsub.f32 %v1447_v50, %v1463_v10  ;;  %12572 = vpow2.f32 %v1472_v12  ;;  %v1603_v33 = vsel %vm1505_vm12, %v1598_v19, 0 }
 0x4f2   : > { %v1474_v14 = vmul.f32 1.442695, %v1467_v13 }
 0x4f3   : > { %v1646_v20 = vpop.permute.xlu1 %1645 }
 0x4f4   : > { %12574 = vpow2.f32 %v1474_v14  ;;  %v1651_v36 = vsel %vm1505_vm12, %v1646_v20, 0 }
 0x4f5   : > { %v12569_v1 = vpop.eup %12568 }
 0x4f6   : > { %v1476_v2 = vsel %vm1258_vm2, %v12569_v1, 0.0 }
 0x4f7   : > { %1477 = vadd.xlane.f32.xlu0 %v1476_v2 }
 0x4f9   : > { %v12571_v3 = vpop.eup %12570 }
 0x4fa   : > { %v1479_v5 = vsel %vm1258_vm2, %v12571_v3, 0.0 }
 0x4fb   : > { %1480 = vadd.xlane.f32.xlu1 %v1479_v5 }
 0x4fd   : > { %v12573_v15 = vpop.eup %12572 }
 0x4fe   : > { %v1482_v16 = vsel %vm1258_vm2, %v12573_v15, 0.0 }
 0x501   : > { %v12575_v17 = vpop.eup %12574 }
 0x502   : > { %v1485_v18 = vsel %vm1258_vm2, %v12575_v17, 0.0 }
 0x50c   : > { %1747 = vrot.lane.b32.xlu1 %v13913_v8, %s13451_s4 }
 0x50d   : > { %1500 = vrot.lane.b32.xlu0 %v13909_v4, %s13450_s6 }
 0x52c   : > { %1483 = vadd.xlane.f32.xlu0 %v1482_v16 }
 0x530   : > { %1486 = vadd.xlane.f32.xlu1 %v1485_v18 }
 0x541   : > { %1745 = vrot.lane.b32.xlu1 %v13913_v8, %s13452_s13 }
 0x542   : > { %1697 = vrot.lane.b32.xlu0 %v13909_v4, %s13451_s4 }
 0x545   : > { %1847 = vrot.lane.b32.xlu1 %v13921_v11, %s13451_s4 }
 0x546   : > { %1695 = vrot.lane.b32.xlu0 %v13909_v4, %s13452_s13 }
 0x549   : > { %1845 = vrot.lane.b32.xlu1 %v13921_v11, %s13452_s13 }
 0x54a   : > { %1797 = vrot.lane.b32.xlu0 %v13917_v9, %s13451_s4 }
 0x54e   : > { %1795 = vrot.lane.b32.xlu0 %v13917_v9, %s13452_s13 }
 0x580   : > { %v1478_v22 = vpop.xlane.xlu0 %1477 }
 0x581   : > { %12576 = vrcp.f32 %v1478_v22 }
 0x584   : > { %v1481_v23 = vpop.xlane.xlu1 %1480  ;;  %v1501_v24 = vpop.permute.xlu0 %1500 }
 0x585   : > { %12578 = vrcp.f32 %v1481_v23  ;;  %v1507_v25 = vsel %vm1505_vm12, %v1501_v24, 0 }
 0x586   : > { %11369 = vmatpush3.bf16.msra.mxu1 %v1507_v25 }
 0x587   : > { %11380 = vmatprep.subr.bf16.mxu1 %v13446_v62 }
 0x588   : > { %v1748_v37 = vpop.permute.xlu1 %1747 }
 0x589   : > { %v1753_v52 = vsel %vm1258_vm2, %v1748_v37, 0 }
 0x58e   : > { %v12577_v28 = vpop.eup %12576 }
 0x58f   : > { %v1489_v29 = vmul.f32 %v12577_v28, %v12569_v1 }
 0x591   : > { %v1496_v30 = vpack.c.bf16 %v1489_v29, %v1489_v29 }
 0x592   : > { %v12579_v31 = vpop.eup %12578 }
 0x593   : > { %11371 = vmatmul.mubr.msk.bf16.vlgmr.msra.gmra.mxu1 %vm1258_vm2, %v1496_v30  ;;  %v1491_v34 = vmul.f32 %v12579_v31, %v12571_v3 }
 0x594   : > { %11381 = vmatpush3.bf16.msra.mxu1 %v1603_v33  ;;  %11382 = vmatprep.mubr.msk.bf16.mxu1 %vm13447_vm1, %v13446_v62 }
 0x595   : > { %v1497_v35 = vpack.c.bf16 %v1491_v34, %v1491_v34  ;;  %11392 = vmatprep.subr.bf16.mxu1 %v13446_v62 }
 0x597   : > { %11377 = vmatmul.mubr.msk.bf16.vlgmr.msra.gmra.mxu0 %vm1258_vm2, %v1497_v35 }
 0x598   : > { %11387 = vmatpush3.bf16.msra.mxu0 %v1651_v36  ;;  %11388 = vmatprep.mubr.msk.bf16.mxu0 %vm13447_vm1, %v13446_v62 }
 0x599   : > { %11398 = vmatprep.subr.bf16.mxu0 %v13446_v62 }
 0x5b5   : > { %v1484_v38 = vpop.xlane.xlu0 %1483 }
 0x5b6   : > { %12580 = vrcp.f32 %v1484_v38 }
 0x5b9   : > { %v1487_v40 = vpop.xlane.xlu1 %1486  ;;  %v1698_v41 = vpop.permute.xlu0 %1697 }
 0x5ba   : > { %12582 = vrcp.f32 %v1487_v40  ;;  %v1703_v48 = vsel %vm1258_vm2, %v1698_v41, 0 }
 0x5bd   : > { %v1696_v47 = vpop.permute.xlu0 %1695  ;;  %v1746_v51 = vpop.permute.xlu1 %1745 }
 0x5c1   : > { %v1798_v53 = vpop.permute.xlu0 %1797  ;;  %v1848_v55 = vpop.permute.xlu1 %1847 }
 0x5c2   : > { %v1803_v54 = vsel %vm1258_vm2, %v1798_v53, 0  ;;  %v1853_v56 = vsel %vm1258_vm2, %v1848_v55, 0 }
 0x5c3   : > { %v12581_v42 = vpop.eup %12580 }
 0x5c4   : > { %v1493_v43 = vmul.f32 %v12581_v42, %v12573_v15 }
 0x5c5   : > { %v1796_v57 = vpop.permute.xlu0 %1795  ;;  %v1846_v58 = vpop.permute.xlu1 %1845 }
 0x5c6   : > { %v1498_v44 = vpack.c.bf16 %v1493_v43, %v1493_v43 }
 0x5c7   : > { %v12583_v45 = vpop.eup %12582 }
 0x5c8   : > { %11383 = vmatmul.mubr.msk.bf16.vlgmr.msra.gmra.mxu1 %vm1258_vm2, %v1498_v44  ;;  %v1495_v49 = vmul.f32 %v12583_v45, %v12575_v17 }
 0x5c9   : > { %11393 = vmatpush3.bf16.xpose.msra.mxu1 %v1703_v48  ;;  %11394 = vmatprep.mubr.msk.bf16.mxu1 %vm13447_vm1, %v13446_v62 }
 0x5ca   : > { %v1499_v50 = vpack.c.bf16 %v1495_v49, %v1495_v49  ;;  %11404 = vmatprep.subr.bf16.mxu1 %v13446_v62 }
 0x5cc   : > { %11389 = vmatmul.mubr.msk.bf16.vlgmr.msra.gmra.mxu0 %vm1258_vm2, %v1499_v50 }
 0x5cd   : > { %11399 = vmatpush3.bf16.xpose.msra.mxu0 %v1753_v52  ;;  %11400 = vmatprep.mubr.msk.bf16.mxu0 %vm13447_vm1, %v13446_v62 }
 0x5ce   : > { %11410 = vmatprep.subr.bf16.mxu0 %v13446_v62 }
 0x5d0   : > { %11395 = vmatmul.mubr.msk.bf16.vlgmr.msra.gmra.mxu1 %vm1258_vm2, %v1696_v47 }
 0x5d1   : > { %11405 = vmatpush3.bf16.xpose.msra.mxu1 %v1803_v54  ;;  %11406 = vmatprep.mubr.msk.bf16.mxu1 %vm13447_vm1, %v13446_v62 }
 0x5d2   : > { %11416 = vmatprep.subr.bf16.mxu1 %v13446_v62 }
 0x5d4   : > { %11401 = vmatmul.mubr.msk.bf16.vlgmr.msra.gmra.mxu0 %vm1258_vm2, %v1746_v51 }
 0x5d5   : > { %11411 = vmatpush3.bf16.xpose.msra.mxu0 %v1853_v56  ;;  %11412 = vmatprep.mubr.msk.bf16.mxu0 %vm13447_vm1, %v13446_v62 }
 0x5d6   : > { %11422 = vmatprep.subr.bf16.mxu0 %v13446_v62 }
 0x5d8   : > { %11407 = vmatmul.mubr.msk.bf16.vlgmr.msra.gmra.mxu1 %vm1258_vm2, %v1796_v57 }
 0x5d9   : > { %11418 = vmatprep.mubr.msk.bf16.mxu1 %vm13447_vm1, %v13446_v62 }
 0x5dc   : > { %11413 = vmatmul.mubr.msk.bf16.vlgmr.msra.gmra.mxu0 %vm1258_vm2, %v1846_v58 }
 0x5dd   : > { %11424 = vmatprep.mubr.msk.bf16.mxu0 %vm13447_vm1, %v13446_v62 }
 0x653   : > { %v14053_v59 = vpop.f32.mrf.mxu1 }
 0x655   : > { %v11372_v60 = vpop.f32.mrf.mxu1 }
 0x657   : > { %v1546_v61 = vpop.f32.mrf.mxu1  ;;  %v14055_v63 = vpop.f32.mrf.mxu0 }
 0x658   : > { %v1693_v0 = vpack.c.bf16 %v14055_v63, %v14053_v59 }
 0x659   : > { %v11373_v1 = vpop.f32.mrf.mxu1  ;;  %v11378_v2 = vpop.f32.mrf.mxu0 }
 0x65b   : > { %v1594_v3 = vpop.f32.mrf.mxu0 }
 0x65d   : > { %v11379_v5 = vpop.f32.mrf.mxu0 }
 0x688   : > { %v14059_v6 = vpop.f32.mrf.mxu1 }
 0x68a   : > { %v11384_v7 = vpop.f32.mrf.mxu1 }
 0x68c   : > { %v1642_v10 = vpop.f32.mrf.mxu1  ;;  %v14061_v12 = vpop.f32.mrf.mxu0 }
 0x68d   : > { %v1694_v13 = vpack.c.bf16 %v14061_v12, %v14059_v6 }
 0x68e   : > { %v11385_v14 = vpop.f32.mrf.mxu1  ;;  %v11390_v15 = vpop.f32.mrf.mxu0 }
 0x690   : > { %v1690_v16 = vpop.f32.mrf.mxu0  ;;  %v1739_v17 = vpop.f32.mrf.mxu1 }
 0x691   : > { %v1740_v18 = vadd.f32 %v1739_v17, %v13958_v27 }
 0x692   : > { %v11391_v19 = vpop.f32.mrf.mxu0  ;;  %v11396_v20 = vpop.f32.mrf.mxu1 }
 0x693   : > { %v1895_v22 = vsel %vm1258_vm2, %v1740_v18, -inf }
 0x694   : > { %v1789_v23 = vpop.f32.mrf.mxu0  ;;  %1896 = vmax.xlane.f32.xlu0 %v1895_v22  ;;  %v1742_v24 = vpop.f32.mrf.mxu1 }
 0x695   : > { %v1790_v25 = vadd.f32 %v1789_v23, %v13965_v32 }
 0x696   : > { %v11397_v28 = vpop.f32.mrf.mxu1  ;;  %v11402_v29 = vpop.f32.mrf.mxu0 }
 0x697   : > { %v1898_v30 = vsel %vm1258_vm2, %v1790_v25, -inf }
 0x698   : > { %1899 = vmax.xlane.f32.xlu1 %v1898_v30  ;;  %v1792_v31 = vpop.f32.mrf.mxu0  ;;  %v1839_v33 = vpop.f32.mrf.mxu1 }
 0x699   : > { %v1840_v34 = vadd.f32 %v1839_v33, %v13973_v39 }
 0x69a   : > { %v11403_v35 = vpop.f32.mrf.mxu0  ;;  %v11408_v36 = vpop.f32.mrf.mxu1 }
 0x69b   : > { %v1901_v37 = vsel %vm1258_vm2, %v1840_v34, -inf }
 0x69c   : > { %v1889_v38 = vpop.f32.mrf.mxu0  ;;  %1902 = vmax.xlane.f32.xlu0 %v1901_v37  ;;  %v1842_v40 = vpop.f32.mrf.mxu1 }
 0x69d   : > { %v1890_v41 = vadd.f32 %v1889_v38, %v13980_v46  ;;  %v1247_v40 = vld [vmem:[#allocation19] sm:$0xf] }
 0x69e   : > { %v11409_v42 = vpop.f32.mrf.mxu1  ;;  %v11414_v43 = vpop.f32.mrf.mxu0 }
 0x69f   : > { %v1904_v44 = vsel %vm1258_vm2, %v1890_v41, -inf }
 0x6a0   : > { %v1892_v45 = vpop.f32.mrf.mxu0  ;;  %1905 = vmax.xlane.f32.xlu0 %v1904_v44 }
 0x6a1   : > { %v2202_v45 = vsel %vm1505_vm12, %v1247_v40, 0 }
 0x6a2   : > { %v11415_v47 = vpop.f32.mrf.mxu0 }
 0x71d   : > { %v1897_v48 = vpop.xlane.xlu0 %1896 }
 0x71e   : > { %v1907_v49 = vsub.f32 %v1740_v18, %v1897_v48 }
 0x720   : > { %v1911_v50 = vmul.f32 1.442695, %v1907_v49 }
 0x721   : > { %v1900_v51 = vpop.xlane.xlu1 %1899 }
 0x722   : > { %12584 = vpow2.f32 %v1911_v50  ;;  %v1908_v52 = vsub.f32 %v1790_v25, %v1900_v51 }
 0x724   : > { %v1913_v53 = vmul.f32 1.442695, %v1908_v52 }
 0x725   : > { %v1903_v54 = vpop.xlane.xlu0 %1902 }
 0x726   : > { %12586 = vpow2.f32 %v1913_v53  ;;  %v1909_v55 = vsub.f32 %v1840_v34, %v1903_v54 }
 0x728   : > { %v1915_v56 = vmul.f32 1.442695, %v1909_v55 }
 0x729   : > { %v1906_v3 = vpop.xlane.xlu0 %1905 }
 0x72a   : > { %12588 = vpow2.f32 %v1915_v56  ;;  %v1910_v5 = vsub.f32 %v1890_v41, %v1906_v3 }
 0x72c   : > { %v1917_v7 = vmul.f32 1.442695, %v1910_v5 }
 0x72e   : > { %12590 = vpow2.f32 %v1917_v7 }
 0x72f   : > { %v12585_v57 = vpop.eup %12584 }
 0x730   : > { %v1919_v58 = vsel %vm1258_vm2, %v12585_v57, 0.0 }
 0x731   : > { %1920 = vadd.xlane.f32.xlu0 %v1919_v58 }
 0x733   : > { %v12587_v60 = vpop.eup %12586 }
 0x734   : > { %v1922_v61 = vsel %vm1258_vm2, %v12587_v60, 0.0 }
 0x735   : > { %1923 = vadd.xlane.f32.xlu1 %v1922_v61 }
 0x737   : > { %v12589_v1 = vpop.eup %12588 }
 0x738   : > { %v1925_v2 = vsel %vm1258_vm2, %v12589_v1, 0.0 }
 0x739   : > { %1926 = vadd.xlane.f32.xlu0 %v1925_v2 }
 0x73b   : > { %v12591_v10 = vpop.eup %12590 }
 0x73c   : > { %v1928_v14 = vsel %vm1258_vm2, %v12591_v10, 0.0 }
 0x746   : > { %1991 = vrot.lane.b32.xlu1 %v13913_v8, %s13453_s0 }
 0x74a   : > { %2039 = vrot.lane.b32.xlu1 %v13917_v9, %s13453_s0 }
 0x74f   : > { %1943 = vrot.lane.b32.xlu0 %v13909_v4, %s13453_s0 }
 0x753   : > { %2255 = vrot.lane.b32.xlu0 %v13909_v4, %s13454_s7 }
 0x757   : > { %2253 = vrot.lane.b32.xlu0 %v13909_v4, %s13455_s8 }
 0x75b   : > { %2355 = vrot.lane.b32.xlu0 %v13917_v9, %s13454_s7 }
 0x75f   : > { %2353 = vrot.lane.b32.xlu0 %v13917_v9, %s13455_s8 }
 0x76e   : > { %1929 = vadd.xlane.f32.xlu1 %v1928_v14 }
 0x77f   : > { %2087 = vrot.lane.b32.xlu1 %v13921_v11, %s13453_s0 }
 0x783   : > { %2305 = vrot.lane.b32.xlu1 %v13913_v8, %s13454_s7 }
 0x787   : > { %2303 = vrot.lane.b32.xlu1 %v13913_v8, %s13455_s8 }
 0x78b   : > { %2405 = vrot.lane.b32.xlu1 %v13921_v11, %s13454_s7 }
 0x78f   : > { %2403 = vrot.lane.b32.xlu1 %v13921_v11, %s13455_s8 }
 0x7ba   : > { %v1921_v15 = vpop.xlane.xlu0 %1920 }
 0x7bb   : > { %12592 = vrcp.f32 %v1921_v15 }
 0x7be   : > { %v1924_v16 = vpop.xlane.xlu1 %1923 }
 0x7bf   : > { %12594 = vrcp.f32 %v1924_v16 }
 0x7c2   : > { %v1992_v17 = vpop.permute.xlu1 %1991  ;;  %v1927_v18 = vpop.xlane.xlu0 %1926 }
 0x7c3   : > { %v1997_v19 = vsel %vm1505_vm12, %v1992_v17, 0  ;;  %12596 = vrcp.f32 %v1927_v18 }
 0x7c4   : > { %11423 = vmatpush3.bf16.msra.mxu0 %v1997_v19 }
 0x7c5   : > { %11434 = vmatprep.subr.bf16.mxu0 %v13446_v62 }
 0x7c6   : > { %v1944_v20 = vpop.permute.xlu0 %1943  ;;  %v2040_v25 = vpop.permute.xlu1 %2039 }
 0x7c7   : > { %v1949_v22 = vsel %vm1505_vm12, %v1944_v20, 0  ;;  %v2045_v30 = vsel %vm1505_vm12, %v2040_v25, 0 }
 0x7c8   : > { %v12593_v23 = vpop.eup %12592  ;;  %11417 = vmatpush3.bf16.msra.mxu1 %v1949_v22 }
 0x7c9   : > { %11428 = vmatprep.subr.bf16.mxu1 %v13446_v62  ;;  %v1932_v24 = vmul.f32 %v12593_v23, %v12585_v57 }
 0x7ca   : > { %v2256_v2 = vpop.permute.xlu0 %2255 }
 0x7cb   : > { %v1939_v28 = vpack.c.bf16 %v1932_v24, %v1932_v24  ;;  %v2261_v14 = vsel %vm1258_vm2, %v2256_v2, 0 }
 0x7cc   : > { %v12595_v29 = vpop.eup %12594 }
 0x7cd   : > { %11419 = vmatmul.mubr.msk.bf16.vlgmr.msra.gmra.mxu1 %vm1258_vm2, %v1939_v28  ;;  %v1934_v31 = vmul.f32 %v12595_v29, %v12587_v60 }
 0x7ce   : > { %11429 = vmatpush3.bf16.msra.mxu1 %v2045_v30  ;;  %11430 = vmatprep.mubr.msk.bf16.mxu1 %vm13447_vm1, %v13446_v62  ;;  %v2254_v7 = vpop.permute.xlu0 %2253 }
 0x7cf   : > { %v1940_v33 = vpack.c.bf16 %v1934_v31, %v1934_v31 }
 0x7d0   : > { %v12597_v34 = vpop.eup %12596 }
 0x7d1   : > { %11425 = vmatmul.mubr.msk.bf16.vlgmr.msra.gmra.mxu0 %vm1258_vm2, %v1940_v33  ;;  %v1936_v35 = vmul.f32 %v12597_v34, %v12589_v1 }
 0x7d2   : > { %11436 = vmatprep.mubr.msk.bf16.mxu0 %vm13447_vm1, %v13446_v62  ;;  %v2356_v17 = vpop.permute.xlu0 %2355 }
 0x7d3   : > { %v1941_v36 = vpack.c.bf16 %v1936_v35, %v1936_v35  ;;  %v2361_v20 = vsel %vm1258_vm2, %v2356_v17, 0 }
 0x7d5   : > { %11431 = vmatmul.mubr.msk.bf16.vlgmr.msra.gmra.mxu1 %vm1258_vm2, %v1941_v36 }
 0x7d6   : > { %v2354_v28 = vpop.permute.xlu0 %2353 }
 0x7f7   : > { %v1930_v37 = vpop.xlane.xlu1 %1929 }
 0x7f8   : > { %12598 = vrcp.f32 %v1930_v37 }
 0x7fb   : > { %v2088_v38 = vpop.permute.xlu1 %2087 }
 0x7fc   : > { %v2093_v41 = vsel %vm1505_vm12, %v2088_v38, 0 }
 0x7fd   : > { %11435 = vmatpush3.bf16.msra.mxu0 %v2093_v41 }
 0x7fe   : > { %12297 = vmatprep.subr.msk.bf16.mxu0 %vm1505_vm12, %v1247_v40 }
 0x7ff   : > { %v2306_v47 = vpop.permute.xlu1 %2305 }
 0x800   : > { %v2311_v49 = vsel %vm1258_vm2, %v2306_v47, 0 }
 0x803   : > { %v2304_v48 = vpop.permute.xlu1 %2303 }
 0x805   : > { %v12599_v42 = vpop.eup %12598 }
 0x806   : > { %v1938_v43 = vmul.f32 %v12599_v42, %v12591_v10 }
 0x807   : > { %v2406_v59 = vpop.permute.xlu1 %2405 }
 0x808   : > { %v1942_v44 = vpack.c.bf16 %v1938_v43, %v1938_v43  ;;  %v2411_v63 = vsel %vm1258_vm2, %v2406_v59, 0 }
 0x80a   : > { %11437 = vmatmul.mubr.msk.bf16.vlgmr.msra.gmra.mxu0 %vm1258_vm2, %v1942_v44 }
 0x80b   : > { %11448 = vmatprep.mubr.msk.bf16.mxu0 %vm1258_vm2, %v1693_v0  ;;  %11447 = vmatpush3.bf16.msra.mxu0 %v2202_v45  ;;  %v1248_v0 = vld [vmem:[#allocation19 + $0x4] sm:$0xf]  ;;  %v2404_v12 = vpop.permute.xlu1 %2403 }
 0x80c   : > { %11458 = vmatprep.subr.bf16.mxu0 %v13446_v62  ;;  %12296 = vmatprep.subr.msk.bf16.mxu1 %vm1505_vm12, %v1248_v0  ;;  %v2144_v6 = vsel %vm1505_vm12, %v1248_v0, 0 }
 0x80d   : > { %11441 = vmatpush3.bf16.msra.mxu1 %v2144_v6 }
 0x80e   : > { %11452 = vmatprep.subr.bf16.mxu1 %v13446_v62 }
 0x812   : > { %11449 = vmatmul.mubr.msk.bf16.vlgmr.msra.gmra.mxu0 %vm1258_vm2, %v1694_v13 }
 0x813   : > { %11459 = vmatpush3.bf16.xpose.msra.mxu0 %v2311_v49  ;;  %11460 = vmatprep.mubr.msk.bf16.mxu0 %vm13447_vm1, %v13446_v62 }
 0x814   : > { %11470 = vmatprep.subr.bf16.mxu0 %v13446_v62 }
 0x81a   : > { %11461 = vmatmul.mubr.msk.bf16.vlgmr.msra.gmra.mxu0 %vm1258_vm2, %v2304_v48 }
 0x81b   : > { %11471 = vmatpush3.bf16.xpose.msra.mxu0 %v2411_v63  ;;  %11472 = vmatprep.mubr.msk.bf16.mxu0 %vm13447_vm1, %v13446_v62 }
 0x81c   : > { %11482 = vmatprep.subr.bf16.mxu0 %v13446_v62 }
 0x822   : > { %11473 = vmatmul.mubr.msk.bf16.vlgmr.msra.gmra.mxu0 %vm1258_vm2, %v2404_v12 }
 0x823   : > { %11484 = vmatprep.mubr.msk.bf16.mxu0 %vm13447_vm1, %v13446_v62 }
 0x88d   : > { %v1985_v13 = vpop.f32.mrf.mxu1 }
 0x88f   : > { %v11420_v50 = vpop.f32.mrf.mxu1 }
 0x891   : > { %v1988_v51 = vpop.f32.mrf.mxu1  ;;  %v2033_v52 = vpop.f32.mrf.mxu0 }
 0x892   : > { %v2135_v53 = vpack.c.bf16 %v2033_v52, %v1985_v13 }
 0x893   : > { %v11421_v54 = vpop.f32.mrf.mxu1  ;;  %v11426_v55 = vpop.f32.mrf.mxu0 }
 0x894   : > { %11442 = vmatprep.mubr.msk.bf16.mxu1 %vm1258_vm2, %v2135_v53 }
 0x895   : > { %v2036_v56 = vpop.f32.mrf.mxu0  ;;  %v2081_v57 = vpop.f32.mrf.mxu1 }
 0x897   : > { %v11427_v58 = vpop.f32.mrf.mxu0  ;;  %v11432_v60 = vpop.f32.mrf.mxu1 }
 0x899   : > { %v2084_v61 = vpop.f32.mrf.mxu1 }
 0x89b   : > { %v11433_v1 = vpop.f32.mrf.mxu1 }
 0x8ca   : > { %v2129_v3 = vpop.f32.mrf.mxu0 }
 0x8cb   : > { %v2136_v5 = vpack.c.bf16 %v2129_v3, %v2081_v57 }
 0x8cc   : > { %v11438_v10 = vpop.f32.mrf.mxu0 }
 0x8cd   : > { %11443 = vmatmul.mubr.msk.bf16.vlgmr.msra.gmra.mxu1 %vm1258_vm2, %v2136_v5 }
 0x8ce   : > { %11453 = vmatpush3.bf16.xpose.msra.mxu1 %v2261_v14  ;;  %v2132_v15 = vpop.f32.mrf.mxu0  ;;  %11454 = vmatprep.mubr.msk.bf16.mxu1 %vm13447_vm1, %v13446_v62 }
 0x8cf   : > { %11464 = vmatprep.subr.bf16.mxu1 %v13446_v62 }
 0x8d0   : > { %v11439_v16 = vpop.f32.mrf.mxu0 }
 0x8d2   : > { %v14147_v18 = vpop.f32.mrf.mxu0 }
 0x8d4   : > { %v14149_v19 = vpop.f32.mrf.mxu0 }
 0x8d5   : > { %11455 = vmatmul.mubr.msk.bf16.vlgmr.msra.gmra.mxu1 %vm1258_vm2, %v2254_v7 }
 0x8d6   : > { %11465 = vmatpush3.bf16.xpose.msra.mxu1 %v2361_v20  ;;  %v14153_v22 = vpop.f32.mrf.mxu0  ;;  %11466 = vmatprep.mubr.msk.bf16.mxu1 %vm13447_vm1, %v13446_v62 }
 0x8d7   : > { %11476 = vmatprep.subr.bf16.mxu1 %v13446_v62 }
 0x8d8   : > { %v14158_v23 = vpop.f32.mrf.mxu0 }
 0x8da   : > { %v2347_v24 = vpop.f32.mrf.mxu0 }
 0x8db   : > { %v2348_v25 = vadd.f32 %v2347_v24, %v13965_v32 }
 0x8dc   : > { %v11462_v29 = vpop.f32.mrf.mxu0 }
 0x8dd   : > { %11467 = vmatmul.mubr.msk.bf16.vlgmr.msra.gmra.mxu1 %vm1258_vm2, %v2354_v28  ;;  %v2456_v30 = vsel %vm1258_vm2, %v2348_v25, -inf }
 0x8de   : > { %2457 = vmax.xlane.f32.xlu1 %v2456_v30  ;;  %v2350_v31 = vpop.f32.mrf.mxu0  ;;  %11478 = vmatprep.mubr.msk.bf16.mxu1 %vm13447_vm1, %v13446_v62 }
 0x8e0   : > { %v11463_v33 = vpop.f32.mrf.mxu0 }
 0x8e2   : > { %v2447_v34 = vpop.f32.mrf.mxu0 }
 0x8e3   : > { %v2448_v52 = vadd.f32 %v2447_v34, %v13980_v46 }
 0x8e4   : > { %v11474_v35 = vpop.f32.mrf.mxu0 }
 0x8e5   : > { %v2462_v56 = vsel %vm1258_vm2, %v2448_v52, -inf }
 0x8e6   : > { %v2450_v36 = vpop.f32.mrf.mxu0 }
 0x8e8   : > { %v11475_v37 = vpop.f32.mrf.mxu0 }
 0x967   : > { %v2458_v38 = vpop.xlane.xlu1 %2457 }
 0x968   : > { %v2466_v40 = vsub.f32 %v2348_v25, %v2458_v38 }
 0x96a   : > { %v2471_v41 = vmul.f32 1.442695, %v2466_v40 }
 0x96c   : > { %12600 = vpow2.f32 %v2471_v41 }
 0x979   : > { %v14165_v42 = vpop.eup %12600 }
 0x97a   : > { %v2480_v43 = vsel %vm1258_vm2, %v14165_v42, 0.0 }
 0x97b   : > { %2481 = vadd.xlane.f32.xlu1 %v2480_v43 }
 0x98d   : > { %v14169_v44 = vpop.f32.mrf.mxu1 }
 0x98f   : > { %v14171_v45 = vpop.f32.mrf.mxu1 }
 0x991   : > { %v14173_v47 = vpop.f32.mrf.mxu1 }
 0x993   : > { %v14175_v48 = vpop.f32.mrf.mxu1 }
 0x995   : > { %v2297_v49 = vpop.f32.mrf.mxu1 }
 0x996   : > { %v2298_v59 = vadd.f32 %v2297_v49, %v13958_v27 }
 0x997   : > { %v11456_v63 = vpop.f32.mrf.mxu1 }
 0x998   : > { %v2453_v0 = vsel %vm1258_vm2, %v2298_v59, -inf }
 0x999   : > { %2454 = vmax.xlane.f32.xlu0 %v2453_v0  ;;  %v2300_v6 = vpop.f32.mrf.mxu1 }
 0x99b   : > { %v11457_v12 = vpop.f32.mrf.mxu1 }
 0x99d   : > { %v2397_v13 = vpop.f32.mrf.mxu1 }
 0x99e   : > { %v2398_v50 = vadd.f32 %v2397_v13, %v13973_v39 }
 0x99f   : > { %v11468_v51 = vpop.f32.mrf.mxu1 }
 0x9a0   : > { %v2459_v53 = vsel %vm1258_vm2, %v2398_v50, -inf }
 0x9a1   : > { %2460 = vmax.xlane.f32.xlu0 %v2459_v53  ;;  %v2400_v54 = vpop.f32.mrf.mxu1 }
 0x9a3   : > { %v11469_v55 = vpop.f32.mrf.mxu1 }
 0x9a5   : > { %2463 = vmax.xlane.f32.xlu0 %v2462_v56 }
 0xa04   : > { %v2482_v24 = vpop.xlane.xlu1 %2481 }
 0xa22   : > { %v2455_v57 = vpop.xlane.xlu0 %2454 }
 0xa23   : > { %v2465_v58 = vsub.f32 %v2298_v59, %v2455_v57  ;;  %v1249_v57 = vld [vmem:[#allocation19 + $0x8] sm:$0xf] }
 0xa25   : > { %v2469_v60 = vmul.f32 1.442695, %v2465_v58  ;;  %v2702_v58 = vsel %vm1505_vm12, %v1249_v57, 0 }
 0xa27   : > { %12602 = vpow2.f32 %v2469_v60 }
 0xa2a   : > { %v2461_v61 = vpop.xlane.xlu0 %2460 }
 0xa2b   : > { %v2467_v1 = vsub.f32 %v2398_v50, %v2461_v61 }
 0xa2d   : > { %v2473_v2 = vmul.f32 1.442695, %v2467_v1 }
 0xa2e   : > { %v2464_v3 = vpop.xlane.xlu0 %2463 }
 0xa2f   : > { %12604 = vpow2.f32 %v2473_v2  ;;  %v2468_v5 = vsub.f32 %v2448_v52, %v2464_v3 }
 0xa31   : > { %v2475_v7 = vmul.f32 1.442695, %v2468_v5 }
 0xa33   : > { %12606 = vpow2.f32 %v2475_v7 }
 0xa34   : > { %v12603_v10 = vpop.eup %12602  ;;  %12608 = vrcp.f32 %v2482_v24 }
 0xa35   : > { %v2477_v14 = vsel %vm1258_vm2, %v12603_v10, 0.0 }
 0xa36   : > { %2478 = vadd.xlane.f32.xlu0 %v2477_v14 }
 0xa3c   : > { %v12605_v15 = vpop.eup %12604 }
 0xa3d   : > { %v2483_v16 = vsel %vm1258_vm2, %v12605_v15, 0.0 }
 0xa3e   : > { %2484 = vadd.xlane.f32.xlu0 %v2483_v16 }
 0xa40   : > { %v12607_v17 = vpop.eup %12606 }
 0xa41   : > { %v2486_v20 = vsel %vm1258_vm2, %v12607_v17, 0.0  ;;  %v12609_v29 = vpop.eup %12608 }
 0xa42   : > { %2487 = vadd.xlane.f32.xlu1 %v2486_v20  ;;  %v2492_v36 = vmul.f32 %v12609_v29, %v14165_v42 }
 0xa44   : > { %v2498_v41 = vpack.c.bf16 %v2492_v36, %v2492_v36 }
 0xa53   : > { %2549 = vrot.lane.b32.xlu1 %v13913_v8, %s15652_s3 }
 0xa54   : > { %2501 = vrot.lane.b32.xlu0 %v13909_v4, %s15652_s3 }
 0xa57   : > { %2597 = vrot.lane.b32.xlu1 %v13917_v9, %s15652_s3 }
 0xa58   : > { %2759 = vrot.lane.b32.xlu0 %v13909_v4, %s13457_s9 }
 0xa5b   : > { %2645 = vrot.lane.b32.xlu1 %v13921_v11, %s15652_s3 }
 0xa5c   : > { %2757 = vrot.lane.b32.xlu0 %v13909_v4, %s13458_s23 }
 0xa5f   : > { %2809 = vrot.lane.b32.xlu1 %v13913_v8, %s13457_s9 }
 0xa60   : > { %2859 = vrot.lane.b32.xlu0 %v13917_v9, %s13457_s9 }
 0xa63   : > { %2807 = vrot.lane.b32.xlu1 %v13913_v8, %s13458_s23 }
 0xa64   : > { %2857 = vrot.lane.b32.xlu0 %v13917_v9, %s13458_s23 }
 0xa67   : > { %2909 = vrot.lane.b32.xlu1 %v13921_v11, %s13457_s9 }
 0xa6b   : > { %2907 = vrot.lane.b32.xlu1 %v13921_v11, %s13458_s23 }
 0xabf   : > { %v2479_v25 = vpop.xlane.xlu0 %2478 }
 0xac0   : > { %12610 = vrcp.f32 %v2479_v25 }
 0xac7   : > { %v2485_v28 = vpop.xlane.xlu0 %2484 }
 0xac8   : > { %12612 = vrcp.f32 %v2485_v28 }
 0xacb   : > { %v2488_v30 = vpop.xlane.xlu1 %2487  ;;  %v2502_v31 = vpop.permute.xlu0 %2501 }
 0xacc   : > { %12614 = vrcp.f32 %v2488_v30  ;;  %v2507_v33 = vsel %vm1505_vm12, %v2502_v31, 0 }
 0xacd   : > { %v12611_v34 = vpop.eup %12610  ;;  %11477 = vmatpush3.bf16.msra.mxu1 %v2507_v33 }
 0xace   : > { %v2490_v35 = vmul.f32 %v12611_v34, %v12603_v10  ;;  %11488 = vmatprep.subr.bf16.mxu1 %v13446_v62 }
 0xacf   : > { %v2550_v37 = vpop.permute.xlu1 %2549  ;;  %v2760_v63 = vpop.permute.xlu0 %2759 }
 0xad0   : > { %v2555_v38 = vsel %vm1505_vm12, %v2550_v37, 0  ;;  %v2497_v40 = vpack.c.bf16 %v2490_v35, %v2490_v35  ;;  %v2765_v53 = vsel %vm1258_vm2, %v2760_v63, 0 }
 0xad1   : > { %11483 = vmatpush3.bf16.msra.mxu0 %v2555_v38 }
 0xad2   : > { %11479 = vmatmul.mubr.msk.bf16.vlgmr.msra.gmra.mxu1 %vm1258_vm2, %v2497_v40  ;;  %11494 = vmatprep.subr.bf16.mxu0 %v13446_v62 }
 0xad3   : > { %v2598_v43 = vpop.permute.xlu1 %2597  ;;  %11490 = vmatprep.mubr.msk.bf16.mxu1 %vm13447_vm1, %v13446_v62  ;;  %v2758_v52 = vpop.permute.xlu0 %2757 }
 0xad4   : > { %v2603_v49 = vsel %vm1505_vm12, %v2598_v43, 0  ;;  %11485 = vmatmul.mubr.msk.bf16.vlgmr.msra.gmra.mxu0 %vm1258_vm2, %v2498_v41 }
 0xad5   : > { %v12613_v42 = vpop.eup %12612  ;;  %11489 = vmatpush3.bf16.msra.mxu1 %v2603_v49  ;;  %11496 = vmatprep.mubr.msk.bf16.mxu0 %vm13447_vm1, %v13446_v62 }
 0xad6   : > { %v2494_v59 = vmul.f32 %v12613_v42, %v12605_v15  ;;  %12298 = vmatprep.subr.msk.bf16.mxu1 %vm1505_vm12, %v1249_v57 }
 0xad7   : > { %v2646_v0 = vpop.permute.xlu1 %2645  ;;  %v2860_v54 = vpop.permute.xlu0 %2859 }
 0xad8   : > { %v2651_v6 = vsel %vm1505_vm12, %v2646_v0, 0  ;;  %v2499_v12 = vpack.c.bf16 %v2494_v59, %v2494_v59  ;;  %v2865_v55 = vsel %vm1258_vm2, %v2860_v54, 0 }
 0xad9   : > { %v12615_v13 = vpop.eup %12614  ;;  %11495 = vmatpush3.bf16.msra.mxu0 %v2651_v6 }
 0xada   : > { %11491 = vmatmul.mubr.msk.bf16.vlgmr.msra.gmra.mxu1 %vm1258_vm2, %v2499_v12  ;;  %11506 = vmatprep.subr.bf16.mxu0 %v13446_v62  ;;  %v2496_v50 = vmul.f32 %v12615_v13, %v12607_v17 }
 0xadb   : > { %v2858_v56 = vpop.permute.xlu0 %2857  ;;  %11501 = vmatpush3.bf16.msra.mxu1 %v2702_v58  ;;  %v2810_v14 = vpop.permute.xlu1 %2809  ;;  %v2250_v58 = vadd.f32 %v14153_v22, %v14173_v47 }
 0xadc   : > { %v2500_v51 = vpack.c.bf16 %v2496_v50, %v2496_v50  ;;  %11512 = vmatprep.subr.bf16.mxu1 %v13446_v62  ;;  %v2815_v31 = vsel %vm1258_vm2, %v2810_v14, 0 }
 0xade   : > { %11497 = vmatmul.mubr.msk.bf16.vlgmr.msra.gmra.mxu0 %vm1258_vm2, %v2500_v51  ;;  %v2247_v51 = vadd.f32 %v14147_v18, %v14169_v44 }
 0xadf   : > { %11507 = vmatpush3.bf16.xpose.msra.mxu0 %v2765_v53  ;;  %11508 = vmatprep.mubr.msk.bf16.mxu0 %vm13447_vm1, %v13446_v62  ;;  %v2808_v25 = vpop.permute.xlu1 %2807 }
 0xae0   : > { %11518 = vmatprep.subr.bf16.mxu0 %v13446_v62 }
 0xae3   : > { %v2910_v35 = vpop.permute.xlu1 %2909 }
 0xae4   : > { %v2915_v40 = vsel %vm1258_vm2, %v2910_v35, 0 }
 0xae6   : > { %11509 = vmatmul.mubr.msk.bf16.vlgmr.msra.gmra.mxu0 %vm1258_vm2, %v2758_v52 }
 0xae7   : > { %11519 = vmatpush3.bf16.xpose.msra.mxu0 %v2865_v55  ;;  %11520 = vmatprep.mubr.msk.bf16.mxu0 %vm13447_vm1, %v13446_v62  ;;  %v2908_v63 = vpop.permute.xlu1 %2907  ;;  %v2239_v55 = vadd.f32 %v14149_v19, %v14171_v45 }
 0xae8   : > { %11530 = vmatprep.subr.bf16.mxu0 %v13446_v62 }
 0xaee   : > { %11521 = vmatmul.mubr.msk.bf16.vlgmr.msra.gmra.mxu0 %vm1258_vm2, %v2858_v56 }
 0xaef   : > { %11532 = vmatprep.mubr.msk.bf16.mxu0 %vm13447_vm1, %v13446_v62 }
 0xb92   : > { %v2543_v60 = vpop.f32.mrf.mxu1 }
 0xb94   : > { %v11480_v61 = vpop.f32.mrf.mxu1  ;;  %v2591_v1 = vpop.f32.mrf.mxu0 }
 0xb95   : > { %v2693_v2 = vpack.c.bf16 %v2591_v1, %v2543_v60 }
 0xb96   : > { %v2546_v3 = vpop.f32.mrf.mxu1  ;;  %v11486_v5 = vpop.f32.mrf.mxu0 }
 0xb97   : > { %11502 = vmatprep.mubr.msk.bf16.mxu1 %vm1258_vm2, %v2693_v2 }
 0xb98   : > { %v11481_v7 = vpop.f32.mrf.mxu1  ;;  %v2594_v10 = vpop.f32.mrf.mxu0 }
 0xb9a   : > { %v11487_v15 = vpop.f32.mrf.mxu0  ;;  %v2639_v16 = vpop.f32.mrf.mxu1 }
 0xb9c   : > { %v11492_v17 = vpop.f32.mrf.mxu1 }
 0xb9e   : > { %v2642_v20 = vpop.f32.mrf.mxu1  ;;  %v2687_v24 = vpop.f32.mrf.mxu0 }
 0xb9f   : > { %v2694_v28 = vpack.c.bf16 %v2687_v24, %v2639_v16 }
 0xba0   : > { %v11493_v29 = vpop.f32.mrf.mxu1  ;;  %v11498_v30 = vpop.f32.mrf.mxu0 }
 0xba1   : > { %11503 = vmatmul.mubr.msk.bf16.vlgmr.msra.gmra.mxu1 %vm1258_vm2, %v2694_v28 }
 0xba2   : > { %11513 = vmatpush3.bf16.xpose.msra.mxu1 %v2815_v31  ;;  %v2690_v33 = vpop.f32.mrf.mxu0  ;;  %11514 = vmatprep.mubr.msk.bf16.mxu1 %vm13447_vm1, %v13446_v62 }
 0xba3   : > { %11524 = vmatprep.subr.bf16.mxu1 %v13446_v62 }
 0xba4   : > { %v11499_v34 = vpop.f32.mrf.mxu0 }
 0xba6   : > { %v2801_v36 = vpop.f32.mrf.mxu0 }
 0xba7   : > { %v2802_v37 = vadd.f32 %v2801_v36, %v13958_v27 }
 0xba8   : > { %v11510_v38 = vpop.f32.mrf.mxu0 }
 0xba9   : > { %11515 = vmatmul.mubr.msk.bf16.vlgmr.msra.gmra.mxu1 %vm1258_vm2, %v2808_v25  ;;  %v2957_v41 = vsel %vm1258_vm2, %v2802_v37, -inf }
 0xbaa   : > { %11525 = vmatpush3.bf16.xpose.msra.mxu1 %v2915_v40  ;;  %2958 = vmax.xlane.f32.xlu0 %v2957_v41  ;;  %v2804_v43 = vpop.f32.mrf.mxu0 }
 0xbab   : > { %11526 = vmatprep.mubr.msk.bf16.mxu1 %vm13447_vm1, %v13446_v62  ;;  %11536 = vmatprep.subr.bf16.mxu1 %v13446_v62 }
 0xbac   : > { %v11511_v49 = vpop.f32.mrf.mxu0 }
 0xbae   : > { %v2901_v42 = vpop.f32.mrf.mxu0 }
 0xbaf   : > { %v2902_v59 = vadd.f32 %v2901_v42, %v13973_v39 }
 0xbb0   : > { %v11522_v0 = vpop.f32.mrf.mxu0 }
 0xbb1   : > { %11527 = vmatmul.mubr.msk.bf16.vlgmr.msra.gmra.mxu1 %vm1258_vm2, %v2908_v63  ;;  %v2963_v6 = vsel %vm1258_vm2, %v2902_v59, -inf }
 0xbb2   : > { %2964 = vmax.xlane.f32.xlu0 %v2963_v6  ;;  %v2904_v12 = vpop.f32.mrf.mxu0  ;;  %11538 = vmatprep.mubr.msk.bf16.mxu1 %vm13447_vm1, %v13446_v62 }
 0xbb4   : > { %v11523_v13 = vpop.f32.mrf.mxu0 }
 0xc33   : > { %v2959_v50 = vpop.xlane.xlu0 %2958 }
 0xc34   : > { %v2969_v52 = vsub.f32 %v2802_v37, %v2959_v50 }
 0xc36   : > { %v2973_v60 = vmul.f32 1.442695, %v2969_v52 }
 0xc38   : > { %12616 = vpow2.f32 %v2973_v60 }
 0xc3b   : > { %v2965_v53 = vpop.xlane.xlu0 %2964 }
 0xc3c   : > { %v2971_v61 = vsub.f32 %v2902_v59, %v2965_v53 }
 0xc3e   : > { %v2977_v44 = vmul.f32 1.442695, %v2971_v61 }
 0xc40   : > { %12618 = vpow2.f32 %v2977_v44 }
 0xc45   : > { %v12617_v17 = vpop.eup %12616 }
 0xc46   : > { %v2981_v25 = vsel %vm1258_vm2, %v12617_v17, 0.0 }
 0xc4d   : > { %v12619_v28 = vpop.eup %12618 }
 0xc4e   : > { %v2987_v29 = vsel %vm1258_vm2, %v12619_v28, 0.0 }
 0xc61   : > { %v11504_v54 = vpop.f32.mrf.mxu1 }
 0xc62   : > { %v14263_v56 = vadd.f32 %v11504_v54, %v2247_v51 }
 0xc63   : > { %v2738_v57 = vpop.f32.mrf.mxu1 }
 0xc64   : > { %v14267_v1 = vadd.f32 %v2738_v57, %v2239_v55 }
 0xc65   : > { %v11505_v2 = vpop.f32.mrf.mxu1 }
 0xc66   : > { %v14269_v3 = vadd.f32 %v11505_v2, %v2250_v58 }
 0xc67   : > { %v14271_v18 = vpop.f32.mrf.mxu1 }
 0xc69   : > { %v2851_v5 = vpop.f32.mrf.mxu1 }
 0xc6a   : > { %v2852_v19 = vadd.f32 %v2851_v5, %v13965_v32 }
 0xc6b   : > { %v11516_v45 = vpop.f32.mrf.mxu1 }
 0xc6c   : > { %v2960_v7 = vsel %vm1258_vm2, %v2852_v19, -inf }
 0xc6d   : > { %2961 = vmax.xlane.f32.xlu1 %v2960_v7  ;;  %v2854_v22 = vpop.f32.mrf.mxu1 }
 0xc6f   : > { %v11517_v47 = vpop.f32.mrf.mxu1 }
 0xc71   : > { %v2951_v10 = vpop.f32.mrf.mxu1 }
 0xc72   : > { %v2952_v14 = vadd.f32 %v2951_v10, %v13980_v46 }
 0xc73   : > { %v11528_v15 = vpop.f32.mrf.mxu1 }
 0xc74   : > { %v2966_v16 = vsel %vm1258_vm2, %v2952_v14, -inf }
 0xc75   : > { %2967 = vmax.xlane.f32.xlu0 %v2966_v16  ;;  %v2954_v20 = vpop.f32.mrf.mxu1 }
 0xc77   : > { %v11529_v24 = vpop.f32.mrf.mxu1 }
 0xc79   : > { %2982 = vadd.xlane.f32.xlu0 %v2981_v25 }
 0xc7d   : > { %2988 = vadd.xlane.f32.xlu0 %v2987_v29 }
 0xc7e   : > { %3053 = vrot.lane.b32.xlu1 %v13913_v8, %s15650_s29 }
 0xc82   : > { %3101 = vrot.lane.b32.xlu1 %v13917_v9, %s15650_s29 }
 0xc93   : > { %3005 = vrot.lane.b32.xlu0 %v13909_v4, %s15650_s29 }
 0xcf6   : > { %v2962_v30 = vpop.xlane.xlu1 %2961 }
 0xcf7   : > { %v2970_v31 = vsub.f32 %v2852_v19, %v2962_v30 }
 0xcf9   : > { %v2975_v33 = vmul.f32 1.442695, %v2970_v31 }
 0xcfa   : > { %v3054_v34 = vpop.permute.xlu1 %3053 }
 0xcfb   : > { %12620 = vpow2.f32 %v2975_v33  ;;  %v3059_v35 = vsel %vm1505_vm12, %v3054_v34, 0 }
 0xcfc   : > { %11537 = vmatpush3.bf16.msra.mxu1 %v3059_v35 }
 0xcfd   : > { %11548 = vmatprep.subr.bf16.mxu1 %v13446_v62 }
 0xcfe   : > { %v2968_v36 = vpop.xlane.xlu0 %2967  ;;  %v3102_v0 = vpop.permute.xlu1 %3101 }
 0xcff   : > { %v2972_v37 = vsub.f32 %v2952_v14, %v2968_v36  ;;  %v3107_v13 = vsel %vm1505_vm12, %v3102_v0, 0  ;;  %v1250_v14 = vld [vmem:[#allocation19 + $0xc] sm:$0xf] }
 0xd00   : > { %v3206_v15 = vsel %vm1505_vm12, %v1250_v14, 0 }
 0xd01   : > { %v2979_v38 = vmul.f32 1.442695, %v2972_v37  ;;  %v2242_v37 = vadd.f32 %v14158_v23, %v14175_v48  ;;  %v12890_v23 = vld [vmem:[%s13887_s28 + $0x18] sm:$0xff] }
 0xd02   : > { %v2983_v8 = vpop.xlane.xlu0 %2982 }
 0xd03   : > { %12622 = vpow2.f32 %v2979_v38 }
 0xd04   : > { %12624 = vrcp.f32 %v2983_v8 }
 0xd06   : > { %v2989_v9 = vpop.xlane.xlu0 %2988 }
 0xd07   : > { %12626 = vrcp.f32 %v2989_v9  ;;  %v2754_v9 = vadd.f32 %v14271_v18, %v2242_v37 }
 0xd08   : > { %v12621_v40 = vpop.eup %12620 }
 0xd09   : > { %v2984_v4 = vsel %vm1258_vm2, %v12621_v40, 0.0 }
 0xd0a   : > { %2985 = vadd.xlane.f32.xlu1 %v2984_v4  ;;  %v3006_v41 = vpop.permute.xlu0 %3005 }
 0xd0b   : > { %v3011_v43 = vsel %vm1505_vm12, %v3006_v41, 0  ;;  %v12889_v41 = vld [vmem:[%s13887_s28] sm:$0xff] }
 0xd0c   : > { %11531 = vmatpush3.bf16.msra.mxu0 %v3011_v43 }
 0xd0d   : > { %11542 = vmatprep.subr.bf16.mxu0 %v13446_v62 }
 0xd10   : > { %v12623_v49 = vpop.eup %12622 }
 0xd11   : > { %v12625_v42 = vpop.eup %12624  ;;  %v2990_v59 = vsel %vm1258_vm2, %v12623_v49, 0.0 }
 0xd12   : > { %2991 = vadd.xlane.f32.xlu1 %v2990_v59  ;;  %v2994_v63 = vmul.f32 %v12625_v42, %v12617_v17  ;;  %v10775_v42 = vld [vmem:[#allocation20] ss:$0 sm:$0xff] }
 0xd14   : > { %v3001_v6 = vpack.c.bf16 %v2994_v63, %v2994_v63  ;;  %v12627_v12 = vpop.eup %12626 }
 0xd15   : > { %v2998_v50 = vmul.f32 %v12627_v12, %v12619_v28 }
 0xd16   : > { %11533 = vmatmul.mubr.msk.bf16.vlgmr.msra.gmra.mxu0 %vm1258_vm2, %v3001_v6  ;;  %v12891_v6 = vld [vmem:[%s13887_s28 + $0x8] sm:$0xff] }
 0xd17   : > { %11543 = vmatpush3.bf16.msra.mxu0 %v3107_v13  ;;  %11544 = vmatprep.mubr.msk.bf16.mxu0 %vm13447_vm1, %v13446_v62  ;;  %v3003_v51 = vpack.c.bf16 %v2998_v50, %v2998_v50 }
 0xd18   : > { %12299 = vmatprep.subr.msk.bf16.mxu0 %vm1505_vm12, %v1250_v14 }
 0xd1e   : > { %11545 = vmatmul.mubr.msk.bf16.vlgmr.msra.gmra.mxu0 %vm1258_vm2, %v3003_v51 }
 0xd1f   : > { %11555 = vmatpush3.bf16.msra.mxu0 %v3206_v15 }
 0xd20   : > { %11568 = vmatprep.subr.bf16.mxu0 %v13446_v62 }
 0xd23   : > { %3149 = vrot.lane.b32.xlu1 %v13921_v11, %s15650_s29  ;;  %s15709_s29 = sld [smem:[#allocation51_spill]] }
 0xd93   : > { %v2986_v52 = vpop.xlane.xlu1 %2985 }
 0xd94   : > { %12628 = vrcp.f32 %v2986_v52 }
 0xd9b   : > { %v2992_v53 = vpop.xlane.xlu1 %2991 }
 0xd9c   : > { %12630 = vrcp.f32 %v2992_v53 }
 0xd9f   : > { %v3150_v57 = vpop.permute.xlu1 %3149 }
 0xda0   : > { %v3155_v60 = vsel %vm1505_vm12, %v3150_v57, 0 }
 0xda1   : > { %v12629_v54 = vpop.eup %12628 }
 0xda2   : > { %v2996_v55 = vmul.f32 %v12629_v54, %v12621_v40  ;;  %v12888_v40 = vld [vmem:[%s13887_s28 + $0x10] sm:$0xff]  ;;  %s10984_s28 = sshll.u32 %s13881_s2, 4  ;;  %s1058_s2 = sld [smem:[#allocation3 + %s13635_s12]] }
 0xda3   : > { %s1050_s3 = scalar_lea.vmem %s15709_s29, %s10984_s28 }
 0xda4   : > { %v3002_v58 = vpack.c.bf16 %v2996_v55, %v2996_v55 }
 0xda6   : > { %11539 = vmatmul.mubr.msk.bf16.vlgmr.msra.gmra.mxu1 %vm1258_vm2, %v3002_v58 }
 0xda7   : > { %11549 = vmatpush3.bf16.msra.mxu1 %v3155_v60  ;;  %11550 = vmatprep.mubr.msk.bf16.mxu1 %vm13447_vm1, %v13446_v62 }
 0xda9   : > { %v12631_v61 = vpop.eup %12630 }
 0xdaa   : > { %v3000_v2 = vmul.f32 %v12631_v61, %v12623_v49 }
 0xdac   : > { %v3004_v44 = vpack.c.bf16 %v3000_v2, %v3000_v2 }
 0xdae   : > { %11551 = vmatmul.mubr.msk.bf16.vlgmr.msra.gmra.mxu1 %vm1258_vm2, %v3004_v44 }
 0xdd6   : > { %v3047_v11 = vpop.f32.mrf.mxu0 }
 0xdd8   : > { %v11534_v5 = vpop.f32.mrf.mxu0 }
 0xdda   : > { %v3050_v19 = vpop.f32.mrf.mxu0 }
 0xddc   : > { %v11535_v45 = vpop.f32.mrf.mxu0 }
 0xdde   : > { %v3143_v7 = vpop.f32.mrf.mxu0 }
 0xde0   : > { %v11546_v22 = vpop.f32.mrf.mxu0 }
 0xde2   : > { %v3146_v47 = vpop.f32.mrf.mxu0 }
 0xde4   : > { %v11547_v10 = vpop.f32.mrf.mxu0 }
 0xe66   : > { %v3095_v16 = vpop.f32.mrf.mxu1 }
 0xe67   : > { %v3197_v17 = vpack.c.bf16 %v3095_v16, %v3047_v11  ;;  %v12536_v16 = vld [vmem:[#allocation25 + $0x8] sm:$0xff]  }
 0xe68   : > { %v11540_v20 = vpop.f32.mrf.mxu1 }
 0xe69   : > { %11556 = vmatprep.mubr.msk.bf16.mxu0 %vm1258_vm2, %v3197_v17  ;;  %v1056_v17 = vld [vmem:[%s1050_s3] sm:$0xff]  ;;  %v1057_v20 = vld [vmem:[%s1050_s3 + $0x8] sm:$0xff]  ;;  %s15714_s3 = sld [smem:[#allocation63_spill]] }
 0xe6a   : > { %v3098_v24 = vpop.f32.mrf.mxu1 }
 0xe6b   : > { %v12537_v24 = vld [vmem:[#allocation25] sm:$0xff]  }
 0xe6c   : > { %v11541_v25 = vpop.f32.mrf.mxu1 }
 0xe6d   : > { %v14349_v25 = vpack.c.bf16 %v1057_v20, %v1056_v17 }
 0xe6e   : > { %v3191_v28 = vpop.f32.mrf.mxu1 }
 0xe6f   : > { %v3198_v29 = vpack.c.bf16 %v3191_v28, %v3143_v7  ;;  %v12538_v28 = vld [vmem:[#allocation22 + $0x8] sm:$0xff]  }
 0xe70   : > { %v11552_v30 = vpop.f32.mrf.mxu1  ;;  %11560 = vmatprep.subr.bf16.mxu1 %v12538_v28 }
 0xe71   : > { %11557 = vmatmul.mubr.msk.bf16.vlgmr.msra.gmra.mxu0 %vm1258_vm2, %v3198_v29  ;;  %v12539_v29 = vld [vmem:[#allocation22] sm:$0xff]   ;;  %11561 = vmatpush3.bf16.msra.mxu1 %v12538_v28 }
 0xe72   : > { %v3194_v31 = vpop.f32.mrf.mxu1  ;;  %11572 = vmatprep.mubr.msk.bf16.mxu0 %vm13447_vm1, %v13446_v62  ;;  %11569 = vmatpush3.bf16.msra.mxu0 %v12536_v16 }
 0xe73   : > { %11570 = vmatprep.subr.bf16.mxu0 %v13446_v62  ;;  %11562 = vmatprep.subr.bf16.mxu1 %v12539_v29 }
 0xe74   : > { %v11553_v33 = vpop.f32.mrf.mxu1 }
 0xe75   : > { %11563 = vmatpush3.bf16.msra.mxu1 %v12539_v29 }
 0xe76   : > { %11571 = vmatpush3.bf16.msra.mxu0 %v12537_v24  ;;  %11576 = vmatprep.subr.bf16.mxu1 %v13446_v62 }
 0xe77   : > { %11582 = vmatprep.subr.bf16.mxu0 %v13446_v62 }
 0xe79   : > { %11573 = vmatmul.mubr.msk.bf16.vlgmr.msra.gmra.mxu0 %vm1093_vm0, %v14349_v25 }
 0xe7a   : > { %11584 = vmatprep.mubr.msk.bf16.mxu0 %vm13447_vm1, %v13446_v62 }
 0xf31   : > { %v11558_v34 = vpop.f32.mrf.mxu0 }
 0xf32   : > { %v3259_v35 = vadd.f32 %v11558_v34, %v14263_v56 }
 0xf33   : > { %v3242_v36 = vpop.f32.mrf.mxu0 }
 0xf34   : > { %v3257_v38 = vadd.f32 %v3242_v36, %v14267_v1  ;;  %v3263_v4 = vadd.f32 %v12888_v40, %v3259_v35 }
 0xf35   : > { %v11559_v8 = vpop.f32.mrf.mxu0 }
 0xf36   : > { %v3261_v43 = vadd.f32 %v12889_v41, %v3257_v38  ;;  %v3260_v49 = vadd.f32 %v11559_v8, %v14269_v3  ;;  %v14320_v0 = vadd.f32 %v10775_v42, %v3263_v4 }
 0xf37   : > { %v3245_v59 = vpop.f32.mrf.mxu0 }
 0xf38   : > { %v14318_v56 = vadd.f32 %v10775_v42, %v3261_v43  ;;  %v3258_v63 = vadd.f32 %v3245_v59, %v2754_v9  ;;  %v3264_v48 = vadd.f32 %v12890_v23, %v3260_v49  ;;  %v3284_v3 = vsel %vm1093_vm0, %v14320_v0, 0.0  ;;  %v10776_v49 = vld [vmem:[#allocation10] ss:$0 sm:$0xff] }
 0xf3a   : > { %v3262_v1 = vadd.f32 %v12891_v6, %v3258_v63  ;;  %v3278_v18 = vsel %vm1093_vm0, %v14318_v56, 0.0  ;;  %v14328_v13 = vadd.f32 %v10775_v42, %v3264_v48  ;;  %v10777_v6 = vld [vmem:[#allocation11] ss:$0 sm:$0xff] }
 0xf3b   : > { %3279 = vadd.xlane.f32.xlu0 %v3278_v18 }
 0xf3c   : > { %v14326_v12 = vadd.f32 %v10775_v42, %v3262_v1  ;;  %v3287_v51 = vsel %vm1093_vm0, %v14328_v13, 0.0 }
 0xf3e   : > { %v3281_v50 = vsel %vm1093_vm0, %v14326_v12, 0.0 }
 0xf3f   : > { %3285 = vadd.xlane.f32.xlu0 %v3284_v3  ;;  %3282 = vadd.xlane.f32.xlu1 %v3281_v50 }
 0xf43   : > { %3288 = vadd.xlane.f32.xlu0 %v3287_v51 }
 0xfc4   : > { %v3280_v52 = vpop.xlane.xlu0 %3279 }
 0xfc5   : > { %v3290_v53 = vmul.f32 0.03125, %v3280_v52 }
 0xfc7   : > { %v3294_v54 = vsub.f32 %v14318_v56, %v3290_v53 }
 0xfc8   : > { %v3286_v55 = vpop.xlane.xlu0 %3285  ;;  %v3283_v57 = vpop.xlane.xlu1 %3282 }
 0xfc9   : > { %v3292_v58 = vmul.f32 0.03125, %v3286_v55  ;;  %v3291_v60 = vmul.f32 0.03125, %v3283_v57  ;;  %v3298_v61 = vmul.f32 %v3294_v54, %v3294_v54 }
 0xfcb   : > { %v3296_v2 = vsub.f32 %v14320_v0, %v3292_v58  ;;  %v3295_v44 = vsub.f32 %v14326_v12, %v3291_v60  ;;  %v3302_v11 = vsel %vm1093_vm0, %v3298_v61, 0.0  ;;  %v10783_v60 = vld [vmem:[#allocation26] ss:$0 sm:$0xff]  ;;  %v3491_v61 = vpop.f32.mrf.mxu0 }
 0xfcc   : > { %3303 = vadd.xlane.f32.xlu0 %v3302_v11  ;;  %v3289_v5 = vpop.xlane.xlu0 %3288 }
 0xfcd   : > { %v3293_v19 = vmul.f32 0.03125, %v3289_v5  ;;  %v3300_v45 = vmul.f32 %v3296_v2, %v3296_v2  ;;  %v3299_v7 = vmul.f32 %v3295_v44, %v3295_v44 }
 0xfcf   : > { %v3297_v22 = vsub.f32 %v14328_v13, %v3293_v19  ;;  %v3308_v47 = vsel %vm1093_vm0, %v3300_v45, 0.0  ;;  %v3305_v10 = vsel %vm1093_vm0, %v3299_v7, 0.0 }
 0xfd0   : > { %3309 = vadd.xlane.f32.xlu0 %v3308_v47  ;;  %3306 = vadd.xlane.f32.xlu1 %v3305_v10  ;;  %v10778_v47 = vld [vmem:[#allocation23] ss:$0 sm:$0xff] }
 0xfd1   : > { %v3301_v14 = vmul.f32 %v3297_v22, %v3297_v22 }
 0xfd3   : > { %v3311_v15 = vsel %vm1093_vm0, %v3301_v14, 0.0 }
 0xfd4   : > { %3312 = vadd.xlane.f32.xlu1 %v3311_v15 }
0x1055   : > { %v3304_v30 = vpop.xlane.xlu0 %3303 }
0x1056   : > { %v3314_v31 = vmul.f32 0.03125, %v3304_v30 }
0x1058   : > { %v3318_v33 = vadd.f32 1e-05, %v3314_v31 }
0x1059   : > { %v3310_v34 = vpop.xlane.xlu0 %3309  ;;  %v3307_v35 = vpop.xlane.xlu1 %3306 }
0x105a   : > { %12632 = vrsqrt.f32 %v3318_v33  ;;  %v3316_v36 = vmul.f32 0.03125, %v3310_v34  ;;  %v3315_v37 = vmul.f32 0.03125, %v3307_v35  ;;  %v1061_v33 = vstv %s1058_s2  ;;  %s15711_s2 = smov %s15710_s1 }
0x105b   : > { %vm1062_vm13 = vcmp.lt.s32.totalorder %v13950_v21, %v1061_v33 }
0x105c   : > { %v3320_v38 = vadd.f32 1e-05, %v3316_v36  ;;  %v3319_v8 = vadd.f32 1e-05, %v3315_v37  ;;  %v14396_v34 = vsel %vm1062_vm13, 0.0, %v13449_v26 }
0x105d   : > { %v3313_v9 = vpop.xlane.xlu1 %3312 }
0x105e   : > { %12634 = vrsqrt.f32 %v3320_v38  ;;  %v3317_v40 = vmul.f32 0.03125, %v3313_v9 }
0x105f   : > { %12636 = vrsqrt.f32 %v3319_v8 }
0x1060   : > { %v3321_v4 = vadd.f32 1e-05, %v3317_v40 }
0x1062   : > { %12638 = vrsqrt.f32 %v3321_v4 }
0x1067   : > { %v12633_v41 = vpop.eup %12632 }
0x1068   : > { %v3326_v43 = vmul.f32 %v12633_v41, %v3294_v54 }
0x106a   : > { %v3336_v48 = vmul.f32 %v10776_v49, %v3326_v43 }
0x106b   : > { %v12635_v42 = vpop.eup %12634 }
0x106c   : > { %v12637_v59 = vpop.eup %12636  ;;  %v3328_v63 = vmul.f32 %v12635_v42, %v3296_v2  ;;  %v3346_v51 = vadd.f32 %v10777_v6, %v3336_v48  ;;  %v11574_v2 = vpop.f32.mrf.mxu0 }
0x106d   : > { %v3327_v23 = vmul.f32 %v12637_v59, %v3295_v44  ;;  %v3492_v44 = vadd.f32 %v10783_v60, %v3491_v61 }
0x106e   : > { %v3338_v50 = vmul.f32 %v10776_v49, %v3328_v63  ;;  %v3494_v11 = vpop.f32.mrf.mxu0 }
0x106f   : > { %v12639_v1 = vpop.eup %12638  ;;  %v3337_v18 = vmul.f32 %v10776_v49, %v3327_v23  ;;  %v3495_v5 = vadd.f32 %v10783_v60, %v3494_v11 }
0x1070   : > { %v3329_v3 = vmul.f32 %v12639_v1, %v3297_v22  ;;  %v3348_v57 = vadd.f32 %v10777_v6, %v3338_v50  ;;  %v11575_v19 = vpop.f32.mrf.mxu0 }
0x1071   : > { %v3347_v52 = vadd.f32 %v10777_v6, %v3337_v18  ;;  %v14361_v45 = vpack.c.bf16 %v3495_v5, %v3492_v44 }
0x1072   : > { %v3339_v53 = vmul.f32 %v10776_v49, %v3329_v3 }
0x1073   : > { %v3350_v55 = vpack.c.bf16 %v3347_v52, %v3346_v51  ;;  %v3511_v7 = vsel %vm1258_vm2, %v14361_v45, 0 }
0x1074   : > { %v3349_v58 = vadd.f32 %v10777_v6, %v3339_v53  ;;  %11583 = vmatpush3.bf16.xpose.msra.mxu0 %v3511_v7 }
0x1075   : > { %11564 = vmatprep.mubr.msk.bf16.mxu1 %vm1093_vm0, %v3350_v55  ;;  %11594 = vmatprep.subr.bf16.mxu0 %v13446_v62 }
0x1076   : > { %v3351_v54 = vpack.c.bf16 %v3349_v58, %v3348_v57 }
0x1078   : > { %11565 = vmatmul.mubr.msk.bf16.vlgmr.msra.gmra.mxu1 %vm1093_vm0, %v3351_v54 }
0x1079   : > { %11578 = vmatprep.mubr.msk.bf16.mxu1 %vm13447_vm1, %v13446_v62  ;;  %11577 = vmatpush3.bf16.xpose.msra.mxu1 %v3511_v7 }
0x107a   : > { %11588 = vmatprep.subr.bf16.mxu1 %v13446_v62 }
0x1138   : > { %v11566_v22 = vpop.f32.mrf.mxu1 }
0x1139   : > { %v3424_v24 = vadd.f32 %v11566_v22, %v10778_v47 }
0x113a   : > { %v3415_v10 = vpop.f32.mrf.mxu1 }
0x113b   : > { %v3416_v14 = vadd.f32 %v10778_v47, %v3415_v10  ;;  %v14380_v29 = vpack.c.bf16 %v3424_v24, %v3424_v24 }
0x113c   : > { %v11567_v15 = vpop.f32.mrf.mxu1 }
0x113d   : > { %v14367_v16 = vpack.c.bf16 %v3416_v14, %v3416_v14  ;;  %v3427_v30 = vadd.f32 %v11567_v15, %v10778_v47 }
0x113e   : > { %v3418_v17 = vpop.f32.mrf.mxu1 }
0x113f   : > { %v3419_v20 = vadd.f32 %v10778_v47, %v3418_v17  ;;  %11579 = vmatmul.mubr.msk.bf16.vlgmr.msra.gmra.mxu1 %vm1258_vm2, %v14367_v16  ;;  %v14387_v31 = vpack.c.bf16 %v3427_v30, %v3427_v30 }
0x1140   : > { %11589 = vmatpush3.bf16.xpose.msra.mxu1 %v3511_v7  ;;  %11590 = vmatprep.mubr.msk.bf16.mxu1 %vm13447_vm1, %v13446_v62 }
0x1141   : > { %v14373_v28 = vpack.c.bf16 %v3419_v20, %v3419_v20  ;;  %11600 = vmatprep.subr.bf16.mxu1 %v13446_v62 }
0x1143   : > { %11585 = vmatmul.mubr.msk.bf16.vlgmr.msra.gmra.mxu0 %vm1258_vm2, %v14373_v28 }
0x1144   : > { %11595 = vmatpush3.bf16.xpose.msra.mxu0 %v3511_v7  ;;  %11596 = vmatprep.mubr.msk.bf16.mxu0 %vm13447_vm1, %v13446_v62 }
0x1145   : > { %11606 = vmatprep.subr.bf16.mxu0 %v13446_v62 }
0x1147   : > { %11591 = vmatmul.mubr.msk.bf16.vlgmr.msra.gmra.mxu1 %vm1258_vm2, %v14380_v29 }
0x1148   : > { %11602 = vmatprep.mubr.msk.bf16.mxu1 %vm13447_vm1, %v13446_v62 }
0x114b   : > { %11597 = vmatmul.mubr.msk.bf16.vlgmr.msra.gmra.mxu0 %vm1258_vm2, %v14387_v31 }
0x114c   : > { %11608 = vmatprep.mubr.msk.bf16.mxu0 %vm13447_vm1, %v13446_v62 }
0x11ff   : > { %v3547_v35 = vpop.f32.mrf.mxu1 }
0x1200   : > { %v3548_v36 = vadd.f32 %v3547_v35, %v14396_v34 }
0x1201   : > { %v11580_v37 = vpop.f32.mrf.mxu1 }
0x1202   : > { %v3683_v38 = vsel %vm3682_vm14, %v3548_v36, -inf }
0x1203   : > { %v3590_v8 = vpop.f32.mrf.mxu0  ;;  %3684 = vmax.xlane.f32.xlu0 %v3683_v38  ;;  %v3550_v9 = vpop.f32.mrf.mxu1 }
0x1204   : > { %v3591_v40 = vadd.f32 %v3590_v8, %v14396_v34 }
0x1205   : > { %v11581_v4 = vpop.f32.mrf.mxu1  ;;  %v11586_v41 = vpop.f32.mrf.mxu0 }
0x1206   : > { %v3686_v43 = vsel %vm3682_vm14, %v3591_v40, -inf }
0x1207   : > { %3687 = vmax.xlane.f32.xlu1 %v3686_v43  ;;  %v3593_v21 = vpop.f32.mrf.mxu0  ;;  %v3633_v26 = vpop.f32.mrf.mxu1 }
0x1208   : > { %v3634_v49 = vadd.f32 %v3633_v26, %v14396_v34 }
0x1209   : > { %v11587_v42 = vpop.f32.mrf.mxu0  ;;  %v11592_v59 = vpop.f32.mrf.mxu1 }
0x120a   : > { %v3689_v63 = vsel %vm3682_vm14, %v3634_v49, -inf }
0x120b   : > { %v3676_v23 = vpop.f32.mrf.mxu0  ;;  %3690 = vmax.xlane.f32.xlu0 %v3689_v63  ;;  %v3636_v48 = vpop.f32.mrf.mxu1 }
0x120c   : > { %v3677_v6 = vadd.f32 %v3676_v23, %v14396_v34 }
0x120d   : > { %v11593_v1 = vpop.f32.mrf.mxu1  ;;  %v11598_v18 = vpop.f32.mrf.mxu0 }
0x120e   : > { %v3692_v3 = vsel %vm3682_vm14, %v3677_v6, -inf }
0x120f   : > { %3693 = vmax.xlane.f32.xlu1 %v3692_v3  ;;  %v3679_v50 = vpop.f32.mrf.mxu0 }
0x1211   : > { %v11599_v51 = vpop.f32.mrf.mxu0 }
0x128c   : > { %v3685_v52 = vpop.xlane.xlu0 %3684 }
0x128d   : > { %v3695_v53 = vsub.f32 %v3548_v36, %v3685_v52 }
0x128f   : > { %v3699_v55 = vmul.f32 1.442695, %v3695_v53 }
0x1290   : > { %v3688_v57 = vpop.xlane.xlu1 %3687 }
0x1291   : > { %12640 = vpow2.f32 %v3699_v55  ;;  %v3696_v58 = vsub.f32 %v3591_v40, %v3688_v57 }
0x1293   : > { %v3701_v54 = vmul.f32 1.442695, %v3696_v58 }
0x1294   : > { %v3691_v60 = vpop.xlane.xlu0 %3690 }
0x1295   : > { %12642 = vpow2.f32 %v3701_v54  ;;  %v3697_v61 = vsub.f32 %v3634_v49, %v3691_v60 }
0x1297   : > { %v3703_v2 = vmul.f32 1.442695, %v3697_v61 }
0x1298   : > { %v3694_v47 = vpop.xlane.xlu1 %3693 }
0x1299   : > { %12644 = vpow2.f32 %v3703_v2  ;;  %v3698_v10 = vsub.f32 %v3677_v6, %v3694_v47 }
0x129b   : > { %v3705_v14 = vmul.f32 1.442695, %v3698_v10 }
0x129d   : > { %12646 = vpow2.f32 %v3705_v14 }
0x129e   : > { %v12641_v44 = vpop.eup %12640 }
0x129f   : > { %v3707_v11 = vsel %vm3682_vm14, %v12641_v44, 0.0 }
0x12a0   : > { %3708 = vadd.xlane.f32.xlu0 %v3707_v11 }
0x12a2   : > { %v12643_v5 = vpop.eup %12642 }
0x12a3   : > { %v3710_v19 = vsel %vm3682_vm14, %v12643_v5, 0.0 }
0x12a4   : > { %3711 = vadd.xlane.f32.xlu1 %v3710_v19 }
0x12a6   : > { %v12645_v7 = vpop.eup %12644 }
0x12a7   : > { %v3713_v22 = vsel %vm3682_vm14, %v12645_v7, 0.0 }
0x12a8   : > { %3714 = vadd.xlane.f32.xlu0 %v3713_v22 }
0x12aa   : > { %v12647_v15 = vpop.eup %12646 }
0x12ab   : > { %v3716_v17 = vsel %vm3682_vm14, %v12647_v15, 0.0 }
0x12b5   : > { %3912 = vrot.lane.b32.xlu1 %v14361_v45, %s13452_s13 }
0x12be   : > { %3732 = vrot.lane.b32.xlu0 %v14361_v45, %s13448_s10 }
0x12c2   : > { %4007 = vrot.lane.b32.xlu0 %v14380_v29, %s13452_s13 }
0x12d9   : > { %3717 = vadd.xlane.f32.xlu1 %v3716_v17 }
0x12ea   : > { %3910 = vrot.lane.b32.xlu1 %v14367_v16, %s13452_s13 }
0x12ee   : > { %3961 = vrot.lane.b32.xlu1 %v14373_v28, %s13452_s13 }
0x12f2   : > { %4053 = vrot.lane.b32.xlu1 %v14387_v31, %s13452_s13 }
0x1329   : > { %v3709_v20 = vpop.xlane.xlu0 %3708 }
0x132a   : > { %12648 = vrcp.f32 %v3709_v20 }
0x132d   : > { %v3712_v24 = vpop.xlane.xlu1 %3711 }
0x132e   : > { %12650 = vrcp.f32 %v3712_v24 }
0x1331   : > { %v3715_v30 = vpop.xlane.xlu0 %3714  ;;  %v3913_v41 = vpop.permute.xlu1 %3912 }
0x1332   : > { %12652 = vrcp.f32 %v3715_v30  ;;  %v3918_v21 = vsel %vm1258_vm2, %v3913_v41, 0 }
0x1335   : > { %v3733_v33 = vpop.permute.xlu0 %3732 }
0x1336   : > { %11601 = vmatpush3.bf16.msra.mxu1 %v3733_v33  ;;  %11607 = vmatpush3.bf16.msra.mxu0 %v3733_v33 }
0x1337   : > { %v12649_v35 = vpop.eup %12648  ;;  %11612 = vmatprep.subr.bf16.mxu1 %v13446_v62  ;;  %11618 = vmatprep.subr.bf16.mxu0 %v13446_v62 }
0x1338   : > { %v3720_v36 = vmul.f32 %v12649_v35, %v12641_v44 }
0x1339   : > { %v4008_v42 = vpop.permute.xlu0 %4007 }
0x133a   : > { %v3727_v37 = vpack.c.bf16 %v3720_v36, %v3720_v36 }
0x133b   : > { %v12651_v38 = vpop.eup %12650 }
0x133c   : > { %11603 = vmatmul.mubr.msk.bf16.vlgmr.msra.gmra.mxu1 %vm3682_vm14, %v3727_v37  ;;  %v3722_v8 = vmul.f32 %v12651_v38, %v12643_v5 }
0x133d   : > { %11613 = vmatpush3.bf16.msra.mxu1 %v3733_v33  ;;  %11614 = vmatprep.mubr.msk.bf16.mxu1 %vm13447_vm1, %v13446_v62 }
0x133e   : > { %v3728_v9 = vpack.c.bf16 %v3722_v8, %v3722_v8  ;;  %11624 = vmatprep.subr.bf16.mxu1 %v13446_v62 }
0x133f   : > { %v12653_v40 = vpop.eup %12652 }
0x1340   : > { %11609 = vmatmul.mubr.msk.bf16.vlgmr.msra.gmra.mxu0 %vm3682_vm14, %v3728_v9  ;;  %v3724_v4 = vmul.f32 %v12653_v40, %v12645_v7 }
0x1341   : > { %11619 = vmatpush3.bf16.msra.mxu0 %v3733_v33  ;;  %11620 = vmatprep.mubr.msk.bf16.mxu0 %vm13447_vm1, %v13446_v62 }
0x1342   : > { %v3729_v43 = vpack.c.bf16 %v3724_v4, %v3724_v4  ;;  %11630 = vmatprep.subr.bf16.mxu0 %v13446_v62 }
0x1344   : > { %11615 = vmatmul.mubr.msk.bf16.vlgmr.msra.gmra.mxu1 %vm3682_vm14, %v3729_v43 }
0x1345   : > { %11625 = vmatpush3.bf16.xpose.msra.mxu1 %v3918_v21  ;;  %11626 = vmatprep.mubr.msk.bf16.mxu1 %vm13447_vm1, %v13446_v62 }
0x1346   : > { %11636 = vmatprep.subr.bf16.mxu1 %v13446_v62 }
0x1362   : > { %v3718_v26 = vpop.xlane.xlu1 %3717 }
0x1363   : > { %12654 = vrcp.f32 %v3718_v26 }
0x1366   : > { %v3911_v49 = vpop.permute.xlu1 %3910 }
0x1367   : > { %11627 = vmatmul.mubr.msk.bf16.vlgmr.msra.gmra.mxu1 %vm1258_vm2, %v3911_v49 }
0x1368   : > { %11637 = vmatpush3.bf16.xpose.msra.mxu1 %v3918_v21  ;;  %11638 = vmatprep.mubr.msk.bf16.mxu1 %vm13447_vm1, %v13446_v62 }
0x1369   : > { %11648 = vmatprep.subr.bf16.mxu1 %v13446_v62 }
0x136a   : > { %v3962_v48 = vpop.permute.xlu1 %3961 }
0x136e   : > { %v4054_v6 = vpop.permute.xlu1 %4053 }
0x136f   : > { %11639 = vmatmul.mubr.msk.bf16.vlgmr.msra.gmra.mxu1 %vm1258_vm2, %v4008_v42 }
0x1370   : > { %v12655_v59 = vpop.eup %12654  ;;  %11650 = vmatprep.mubr.msk.bf16.mxu1 %vm13447_vm1, %v13446_v62 }
0x1371   : > { %v3726_v63 = vmul.f32 %v12655_v59, %v12647_v15 }
0x1373   : > { %v3730_v23 = vpack.c.bf16 %v3726_v63, %v3726_v63 }
0x1375   : > { %11621 = vmatmul.mubr.msk.bf16.vlgmr.msra.gmra.mxu0 %vm3682_vm14, %v3730_v23 }
0x1376   : > { %11631 = vmatpush3.bf16.xpose.msra.mxu0 %v3918_v21  ;;  %11632 = vmatprep.mubr.msk.bf16.mxu0 %vm13447_vm1, %v13446_v62 }
0x1377   : > { %11642 = vmatprep.subr.bf16.mxu0 %v13446_v62 }
0x137d   : > { %11633 = vmatmul.mubr.msk.bf16.vlgmr.msra.gmra.mxu0 %vm1258_vm2, %v3962_v48 }
0x137e   : > { %11643 = vmatpush3.bf16.xpose.msra.mxu0 %v3918_v21  ;;  %11644 = vmatprep.mubr.msk.bf16.mxu0 %vm13447_vm1, %v13446_v62 }
0x137f   : > { %11654 = vmatprep.subr.bf16.mxu0 %v13446_v62 }
0x1385   : > { %11645 = vmatmul.mubr.msk.bf16.vlgmr.msra.gmra.mxu0 %vm1258_vm2, %v4054_v6 }
0x1386   : > { %11656 = vmatprep.mubr.msk.bf16.mxu0 %vm13447_vm1, %v13446_v62 }
0x13fc   : > { %v14455_v1 = vpop.f32.mrf.mxu1 }
0x13fe   : > { %v11604_v18 = vpop.f32.mrf.mxu1 }
0x1400   : > { %v3775_v3 = vpop.f32.mrf.mxu1  ;;  %v14457_v50 = vpop.f32.mrf.mxu0 }
0x1401   : > { %v3907_v51 = vpack.c.bf16 %v14457_v50, %v14455_v1 }
0x1402   : > { %v11605_v52 = vpop.f32.mrf.mxu1  ;;  %v11610_v53 = vpop.f32.mrf.mxu0 }
0x1404   : > { %v3818_v55 = vpop.f32.mrf.mxu0  ;;  %v14461_v57 = vpop.f32.mrf.mxu1 }
0x1406   : > { %v11611_v58 = vpop.f32.mrf.mxu0  ;;  %v11616_v54 = vpop.f32.mrf.mxu1 }
0x1408   : > { %v3861_v60 = vpop.f32.mrf.mxu1 }
0x140a   : > { %v11617_v61 = vpop.f32.mrf.mxu1 }
0x1427   : > { %v3954_v2 = vpop.f32.mrf.mxu1 }
0x1428   : > { %v3955_v44 = vadd.f32 %v3954_v2, %v14396_v34 }
0x1429   : > { %v11628_v11 = vpop.f32.mrf.mxu1 }
0x142a   : > { %v4098_v5 = vsel %vm3682_vm14, %v3955_v44, -inf }
0x142b   : > { %4099 = vmax.xlane.f32.xlu0 %v4098_v5  ;;  %v3957_v19 = vpop.f32.mrf.mxu1 }
0x142d   : > { %v11629_v7 = vpop.f32.mrf.mxu1 }
0x142f   : > { %v4046_v22 = vpop.f32.mrf.mxu1 }
0x1430   : > { %v4047_v47 = vadd.f32 %v4046_v22, %v14396_v34 }
0x1431   : > { %v11640_v10 = vpop.f32.mrf.mxu1 }
0x1432   : > { %v4104_v14 = vsel %vm3682_vm14, %v4047_v47, -inf }
0x1433   : > { %4105 = vmax.xlane.f32.xlu0 %v4104_v14  ;;  %v4049_v15 = vpop.f32.mrf.mxu1 }
0x1435   : > { %v14467_v17 = vpop.f32.mrf.mxu0  ;;  %v11641_v20 = vpop.f32.mrf.mxu1 }
0x1436   : > { %v3908_v24 = vpack.c.bf16 %v14467_v17, %v14461_v57 }
0x1437   : > { %v11622_v30 = vpop.f32.mrf.mxu0 }
0x1439   : > { %v3904_v33 = vpop.f32.mrf.mxu0 }
0x143b   : > { %v11623_v35 = vpop.f32.mrf.mxu0 }
0x143d   : > { %v4000_v36 = vpop.f32.mrf.mxu0 }
0x143e   : > { %v4001_v37 = vadd.f32 %v4000_v36, %v14396_v34 }
0x143f   : > { %v11634_v38 = vpop.f32.mrf.mxu0 }
0x1440   : > { %v4101_v8 = vsel %vm3682_vm14, %v4001_v37, -inf }
0x1441   : > { %4102 = vmax.xlane.f32.xlu1 %v4101_v8  ;;  %v4003_v9 = vpop.f32.mrf.mxu0 }
0x1442   : > { %v3498_v9 = vld [vmem:[%s15629_s18] sm:$0xf] }
0x1443   : > { %v11635_v40 = vpop.f32.mrf.mxu0 }
0x1445   : > { %v4092_v4 = vpop.f32.mrf.mxu0 }
0x1446   : > { %v4093_v41 = vadd.f32 %v4092_v4, %v14396_v34 }
0x1447   : > { %v11646_v43 = vpop.f32.mrf.mxu0 }
0x1448   : > { %v4107_v21 = vsel %vm3682_vm14, %v4093_v41, -inf  ;;  %v4388_v43 = vsel %vm1505_vm12, %v3498_v9, 0 }
0x1449   : > { %v4095_v26 = vpop.f32.mrf.mxu0  ;;  %4108 = vmax.xlane.f32.xlu0 %v4107_v21 }
0x144b   : > { %v11647_v49 = vpop.f32.mrf.mxu0 }
0x14b4   : > { %v4100_v42 = vpop.xlane.xlu0 %4099 }
0x14b5   : > { %v4110_v59 = vsub.f32 %v3955_v44, %v4100_v42 }
0x14b7   : > { %v4114_v63 = vmul.f32 1.442695, %v4110_v59 }
0x14b9   : > { %12656 = vpow2.f32 %v4114_v63 }
0x14bc   : > { %v4106_v23 = vpop.xlane.xlu0 %4105 }
0x14bd   : > { %v4112_v48 = vsub.f32 %v4047_v47, %v4106_v23 }
0x14bf   : > { %v4118_v6 = vmul.f32 1.442695, %v4112_v48 }
0x14c1   : > { %12658 = vpow2.f32 %v4118_v6 }
0x14c6   : > { %v12657_v18 = vpop.eup %12656 }
0x14c7   : > { %v4122_v3 = vsel %vm3682_vm14, %v12657_v18, 0.0 }
0x14c8   : > { %4123 = vadd.xlane.f32.xlu0 %v4122_v3 }
0x14ca   : > { %v4103_v52 = vpop.xlane.xlu1 %4102 }
0x14cb   : > { %v4111_v53 = vsub.f32 %v4001_v37, %v4103_v52 }
0x14cd   : > { %v4116_v55 = vmul.f32 1.442695, %v4111_v53 }
0x14ce   : > { %v12659_v58 = vpop.eup %12658 }
0x14cf   : > { %12660 = vpow2.f32 %v4116_v55  ;;  %v4128_v54 = vsel %vm3682_vm14, %v12659_v58, 0.0 }
0x14d0   : > { %4129 = vadd.xlane.f32.xlu0 %v4128_v54 }
0x14d2   : > { %v4109_v60 = vpop.xlane.xlu0 %4108 }
0x14d3   : > { %v4113_v61 = vsub.f32 %v4093_v41, %v4109_v60 }
0x14d5   : > { %v4120_v2 = vmul.f32 1.442695, %v4113_v61 }
0x14d7   : > { %12662 = vpow2.f32 %v4120_v2 }
0x14dc   : > { %v12661_v44 = vpop.eup %12660 }
0x14dd   : > { %v4125_v11 = vsel %vm3682_vm14, %v12661_v44, 0.0 }
0x14de   : > { %4126 = vadd.xlane.f32.xlu1 %v4125_v11 }
0x14e4   : > { %v12663_v5 = vpop.eup %12662 }
0x14e5   : > { %v4131_v19 = vsel %vm3682_vm14, %v12663_v5, 0.0 }
0x14e6   : > { %4146 = vrot.lane.b32.xlu0 %v14361_v45, %s13451_s4  ;;  %4132 = vadd.xlane.f32.xlu1 %v4131_v19 }
0x14ea   : > { %4534 = vrot.lane.b32.xlu0 %v14380_v29, %s13455_s8 }
0x14f7   : > { %4441 = vrot.lane.b32.xlu1 %v14361_v45, %s13455_s8 }
0x14fb   : > { %4439 = vrot.lane.b32.xlu1 %v14367_v16, %s13455_s8 }
0x14ff   : > { %4489 = vrot.lane.b32.xlu1 %v14373_v28, %s13455_s8 }
0x1503   : > { %4579 = vrot.lane.b32.xlu1 %v14387_v31, %s13455_s8 }
0x1551   : > { %v4124_v7 = vpop.xlane.xlu0 %4123 }
0x1552   : > { %12664 = vrcp.f32 %v4124_v7 }
0x1559   : > { %v4130_v22 = vpop.xlane.xlu0 %4129 }
0x155a   : > { %12666 = vrcp.f32 %v4130_v22 }
0x155d   : > { %v4147_v47 = vpop.permute.xlu0 %4146 }
0x155e   : > { %11649 = vmatpush3.bf16.msra.mxu1 %v4147_v47  ;;  %11655 = vmatpush3.bf16.msra.mxu0 %v4147_v47 }
0x155f   : > { %v12665_v10 = vpop.eup %12664  ;;  %11660 = vmatprep.subr.bf16.mxu1 %v13446_v62  ;;  %11666 = vmatprep.subr.bf16.mxu0 %v13446_v62 }
0x1560   : > { %v4135_v14 = vmul.f32 %v12665_v10, %v12657_v18 }
0x1562   : > { %v4142_v15 = vpack.c.bf16 %v4135_v14, %v4135_v14 }
0x1564   : > { %11651 = vmatmul.mubr.msk.bf16.vlgmr.msra.gmra.mxu1 %vm3682_vm14, %v4142_v15 }
0x1565   : > { %11661 = vmatpush3.bf16.msra.mxu1 %v4147_v47  ;;  %11662 = vmatprep.mubr.msk.bf16.mxu1 %vm13447_vm1, %v13446_v62 }
0x1567   : > { %v12667_v20 = vpop.eup %12666  ;;  %v4127_v30 = vpop.xlane.xlu1 %4126 }
0x1568   : > { %12668 = vrcp.f32 %v4127_v30  ;;  %v4139_v33 = vmul.f32 %v12667_v20, %v12659_v58 }
0x156a   : > { %v4144_v35 = vpack.c.bf16 %v4139_v33, %v4139_v33 }
0x156c   : > { %11663 = vmatmul.mubr.msk.bf16.vlgmr.msra.gmra.mxu1 %vm3682_vm14, %v4144_v35 }
0x156f   : > { %v4133_v36 = vpop.xlane.xlu1 %4132 }
0x1570   : > { %12670 = vrcp.f32 %v4133_v36 }
0x1573   : > { %v4442_v21 = vpop.permute.xlu1 %4441 }
0x1574   : > { %v4447_v26 = vsel %vm1258_vm2, %v4442_v21, 0 }
0x1575   : > { %v12669_v37 = vpop.eup %12668 }
0x1576   : > { %v4137_v38 = vmul.f32 %v12669_v37, %v12661_v44 }
0x1577   : > { %v4440_v49 = vpop.permute.xlu1 %4439 }
0x1578   : > { %v4143_v8 = vpack.c.bf16 %v4137_v38, %v4137_v38 }
0x157a   : > { %11657 = vmatmul.mubr.msk.bf16.vlgmr.msra.gmra.mxu0 %vm3682_vm14, %v4143_v8 }
0x157b   : > { %11667 = vmatpush3.bf16.msra.mxu0 %v4147_v47  ;;  %11668 = vmatprep.mubr.msk.bf16.mxu0 %vm13447_vm1, %v13446_v62  ;;  %v4490_v1 = vpop.permute.xlu1 %4489  ;;  %v4535_v47 = vpop.permute.xlu0 %4534 }
0x157c   : > { %12301 = vmatprep.subr.msk.bf16.mxu0 %vm1505_vm12, %v3498_v9 }
0x157d   : > { %v12671_v40 = vpop.eup %12670 }
0x157e   : > { %v4141_v4 = vmul.f32 %v12671_v40, %v12663_v5 }
0x157f   : > { %v4580_v50 = vpop.permute.xlu1 %4579 }
0x1580   : > { %v4145_v41 = vpack.c.bf16 %v4141_v4, %v4141_v4 }
0x1582   : > { %11669 = vmatmul.mubr.msk.bf16.vlgmr.msra.gmra.mxu0 %vm3682_vm14, %v4145_v41 }
0x1583   : > { %11680 = vmatprep.mubr.msk.bf16.mxu0 %vm1258_vm2, %v3907_v51  ;;  %11679 = vmatpush3.bf16.msra.mxu0 %v4388_v43  ;;  %v3499_v51 = vld [vmem:[%s15629_s18 + $0x4] sm:$0xf] }
0x1584   : > { %11690 = vmatprep.subr.bf16.mxu0 %v13446_v62  ;;  %12300 = vmatprep.subr.msk.bf16.mxu1 %vm1505_vm12, %v3499_v51  ;;  %v4330_v57 = vsel %vm1505_vm12, %v3499_v51, 0 }
0x1585   : > { %11673 = vmatpush3.bf16.msra.mxu1 %v4330_v57 }
0x1586   : > { %11684 = vmatprep.subr.bf16.mxu1 %v13446_v62 }
0x158a   : > { %11681 = vmatmul.mubr.msk.bf16.vlgmr.msra.gmra.mxu0 %vm1258_vm2, %v3908_v24 }
0x158b   : > { %11691 = vmatpush3.bf16.xpose.msra.mxu0 %v4447_v26  ;;  %11692 = vmatprep.mubr.msk.bf16.mxu0 %vm13447_vm1, %v13446_v62 }
0x158c   : > { %11702 = vmatprep.subr.bf16.mxu0 %v13446_v62 }
0x1592   : > { %11693 = vmatmul.mubr.msk.bf16.vlgmr.msra.gmra.mxu0 %vm1258_vm2, %v4490_v1 }
0x1593   : > { %11703 = vmatpush3.bf16.xpose.msra.mxu0 %v4447_v26  ;;  %11704 = vmatprep.mubr.msk.bf16.mxu0 %vm13447_vm1, %v13446_v62 }
0x1594   : > { %11714 = vmatprep.subr.bf16.mxu0 %v13446_v62 }
0x159a   : > { %11705 = vmatmul.mubr.msk.bf16.vlgmr.msra.gmra.mxu0 %vm1258_vm2, %v4580_v50 }
0x159b   : > { %11716 = vmatprep.mubr.msk.bf16.mxu0 %vm13447_vm1, %v13446_v62 }
0x1624   : > { %v4186_v17 = vpop.f32.mrf.mxu1 }
0x1626   : > { %v11652_v24 = vpop.f32.mrf.mxu1 }
0x1628   : > { %v4189_v42 = vpop.f32.mrf.mxu1 }
0x162a   : > { %v11653_v59 = vpop.f32.mrf.mxu1 }
0x162c   : > { %v4272_v63 = vpop.f32.mrf.mxu1 }
0x162e   : > { %v11664_v23 = vpop.f32.mrf.mxu1 }
0x1630   : > { %v4275_v48 = vpop.f32.mrf.mxu1 }
0x1632   : > { %v11665_v6 = vpop.f32.mrf.mxu1 }
0x163a   : > { %v4229_v18 = vpop.f32.mrf.mxu0 }
0x163b   : > { %v4321_v3 = vpack.c.bf16 %v4229_v18, %v4186_v17 }
0x163c   : > { %v11658_v52 = vpop.f32.mrf.mxu0 }
0x163d   : > { %11674 = vmatprep.mubr.msk.bf16.mxu1 %vm1258_vm2, %v4321_v3 }
0x163e   : > { %v4232_v53 = vpop.f32.mrf.mxu0 }
0x1640   : > { %v11659_v55 = vpop.f32.mrf.mxu0 }
0x1642   : > { %v4315_v58 = vpop.f32.mrf.mxu0 }
0x1643   : > { %v4322_v54 = vpack.c.bf16 %v4315_v58, %v4272_v63 }
0x1644   : > { %v11670_v60 = vpop.f32.mrf.mxu0 }
0x1645   : > { %11675 = vmatmul.mubr.msk.bf16.vlgmr.msra.gmra.mxu1 %vm1258_vm2, %v4322_v54 }
0x1646   : > { %11685 = vmatpush3.bf16.xpose.msra.mxu1 %v4447_v26  ;;  %v4318_v61 = vpop.f32.mrf.mxu0  ;;  %11686 = vmatprep.mubr.msk.bf16.mxu1 %vm13447_vm1, %v13446_v62 }
0x1647   : > { %11696 = vmatprep.subr.bf16.mxu1 %v13446_v62 }
0x1648   : > { %v11671_v2 = vpop.f32.mrf.mxu0 }
0x164a   : > { %v14537_v44 = vpop.f32.mrf.mxu0 }
0x164c   : > { %v14539_v11 = vpop.f32.mrf.mxu0 }
0x164d   : > { %11687 = vmatmul.mubr.msk.bf16.vlgmr.msra.gmra.mxu1 %vm1258_vm2, %v4440_v49 }
0x164e   : > { %11697 = vmatpush3.bf16.xpose.msra.mxu1 %v4447_v26  ;;  %v14542_v5 = vpop.f32.mrf.mxu0  ;;  %11698 = vmatprep.mubr.msk.bf16.mxu1 %vm13447_vm1, %v13446_v62 }
0x164f   : > { %11708 = vmatprep.subr.bf16.mxu1 %v13446_v62 }
0x1650   : > { %v14547_v19 = vpop.f32.mrf.mxu0 }
0x1652   : > { %v4528_v7 = vpop.f32.mrf.mxu0 }
0x1653   : > { %v4529_v22 = vadd.f32 %v4528_v7, %v14396_v34 }
0x1654   : > { %v11694_v10 = vpop.f32.mrf.mxu0 }
0x1655   : > { %11699 = vmatmul.mubr.msk.bf16.vlgmr.msra.gmra.mxu1 %vm1258_vm2, %v4535_v47  ;;  %v4627_v14 = vsel %vm3682_vm14, %v4529_v22, -inf }
0x1656   : > { %4628 = vmax.xlane.f32.xlu1 %v4627_v14  ;;  %v4531_v15 = vpop.f32.mrf.mxu0  ;;  %11710 = vmatprep.mubr.msk.bf16.mxu1 %vm13447_vm1, %v13446_v62 }
0x1658   : > { %v11695_v20 = vpop.f32.mrf.mxu0 }
0x165a   : > { %v4618_v30 = vpop.f32.mrf.mxu0 }
0x165b   : > { %v4619_v59 = vadd.f32 %v4618_v30, %v14396_v34 }
0x165c   : > { %v11706_v33 = vpop.f32.mrf.mxu0 }
0x165d   : > { %v4633_v6 = vsel %vm3682_vm14, %v4619_v59, -inf }
0x165e   : > { %v4621_v35 = vpop.f32.mrf.mxu0 }
0x1660   : > { %v11707_v36 = vpop.f32.mrf.mxu0 }
0x16df   : > { %v4629_v37 = vpop.xlane.xlu1 %4628 }
0x16e0   : > { %v4637_v38 = vsub.f32 %v4529_v22, %v4629_v37 }
0x16e2   : > { %v4642_v8 = vmul.f32 1.442695, %v4637_v38 }
0x16e4   : > { %12672 = vpow2.f32 %v4642_v8 }
0x16f1   : > { %v12673_v9 = vpop.eup %12672 }
0x16f2   : > { %v4651_v40 = vsel %vm3682_vm14, %v12673_v9, 0.0 }
0x16f3   : > { %4652 = vadd.xlane.f32.xlu1 %v4651_v40 }
0x1705   : > { %v14555_v4 = vpop.f32.mrf.mxu1 }
0x1707   : > { %v14557_v41 = vpop.f32.mrf.mxu1 }
0x1709   : > { %v14559_v43 = vpop.f32.mrf.mxu1 }
0x170b   : > { %v14561_v21 = vpop.f32.mrf.mxu1 }
0x170d   : > { %v4483_v26 = vpop.f32.mrf.mxu1 }
0x170e   : > { %v4484_v49 = vadd.f32 %v4483_v26, %v14396_v34 }
0x170f   : > { %v11688_v1 = vpop.f32.mrf.mxu1 }
0x1710   : > { %v4624_v50 = vsel %vm3682_vm14, %v4484_v49, -inf }
0x1711   : > { %4625 = vmax.xlane.f32.xlu0 %v4624_v50  ;;  %v4486_v51 = vpop.f32.mrf.mxu1 }
0x1713   : > { %v11689_v57 = vpop.f32.mrf.mxu1 }
0x1715   : > { %v4573_v17 = vpop.f32.mrf.mxu1 }
0x1716   : > { %v4574_v24 = vadd.f32 %v4573_v17, %v14396_v34  ;;  %v3500_v17 = vld [vmem:[%s15629_s18 + $0x8] sm:$0xf] }
0x1717   : > { %v11700_v42 = vpop.f32.mrf.mxu1 }
0x1718   : > { %v4630_v63 = vsel %vm3682_vm14, %v4574_v24, -inf }
0x1719   : > { %4631 = vmax.xlane.f32.xlu0 %v4630_v63  ;;  %v4576_v23 = vpop.f32.mrf.mxu1 }
0x171b   : > { %v11701_v48 = vpop.f32.mrf.mxu1 }
0x171d   : > { %4634 = vmax.xlane.f32.xlu0 %v4633_v6 }
0x177c   : > { %v4653_v15 = vpop.xlane.xlu1 %4652 }
0x179a   : > { %v4626_v18 = vpop.xlane.xlu0 %4625 }
0x179b   : > { %v4636_v3 = vsub.f32 %v4484_v49, %v4626_v18 }
0x179d   : > { %v4640_v52 = vmul.f32 1.442695, %v4636_v3 }
0x179f   : > { %12674 = vpow2.f32 %v4640_v52 }
0x17a2   : > { %v4632_v53 = vpop.xlane.xlu0 %4631 }
0x17a3   : > { %v4638_v55 = vsub.f32 %v4574_v24, %v4632_v53  ;;  %v4856_v24 = vsel %vm1505_vm12, %v3500_v17, 0 }
0x17a5   : > { %v4644_v58 = vmul.f32 1.442695, %v4638_v55 }
0x17a6   : > { %v4635_v54 = vpop.xlane.xlu0 %4634 }
0x17a7   : > { %12676 = vpow2.f32 %v4644_v58  ;;  %v4639_v60 = vsub.f32 %v4619_v59, %v4635_v54 }
0x17a9   : > { %v4646_v61 = vmul.f32 1.442695, %v4639_v60 }
0x17ab   : > { %12678 = vpow2.f32 %v4646_v61 }
0x17ac   : > { %v12675_v2 = vpop.eup %12674  ;;  %12680 = vrcp.f32 %v4653_v15 }
0x17ad   : > { %v4648_v7 = vsel %vm3682_vm14, %v12675_v2, 0.0 }
0x17ae   : > { %4649 = vadd.xlane.f32.xlu0 %v4648_v7 }
0x17b4   : > { %v12677_v22 = vpop.eup %12676 }
0x17b5   : > { %v4654_v47 = vsel %vm3682_vm14, %v12677_v22, 0.0 }
0x17b6   : > { %4655 = vadd.xlane.f32.xlu0 %v4654_v47 }
0x17b8   : > { %v12679_v10 = vpop.eup %12678 }
0x17b9   : > { %v4657_v14 = vsel %vm3682_vm14, %v12679_v10, 0.0  ;;  %v12681_v30 = vpop.eup %12680 }
0x17ba   : > { %4658 = vadd.xlane.f32.xlu1 %v4657_v14  ;;  %v4663_v35 = vmul.f32 %v12681_v30, %v12673_v9 }
0x17cb   : > { %4913 = vrot.lane.b32.xlu1 %v14361_v45, %s13458_s23 }
0x17cc   : > { %4672 = vrot.lane.b32.xlu0 %v14361_v45, %s13454_s7 }
0x17cf   : > { %4911 = vrot.lane.b32.xlu1 %v14367_v16, %s13458_s23 }
0x17d0   : > { %5006 = vrot.lane.b32.xlu0 %v14380_v29, %s13458_s23  ;;  %v4669_v29 = vpack.c.bf16 %v4663_v35, %v4663_v35 }
0x17d3   : > { %4961 = vrot.lane.b32.xlu1 %v14373_v28, %s13458_s23 }
0x17d7   : > { %5051 = vrot.lane.b32.xlu1 %v14387_v31, %s13458_s23 }
0x1837   : > { %v4650_v20 = vpop.xlane.xlu0 %4649 }
0x1838   : > { %12682 = vrcp.f32 %v4650_v20 }
0x183f   : > { %v4656_v33 = vpop.xlane.xlu0 %4655 }
0x1840   : > { %12684 = vrcp.f32 %v4656_v33 }
0x1843   : > { %v4659_v36 = vpop.xlane.xlu1 %4658  ;;  %v4673_v37 = vpop.permute.xlu0 %4672 }
0x1844   : > { %12686 = vrcp.f32 %v4659_v36  ;;  %11709 = vmatpush3.bf16.msra.mxu1 %v4673_v37  ;;  %11715 = vmatpush3.bf16.msra.mxu0 %v4673_v37 }
0x1845   : > { %v12683_v16 = vpop.eup %12682  ;;  %11726 = vmatprep.subr.bf16.mxu0 %v13446_v62  ;;  %11720 = vmatprep.subr.bf16.mxu1 %v13446_v62 }
0x1846   : > { %v4661_v28 = vmul.f32 %v12683_v16, %v12675_v2 }
0x1847   : > { %11717 = vmatmul.mubr.msk.bf16.vlgmr.msra.gmra.mxu0 %vm3682_vm14, %v4669_v29  ;;  %v4914_v49 = vpop.permute.xlu1 %4913  ;;  %v5007_v57 = vpop.permute.xlu0 %5006 }
0x1848   : > { %v4668_v31 = vpack.c.bf16 %v4661_v28, %v4661_v28  ;;  %11727 = vmatpush3.bf16.msra.mxu0 %v4673_v37  ;;  %11728 = vmatprep.mubr.msk.bf16.mxu0 %vm13447_vm1, %v13446_v62  ;;  %v4919_v50 = vsel %vm1258_vm2, %v4914_v49, 0  ;;  %v4425_v49 = vadd.f32 %v14539_v11, %v14557_v41 }
0x1849   : > { %11738 = vmatprep.subr.bf16.mxu0 %v13446_v62 }
0x184a   : > { %11711 = vmatmul.mubr.msk.bf16.vlgmr.msra.gmra.mxu1 %vm3682_vm14, %v4668_v31 }
0x184b   : > { %11721 = vmatpush3.bf16.msra.mxu1 %v4673_v37  ;;  %11722 = vmatprep.mubr.msk.bf16.mxu1 %vm13447_vm1, %v13446_v62  ;;  %v4912_v51 = vpop.permute.xlu1 %4911 }
0x184c   : > { %12302 = vmatprep.subr.msk.bf16.mxu1 %vm1505_vm12, %v3500_v17 }
0x184d   : > { %v12685_v38 = vpop.eup %12684 }
0x184e   : > { %v4665_v8 = vmul.f32 %v12685_v38, %v12677_v22 }
0x184f   : > { %v4962_v14 = vpop.permute.xlu1 %4961 }
0x1850   : > { %v4670_v9 = vpack.c.bf16 %v4665_v8, %v4665_v8  ;;  %v4433_v8 = vadd.f32 %v14537_v44, %v14555_v4 }
0x1851   : > { %v12687_v40 = vpop.eup %12686 }
0x1852   : > { %v4667_v26 = vmul.f32 %v12687_v40, %v12679_v10  ;;  %11723 = vmatmul.mubr.msk.bf16.vlgmr.msra.gmra.mxu1 %vm3682_vm14, %v4670_v9 }
0x1853   : > { %11733 = vmatpush3.bf16.msra.mxu1 %v4856_v24  ;;  %v5052_v37 = vpop.permute.xlu1 %5051 }
0x1854   : > { %v4671_v1 = vpack.c.bf16 %v4667_v26, %v4667_v26  ;;  %11744 = vmatprep.subr.bf16.mxu1 %v13446_v62 }
0x1856   : > { %11729 = vmatmul.mubr.msk.bf16.vlgmr.msra.gmra.mxu0 %vm3682_vm14, %v4671_v1 }
0x1857   : > { %11739 = vmatpush3.bf16.xpose.msra.mxu0 %v4919_v50  ;;  %11740 = vmatprep.mubr.msk.bf16.mxu0 %vm13447_vm1, %v13446_v62 }
0x1858   : > { %11750 = vmatprep.subr.bf16.mxu0 %v13446_v62 }
0x185e   : > { %11741 = vmatmul.mubr.msk.bf16.vlgmr.msra.gmra.mxu0 %vm1258_vm2, %v4912_v51  ;;  %v4436_v51 = vadd.f32 %v14542_v5, %v14559_v43 }
0x185f   : > { %11751 = vmatpush3.bf16.xpose.msra.mxu0 %v4919_v50  ;;  %11752 = vmatprep.mubr.msk.bf16.mxu0 %vm13447_vm1, %v13446_v62 }
0x1860   : > { %11762 = vmatprep.subr.bf16.mxu0 %v13446_v62 }
0x1866   : > { %11753 = vmatmul.mubr.msk.bf16.vlgmr.msra.gmra.mxu0 %vm1258_vm2, %v5007_v57 }
0x1867   : > { %11764 = vmatprep.mubr.msk.bf16.mxu0 %vm13447_vm1, %v13446_v62 }
0x1907   : > { %v4755_v42 = vpop.f32.mrf.mxu0 }
0x1909   : > { %v11718_v59 = vpop.f32.mrf.mxu0 }
0x190a   : > { %v4712_v63 = vpop.f32.mrf.mxu1 }
0x190b   : > { %v4847_v23 = vpack.c.bf16 %v4755_v42, %v4712_v63  ;;  %v4758_v48 = vpop.f32.mrf.mxu0 }
0x190c   : > { %v11712_v6 = vpop.f32.mrf.mxu1 }
0x190d   : > { %v11719_v18 = vpop.f32.mrf.mxu0  ;;  %11734 = vmatprep.mubr.msk.bf16.mxu1 %vm1258_vm2, %v4847_v23 }
0x190e   : > { %v4715_v3 = vpop.f32.mrf.mxu1 }
0x1910   : > { %v11713_v52 = vpop.f32.mrf.mxu1 }
0x1912   : > { %v4798_v53 = vpop.f32.mrf.mxu1 }
0x1914   : > { %v11724_v55 = vpop.f32.mrf.mxu1 }
0x1916   : > { %v4801_v58 = vpop.f32.mrf.mxu1  ;;  %v4841_v54 = vpop.f32.mrf.mxu0 }
0x1917   : > { %v4848_v60 = vpack.c.bf16 %v4841_v54, %v4798_v53 }
0x1918   : > { %v11725_v61 = vpop.f32.mrf.mxu1  ;;  %v11730_v2 = vpop.f32.mrf.mxu0 }
0x1919   : > { %11735 = vmatmul.mubr.msk.bf16.vlgmr.msra.gmra.mxu1 %vm1258_vm2, %v4848_v60 }
0x191a   : > { %11745 = vmatpush3.bf16.xpose.msra.mxu1 %v4919_v50  ;;  %v4844_v7 = vpop.f32.mrf.mxu0  ;;  %11746 = vmatprep.mubr.msk.bf16.mxu1 %vm13447_vm1, %v13446_v62 }
0x191b   : > { %11756 = vmatprep.subr.bf16.mxu1 %v13446_v62 }
0x191c   : > { %v11731_v22 = vpop.f32.mrf.mxu0 }
0x191e   : > { %v4955_v47 = vpop.f32.mrf.mxu0 }
0x191f   : > { %v4956_v10 = vadd.f32 %v4955_v47, %v14396_v34 }
0x1920   : > { %v11742_v15 = vpop.f32.mrf.mxu0 }
0x1921   : > { %11747 = vmatmul.mubr.msk.bf16.vlgmr.msra.gmra.mxu1 %vm1258_vm2, %v4962_v14  ;;  %v5096_v20 = vsel %vm3682_vm14, %v4956_v10, -inf }
0x1922   : > { %11757 = vmatpush3.bf16.xpose.msra.mxu1 %v4919_v50  ;;  %5097 = vmax.xlane.f32.xlu0 %v5096_v20  ;;  %v4958_v30 = vpop.f32.mrf.mxu0 }
0x1923   : > { %11758 = vmatprep.mubr.msk.bf16.mxu1 %vm13447_vm1, %v13446_v62  ;;  %11768 = vmatprep.subr.bf16.mxu1 %v13446_v62 }
0x1924   : > { %v11743_v33 = vpop.f32.mrf.mxu0 }
0x1926   : > { %v5045_v35 = vpop.f32.mrf.mxu0 }
0x1927   : > { %v5046_v36 = vadd.f32 %v5045_v35, %v14396_v34 }
0x1928   : > { %v11754_v16 = vpop.f32.mrf.mxu0 }
0x1929   : > { %11759 = vmatmul.mubr.msk.bf16.vlgmr.msra.gmra.mxu1 %vm1258_vm2, %v5052_v37  ;;  %v5102_v29 = vsel %vm3682_vm14, %v5046_v36, -inf }
0x192a   : > { %5103 = vmax.xlane.f32.xlu0 %v5102_v29  ;;  %v5048_v28 = vpop.f32.mrf.mxu0  ;;  %11770 = vmatprep.mubr.msk.bf16.mxu1 %vm13447_vm1, %v13446_v62 }
0x192c   : > { %v11755_v31 = vpop.f32.mrf.mxu0 }
0x19ab   : > { %v5098_v38 = vpop.xlane.xlu0 %5097 }
0x19ac   : > { %v5108_v9 = vsub.f32 %v4956_v10, %v5098_v38 }
0x19ae   : > { %v5112_v57 = vmul.f32 1.442695, %v5108_v9 }
0x19b0   : > { %12688 = vpow2.f32 %v5112_v57 }
0x19b3   : > { %v5104_v40 = vpop.xlane.xlu0 %5103 }
0x19b4   : > { %v5110_v17 = vsub.f32 %v5046_v36, %v5104_v40 }
0x19b6   : > { %v5116_v4 = vmul.f32 1.442695, %v5110_v17 }
0x19b8   : > { %12690 = vpow2.f32 %v5116_v4 }
0x19bd   : > { %v12689_v52 = vpop.eup %12688 }
0x19be   : > { %v5120_v58 = vsel %vm3682_vm14, %v12689_v52, 0.0 }
0x19c5   : > { %v12691_v54 = vpop.eup %12690 }
0x19c6   : > { %v5126_v60 = vsel %vm3682_vm14, %v12691_v54, 0.0 }
0x19d9   : > { %v11736_v26 = vpop.f32.mrf.mxu1 }
0x19da   : > { %v14632_v1 = vadd.f32 %v11736_v26, %v4433_v8 }
0x19db   : > { %v4892_v50 = vpop.f32.mrf.mxu1 }
0x19dc   : > { %v14636_v24 = vadd.f32 %v4892_v50, %v4425_v49 }
0x19dd   : > { %v11737_v42 = vpop.f32.mrf.mxu1 }
0x19de   : > { %v14638_v59 = vadd.f32 %v11737_v42, %v4436_v51 }
0x19df   : > { %v14640_v44 = vpop.f32.mrf.mxu1 }
0x19e1   : > { %v5000_v63 = vpop.f32.mrf.mxu1 }
0x19e2   : > { %v5001_v11 = vadd.f32 %v5000_v63, %v14396_v34 }
0x19e3   : > { %v11748_v41 = vpop.f32.mrf.mxu1 }
0x19e4   : > { %v5099_v23 = vsel %vm3682_vm14, %v5001_v11, -inf }
0x19e5   : > { %5100 = vmax.xlane.f32.xlu1 %v5099_v23  ;;  %v5003_v5 = vpop.f32.mrf.mxu1 }
0x19e6   : > { %v3501_v5 = vld [vmem:[%s15629_s18 + $0xc] sm:$0xf] }
0x19e7   : > { %v11749_v43 = vpop.f32.mrf.mxu1 }
0x19e8   : > { %v5328_v43 = vsel %vm1505_vm12, %v3501_v5, 0 }
0x19e9   : > { %v5090_v48 = vpop.f32.mrf.mxu1 }
0x19ea   : > { %v5091_v6 = vadd.f32 %v5090_v48, %v14396_v34 }
0x19eb   : > { %v11760_v18 = vpop.f32.mrf.mxu1 }
0x19ec   : > { %v5105_v3 = vsel %vm3682_vm14, %v5091_v6, -inf }
0x19ed   : > { %5106 = vmax.xlane.f32.xlu0 %v5105_v3  ;;  %v5093_v53 = vpop.f32.mrf.mxu1 }
0x19ef   : > { %v11761_v55 = vpop.f32.mrf.mxu1 }
0x19f1   : > { %5121 = vadd.xlane.f32.xlu0 %v5120_v58 }
0x19f5   : > { %5127 = vadd.xlane.f32.xlu0 %v5126_v60 }
0x1a0b   : > { %5144 = vrot.lane.b32.xlu0 %v14361_v45, %s13457_s9 }
0x1a6e   : > { %v5101_v61 = vpop.xlane.xlu1 %5100 }
0x1a6f   : > { %v5109_v2 = vsub.f32 %v5001_v11, %v5101_v61 }
0x1a71   : > { %v5114_v7 = vmul.f32 1.442695, %v5109_v2 }
0x1a73   : > { %12692 = vpow2.f32 %v5114_v7  ;;  %v10827_v7 = vld [vmem:[%s15630_s19] ss:$0 sm:$0xff] }
0x1a76   : > { %v5107_v22 = vpop.xlane.xlu0 %5106 }
0x1a77   : > { %v5111_v47 = vsub.f32 %v5091_v6, %v5107_v22 }
0x1a79   : > { %v5118_v10 = vmul.f32 1.442695, %v5111_v47  ;;  %v4428_v47 = vadd.f32 %v14547_v19, %v14561_v21 }
0x1a7a   : > { %v5122_v14 = vpop.xlane.xlu0 %5121 }
0x1a7b   : > { %12694 = vpow2.f32 %v5118_v10 }
0x1a7c   : > { %12696 = vrcp.f32 %v5122_v14 }
0x1a7e   : > { %v5128_v15 = vpop.xlane.xlu0 %5127 }
0x1a7f   : > { %12698 = vrcp.f32 %v5128_v15 }
0x1a80   : > { %v12693_v20 = vpop.eup %12692 }
0x1a81   : > { %v5123_v30 = vsel %vm3682_vm14, %v12693_v20, 0.0 }
0x1a82   : > { %5124 = vadd.xlane.f32.xlu1 %v5123_v30  ;;  %v5145_v33 = vpop.permute.xlu0 %5144 }
0x1a83   : > { %11763 = vmatpush3.bf16.msra.mxu0 %v5145_v33  ;;  %11769 = vmatpush3.bf16.msra.mxu1 %v5145_v33 }
0x1a84   : > { %11774 = vmatprep.subr.bf16.mxu0 %v13446_v62  ;;  %11780 = vmatprep.subr.bf16.mxu1 %v13446_v62 }
0x1a88   : > { %v12695_v45 = vpop.eup %12694 }
0x1a89   : > { %v12697_v35 = vpop.eup %12696  ;;  %v5129_v36 = vsel %vm3682_vm14, %v12695_v45, 0.0 }
0x1a8a   : > { %v5133_v37 = vmul.f32 %v12697_v35, %v12689_v52  ;;  %5130 = vadd.xlane.f32.xlu1 %v5129_v36 }
0x1a8c   : > { %v5140_v16 = vpack.c.bf16 %v5133_v37, %v5133_v37  ;;  %v12699_v29 = vpop.eup %12698 }
0x1a8d   : > { %v5137_v28 = vmul.f32 %v12699_v29, %v12691_v54 }
0x1a8e   : > { %11765 = vmatmul.mubr.msk.bf16.vlgmr.msra.gmra.mxu0 %vm3682_vm14, %v5140_v16 }
0x1a8f   : > { %11775 = vmatpush3.bf16.msra.mxu0 %v5145_v33  ;;  %11776 = vmatprep.mubr.msk.bf16.mxu0 %vm13447_vm1, %v13446_v62  ;;  %v5142_v31 = vpack.c.bf16 %v5137_v28, %v5137_v28 }
0x1a90   : > { %12303 = vmatprep.subr.msk.bf16.mxu0 %vm1505_vm12, %v3501_v5  ;;  %v12542_v5 = vld [vmem:[%s15633_s22 + $0x18] sm:$0xff]  }
0x1a96   : > { %11777 = vmatmul.mubr.msk.bf16.vlgmr.msra.gmra.mxu0 %vm3682_vm14, %v5142_v31 }
0x1a97   : > { %11787 = vmatpush3.bf16.msra.mxu0 %v5328_v43 }
0x1a98   : > { %11800 = vmatprep.subr.bf16.mxu0 %v12542_v5 }
0x1b0b   : > { %v5125_v38 = vpop.xlane.xlu1 %5124 }
0x1b0c   : > { %12700 = vrcp.f32 %v5125_v38 }
0x1b13   : > { %v5131_v8 = vpop.xlane.xlu1 %5130 }
0x1b14   : > { %12702 = vrcp.f32 %v5131_v8 }
0x1b19   : > { %v12701_v9 = vpop.eup %12700 }
0x1b1a   : > { %v5135_v40 = vmul.f32 %v12701_v9, %v12693_v20  ;;  %v4908_v20 = vadd.f32 %v14640_v44, %v4428_v47 }
0x1b1c   : > { %v5141_v26 = vpack.c.bf16 %v5135_v40, %v5135_v40 }
0x1b1e   : > { %11771 = vmatmul.mubr.msk.bf16.vlgmr.msra.gmra.mxu1 %vm3682_vm14, %v5141_v26 }
0x1b1f   : > { %11781 = vmatpush3.bf16.msra.mxu1 %v5145_v33  ;;  %11782 = vmatprep.mubr.msk.bf16.mxu1 %vm13447_vm1, %v13446_v62 }
0x1b21   : > { %v12703_v49 = vpop.eup %12702 }
0x1b22   : > { %v5139_v50 = vmul.f32 %v12703_v49, %v12695_v45 }
0x1b24   : > { %v5143_v51 = vpack.c.bf16 %v5139_v50, %v5139_v50 }
0x1b26   : > { %11783 = vmatmul.mubr.msk.bf16.vlgmr.msra.gmra.mxu1 %vm3682_vm14, %v5143_v51 }
0x1b4e   : > { %v5184_v57 = vpop.f32.mrf.mxu0 }
0x1b50   : > { %v11766_v17 = vpop.f32.mrf.mxu0 }
0x1b52   : > { %v5187_v42 = vpop.f32.mrf.mxu0 }
0x1b54   : > { %v11767_v4 = vpop.f32.mrf.mxu0 }
0x1b56   : > { %v5270_v63 = vpop.f32.mrf.mxu0 }
0x1b58   : > { %v11778_v11 = vpop.f32.mrf.mxu0 }
0x1b5a   : > { %v5273_v41 = vpop.f32.mrf.mxu0 }
0x1b5b   : > { %v12540_v41 = vld [vmem:[#allocation28 + $0x8] sm:$0xff]  }
0x1b5c   : > { %v11779_v23 = vpop.f32.mrf.mxu0  ;;  %11792 = vmatprep.subr.bf16.mxu1 %v12540_v41 }
0x1b5d   : > { %v12541_v23 = vld [vmem:[#allocation28] sm:$0xff]   ;;  %11793 = vmatpush3.bf16.msra.mxu1 %v12540_v41 }
0x1b5e   : > { %11794 = vmatprep.subr.bf16.mxu1 %v12541_v23 }
0x1b61   : > { %11795 = vmatpush3.bf16.msra.mxu1 %v12541_v23  ;;  %v10841_v23 = vld [vmem:[%s15710_s1] ss:$0 sm:$0xff]  ;;  %s13328_s1 = sshll.u32 %s13460_s30, 4  ;;  %s13329_s1 = int_to_ptr.vmem [resolvable:$false] %s13328_s1 }
0x1bde   : > { %v5227_v48 = vpop.f32.mrf.mxu1 }
0x1bdf   : > { %v5319_v6 = vpack.c.bf16 %v5227_v48, %v5184_v57 }
0x1be0   : > { %v11772_v18 = vpop.f32.mrf.mxu1 }
0x1be1   : > { %11788 = vmatprep.mubr.msk.bf16.mxu0 %vm1258_vm2, %v5319_v6 }
0x1be2   : > { %v5230_v3 = vpop.f32.mrf.mxu1 }
0x1be4   : > { %v11773_v52 = vpop.f32.mrf.mxu1 }
0x1be6   : > { %v5313_v53 = vpop.f32.mrf.mxu1 }
0x1be7   : > { %v5320_v55 = vpack.c.bf16 %v5313_v53, %v5270_v63 }
0x1be8   : > { %v11784_v58 = vpop.f32.mrf.mxu1 }
0x1be9   : > { %11789 = vmatmul.mubr.msk.bf16.vlgmr.msra.gmra.mxu0 %vm1258_vm2, %v5320_v55 }
0x1bea   : > { %v5316_v54 = vpop.f32.mrf.mxu1  ;;  %11801 = vmatpush3.bf16.msra.mxu0 %v12542_v5 }
0x1bec   : > { %v11785_v60 = vpop.f32.mrf.mxu1 }
0x1ca9   : > { %v11790_v61 = vpop.f32.mrf.mxu0 }
0x1caa   : > { %v5381_v2 = vadd.f32 %v11790_v61, %v14632_v1 }
0x1cab   : > { %v5364_v22 = vpop.f32.mrf.mxu0 }
0x1cac   : > { %v5385_v10 = vadd.f32 %v5381_v2, %v14320_v0  ;;  %v5379_v14 = vadd.f32 %v5364_v22, %v14636_v24 }
0x1cad   : > { %v11791_v15 = vpop.f32.mrf.mxu0 }
0x1cae   : > { %v14678_v30 = vadd.f32 %v10827_v7, %v5385_v10  ;;  %v5383_v33 = vadd.f32 %v5379_v14, %v14318_v56  ;;  %v5382_v35 = vadd.f32 %v11791_v15, %v14638_v59  ;;  %v10828_v10 = vld [vmem:[#allocation13] ss:$0 sm:$0xff] }
0x1caf   : > { %v5367_v1 = vpop.f32.mrf.mxu0 }
0x1cb0   : > { %v14681_v45 = vadd.f32 %v10827_v7, %v5383_v33  ;;  %v5380_v36 = vadd.f32 %v5367_v1, %v4908_v20  ;;  %v5406_v19 = vsel %vm1093_vm0, %v14678_v30, 0.0  ;;  %v5386_v21 = vadd.f32 %v5382_v35, %v14328_v13  ;;  %v10829_v35 = vld [vmem:[#allocation14] ss:$0 sm:$0xff] }
0x1cb1   : > { %5407 = vadd.xlane.f32.xlu1 %v5406_v19 }
0x1cb2   : > { %v5384_v0 = vadd.f32 %v5380_v36, %v14326_v12  ;;  %v5400_v44 = vsel %vm1093_vm0, %v14681_v45, 0.0  ;;  %v14692_v56 = vadd.f32 %v10827_v7, %v5386_v21 }
0x1cb4   : > { %v14688_v24 = vadd.f32 %v10827_v7, %v5384_v0  ;;  %v5409_v37 = vsel %vm1093_vm0, %v14692_v56, 0.0 }
0x1cb5   : > { %5401 = vadd.xlane.f32.xlu1 %v5400_v44 }
0x1cb6   : > { %v5403_v59 = vsel %vm1093_vm0, %v14688_v24, 0.0 }
0x1cb9   : > { %5404 = vadd.xlane.f32.xlu1 %v5403_v59 }
0x1cbd   : > { %5410 = vadd.xlane.f32.xlu1 %v5409_v37 }
0x1d3a   : > { %v5408_v16 = vpop.xlane.xlu1 %5407 }
0x1d3b   : > { %v5414_v12 = vmul.f32 0.03125, %v5408_v16 }
0x1d3d   : > { %v5418_v13 = vsub.f32 %v14678_v30, %v5414_v12 }
0x1d3e   : > { %v5402_v29 = vpop.xlane.xlu1 %5401 }
0x1d3f   : > { %v5412_v28 = vmul.f32 0.03125, %v5402_v29  ;;  %v5422_v31 = vmul.f32 %v5418_v13, %v5418_v13  ;;  %v12544_v29 = vld [vmem:[%s15633_s22 + $0x8] sm:$0xff]  }
0x1d41   : > { %v5416_v38 = vsub.f32 %v14681_v45, %v5412_v28  ;;  %v5430_v8 = vsel %vm1093_vm0, %v5422_v31, 0.0  ;;  %v12545_v28 = vld [vmem:[%s15633_s22] sm:$0xff]  }
0x1d42   : > { %5431 = vadd.xlane.f32.xlu0 %v5430_v8  ;;  %v5405_v9 = vpop.xlane.xlu1 %5404  ;;  %v10830_v8 = vld [vmem:[%s15632_s21] ss:$0 sm:$0xff] }
0x1d43   : > { %v5413_v40 = vmul.f32 0.03125, %v5405_v9  ;;  %v5420_v26 = vmul.f32 %v5416_v38, %v5416_v38 }
0x1d45   : > { %v5417_v49 = vsub.f32 %v14688_v24, %v5413_v40  ;;  %v5424_v50 = vsel %vm1093_vm0, %v5420_v26, 0.0 }
0x1d46   : > { %5425 = vadd.xlane.f32.xlu1 %v5424_v50  ;;  %v5411_v51 = vpop.xlane.xlu1 %5410 }
0x1d47   : > { %v5415_v57 = vmul.f32 0.03125, %v5411_v51  ;;  %v5421_v17 = vmul.f32 %v5417_v49, %v5417_v49 }
0x1d49   : > { %v5419_v42 = vsub.f32 %v14692_v56, %v5415_v57  ;;  %v5427_v4 = vsel %vm1093_vm0, %v5421_v17, 0.0 }
0x1d4a   : > { %5428 = vadd.xlane.f32.xlu1 %v5427_v4 }
0x1d4b   : > { %v5423_v63 = vmul.f32 %v5419_v42, %v5419_v42 }
0x1d4d   : > { %v5433_v11 = vsel %vm1093_vm0, %v5423_v63, 0.0 }
0x1d4e   : > { %5434 = vadd.xlane.f32.xlu1 %v5433_v11 }
0x1dcb   : > { %v5432_v43 = vpop.xlane.xlu0 %5431 }
0x1dcc   : > { %v5438_v48 = vmul.f32 0.03125, %v5432_v43 }
0x1dce   : > { %v5442_v3 = vadd.f32 1e-05, %v5438_v48 }
0x1dcf   : > { %v5426_v6 = vpop.xlane.xlu1 %5425 }
0x1dd0   : > { %v5436_v18 = vmul.f32 0.03125, %v5426_v6 }
0x1dd2   : > { %v5440_v52 = vadd.f32 1e-05, %v5436_v18 }
0x1dd3   : > { %v5429_v53 = vpop.xlane.xlu1 %5428 }
0x1dd4   : > { %12704 = vrsqrt.f32 %v5440_v52  ;;  %v5437_v55 = vmul.f32 0.03125, %v5429_v53 }
0x1dd5   : > { %12706 = vrsqrt.f32 %v5442_v3 }
0x1dd6   : > { %v5441_v58 = vadd.f32 1e-05, %v5437_v55 }
0x1dd7   : > { %v5435_v54 = vpop.xlane.xlu1 %5434 }
0x1dd8   : > { %12708 = vrsqrt.f32 %v5441_v58  ;;  %v5439_v60 = vmul.f32 0.03125, %v5435_v54 }
0x1dda   : > { %v5443_v61 = vadd.f32 1e-05, %v5439_v60 }
0x1ddc   : > { %12710 = vrsqrt.f32 %v5443_v61 }
0x1de1   : > { %v12705_v2 = vpop.eup %12704 }
0x1de2   : > { %v5448_v7 = vmul.f32 %v12705_v2, %v5416_v38  ;;  %v12707_v22 = vpop.eup %12706 }
0x1de3   : > { %v5450_v14 = vmul.f32 %v12707_v22, %v5418_v13  ;;  %v12543_v13 = vld [vmem:[%s15633_s22 + $0x10] sm:$0xff]  }
0x1de4   : > { %v5458_v20 = vmul.f32 %v10828_v10, %v5448_v7  ;;  %11802 = vmatprep.subr.bf16.mxu0 %v12543_v13 }
0x1de5   : > { %v12709_v47 = vpop.eup %12708  ;;  %v5460_v19 = vmul.f32 %v10828_v10, %v5450_v14  ;;  %11803 = vmatpush3.bf16.msra.mxu0 %v12543_v13 }
0x1de6   : > { %v5449_v15 = vmul.f32 %v12709_v47, %v5417_v49  ;;  %v5468_v0 = vadd.f32 %v10829_v35, %v5458_v20  ;;  %11804 = vmatprep.subr.bf16.mxu0 %v12544_v29 }
0x1de7   : > { %v5470_v37 = vadd.f32 %v10829_v35, %v5460_v19 }
0x1de8   : > { %v5459_v33 = vmul.f32 %v10828_v10, %v5449_v15 }
0x1de9   : > { %v12711_v1 = vpop.eup %12710  ;;  %11805 = vmatpush3.bf16.msra.mxu0 %v12544_v29 }
0x1dea   : > { %v5451_v36 = vmul.f32 %v12711_v1, %v5419_v42  ;;  %v5469_v21 = vadd.f32 %v10829_v35, %v5459_v33  ;;  %11806 = vmatprep.subr.bf16.mxu0 %v12545_v28 }
0x1dec   : > { %v5461_v44 = vmul.f32 %v10828_v10, %v5451_v36  ;;  %v5472_v59 = vpack.c.bf16 %v5469_v21, %v5468_v0 }
0x1ded   : > { %11807 = vmatpush3.bf16.msra.mxu0 %v12545_v28 }
0x1dee   : > { %v5471_v16 = vadd.f32 %v10829_v35, %v5461_v44  ;;  %11796 = vmatprep.mubr.msk.bf16.mxu1 %vm1093_vm0, %v5472_v59  ;;  %11826 = vmatprep.subr.bf16.mxu0 %v13446_v62 }
0x1df0   : > { %v5473_v12 = vpack.c.bf16 %v5471_v16, %v5470_v37  ;;  %v12546_v16 = vld [vmem:[#allocation16 + $0x18] sm:$0xff]  }
0x1df1   : > { %11812 = vmatprep.subr.bf16.mxu1 %v12546_v16 }
0x1df2   : > { %11797 = vmatmul.mubr.msk.bf16.vlgmr.msra.gmra.mxu1 %vm1093_vm0, %v5473_v12  ;;  %v12547_v12 = vld [vmem:[#allocation16 + $0x10] sm:$0xff]  }
0x1df3   : > { %11813 = vmatpush3.bf16.msra.mxu1 %v12546_v16 }
0x1df4   : > { %11814 = vmatprep.subr.bf16.mxu1 %v12547_v12 }
0x1df7   : > { %11815 = vmatpush3.bf16.msra.mxu1 %v12547_v12 }
0x1df8   : > { %11820 = vmatprep.subr.bf16.mxu1 %v13446_v62 }
0x1eb2   : > { %v11798_v31 = vpop.f32.mrf.mxu1 }
0x1eb3   : > { %v5546_v49 = vadd.f32 %v11798_v31, %v10830_v8 }
0x1eb4   : > { %v5537_v38 = vpop.f32.mrf.mxu1 }
0x1eb5   : > { %v5538_v40 = vadd.f32 %v10830_v8, %v5537_v38  ;;  %v5554_v4 = vmax.f32 %v5546_v49, 0.0 }
0x1eb6   : > { %v11799_v9 = vpop.f32.mrf.mxu1 }
0x1eb7   : > { %v5549_v26 = vadd.f32 %v11799_v9, %v10830_v8  ;;  %v5552_v17 = vmax.f32 %v5538_v40, 0.0 }
0x1eb8   : > { %v5540_v50 = vpop.f32.mrf.mxu1 }
0x1eb9   : > { %v5541_v51 = vadd.f32 %v10830_v8, %v5540_v50  ;;  %v5555_v57 = vmax.f32 %v5549_v26, 0.0 }
0x1ebb   : > { %v5553_v42 = vmax.f32 %v5541_v51, 0.0  ;;  %v5557_v11 = vpack.c.bf16 %v5555_v57, %v5554_v4 }
0x1ebd   : > { %v5556_v63 = vpack.c.bf16 %v5553_v42, %v5552_v17  ;;  %v10842_v42 = vld [vmem:[#allocation5 + $0x1] ss:$0 sm:$0xff] }
0x1ebf   : > { %11808 = vmatprep.mubr.msk.bf16.mxu0 %vm5590_vm15, %v5556_v63 }
0x1ec0   : > { %11809 = vmatmul.mubr.msk.bf16.vlgmr.msra.gmra.mxu0 %vm5590_vm15, %v5557_v11 }
0x1ec1   : > { %11828 = vmatprep.mubr.msk.bf16.mxu0 %vm13447_vm1, %v13446_v62 }
0x1f80   : > { %v11810_v41 = vpop.f32.mrf.mxu0 }
0x1f81   : > { %v5648_v5 = vadd.f32 %v11810_v41, %v14678_v30  ;;  %v10843_v41 = vld [vmem:[#allocation8 + $0x1] ss:$0 sm:$0xff] }
0x1f82   : > { %v5631_v43 = vpop.f32.mrf.mxu0 }
0x1f83   : > { %v14732_v48 = vadd.f32 %v10841_v23, %v5648_v5  ;;  %v5646_v6 = vadd.f32 %v5631_v43, %v14681_v45 }
0x1f84   : > { %v11811_v18 = vpop.f32.mrf.mxu0 }
0x1f85   : > { %v14735_v3 = vadd.f32 %v10841_v23, %v5646_v6  ;;  %v5671_v52 = vsel %vm1093_vm0, %v14732_v48, 0.0  ;;  %v5649_v58 = vadd.f32 %v11811_v18, %v14692_v56 }
0x1f86   : > { %5672 = vadd.xlane.f32.xlu1 %v5671_v52  ;;  %v5634_v53 = vpop.f32.mrf.mxu0 }
0x1f87   : > { %v5647_v55 = vadd.f32 %v5634_v53, %v14688_v24  ;;  %v5665_v30 = vsel %vm1093_vm0, %v14735_v3, 0.0  ;;  %v14745_v60 = vadd.f32 %v10841_v23, %v5649_v58 }
0x1f89   : > { %v14741_v54 = vadd.f32 %v10841_v23, %v5647_v55  ;;  %v5674_v61 = vsel %vm1093_vm0, %v14745_v60, 0.0 }
0x1f8a   : > { %5666 = vadd.xlane.f32.xlu1 %v5665_v30 }
0x1f8b   : > { %v5668_v45 = vsel %vm1093_vm0, %v14741_v54, 0.0 }
0x1f8e   : > { %5669 = vadd.xlane.f32.xlu1 %v5668_v45 }
0x1f92   : > { %5675 = vadd.xlane.f32.xlu1 %v5674_v61 }
0x200f   : > { %v5673_v2 = vpop.xlane.xlu1 %5672 }
0x2010   : > { %v5679_v56 = vmul.f32 0.03125, %v5673_v2 }
0x2012   : > { %v5683_v15 = vsub.f32 %v14732_v48, %v5679_v56 }
0x2013   : > { %v5667_v24 = vpop.xlane.xlu1 %5666 }
0x2014   : > { %v5677_v7 = vmul.f32 0.03125, %v5667_v24  ;;  %v5687_v21 = vmul.f32 %v5683_v15, %v5683_v15 }
0x2016   : > { %v5681_v22 = vsub.f32 %v14735_v3, %v5677_v7  ;;  %v5695_v59 = vsel %vm1093_vm0, %v5687_v21, 0.0  ;;  %v10844_v7 = vld [vmem:[#allocation17 + $0x1] ss:$0 sm:$0xff] }
0x2017   : > { %v5670_v47 = vpop.xlane.xlu1 %5669 }
0x2018   : > { %v5678_v10 = vmul.f32 0.03125, %v5670_v47  ;;  %v5685_v14 = vmul.f32 %v5681_v22, %v5681_v22 }
0x201a   : > { %v5682_v20 = vsub.f32 %v14741_v54, %v5678_v10  ;;  %v5689_v33 = vsel %vm1093_vm0, %v5685_v14, 0.0 }
0x201b   : > { %5690 = vadd.xlane.f32.xlu1 %v5689_v33  ;;  %v5676_v1 = vpop.xlane.xlu1 %5675 }
0x201c   : > { %v5680_v35 = vmul.f32 0.03125, %v5676_v1  ;;  %v5686_v36 = vmul.f32 %v5682_v20, %v5682_v20 }
0x201e   : > { %v5684_v19 = vsub.f32 %v14745_v60, %v5680_v35  ;;  %v5692_v0 = vsel %vm1093_vm0, %v5686_v36, 0.0 }
0x201f   : > { %5693 = vadd.xlane.f32.xlu1 %v5692_v0 }
0x2020   : > { %v5688_v44 = vmul.f32 %v5684_v19, %v5684_v19 }
0x2022   : > { %v5698_v37 = vsel %vm1093_vm0, %v5688_v44, 0.0 }
0x2023   : > { %5696 = vadd.xlane.f32.xlu1 %v5695_v59  ;;  %5699 = vadd.xlane.f32.xlu0 %v5698_v37 }
0x20a4   : > { %v5691_v13 = vpop.xlane.xlu1 %5690 }
0x20a5   : > { %v5701_v29 = vmul.f32 0.03125, %v5691_v13 }
0x20a7   : > { %v5705_v28 = vadd.f32 1e-05, %v5701_v29 }
0x20a8   : > { %v5694_v31 = vpop.xlane.xlu1 %5693 }
0x20a9   : > { %12712 = vrsqrt.f32 %v5705_v28  ;;  %v5702_v38 = vmul.f32 0.03125, %v5694_v31 }
0x20ab   : > { %v5706_v8 = vadd.f32 1e-05, %v5702_v38 }
0x20ac   : > { %v5700_v9 = vpop.xlane.xlu0 %5699  ;;  %v5697_v40 = vpop.xlane.xlu1 %5696 }
0x20ad   : > { %12714 = vrsqrt.f32 %v5706_v8  ;;  %v5704_v26 = vmul.f32 0.03125, %v5700_v9  ;;  %v5703_v49 = vmul.f32 0.03125, %v5697_v40 }
0x20af   : > { %v5708_v50 = vadd.f32 1e-05, %v5704_v26  ;;  %v5707_v51 = vadd.f32 1e-05, %v5703_v49 }
0x20b1   : > { %12716 = vrsqrt.f32 %v5708_v50 }
0x20b2   : > { %12718 = vrsqrt.f32 %v5707_v51 }
0x20b6   : > { %v12713_v57 = vpop.eup %12712 }
0x20b7   : > { %v5713_v17 = vmul.f32 %v12713_v57, %v5681_v22 }
0x20b9   : > { %v5723_v11 = vmul.f32 %v10842_v42, %v5713_v17 }
0x20ba   : > { %v12715_v4 = vpop.eup %12714 }
0x20bb   : > { %v5714_v63 = vmul.f32 %v12715_v4, %v5682_v20  ;;  %v5733_v18 = vadd.f32 %v10843_v41, %v5723_v11 }
0x20bd   : > { %v5724_v23 = vmul.f32 %v10842_v42, %v5714_v63 }
0x20be   : > { %v12717_v5 = vpop.eup %12716 }
0x20bf   : > { %v12719_v43 = vpop.eup %12718  ;;  %v5716_v6 = vmul.f32 %v12717_v5, %v5684_v19  ;;  %v5734_v52 = vadd.f32 %v10843_v41, %v5724_v23 }
0x20c0   : > { %v5715_v53 = vmul.f32 %v12719_v43, %v5683_v15 }
0x20c1   : > { %v5726_v55 = vmul.f32 %v10842_v42, %v5716_v6  ;;  %v5737_v58 = vpack.c.bf16 %v5734_v52, %v5733_v18 }
0x20c2   : > { %v5725_v30 = vmul.f32 %v10842_v42, %v5715_v53 }
0x20c3   : > { %v5736_v45 = vadd.f32 %v10843_v41, %v5726_v55  ;;  %11816 = vmatprep.mubr.msk.bf16.mxu1 %vm1093_vm0, %v5737_v58 }
0x20c4   : > { %v5735_v61 = vadd.f32 %v10843_v41, %v5725_v30 }
0x20c6   : > { %v5738_v2 = vpack.c.bf16 %v5736_v45, %v5735_v61 }
0x20c8   : > { %11817 = vmatmul.mubr.msk.bf16.vlgmr.msra.gmra.mxu1 %vm1093_vm0, %v5738_v2 }
0x20c9   : > { %11822 = vmatprep.mubr.msk.bf16.mxu1 %vm13447_vm1, %v13446_v62 }
0x2188   : > { %v11818_v24 = vpop.f32.mrf.mxu1 }
0x2189   : > { %v5813_v10 = vadd.f32 %v11818_v24, %v10844_v7 }
0x218a   : > { %v5804_v56 = vpop.f32.mrf.mxu1 }
0x218b   : > { %v5805_v22 = vadd.f32 %v10844_v7, %v5804_v56  ;;  %v14768_v33 = vpack.c.bf16 %v5813_v10, %v5813_v10 }
0x218c   : > { %v11819_v47 = vpop.f32.mrf.mxu1 }
0x218d   : > { %v14764_v14 = vpack.c.bf16 %v5805_v22, %v5805_v22  ;;  %v5816_v1 = vadd.f32 %v11819_v47, %v10844_v7 }
0x218e   : > { %v5807_v15 = vpop.f32.mrf.mxu1 }
0x218f   : > { %v5808_v20 = vadd.f32 %v10844_v7, %v5807_v15  ;;  %5829 = vrot.lane.b32.xlu1 %v14764_v14, %s13448_s10  ;;  %v14776_v36 = vpack.c.bf16 %v5816_v1, %v5816_v1 }
0x2191   : > { %v14770_v35 = vpack.c.bf16 %v5808_v20, %v5808_v20 }
0x2193   : > { %5878 = vrot.lane.b32.xlu0 %v14770_v35, %s13448_s10  ;;  %5927 = vrot.lane.b32.xlu1 %v14768_v33, %s13448_s10 }
0x2197   : > { %5976 = vrot.lane.b32.xlu1 %v14776_v36, %s13448_s10 }
0x2201   : > { %v5830_v19 = vpop.permute.xlu1 %5829 }
0x2202   : > { %v5835_v0 = vsel %vm1258_vm2, %v5830_v19, 0 }
0x2203   : > { %11821 = vmatpush3.bf16.xpose.msra.mxu1 %v5835_v0 }
0x2204   : > { %11832 = vmatprep.subr.bf16.mxu1 %v13446_v62 }
0x2205   : > { %v5879_v21 = vpop.permute.xlu0 %5878  ;;  %v5928_v44 = vpop.permute.xlu1 %5927 }
0x2206   : > { %v5884_v59 = vsel %vm1258_vm2, %v5879_v21, 0  ;;  %v5933_v37 = vsel %vm1258_vm2, %v5928_v44, 0 }
0x2207   : > { %11827 = vmatpush3.bf16.xpose.msra.mxu0 %v5884_v59 }
0x2208   : > { %11838 = vmatprep.subr.bf16.mxu0 %v13446_v62 }
0x2209   : > { %v5977_v16 = vpop.permute.xlu1 %5976 }
0x220a   : > { %11823 = vmatmul.mubr.msk.bf16.vlgmr.msra.gmra.mxu1 %vm1258_vm2, %v14764_v14  ;;  %v5982_v12 = vsel %vm1258_vm2, %v5977_v16, 0 }
0x220b   : > { %11833 = vmatpush3.bf16.xpose.msra.mxu1 %v5933_v37  ;;  %11834 = vmatprep.mubr.msk.bf16.mxu1 %vm13447_vm1, %v13446_v62 }
0x220c   : > { %11844 = vmatprep.subr.bf16.mxu1 %v13446_v62 }
0x220e   : > { %11829 = vmatmul.mubr.msk.bf16.vlgmr.msra.gmra.mxu0 %vm1258_vm2, %v14770_v35 }
0x220f   : > { %11839 = vmatpush3.bf16.xpose.msra.mxu0 %v5982_v12  ;;  %11840 = vmatprep.mubr.msk.bf16.mxu0 %vm13447_vm1, %v13446_v62 }
0x2210   : > { %11850 = vmatprep.subr.bf16.mxu0 %v13446_v62 }
0x2212   : > { %11835 = vmatmul.mubr.msk.bf16.vlgmr.msra.gmra.mxu1 %vm1258_vm2, %v14768_v33 }
0x2213   : > { %11846 = vmatprep.mubr.msk.bf16.mxu1 %vm13447_vm1, %v13446_v62 }
0x2216   : > { %11841 = vmatmul.mubr.msk.bf16.vlgmr.msra.gmra.mxu0 %vm1258_vm2, %v14776_v36 }
0x2217   : > { %11852 = vmatprep.mubr.msk.bf16.mxu0 %vm13447_vm1, %v13446_v62 }
0x22ca   : > { %v5871_v13 = vpop.f32.mrf.mxu1 }
0x22cb   : > { %v5872_v29 = vadd.f32 %v5871_v13, %v13958_v27 }
0x22cc   : > { %v11824_v28 = vpop.f32.mrf.mxu1 }
0x22cd   : > { %v6024_v31 = vsel %vm1258_vm2, %v5872_v29, -inf }
0x22ce   : > { %v5920_v38 = vpop.f32.mrf.mxu0  ;;  %6025 = vmax.xlane.f32.xlu0 %v6024_v31  ;;  %v5874_v8 = vpop.f32.mrf.mxu1 }
0x22cf   : > { %v5921_v9 = vadd.f32 %v5920_v38, %v13965_v32 }
0x22d0   : > { %v11825_v40 = vpop.f32.mrf.mxu1  ;;  %v11830_v26 = vpop.f32.mrf.mxu0 }
0x22d1   : > { %v6027_v49 = vsel %vm1258_vm2, %v5921_v9, -inf }
0x22d2   : > { %v5923_v50 = vpop.f32.mrf.mxu0  ;;  %6028 = vmax.xlane.f32.xlu1 %v6027_v49  ;;  %v5969_v51 = vpop.f32.mrf.mxu1 }
0x22d3   : > { %v5970_v57 = vadd.f32 %v5969_v51, %v13973_v39 }
0x22d4   : > { %v11831_v17 = vpop.f32.mrf.mxu0  ;;  %v11836_v42 = vpop.f32.mrf.mxu1 }
0x22d5   : > { %v6030_v4 = vsel %vm1258_vm2, %v5970_v57, -inf }
0x22d6   : > { %6031 = vmax.xlane.f32.xlu0 %v6030_v4  ;;  %v5972_v63 = vpop.f32.mrf.mxu1  ;;  %v6018_v11 = vpop.f32.mrf.mxu0 }
0x22d7   : > { %v6019_v41 = vadd.f32 %v6018_v11, %v13980_v46 }
0x22d8   : > { %v11837_v23 = vpop.f32.mrf.mxu1  ;;  %v11842_v5 = vpop.f32.mrf.mxu0 }
0x22d9   : > { %v6033_v43 = vsel %vm1258_vm2, %v6019_v41, -inf }
0x22da   : > { %6034 = vmax.xlane.f32.xlu0 %v6033_v43  ;;  %v6021_v6 = vpop.f32.mrf.mxu0 }
0x22dc   : > { %v11843_v18 = vpop.f32.mrf.mxu0 }
0x22e3   : > { %6072 = vrot.lane.b32.xlu1 %v14764_v14, %s13450_s6 }
0x2357   : > { %v6026_v52 = vpop.xlane.xlu0 %6025 }
0x2358   : > { %v6036_v53 = vsub.f32 %v5872_v29, %v6026_v52 }
0x235a   : > { %v6040_v55 = vmul.f32 1.442695, %v6036_v53 }
0x235b   : > { %v6029_v58 = vpop.xlane.xlu1 %6028 }
0x235c   : > { %12720 = vpow2.f32 %v6040_v55  ;;  %v6037_v30 = vsub.f32 %v5921_v9, %v6029_v58 }
0x235e   : > { %v6042_v45 = vmul.f32 1.442695, %v6037_v30 }
0x235f   : > { %v6073_v61 = vpop.permute.xlu1 %6072  ;;  %v6032_v47 = vpop.xlane.xlu0 %6031 }
0x2360   : > { %12722 = vpow2.f32 %v6042_v45  ;;  %v6078_v2 = vsel %vm1505_vm12, %v6073_v61, 0  ;;  %v6038_v15 = vsub.f32 %v5970_v57, %v6032_v47 }
0x2361   : > { %11845 = vmatpush3.bf16.msra.mxu1 %v6078_v2 }
0x2362   : > { %11856 = vmatprep.subr.bf16.mxu1 %v13446_v62  ;;  %v6044_v1 = vmul.f32 1.442695, %v6038_v15 }
0x2363   : > { %v6035_v10 = vpop.xlane.xlu0 %6034 }
0x2364   : > { %v6039_v20 = vsub.f32 %v6019_v41, %v6035_v10  ;;  %12724 = vpow2.f32 %v6044_v1 }
0x2366   : > { %v6046_v19 = vmul.f32 1.442695, %v6039_v20 }
0x2368   : > { %12726 = vpow2.f32 %v6046_v19 }
0x2369   : > { %v12721_v24 = vpop.eup %12720 }
0x236a   : > { %v6048_v7 = vsel %vm1258_vm2, %v12721_v24, 0.0 }
0x236b   : > { %6049 = vadd.xlane.f32.xlu1 %v6048_v7 }
0x236d   : > { %v12723_v56 = vpop.eup %12722 }
0x236e   : > { %v6051_v22 = vsel %vm1258_vm2, %v12723_v56, 0.0 }
0x236f   : > { %6052 = vadd.xlane.f32.xlu0 %v6051_v22 }
0x2371   : > { %v12725_v0 = vpop.eup %12724 }
0x2372   : > { %v6054_v44 = vsel %vm1258_vm2, %v12725_v0, 0.0 }
0x2375   : > { %v12727_v21 = vpop.eup %12726 }
0x2376   : > { %v6057_v59 = vsel %vm1258_vm2, %v12727_v21, 0.0 }
0x237c   : > { %6168 = vrot.lane.b32.xlu1 %v14768_v33, %s13450_s6 }
0x2380   : > { %6216 = vrot.lane.b32.xlu1 %v14776_v36, %s13450_s6 }
0x2385   : > { %6120 = vrot.lane.b32.xlu0 %v14770_v35, %s13450_s6  ;;  %s15712_s6 = smov 48  }
0x23a4   : > { %6055 = vadd.xlane.f32.xlu1 %v6054_v44  ;;  %6058 = vadd.xlane.f32.xlu0 %v6057_v59 }
0x23b5   : > { %6318 = vrot.lane.b32.xlu1 %v14770_v35, %s13451_s4 }
0x23b9   : > { %6316 = vrot.lane.b32.xlu1 %v14770_v35, %s13452_s13 }
0x23ba   : > { %6268 = vrot.lane.b32.xlu0 %v14764_v14, %s13451_s4 }
0x23bd   : > { %6418 = vrot.lane.b32.xlu1 %v14776_v36, %s13451_s4 }
0x23be   : > { %6266 = vrot.lane.b32.xlu0 %v14764_v14, %s13452_s13 }
0x23c1   : > { %6416 = vrot.lane.b32.xlu1 %v14776_v36, %s13452_s13 }
0x23c2   : > { %6368 = vrot.lane.b32.xlu0 %v14768_v33, %s13451_s4 }
0x23c6   : > { %6366 = vrot.lane.b32.xlu0 %v14768_v33, %s13452_s13 }
0x23f4   : > { %v6050_v37 = vpop.xlane.xlu1 %6049 }
0x23f5   : > { %12728 = vrcp.f32 %v6050_v37 }
0x23f8   : > { %v6053_v16 = vpop.xlane.xlu0 %6052  ;;  %v6169_v28 = vpop.permute.xlu1 %6168 }
0x23f9   : > { %12730 = vrcp.f32 %v6053_v16  ;;  %v6174_v40 = vsel %vm1505_vm12, %v6169_v28, 0 }
0x23fc   : > { %v6121_v12 = vpop.permute.xlu0 %6120  ;;  %v6217_v26 = vpop.permute.xlu1 %6216 }
0x23fd   : > { %v6126_v13 = vsel %vm1505_vm12, %v6121_v12, 0  ;;  %v6222_v50 = vsel %vm1505_vm12, %v6217_v26, 0 }
0x23fe   : > { %11851 = vmatpush3.bf16.msra.mxu0 %v6126_v13 }
0x23ff   : > { %11862 = vmatprep.subr.bf16.mxu0 %v13446_v62 }
0x2402   : > { %v12729_v29 = vpop.eup %12728 }
0x2403   : > { %v6061_v31 = vmul.f32 %v12729_v29, %v12721_v24 }
0x2405   : > { %v6068_v38 = vpack.c.bf16 %v6061_v31, %v6061_v31 }
0x2406   : > { %v12731_v8 = vpop.eup %12730 }
0x2407   : > { %v6063_v9 = vmul.f32 %v12731_v8, %v12723_v56  ;;  %11847 = vmatmul.mubr.msk.bf16.vlgmr.msra.gmra.mxu1 %vm1258_vm2, %v6068_v38 }
0x2408   : > { %11857 = vmatpush3.bf16.msra.mxu1 %v6174_v40  ;;  %11858 = vmatprep.mubr.msk.bf16.mxu1 %vm13447_vm1, %v13446_v62 }
0x2409   : > { %v6069_v49 = vpack.c.bf16 %v6063_v9, %v6063_v9  ;;  %11868 = vmatprep.subr.bf16.mxu1 %v13446_v62 }
0x240b   : > { %11853 = vmatmul.mubr.msk.bf16.vlgmr.msra.gmra.mxu0 %vm1258_vm2, %v6069_v49 }
0x240c   : > { %11863 = vmatpush3.bf16.msra.mxu0 %v6222_v50  ;;  %11864 = vmatprep.mubr.msk.bf16.mxu0 %vm13447_vm1, %v13446_v62 }
0x240d   : > { %11874 = vmatprep.subr.bf16.mxu0 %v13446_v62 }
0x242d   : > { %v6059_v51 = vpop.xlane.xlu0 %6058  ;;  %v6056_v57 = vpop.xlane.xlu1 %6055 }
0x242e   : > { %12732 = vrcp.f32 %v6059_v51 }
0x242f   : > { %12734 = vrcp.f32 %v6056_v57 }
0x2431   : > { %v6319_v17 = vpop.permute.xlu1 %6318  ;;  %v6269_v42 = vpop.permute.xlu0 %6268 }
0x2432   : > { %v6324_v6 = vsel %vm1258_vm2, %v6319_v17, 0  ;;  %v6274_v52 = vsel %vm1258_vm2, %v6269_v42, 0 }
0x2435   : > { %v6317_v43 = vpop.permute.xlu1 %6316  ;;  %v6267_v18 = vpop.permute.xlu0 %6266 }
0x2439   : > { %v6419_v53 = vpop.permute.xlu1 %6418  ;;  %v6369_v55 = vpop.permute.xlu0 %6368 }
0x243a   : > { %v6424_v58 = vsel %vm1258_vm2, %v6419_v53, 0  ;;  %v6374_v30 = vsel %vm1258_vm2, %v6369_v55, 0 }
0x243b   : > { %v12733_v4 = vpop.eup %12732 }
0x243c   : > { %v12735_v63 = vpop.eup %12734  ;;  %v6067_v11 = vmul.f32 %v12733_v4, %v12727_v21 }
0x243d   : > { %v6065_v41 = vmul.f32 %v12735_v63, %v12725_v0  ;;  %v6417_v45 = vpop.permute.xlu1 %6416  ;;  %v6367_v61 = vpop.permute.xlu0 %6366 }
0x243e   : > { %v6071_v23 = vpack.c.bf16 %v6067_v11, %v6067_v11 }
0x243f   : > { %v6070_v5 = vpack.c.bf16 %v6065_v41, %v6065_v41 }
0x2440   : > { %11865 = vmatmul.mubr.msk.bf16.vlgmr.msra.gmra.mxu0 %vm1258_vm2, %v6071_v23 }
0x2441   : > { %11859 = vmatmul.mubr.msk.bf16.vlgmr.msra.gmra.mxu1 %vm1258_vm2, %v6070_v5  ;;  %11875 = vmatpush3.bf16.xpose.msra.mxu0 %v6324_v6 }
0x2442   : > { %11869 = vmatpush3.bf16.xpose.msra.mxu1 %v6274_v52  ;;  %11870 = vmatprep.mubr.msk.bf16.mxu1 %vm13447_vm1, %v13446_v62 }
0x2443   : > { %11876 = vmatprep.mubr.msk.bf16.mxu0 %vm13447_vm1, %v13446_v62  ;;  %11880 = vmatprep.subr.bf16.mxu1 %v13446_v62 }
0x2444   : > { %11886 = vmatprep.subr.bf16.mxu0 %v13446_v62 }
0x2448   : > { %11877 = vmatmul.mubr.msk.bf16.vlgmr.msra.gmra.mxu0 %vm1258_vm2, %v6317_v43 }
0x2449   : > { %11871 = vmatmul.mubr.msk.bf16.vlgmr.msra.gmra.mxu1 %vm1258_vm2, %v6267_v18  ;;  %11887 = vmatpush3.bf16.xpose.msra.mxu0 %v6424_v58 }
0x244a   : > { %11881 = vmatpush3.bf16.xpose.msra.mxu1 %v6374_v30  ;;  %11882 = vmatprep.mubr.msk.bf16.mxu1 %vm13447_vm1, %v13446_v62 }
0x244b   : > { %11888 = vmatprep.mubr.msk.bf16.mxu0 %vm13447_vm1, %v13446_v62  ;;  %11892 = vmatprep.subr.bf16.mxu1 %v13446_v62 }
0x244c   : > { %11898 = vmatprep.subr.bf16.mxu0 %v13446_v62 }
0x2450   : > { %11889 = vmatmul.mubr.msk.bf16.vlgmr.msra.gmra.mxu0 %vm1258_vm2, %v6417_v45 }
0x2451   : > { %11883 = vmatmul.mubr.msk.bf16.vlgmr.msra.gmra.mxu1 %vm1258_vm2, %v6367_v61  ;;  %11900 = vmatprep.mubr.msk.bf16.mxu0 %vm13447_vm1, %v13446_v62 }
0x2452   : > { %11894 = vmatprep.mubr.msk.bf16.mxu1 %vm13447_vm1, %v13446_v62 }
0x24c7   : > { %v14880_v2 = vpop.f32.mrf.mxu1 }
0x24c9   : > { %v11848_v24 = vpop.f32.mrf.mxu1 }
0x24cb   : > { %v6117_v7 = vpop.f32.mrf.mxu1  ;;  %v14882_v56 = vpop.f32.mrf.mxu0 }
0x24cc   : > { %v6264_v22 = vpack.c.bf16 %v14882_v56, %v14880_v2 }
0x24cd   : > { %v11849_v47 = vpop.f32.mrf.mxu1  ;;  %v11854_v10 = vpop.f32.mrf.mxu0 }
0x24cf   : > { %v6165_v15 = vpop.f32.mrf.mxu0 }
0x24d1   : > { %v11855_v20 = vpop.f32.mrf.mxu0 }
0x2500   : > { %v14886_v1 = vpop.f32.mrf.mxu0 }
0x2501   : > { %v14888_v19 = vpop.f32.mrf.mxu1 }
0x2502   : > { %v6265_v0 = vpack.c.bf16 %v14886_v1, %v14888_v19  ;;  %v11866_v21 = vpop.f32.mrf.mxu0  ;;  %v5821_v1 = vld [vmem:[#allocation19 + $0x14] sm:$0xf] }
0x2503   : > { %v11860_v44 = vpop.f32.mrf.mxu1  ;;  %v6715_v19 = vsel %vm1505_vm12, %v5821_v1, 0 }
0x2504   : > { %v6261_v59 = vpop.f32.mrf.mxu0 }
0x2505   : > { %v6213_v37 = vpop.f32.mrf.mxu1 }
0x2506   : > { %v11867_v16 = vpop.f32.mrf.mxu0 }
0x2507   : > { %v11861_v12 = vpop.f32.mrf.mxu1 }
0x2508   : > { %v6360_v13 = vpop.f32.mrf.mxu0 }
0x2509   : > { %v6310_v29 = vpop.f32.mrf.mxu1  ;;  %v6361_v28 = vadd.f32 %v6360_v13, %v13965_v32 }
0x250a   : > { %v6311_v31 = vadd.f32 %v6310_v29, %v13958_v27  ;;  %v11878_v38 = vpop.f32.mrf.mxu0 }
0x250b   : > { %v11872_v8 = vpop.f32.mrf.mxu1  ;;  %v6469_v9 = vsel %vm1258_vm2, %v6361_v28, -inf }
0x250c   : > { %v6466_v40 = vsel %vm1258_vm2, %v6311_v31, -inf  ;;  %6470 = vmax.xlane.f32.xlu1 %v6469_v9  ;;  %v6363_v26 = vpop.f32.mrf.mxu0 }
0x250d   : > { %6467 = vmax.xlane.f32.xlu0 %v6466_v40  ;;  %v6313_v49 = vpop.f32.mrf.mxu1 }
0x250e   : > { %v11879_v50 = vpop.f32.mrf.mxu0 }
0x250f   : > { %v11873_v51 = vpop.f32.mrf.mxu1 }
0x2510   : > { %v6460_v57 = vpop.f32.mrf.mxu0 }
0x2511   : > { %v6410_v17 = vpop.f32.mrf.mxu1  ;;  %v6461_v11 = vadd.f32 %v6460_v57, %v13980_v46 }
0x2512   : > { %v6411_v42 = vadd.f32 %v6410_v17, %v13973_v39  ;;  %v11890_v4 = vpop.f32.mrf.mxu0 }
0x2513   : > { %v11884_v63 = vpop.f32.mrf.mxu1  ;;  %v6475_v18 = vsel %vm1258_vm2, %v6461_v11, -inf }
0x2514   : > { %v6472_v41 = vsel %vm1258_vm2, %v6411_v42, -inf  ;;  %v6463_v23 = vpop.f32.mrf.mxu0 }
0x2515   : > { %6473 = vmax.xlane.f32.xlu0 %v6472_v41  ;;  %v6413_v5 = vpop.f32.mrf.mxu1  ;;  %v5820_v41 = vld [vmem:[#allocation19 + $0x10] sm:$0xf] }
0x2516   : > { %v11891_v43 = vpop.f32.mrf.mxu0 }
0x2517   : > { %v11885_v6 = vpop.f32.mrf.mxu1 }
0x2519   : > { %6476 = vmax.xlane.f32.xlu0 %v6475_v18 }
0x251d   : > { %6514 = vrot.lane.b32.xlu1 %v14764_v14, %s13453_s0 }
0x2595   : > { %v6471_v52 = vpop.xlane.xlu1 %6470 }
0x2596   : > { %v6468_v53 = vpop.xlane.xlu0 %6467  ;;  %v6479_v55 = vsub.f32 %v6361_v28, %v6471_v52 }
0x2597   : > { %v6478_v58 = vsub.f32 %v6311_v31, %v6468_v53 }
0x2598   : > { %v6484_v30 = vmul.f32 1.442695, %v6479_v55  ;;  %v6773_v55 = vsel %vm1505_vm12, %v5820_v41, 0 }
0x2599   : > { %v6482_v45 = vmul.f32 1.442695, %v6478_v58  ;;  %v6515_v61 = vpop.permute.xlu1 %6514 }
0x259a   : > { %12736 = vpow2.f32 %v6484_v30  ;;  %v6520_v24 = vsel %vm1505_vm12, %v6515_v61, 0 }
0x259b   : > { %12738 = vpow2.f32 %v6482_v45  ;;  %11893 = vmatpush3.bf16.msra.mxu1 %v6520_v24 }
0x259c   : > { %11904 = vmatprep.subr.bf16.mxu1 %v13446_v62 }
0x259e   : > { %v6474_v7 = vpop.xlane.xlu0 %6473 }
0x259f   : > { %v6480_v47 = vsub.f32 %v6411_v42, %v6474_v7 }
0x25a1   : > { %v6486_v10 = vmul.f32 1.442695, %v6480_v47 }
0x25a2   : > { %v6477_v15 = vpop.xlane.xlu0 %6476 }
0x25a3   : > { %12740 = vpow2.f32 %v6486_v10  ;;  %v6481_v20 = vsub.f32 %v6461_v11, %v6477_v15 }
0x25a5   : > { %v6488_v21 = vmul.f32 1.442695, %v6481_v20 }
0x25a7   : > { %v12737_v44 = vpop.eup %12736  ;;  %12742 = vpow2.f32 %v6488_v21 }
0x25a8   : > { %v12739_v59 = vpop.eup %12738  ;;  %v6493_v37 = vsel %vm1258_vm2, %v12737_v44, 0.0 }
0x25a9   : > { %v6490_v16 = vsel %vm1258_vm2, %v12739_v59, 0.0  ;;  %6494 = vadd.xlane.f32.xlu0 %v6493_v37 }
0x25aa   : > { %6491 = vadd.xlane.f32.xlu1 %v6490_v16 }
0x25b0   : > { %v12741_v12 = vpop.eup %12740 }
0x25b1   : > { %v6496_v13 = vsel %vm1258_vm2, %v12741_v12, 0.0 }
0x25b2   : > { %6497 = vadd.xlane.f32.xlu1 %v6496_v13 }
0x25b4   : > { %v12743_v29 = vpop.eup %12742 }
0x25b5   : > { %v6499_v28 = vsel %vm1258_vm2, %v12743_v29, 0.0 }
0x25b6   : > { %6500 = vadd.xlane.f32.xlu0 %v6499_v28 }
0x25c3   : > { %6610 = vrot.lane.b32.xlu1 %v14768_v33, %s13453_s0 }
0x25c7   : > { %6658 = vrot.lane.b32.xlu1 %v14776_v36, %s13453_s0 }
0x25cb   : > { %6876 = vrot.lane.b32.xlu1 %v14770_v35, %s13454_s7 }
0x25cc   : > { %6562 = vrot.lane.b32.xlu0 %v14770_v35, %s13453_s0  ;;  %s15713_s0 = smov 40  }
0x25cf   : > { %6874 = vrot.lane.b32.xlu1 %v14770_v35, %s13455_s8 }
0x25d0   : > { %6826 = vrot.lane.b32.xlu0 %v14764_v14, %s13454_s7 }
0x25d3   : > { %6976 = vrot.lane.b32.xlu1 %v14776_v36, %s13454_s7 }
0x25d4   : > { %6824 = vrot.lane.b32.xlu0 %v14764_v14, %s13455_s8 }
0x25d7   : > { %6974 = vrot.lane.b32.xlu1 %v14776_v36, %s13455_s8 }
0x25d8   : > { %6926 = vrot.lane.b32.xlu0 %v14768_v33, %s13454_s7 }
0x25dc   : > { %6924 = vrot.lane.b32.xlu0 %v14768_v33, %s13455_s8 }
0x2632   : > { %v6495_v31 = vpop.xlane.xlu0 %6494 }
0x2633   : > { %12744 = vrcp.f32 %v6495_v31  ;;  %v6492_v38 = vpop.xlane.xlu1 %6491 }
0x2634   : > { %12746 = vrcp.f32 %v6492_v38 }
0x263b   : > { %v6498_v8 = vpop.xlane.xlu1 %6497 }
0x263c   : > { %12748 = vrcp.f32 %v6498_v8 }
0x263f   : > { %v6501_v9 = vpop.xlane.xlu0 %6500  ;;  %v6611_v40 = vpop.permute.xlu1 %6610 }
0x2640   : > { %v12745_v26 = vpop.eup %12744  ;;  %12750 = vrcp.f32 %v6501_v9  ;;  %v6616_v11 = vsel %vm1505_vm12, %v6611_v40, 0 }
0x2641   : > { %v12747_v49 = vpop.eup %12746  ;;  %v6505_v50 = vmul.f32 %v12745_v26, %v12737_v44 }
0x2642   : > { %v6503_v51 = vmul.f32 %v12747_v49, %v12739_v59 }
0x2643   : > { %v6563_v57 = vpop.permute.xlu0 %6562  ;;  %v6659_v4 = vpop.permute.xlu1 %6658  ;;  %v6511_v63 = vpack.c.bf16 %v6505_v50, %v6505_v50 }
0x2644   : > { %v6510_v17 = vpack.c.bf16 %v6503_v51, %v6503_v51  ;;  %v6568_v42 = vsel %vm1505_vm12, %v6563_v57, 0  ;;  %v6664_v23 = vsel %vm1505_vm12, %v6659_v4, 0 }
0x2645   : > { %11899 = vmatpush3.bf16.msra.mxu0 %v6568_v42 }
0x2646   : > { %11895 = vmatmul.mubr.msk.bf16.vlgmr.msra.gmra.mxu1 %vm1258_vm2, %v6510_v17  ;;  %11910 = vmatprep.subr.bf16.mxu0 %v13446_v62 }
0x2647   : > { %11905 = vmatpush3.bf16.msra.mxu1 %v6616_v11  ;;  %11906 = vmatprep.mubr.msk.bf16.mxu1 %vm13447_vm1, %v13446_v62  ;;  %v6877_v58 = vpop.permute.xlu1 %6876  ;;  %v6827_v21 = vpop.permute.xlu0 %6826 }
0x2648   : > { %11901 = vmatmul.mubr.msk.bf16.vlgmr.msra.gmra.mxu0 %vm1258_vm2, %v6511_v63  ;;  %v6882_v45 = vsel %vm1258_vm2, %v6877_v58, 0  ;;  %12304 = vmatprep.subr.msk.bf16.mxu1 %vm1505_vm12, %v5821_v1  ;;  %v6832_v38 = vsel %vm1258_vm2, %v6827_v21, 0 }
0x2649   : > { %v12749_v5 = vpop.eup %12748  ;;  %11911 = vmatpush3.bf16.msra.mxu0 %v6664_v23  ;;  %11912 = vmatprep.mubr.msk.bf16.mxu0 %vm13447_vm1, %v13446_v62 }
0x264a   : > { %v6507_v43 = vmul.f32 %v12749_v5, %v12741_v12  ;;  %12305 = vmatprep.subr.msk.bf16.mxu0 %vm1505_vm12, %v5820_v41 }
0x264b   : > { %v6875_v30 = vpop.permute.xlu1 %6874  ;;  %v6825_v13 = vpop.permute.xlu0 %6824 }
0x264c   : > { %v6512_v6 = vpack.c.bf16 %v6507_v43, %v6507_v43 }
0x264d   : > { %v12751_v18 = vpop.eup %12750 }
0x264e   : > { %v6509_v52 = vmul.f32 %v12751_v18, %v12743_v29  ;;  %11907 = vmatmul.mubr.msk.bf16.vlgmr.msra.gmra.mxu1 %vm1258_vm2, %v6512_v6 }
0x264f   : > { %v6977_v2 = vpop.permute.xlu1 %6976  ;;  %11917 = vmatpush3.bf16.msra.mxu1 %v6715_v19  ;;  %v6927_v40 = vpop.permute.xlu0 %6926 }
0x2650   : > { %v6513_v53 = vpack.c.bf16 %v6509_v52, %v6509_v52  ;;  %v6982_v56 = vsel %vm1258_vm2, %v6977_v2, 0  ;;  %11928 = vmatprep.subr.bf16.mxu1 %v13446_v62  ;;  %v6932_v50 = vsel %vm1258_vm2, %v6927_v40, 0 }
0x2652   : > { %11913 = vmatmul.mubr.msk.bf16.vlgmr.msra.gmra.mxu0 %vm1258_vm2, %v6513_v53 }
0x2653   : > { %11924 = vmatprep.mubr.msk.bf16.mxu0 %vm1258_vm2, %v6264_v22  ;;  %11923 = vmatpush3.bf16.msra.mxu0 %v6773_v55  ;;  %v6975_v22 = vpop.permute.xlu1 %6974  ;;  %v6925_v4 = vpop.permute.xlu0 %6924 }
0x2654   : > { %11934 = vmatprep.subr.bf16.mxu0 %v13446_v62 }
0x265a   : > { %11925 = vmatmul.mubr.msk.bf16.vlgmr.msra.gmra.mxu0 %vm1258_vm2, %v6265_v0 }
0x265b   : > { %11935 = vmatpush3.bf16.xpose.msra.mxu0 %v6882_v45  ;;  %11936 = vmatprep.mubr.msk.bf16.mxu0 %vm13447_vm1, %v13446_v62 }
0x265c   : > { %11946 = vmatprep.subr.bf16.mxu0 %v13446_v62 }
0x2662   : > { %11937 = vmatmul.mubr.msk.bf16.vlgmr.msra.gmra.mxu0 %vm1258_vm2, %v6875_v30 }
0x2663   : > { %11947 = vmatpush3.bf16.xpose.msra.mxu0 %v6982_v56  ;;  %11948 = vmatprep.mubr.msk.bf16.mxu0 %vm13447_vm1, %v13446_v62 }
0x2664   : > { %11958 = vmatprep.subr.bf16.mxu0 %v13446_v62 }
0x266a   : > { %11949 = vmatmul.mubr.msk.bf16.vlgmr.msra.gmra.mxu0 %vm1258_vm2, %v6975_v22 }
0x266b   : > { %11960 = vmatprep.mubr.msk.bf16.mxu0 %vm13447_vm1, %v13446_v62 }
0x2706   : > { %v6556_v0 = vpop.f32.mrf.mxu1 }
0x2708   : > { %v11896_v61 = vpop.f32.mrf.mxu1  ;;  %v6604_v24 = vpop.f32.mrf.mxu0 }
0x2709   : > { %v6706_v7 = vpack.c.bf16 %v6604_v24, %v6556_v0 }
0x270a   : > { %v6559_v47 = vpop.f32.mrf.mxu1  ;;  %v11902_v10 = vpop.f32.mrf.mxu0 }
0x270b   : > { %11918 = vmatprep.mubr.msk.bf16.mxu1 %vm1258_vm2, %v6706_v7 }
0x270c   : > { %v11897_v15 = vpop.f32.mrf.mxu1  ;;  %v6607_v20 = vpop.f32.mrf.mxu0 }
0x270e   : > { %v11903_v44 = vpop.f32.mrf.mxu0  ;;  %v6652_v59 = vpop.f32.mrf.mxu1 }
0x2710   : > { %v11908_v37 = vpop.f32.mrf.mxu1 }
0x2712   : > { %v6655_v16 = vpop.f32.mrf.mxu1  ;;  %v6700_v12 = vpop.f32.mrf.mxu0 }
0x2713   : > { %v6707_v29 = vpack.c.bf16 %v6700_v12, %v6652_v59 }
0x2714   : > { %v11909_v28 = vpop.f32.mrf.mxu1  ;;  %v11914_v31 = vpop.f32.mrf.mxu0 }
0x2715   : > { %11919 = vmatmul.mubr.msk.bf16.vlgmr.msra.gmra.mxu1 %vm1258_vm2, %v6707_v29 }
0x2716   : > { %11929 = vmatpush3.bf16.xpose.msra.mxu1 %v6832_v38  ;;  %v6703_v8 = vpop.f32.mrf.mxu0  ;;  %11930 = vmatprep.mubr.msk.bf16.mxu1 %vm13447_vm1, %v13446_v62 }
0x2717   : > { %11940 = vmatprep.subr.bf16.mxu1 %v13446_v62 }
0x2718   : > { %v11915_v9 = vpop.f32.mrf.mxu0 }
0x271a   : > { %v14974_v26 = vpop.f32.mrf.mxu0 }
0x271c   : > { %v14976_v49 = vpop.f32.mrf.mxu0 }
0x271d   : > { %11931 = vmatmul.mubr.msk.bf16.vlgmr.msra.gmra.mxu1 %vm1258_vm2, %v6825_v13 }
0x271e   : > { %11941 = vmatpush3.bf16.xpose.msra.mxu1 %v6932_v50  ;;  %v14980_v51 = vpop.f32.mrf.mxu0  ;;  %11942 = vmatprep.mubr.msk.bf16.mxu1 %vm13447_vm1, %v13446_v62 }
0x271f   : > { %11952 = vmatprep.subr.bf16.mxu1 %v13446_v62 }
0x2720   : > { %v14985_v57 = vpop.f32.mrf.mxu0 }
0x2722   : > { %v6918_v17 = vpop.f32.mrf.mxu0 }
0x2723   : > { %v6919_v42 = vadd.f32 %v6918_v17, %v13965_v32 }
0x2724   : > { %v11938_v63 = vpop.f32.mrf.mxu0 }
0x2725   : > { %11943 = vmatmul.mubr.msk.bf16.vlgmr.msra.gmra.mxu1 %vm1258_vm2, %v6925_v4  ;;  %v7027_v11 = vsel %vm1258_vm2, %v6919_v42, -inf }
0x2726   : > { %7028 = vmax.xlane.f32.xlu1 %v7027_v11  ;;  %v6921_v41 = vpop.f32.mrf.mxu0  ;;  %11954 = vmatprep.mubr.msk.bf16.mxu1 %vm13447_vm1, %v13446_v62 }
0x2728   : > { %v11939_v23 = vpop.f32.mrf.mxu0 }
0x272a   : > { %v7018_v5 = vpop.f32.mrf.mxu0 }
0x272b   : > { %v7019_v20 = vadd.f32 %v7018_v5, %v13980_v46 }
0x272c   : > { %v11950_v43 = vpop.f32.mrf.mxu0 }
0x272d   : > { %v7033_v37 = vsel %vm1258_vm2, %v7019_v20, -inf }
0x272e   : > { %v7021_v6 = vpop.f32.mrf.mxu0 }
0x2730   : > { %v11951_v18 = vpop.f32.mrf.mxu0 }
0x2737   : > { %7072 = vrot.lane.b32.xlu1 %v14764_v14, %s15712_s6 }
0x273b   : > { %7168 = vrot.lane.b32.xlu1 %v14768_v33, %s15712_s6 }
0x27af   : > { %v7029_v52 = vpop.xlane.xlu1 %7028 }
0x27b0   : > { %v7037_v45 = vsub.f32 %v6919_v42, %v7029_v52 }
0x27b2   : > { %v7042_v22 = vmul.f32 1.442695, %v7037_v45 }
0x27b3   : > { %v7073_v53 = vpop.permute.xlu1 %7072 }
0x27b4   : > { %v7078_v55 = vsel %vm1505_vm12, %v7073_v53, 0  ;;  %12752 = vpow2.f32 %v7042_v22 }
0x27b5   : > { %11953 = vmatpush3.bf16.msra.mxu1 %v7078_v55 }
0x27b6   : > { %11964 = vmatprep.subr.bf16.mxu1 %v13446_v62 }
0x27b7   : > { %v7169_v23 = vpop.permute.xlu1 %7168 }
0x27c1   : > { %v12753_v16 = vpop.eup %12752 }
0x27c2   : > { %v7051_v12 = vsel %vm1258_vm2, %v12753_v16, 0.0 }
0x27d5   : > { %v14998_v58 = vpop.f32.mrf.mxu1 }
0x27d7   : > { %v15000_v30 = vpop.f32.mrf.mxu1 }
0x27d9   : > { %v15002_v2 = vpop.f32.mrf.mxu1 }
0x27db   : > { %v15004_v56 = vpop.f32.mrf.mxu1 }
0x27dd   : > { %v6868_v1 = vpop.f32.mrf.mxu1 }
0x27de   : > { %v6869_v19 = vadd.f32 %v6868_v1, %v13958_v27 }
0x27df   : > { %v11932_v0 = vpop.f32.mrf.mxu1 }
0x27e0   : > { %v7024_v61 = vsel %vm1258_vm2, %v6869_v19, -inf }
0x27e1   : > { %7025 = vmax.xlane.f32.xlu0 %v7024_v61  ;;  %v6871_v24 = vpop.f32.mrf.mxu1  ;;  %v7174_v61 = vsel %vm1505_vm12, %v7169_v23, 0 }
0x27e3   : > { %v11933_v7 = vpop.f32.mrf.mxu1 }
0x27e5   : > { %v6968_v47 = vpop.f32.mrf.mxu1 }
0x27e6   : > { %v6969_v10 = vadd.f32 %v6968_v47, %v13973_v39 }
0x27e7   : > { %v11944_v15 = vpop.f32.mrf.mxu1 }
0x27e8   : > { %v7030_v21 = vsel %vm1258_vm2, %v6969_v10, -inf }
0x27e9   : > { %7031 = vmax.xlane.f32.xlu0 %v7030_v21  ;;  %v6971_v44 = vpop.f32.mrf.mxu1 }
0x27eb   : > { %v11945_v59 = vpop.f32.mrf.mxu1 }
0x27ed   : > { %7034 = vmax.xlane.f32.xlu0 %v7033_v37 }
0x27f1   : > { %7052 = vadd.xlane.f32.xlu0 %v7051_v12 }
0x286a   : > { %v7026_v13 = vpop.xlane.xlu0 %7025 }
0x286b   : > { %v7036_v29 = vsub.f32 %v6869_v19, %v7026_v13 }
0x286d   : > { %v7040_v28 = vmul.f32 1.442695, %v7036_v29 }
0x286f   : > { %12754 = vpow2.f32 %v7040_v28  ;;  %v5822_v28 = vld [vmem:[#allocation19 + $0x18] sm:$0xf] }
0x2872   : > { %v7032_v31 = vpop.xlane.xlu0 %7031 }
0x2873   : > { %v7038_v38 = vsub.f32 %v6969_v10, %v7032_v31  ;;  %v7273_v31 = vsel %vm1505_vm12, %v5822_v28, 0 }
0x2875   : > { %v7044_v8 = vmul.f32 1.442695, %v7038_v38 }
0x2876   : > { %v7035_v9 = vpop.xlane.xlu0 %7034 }
0x2877   : > { %12756 = vpow2.f32 %v7044_v8  ;;  %v7039_v40 = vsub.f32 %v7019_v20, %v7035_v9 }
0x2879   : > { %v7046_v50 = vmul.f32 1.442695, %v7039_v40 }
0x287a   : > { %v7053_v5 = vpop.xlane.xlu0 %7052 }
0x287b   : > { %12758 = vpow2.f32 %v7046_v50 }
0x287c   : > { %v12755_v17 = vpop.eup %12754  ;;  %12760 = vrcp.f32 %v7053_v5 }
0x287d   : > { %v7048_v42 = vsel %vm1258_vm2, %v12755_v17, 0.0 }
0x287e   : > { %7049 = vadd.xlane.f32.xlu1 %v7048_v42 }
0x2884   : > { %v12757_v4 = vpop.eup %12756 }
0x2885   : > { %v7054_v63 = vsel %vm1258_vm2, %v12757_v4, 0.0 }
0x2886   : > { %7055 = vadd.xlane.f32.xlu1 %v7054_v63 }
0x2888   : > { %v12759_v11 = vpop.eup %12758 }
0x2889   : > { %v7057_v41 = vsel %vm1258_vm2, %v12759_v11, 0.0  ;;  %v12761_v18 = vpop.eup %12760 }
0x288a   : > { %7058 = vadd.xlane.f32.xlu0 %v7057_v41  ;;  %v7063_v55 = vmul.f32 %v12761_v18, %v12753_v16 }
0x288c   : > { %v7069_v24 = vpack.c.bf16 %v7063_v55, %v7063_v55 }
0x2897   : > { %7216 = vrot.lane.b32.xlu1 %v14776_v36, %s15712_s6 }
0x289b   : > { %7380 = vrot.lane.b32.xlu1 %v14770_v35, %s13457_s9 }
0x289f   : > { %7378 = vrot.lane.b32.xlu1 %v14770_v35, %s13458_s23 }
0x28a0   : > { %7120 = vrot.lane.b32.xlu0 %v14770_v35, %s15712_s6  ;;  %s13330_s6 = scalar_lea.vmem %s13329_s1, 1024 }
0x28a3   : > { %7480 = vrot.lane.b32.xlu1 %v14776_v36, %s13457_s9 }
0x28a4   : > { %7330 = vrot.lane.b32.xlu0 %v14764_v14, %s13457_s9 }
0x28a7   : > { %7478 = vrot.lane.b32.xlu1 %v14776_v36, %s13458_s23 }
0x28a8   : > { %7328 = vrot.lane.b32.xlu0 %v14764_v14, %s13458_s23 }
0x28ac   : > { %7430 = vrot.lane.b32.xlu0 %v14768_v33, %s13457_s9 }
0x28b0   : > { %7428 = vrot.lane.b32.xlu0 %v14768_v33, %s13458_s23 }
0x2907   : > { %v7050_v43 = vpop.xlane.xlu1 %7049 }
0x2908   : > { %12762 = vrcp.f32 %v7050_v43 }
0x290f   : > { %v7056_v6 = vpop.xlane.xlu1 %7055 }
0x2910   : > { %12764 = vrcp.f32 %v7056_v6 }
0x2913   : > { %v7059_v52 = vpop.xlane.xlu0 %7058  ;;  %v7217_v0 = vpop.permute.xlu1 %7216 }
0x2914   : > { %12766 = vrcp.f32 %v7059_v52  ;;  %v7222_v7 = vsel %vm1505_vm12, %v7217_v0, 0 }
0x2915   : > { %v12763_v53 = vpop.eup %12762 }
0x2916   : > { %v7061_v45 = vmul.f32 %v12763_v53, %v12755_v17 }
0x2917   : > { %v7121_v22 = vpop.permute.xlu0 %7120  ;;  %v7381_v63 = vpop.permute.xlu1 %7380 }
0x2918   : > { %v7068_v1 = vpack.c.bf16 %v7061_v45, %v7061_v45  ;;  %v7126_v19 = vsel %vm1505_vm12, %v7121_v22, 0  ;;  %v7386_v55 = vsel %vm1258_vm2, %v7381_v63, 0 }
0x2919   : > { %11959 = vmatpush3.bf16.msra.mxu0 %v7126_v19 }
0x291a   : > { %11955 = vmatmul.mubr.msk.bf16.vlgmr.msra.gmra.mxu1 %vm1258_vm2, %v7068_v1  ;;  %11970 = vmatprep.subr.bf16.mxu0 %v13446_v62 }
0x291b   : > { %11965 = vmatpush3.bf16.msra.mxu1 %v7174_v61  ;;  %11966 = vmatprep.mubr.msk.bf16.mxu1 %vm13447_vm1, %v13446_v62  ;;  %v7331_v15 = vpop.permute.xlu0 %7330  ;;  %v7379_v6 = vpop.permute.xlu1 %7378 }
0x291c   : > { %11961 = vmatmul.mubr.msk.bf16.vlgmr.msra.gmra.mxu0 %vm1258_vm2, %v7069_v24  ;;  %v7336_v16 = vsel %vm1258_vm2, %v7331_v15, 0  ;;  %12306 = vmatprep.subr.msk.bf16.mxu1 %vm1505_vm12, %v5822_v28 }
0x291d   : > { %v12765_v47 = vpop.eup %12764  ;;  %11971 = vmatpush3.bf16.msra.mxu0 %v7222_v7  ;;  %11972 = vmatprep.mubr.msk.bf16.mxu0 %vm13447_vm1, %v13446_v62 }
0x291e   : > { %v7065_v10 = vmul.f32 %v12765_v47, %v12757_v4  ;;  %11982 = vmatprep.subr.bf16.mxu0 %v13446_v62 }
0x291f   : > { %v7329_v37 = vpop.permute.xlu0 %7328  ;;  %v7481_v1 = vpop.permute.xlu1 %7480 }
0x2920   : > { %v7070_v20 = vpack.c.bf16 %v7065_v10, %v7065_v10  ;;  %v7486_v24 = vsel %vm1258_vm2, %v7481_v1, 0 }
0x2921   : > { %v12767_v21 = vpop.eup %12766 }
0x2922   : > { %v7067_v44 = vmul.f32 %v12767_v21, %v12759_v11  ;;  %11967 = vmatmul.mubr.msk.bf16.vlgmr.msra.gmra.mxu1 %vm1258_vm2, %v7070_v20 }
0x2923   : > { %v7431_v12 = vpop.permute.xlu0 %7430  ;;  %11977 = vmatpush3.bf16.msra.mxu1 %v7273_v31 }
0x2924   : > { %v7071_v59 = vpack.c.bf16 %v7067_v44, %v7067_v44  ;;  %v7436_v13 = vsel %vm1258_vm2, %v7431_v12, 0  ;;  %11988 = vmatprep.subr.bf16.mxu1 %v13446_v62 }
0x2926   : > { %11973 = vmatmul.mubr.msk.bf16.vlgmr.msra.gmra.mxu0 %vm1258_vm2, %v7071_v59 }
0x2927   : > { %11983 = vmatpush3.bf16.xpose.msra.mxu0 %v7336_v16  ;;  %11984 = vmatprep.mubr.msk.bf16.mxu0 %vm13447_vm1, %v13446_v62  ;;  %v7429_v29 = vpop.permute.xlu0 %7428 }
0x2928   : > { %11994 = vmatprep.subr.bf16.mxu0 %v13446_v62 }
0x292e   : > { %11985 = vmatmul.mubr.msk.bf16.vlgmr.msra.gmra.mxu0 %vm1258_vm2, %v7329_v37 }
0x292f   : > { %11995 = vmatpush3.bf16.xpose.msra.mxu0 %v7436_v13  ;;  %11996 = vmatprep.mubr.msk.bf16.mxu0 %vm13447_vm1, %v13446_v62 }
0x2930   : > { %12006 = vmatprep.subr.bf16.mxu0 %v13446_v62 }
0x2936   : > { %11997 = vmatmul.mubr.msk.bf16.vlgmr.msra.gmra.mxu0 %vm1258_vm2, %v7429_v29 }
0x2937   : > { %12008 = vmatprep.mubr.msk.bf16.mxu0 %vm13447_vm1, %v13446_v62 }
0x29da   : > { %v7114_v38 = vpop.f32.mrf.mxu1 }
0x29dc   : > { %v11956_v8 = vpop.f32.mrf.mxu1  ;;  %v7162_v9 = vpop.f32.mrf.mxu0 }
0x29dd   : > { %v7264_v40 = vpack.c.bf16 %v7162_v9, %v7114_v38  ;;  %v6810_v8 = vadd.f32 %v14976_v49, %v15000_v30 }
0x29de   : > { %v7117_v50 = vpop.f32.mrf.mxu1  ;;  %v11962_v17 = vpop.f32.mrf.mxu0 }
0x29df   : > { %11978 = vmatprep.mubr.msk.bf16.mxu1 %vm1258_vm2, %v7264_v40  ;;  %v6821_v50 = vadd.f32 %v14980_v51, %v15002_v2 }
0x29e0   : > { %v11957_v42 = vpop.f32.mrf.mxu1  ;;  %v7165_v4 = vpop.f32.mrf.mxu0 }
0x29e2   : > { %v11963_v11 = vpop.f32.mrf.mxu0  ;;  %v7210_v41 = vpop.f32.mrf.mxu1 }
0x29e4   : > { %v11968_v23 = vpop.f32.mrf.mxu1 }
0x29e6   : > { %v7213_v5 = vpop.f32.mrf.mxu1  ;;  %v7258_v43 = vpop.f32.mrf.mxu0 }
0x29e7   : > { %v7265_v18 = vpack.c.bf16 %v7258_v43, %v7210_v41 }
0x29e8   : > { %v11969_v52 = vpop.f32.mrf.mxu1  ;;  %v11974_v53 = vpop.f32.mrf.mxu0 }
0x29e9   : > { %11979 = vmatmul.mubr.msk.bf16.vlgmr.msra.gmra.mxu1 %vm1258_vm2, %v7265_v18 }
0x29ea   : > { %11989 = vmatpush3.bf16.xpose.msra.mxu1 %v7386_v55  ;;  %v7261_v45 = vpop.f32.mrf.mxu0  ;;  %11990 = vmatprep.mubr.msk.bf16.mxu1 %vm13447_vm1, %v13446_v62 }
0x29eb   : > { %12000 = vmatprep.subr.bf16.mxu1 %v13446_v62 }
0x29ec   : > { %v11975_v22 = vpop.f32.mrf.mxu0 }
0x29ee   : > { %v7372_v19 = vpop.f32.mrf.mxu0 }
0x29ef   : > { %v7373_v0 = vadd.f32 %v7372_v19, %v13958_v27  ;;  %v7479_v27 = vpop.permute.xlu1 %7478 }
0x29f0   : > { %v11986_v61 = vpop.f32.mrf.mxu0 }
0x29f1   : > { %11991 = vmatmul.mubr.msk.bf16.vlgmr.msra.gmra.mxu1 %vm1258_vm2, %v7379_v6  ;;  %v7528_v7 = vsel %vm1258_vm2, %v7373_v0, -inf }
0x29f2   : > { %12001 = vmatpush3.bf16.xpose.msra.mxu1 %v7486_v24  ;;  %7529 = vmax.xlane.f32.xlu0 %v7528_v7  ;;  %v7375_v47 = vpop.f32.mrf.mxu0 }
0x29f3   : > { %12002 = vmatprep.mubr.msk.bf16.mxu1 %vm13447_vm1, %v13446_v62  ;;  %12012 = vmatprep.subr.bf16.mxu1 %v13446_v62 }
0x29f4   : > { %v11987_v10 = vpop.f32.mrf.mxu0 }
0x29f6   : > { %v7472_v15 = vpop.f32.mrf.mxu0 }
0x29f7   : > { %v7473_v20 = vadd.f32 %v7472_v15, %v13973_v39  ;;  %v6818_v39 = vadd.f32 %v14974_v26, %v14998_v58 }
0x29f8   : > { %v11998_v21 = vpop.f32.mrf.mxu0 }
0x29f9   : > { %12003 = vmatmul.mubr.msk.bf16.vlgmr.msra.gmra.mxu1 %vm1258_vm2, %v7479_v27  ;;  %v7534_v44 = vsel %vm1258_vm2, %v7473_v20, -inf }
0x29fa   : > { %7535 = vmax.xlane.f32.xlu0 %v7534_v44  ;;  %v7475_v59 = vpop.f32.mrf.mxu0  ;;  %12014 = vmatprep.mubr.msk.bf16.mxu1 %vm13447_vm1, %v13446_v62 }
0x29fc   : > { %v11999_v37 = vpop.f32.mrf.mxu0 }
0x2a7b   : > { %v7530_v16 = vpop.xlane.xlu0 %7529 }
0x2a7c   : > { %v7540_v12 = vsub.f32 %v7373_v0, %v7530_v16 }
0x2a7e   : > { %v7544_v29 = vmul.f32 1.442695, %v7540_v12 }
0x2a80   : > { %12768 = vpow2.f32 %v7544_v29 }
0x2a83   : > { %v7536_v13 = vpop.xlane.xlu0 %7535 }
0x2a84   : > { %v7542_v28 = vsub.f32 %v7473_v20, %v7536_v13 }
0x2a86   : > { %v7548_v31 = vmul.f32 1.442695, %v7542_v28 }
0x2a88   : > { %12770 = vpow2.f32 %v7548_v31 }
0x2a8d   : > { %v12769_v30 = vpop.eup %12768 }
0x2a8e   : > { %v7552_v51 = vsel %vm1258_vm2, %v12769_v30, 0.0 }
0x2a95   : > { %v12771_v2 = vpop.eup %12770 }
0x2a96   : > { %v7558_v18 = vsel %vm1258_vm2, %v12771_v2, 0.0 }
0x2aa9   : > { %v11980_v38 = vpop.f32.mrf.mxu1 }
0x2aaa   : > { %v15086_v9 = vadd.f32 %v11980_v38, %v6818_v39 }
0x2aab   : > { %v7309_v40 = vpop.f32.mrf.mxu1 }
0x2aac   : > { %v15090_v17 = vadd.f32 %v7309_v40, %v6810_v8 }
0x2aad   : > { %v11981_v42 = vpop.f32.mrf.mxu1 }
0x2aae   : > { %v15092_v4 = vadd.f32 %v11981_v42, %v6821_v50 }
0x2aaf   : > { %v15094_v63 = vpop.f32.mrf.mxu1 }
0x2ab1   : > { %v7422_v26 = vpop.f32.mrf.mxu1 }
0x2ab2   : > { %v7423_v58 = vadd.f32 %v7422_v26, %v13965_v32 }
0x2ab3   : > { %v11992_v11 = vpop.f32.mrf.mxu1 }
0x2ab4   : > { %v7531_v49 = vsel %vm1258_vm2, %v7423_v58, -inf }
0x2ab5   : > { %7532 = vmax.xlane.f32.xlu1 %v7531_v49  ;;  %v7425_v41 = vpop.f32.mrf.mxu1 }
0x2ab7   : > { %v11993_v23 = vpop.f32.mrf.mxu1 }
0x2ab9   : > { %7553 = vadd.xlane.f32.xlu1 %v7552_v51  ;;  %v7522_v5 = vpop.f32.mrf.mxu1  ;;  %v5823_v51 = vld [vmem:[#allocation19 + $0x1c] sm:$0xf] }
0x2aba   : > { %v7523_v43 = vadd.f32 %v7522_v5, %v13980_v46 }
0x2abb   : > { %v12004_v6 = vpop.f32.mrf.mxu1 }
0x2abc   : > { %v7537_v52 = vsel %vm1258_vm2, %v7523_v43, -inf }
0x2abd   : > { %7559 = vadd.xlane.f32.xlu1 %v7558_v18  ;;  %7538 = vmax.xlane.f32.xlu0 %v7537_v52  ;;  %v7525_v32 = vpop.f32.mrf.mxu1 }
0x2abf   : > { %v12005_v53 = vpop.f32.mrf.mxu1 }
0x2ace   : > { %7576 = vrot.lane.b32.xlu1 %v14764_v14, %s15713_s0 }
0x2ad2   : > { %7672 = vrot.lane.b32.xlu1 %v14768_v33, %s15713_s0 }
0x2ad6   : > { %7720 = vrot.lane.b32.xlu1 %v14776_v36, %s15713_s0 }
0x2b3e   : > { %v7533_v55 = vpop.xlane.xlu1 %7532 }
0x2b3f   : > { %v7541_v46 = vsub.f32 %v7423_v58, %v7533_v55 }
0x2b41   : > { %v7546_v45 = vmul.f32 1.442695, %v7541_v46 }
0x2b42   : > { %v7554_v22 = vpop.xlane.xlu1 %7553 }
0x2b43   : > { %12772 = vpow2.f32 %v7546_v45 }
0x2b44   : > { %12774 = vrcp.f32 %v7554_v22 }
0x2b46   : > { %v7539_v1 = vpop.xlane.xlu0 %7538  ;;  %v7560_v19 = vpop.xlane.xlu1 %7559 }
0x2b47   : > { %v7543_v0 = vsub.f32 %v7523_v43, %v7539_v1  ;;  %12776 = vrcp.f32 %v7560_v19 }
0x2b49   : > { %v7550_v61 = vmul.f32 1.442695, %v7543_v0  ;;  %v6813_v0 = vadd.f32 %v14985_v57, %v15004_v56 }
0x2b4a   : > { %v7577_v24 = vpop.permute.xlu1 %7576 }
0x2b4b   : > { %12778 = vpow2.f32 %v7550_v61  ;;  %v7582_v14 = vsel %vm1505_vm12, %v7577_v24, 0 }
0x2b4c   : > { %12007 = vmatpush3.bf16.msra.mxu0 %v7582_v14  ;;  %v7325_v14 = vadd.f32 %v15094_v63, %v6813_v0 }
0x2b4d   : > { %12018 = vmatprep.subr.bf16.mxu0 %v13446_v62 }
0x2b4e   : > { %v7673_v10 = vpop.permute.xlu1 %7672 }
0x2b4f   : > { %v7678_v27 = vsel %vm1505_vm12, %v7673_v10, 0 }
0x2b50   : > { %v12773_v33 = vpop.eup %12772 }
0x2b51   : > { %v12775_v36 = vpop.eup %12774  ;;  %v7555_v7 = vsel %vm1258_vm2, %v12773_v33, 0.0 }
0x2b52   : > { %v7565_v47 = vmul.f32 %v12775_v36, %v12769_v30  ;;  %7556 = vadd.xlane.f32.xlu0 %v7555_v7  ;;  %v7721_v31 = vpop.permute.xlu1 %7720 }
0x2b53   : > { %v7726_v8 = vsel %vm1505_vm12, %v7721_v31, 0 }
0x2b54   : > { %v7572_v15 = vpack.c.bf16 %v7565_v47, %v7565_v47  ;;  %v12777_v20 = vpop.eup %12776  ;;  %v10889_v47 = vld [vmem:[#allocation20 + $0x1] ss:$0 sm:$0xff] }
0x2b55   : > { %v7569_v44 = vmul.f32 %v12777_v20, %v12771_v2  ;;  %v7777_v2 = vsel %vm1505_vm12, %v5823_v51, 0 }
0x2b56   : > { %12009 = vmatmul.mubr.msk.bf16.vlgmr.msra.gmra.mxu0 %vm1258_vm2, %v7572_v15 }
0x2b57   : > { %12019 = vmatpush3.bf16.msra.mxu0 %v7678_v27  ;;  %12020 = vmatprep.mubr.msk.bf16.mxu0 %vm13447_vm1, %v13446_v62  ;;  %v7574_v37 = vpack.c.bf16 %v7569_v44, %v7569_v44 }
0x2b58   : > { %v12779_v21 = vpop.eup %12778  ;;  %12307 = vmatprep.subr.msk.bf16.mxu0 %vm1505_vm12, %v5823_v51 }
0x2b59   : > { %v7561_v59 = vsel %vm1258_vm2, %v12779_v21, 0.0 }
0x2b5a   : > { %7562 = vadd.xlane.f32.xlu0 %v7561_v59 }
0x2b5e   : > { %12021 = vmatmul.mubr.msk.bf16.vlgmr.msra.gmra.mxu0 %vm1258_vm2, %v7574_v37 }
0x2b5f   : > { %12031 = vmatpush3.bf16.msra.mxu0 %v7777_v2 }
0x2b60   : > { %12044 = vmatprep.subr.bf16.mxu0 %v13446_v62 }
0x2b70   : > { %7624 = vrot.lane.b32.xlu0 %v14770_v35, %s15713_s0 }
0x2bdb   : > { %v7557_v16 = vpop.xlane.xlu0 %7556 }
0x2bdc   : > { %12780 = vrcp.f32 %v7557_v16 }
0x2be3   : > { %v7563_v12 = vpop.xlane.xlu0 %7562 }
0x2be4   : > { %12782 = vrcp.f32 %v7563_v12 }
0x2be7   : > { %v7625_v13 = vpop.permute.xlu0 %7624 }
0x2be8   : > { %v7630_v29 = vsel %vm1505_vm12, %v7625_v13, 0 }
0x2be9   : > { %v12781_v28 = vpop.eup %12780  ;;  %12013 = vmatpush3.bf16.msra.mxu1 %v7630_v29 }
0x2bea   : > { %v7567_v39 = vmul.f32 %v12781_v28, %v12773_v33  ;;  %12024 = vmatprep.subr.bf16.mxu1 %v13446_v62 }
0x2bec   : > { %v7573_v38 = vpack.c.bf16 %v7567_v39, %v7567_v39 }
0x2bee   : > { %12015 = vmatmul.mubr.msk.bf16.vlgmr.msra.gmra.mxu1 %vm1258_vm2, %v7573_v38 }
0x2bef   : > { %12025 = vmatpush3.bf16.msra.mxu1 %v7726_v8  ;;  %12026 = vmatprep.mubr.msk.bf16.mxu1 %vm13447_vm1, %v13446_v62 }
0x2bf1   : > { %v12783_v35 = vpop.eup %12782 }
0x2bf2   : > { %v7571_v40 = vmul.f32 %v12783_v35, %v12779_v21 }
0x2bf4   : > { %v7575_v50 = vpack.c.bf16 %v7571_v40, %v7571_v40 }
0x2bf6   : > { %12027 = vmatmul.mubr.msk.bf16.vlgmr.msra.gmra.mxu1 %vm1258_vm2, %v7575_v50 }
0x2c16   : > { %v7618_v42 = vpop.f32.mrf.mxu0 }
0x2c18   : > { %v12010_v26 = vpop.f32.mrf.mxu0 }
0x2c1a   : > { %v7621_v58 = vpop.f32.mrf.mxu0 }
0x2c1b   : > { %v12548_v58 = vld [vmem:[#allocation25 + $0x18] sm:$0xff]  }
0x2c1c   : > { %v12011_v11 = vpop.f32.mrf.mxu0 }
0x2c1d   : > { %v12549_v11 = vld [vmem:[#allocation25 + $0x10] sm:$0xff]  }
0x2c1e   : > { %v7714_v49 = vpop.f32.mrf.mxu0 }
0x2c20   : > { %v12022_v30 = vpop.f32.mrf.mxu0 }
0x2c21   : > { %v12551_v30 = vld [vmem:[#allocation22 + $0x10] sm:$0xff]  }
0x2c22   : > { %v7717_v41 = vpop.f32.mrf.mxu0 }
0x2c24   : > { %v12023_v23 = vpop.f32.mrf.mxu0 }
0x2cae   : > { %v7666_v5 = vpop.f32.mrf.mxu1 }
0x2caf   : > { %v7768_v43 = vpack.c.bf16 %v7666_v5, %v7618_v42 }
0x2cb0   : > { %v12016_v6 = vpop.f32.mrf.mxu1 }
0x2cb1   : > { %12032 = vmatprep.mubr.msk.bf16.mxu0 %vm1258_vm2, %v7768_v43 }
0x2cb2   : > { %v7669_v18 = vpop.f32.mrf.mxu1 }
0x2cb4   : > { %v12017_v52 = vpop.f32.mrf.mxu1 }
0x2cb6   : > { %v7762_v32 = vpop.f32.mrf.mxu1 }
0x2cb7   : > { %v7769_v53 = vpack.c.bf16 %v7762_v32, %v7714_v49  ;;  %v12550_v49 = vld [vmem:[#allocation22 + $0x18] sm:$0xff]  }
0x2cb8   : > { %v12028_v55 = vpop.f32.mrf.mxu1  ;;  %12036 = vmatprep.subr.bf16.mxu1 %v12550_v49 }
0x2cb9   : > { %12033 = vmatmul.mubr.msk.bf16.vlgmr.msra.gmra.mxu0 %vm1258_vm2, %v7769_v53  ;;  %12037 = vmatpush3.bf16.msra.mxu1 %v12550_v49 }
0x2cba   : > { %v7765_v46 = vpop.f32.mrf.mxu1  ;;  %12048 = vmatprep.mubr.msk.bf16.mxu0 %vm13447_vm1, %v13446_v62  ;;  %12045 = vmatpush3.bf16.msra.mxu0 %v12548_v58 }
0x2cbb   : > { %12046 = vmatprep.subr.bf16.mxu0 %v13446_v62  ;;  %12038 = vmatprep.subr.bf16.mxu1 %v12551_v30 }
0x2cbc   : > { %v12029_v45 = vpop.f32.mrf.mxu1 }
0x2cbd   : > { %12039 = vmatpush3.bf16.msra.mxu1 %v12551_v30  ;;  %v10890_v45 = vld [vmem:[#allocation10 + $0x1] ss:$0 sm:$0xff] }
0x2cbe   : > { %12047 = vmatpush3.bf16.msra.mxu0 %v12549_v11  ;;  %12052 = vmatprep.subr.bf16.mxu1 %v13446_v62 }
0x2cbf   : > { %12058 = vmatprep.subr.bf16.mxu0 %v13446_v62 }
0x2cc1   : > { %12049 = vmatmul.mubr.msk.bf16.vlgmr.msra.gmra.mxu0 %vm1093_vm0, %v14349_v25 }
0x2cc2   : > { %12060 = vmatprep.mubr.msk.bf16.mxu0 %vm13447_vm1, %v13446_v62 }
0x2d79   : > { %v12034_v22 = vpop.f32.mrf.mxu0 }
0x2d7a   : > { %v7830_v1 = vadd.f32 %v12034_v22, %v15086_v9 }
0x2d7b   : > { %v7813_v19 = vpop.f32.mrf.mxu0 }
0x2d7c   : > { %v7828_v61 = vadd.f32 %v7813_v19, %v15090_v17  ;;  %v7834_v33 = vadd.f32 %v7830_v1, %v14732_v48 }
0x2d7d   : > { %v12035_v24 = vpop.f32.mrf.mxu0 }
0x2d7e   : > { %v7832_v36 = vadd.f32 %v7828_v61, %v14735_v3  ;;  %v7831_v7 = vadd.f32 %v12035_v24, %v15092_v4  ;;  %v15143_v20 = vadd.f32 %v10889_v47, %v7834_v33  ;;  %v10891_v24 = vld [vmem:[#allocation11 + $0x1] ss:$0 sm:$0xff] }
0x2d7f   : > { %v7816_v10 = vpop.f32.mrf.mxu0 }
0x2d80   : > { %v15141_v15 = vadd.f32 %v10889_v47, %v7832_v36  ;;  %v7829_v9 = vadd.f32 %v7816_v10, %v7325_v14  ;;  %v7835_v57 = vadd.f32 %v7831_v7, %v14745_v60  ;;  %v7858_v4 = vsel %vm1093_vm0, %v15143_v20, 0.0 }
0x2d82   : > { %v7833_v56 = vadd.f32 %v7829_v9, %v14741_v54  ;;  %v7852_v17 = vsel %vm1093_vm0, %v15141_v15, 0.0  ;;  %v15151_v3 = vadd.f32 %v10889_v47, %v7835_v57 }
0x2d83   : > { %7853 = vadd.xlane.f32.xlu0 %v7852_v17 }
0x2d84   : > { %v15149_v48 = vadd.f32 %v10889_v47, %v7833_v56  ;;  %v7861_v60 = vsel %vm1093_vm0, %v15151_v3, 0.0 }
0x2d86   : > { %v7855_v63 = vsel %vm1093_vm0, %v15149_v48, 0.0 }
0x2d87   : > { %7859 = vadd.xlane.f32.xlu0 %v7858_v4  ;;  %7856 = vadd.xlane.f32.xlu1 %v7855_v63  ;;  %v10897_v63 = vld [vmem:[#allocation26 + $0x1] ss:$0 sm:$0xff] }
0x2d8b   : > { %7862 = vadd.xlane.f32.xlu0 %v7861_v60  ;;  %v8065_v60 = vpop.f32.mrf.mxu0 }
0x2e0c   : > { %v7854_v54 = vpop.xlane.xlu0 %7853 }
0x2e0d   : > { %v7864_v27 = vmul.f32 0.03125, %v7854_v54  ;;  %v12050_v54 = vpop.f32.mrf.mxu0 }
0x2e0f   : > { %v7868_v21 = vsub.f32 %v15141_v15, %v7864_v27  ;;  %v8066_v27 = vadd.f32 %v10897_v63, %v8065_v60 }
0x2e10   : > { %v7860_v44 = vpop.xlane.xlu0 %7859  ;;  %v7857_v59 = vpop.xlane.xlu1 %7856 }
0x2e11   : > { %v7866_v37 = vmul.f32 0.03125, %v7860_v44  ;;  %v7865_v16 = vmul.f32 0.03125, %v7857_v59  ;;  %v7872_v12 = vmul.f32 %v7868_v21, %v7868_v21 }
0x2e13   : > { %v7870_v13 = vsub.f32 %v15143_v20, %v7866_v37  ;;  %v7869_v29 = vsub.f32 %v15149_v48, %v7865_v16  ;;  %v7876_v28 = vsel %vm1093_vm0, %v7872_v12, 0.0 }
0x2e14   : > { %v7863_v39 = vpop.xlane.xlu0 %7862  ;;  %7877 = vadd.xlane.f32.xlu1 %v7876_v28 }
0x2e15   : > { %v7867_v31 = vmul.f32 0.03125, %v7863_v39  ;;  %v7874_v38 = vmul.f32 %v7870_v13, %v7870_v13  ;;  %v7873_v8 = vmul.f32 %v7869_v29, %v7869_v29 }
0x2e17   : > { %v7871_v35 = vsub.f32 %v15151_v3, %v7867_v31  ;;  %v7882_v40 = vsel %vm1093_vm0, %v7874_v38, 0.0  ;;  %v7879_v50 = vsel %vm1093_vm0, %v7873_v8, 0.0 }
0x2e18   : > { %7883 = vadd.xlane.f32.xlu1 %v7882_v40  ;;  %7880 = vadd.xlane.f32.xlu0 %v7879_v50 }
0x2e19   : > { %v7875_v42 = vmul.f32 %v7871_v35, %v7871_v35 }
0x2e1b   : > { %v7885_v26 = vsel %vm1093_vm0, %v7875_v42, 0.0 }
0x2e1c   : > { %7886 = vadd.xlane.f32.xlu0 %v7885_v26 }
0x2e9d   : > { %v7878_v41 = vpop.xlane.xlu1 %7877 }
0x2e9e   : > { %v7888_v23 = vmul.f32 0.03125, %v7878_v41 }
0x2ea0   : > { %v7892_v51 = vadd.f32 1e-05, %v7888_v23 }
0x2ea1   : > { %v7881_v2 = vpop.xlane.xlu0 %7880  ;;  %v7884_v5 = vpop.xlane.xlu1 %7883 }
0x2ea2   : > { %12784 = vrsqrt.f32 %v7892_v51  ;;  %v7889_v43 = vmul.f32 0.03125, %v7881_v2  ;;  %v7890_v6 = vmul.f32 0.03125, %v7884_v5 }
0x2ea4   : > { %v7893_v25 = vadd.f32 1e-05, %v7889_v43  ;;  %v7894_v18 = vadd.f32 1e-05, %v7890_v6 }
0x2ea5   : > { %v7887_v52 = vpop.xlane.xlu0 %7886 }
0x2ea6   : > { %12786 = vrsqrt.f32 %v7893_v25  ;;  %v7891_v32 = vmul.f32 0.03125, %v7887_v52 }
0x2ea7   : > { %12788 = vrsqrt.f32 %v7894_v18 }
0x2ea8   : > { %v7895_v53 = vadd.f32 1e-05, %v7891_v32 }
0x2eaa   : > { %12790 = vrsqrt.f32 %v7895_v53 }
0x2eaf   : > { %v12785_v55 = vpop.eup %12784 }
0x2eb0   : > { %v7900_v46 = vmul.f32 %v12785_v55, %v7868_v21  ;;  %v8068_v21 = vpop.f32.mrf.mxu0 }
0x2eb1   : > { %v8069_v44 = vadd.f32 %v10897_v63, %v8068_v21 }
0x2eb2   : > { %v7910_v0 = vmul.f32 %v10890_v45, %v7900_v46  ;;  %v12051_v59 = vpop.f32.mrf.mxu0 }
0x2eb3   : > { %v12787_v22 = vpop.eup %12786  ;;  %v15178_v37 = vpack.c.bf16 %v8069_v44, %v8066_v27 }
0x2eb4   : > { %v12789_v1 = vpop.eup %12788  ;;  %v7901_v19 = vmul.f32 %v12787_v22, %v7869_v29  ;;  %v7920_v47 = vadd.f32 %v10891_v24, %v7910_v0 }
0x2eb5   : > { %v7902_v61 = vmul.f32 %v12789_v1, %v7870_v13  ;;  %v8086_v16 = vsel %vm1258_vm2, %v15178_v37, 0  ;;  %v10892_v13 = vld [vmem:[#allocation23 + $0x1] ss:$0 sm:$0xff] }
0x2eb6   : > { %v7911_v14 = vmul.f32 %v10890_v45, %v7901_v19  ;;  %12059 = vmatpush3.bf16.xpose.msra.mxu0 %v8086_v16 }
0x2eb7   : > { %v12791_v33 = vpop.eup %12790  ;;  %v7912_v7 = vmul.f32 %v10890_v45, %v7902_v61  ;;  %12070 = vmatprep.subr.bf16.mxu0 %v13446_v62 }
0x2eb8   : > { %v7903_v36 = vmul.f32 %v12791_v33, %v7871_v35  ;;  %v7921_v10 = vadd.f32 %v10891_v24, %v7911_v14 }
0x2eb9   : > { %v7922_v56 = vadd.f32 %v10891_v24, %v7912_v7 }
0x2eba   : > { %v7913_v9 = vmul.f32 %v10890_v45, %v7903_v36  ;;  %v7924_v57 = vpack.c.bf16 %v7921_v10, %v7920_v47 }
0x2ebc   : > { %v7923_v17 = vadd.f32 %v10891_v24, %v7913_v9  ;;  %12040 = vmatprep.mubr.msk.bf16.mxu1 %vm1093_vm0, %v7924_v57 }
0x2ebe   : > { %v7925_v4 = vpack.c.bf16 %v7923_v17, %v7922_v56 }
0x2ec0   : > { %12041 = vmatmul.mubr.msk.bf16.vlgmr.msra.gmra.mxu1 %vm1093_vm0, %v7925_v4 }
0x2ec1   : > { %12054 = vmatprep.mubr.msk.bf16.mxu1 %vm13447_vm1, %v13446_v62  ;;  %12053 = vmatpush3.bf16.xpose.msra.mxu1 %v8086_v16 }
0x2ec2   : > { %12064 = vmatprep.subr.bf16.mxu1 %v13446_v62 }
0x2f80   : > { %v12042_v12 = vpop.f32.mrf.mxu1 }
0x2f81   : > { %v8000_v35 = vadd.f32 %v12042_v12, %v10892_v13 }
0x2f82   : > { %v7991_v29 = vpop.f32.mrf.mxu1 }
0x2f83   : > { %v7992_v28 = vadd.f32 %v10892_v13, %v7991_v29  ;;  %v15197_v50 = vpack.c.bf16 %v8000_v35, %v8000_v35 }
0x2f84   : > { %v12043_v39 = vpop.f32.mrf.mxu1 }
0x2f85   : > { %v15184_v31 = vpack.c.bf16 %v7992_v28, %v7992_v28  ;;  %v8003_v42 = vadd.f32 %v12043_v39, %v10892_v13 }
0x2f86   : > { %v7994_v38 = vpop.f32.mrf.mxu1 }
0x2f87   : > { %v7995_v8 = vadd.f32 %v10892_v13, %v7994_v38  ;;  %12055 = vmatmul.mubr.msk.bf16.vlgmr.msra.gmra.mxu1 %vm1258_vm2, %v15184_v31  ;;  %v15204_v26 = vpack.c.bf16 %v8003_v42, %v8003_v42 }
0x2f88   : > { %12065 = vmatpush3.bf16.xpose.msra.mxu1 %v8086_v16  ;;  %12066 = vmatprep.mubr.msk.bf16.mxu1 %vm13447_vm1, %v13446_v62 }
0x2f89   : > { %v15190_v40 = vpack.c.bf16 %v7995_v8, %v7995_v8  ;;  %12076 = vmatprep.subr.bf16.mxu1 %v13446_v62 }
0x2f8b   : > { %12061 = vmatmul.mubr.msk.bf16.vlgmr.msra.gmra.mxu0 %vm1258_vm2, %v15190_v40 }
0x2f8c   : > { %12071 = vmatpush3.bf16.xpose.msra.mxu0 %v8086_v16  ;;  %12072 = vmatprep.mubr.msk.bf16.mxu0 %vm13447_vm1, %v13446_v62 }
0x2f8d   : > { %12082 = vmatprep.subr.bf16.mxu0 %v13446_v62 }
0x2f8f   : > { %12067 = vmatmul.mubr.msk.bf16.vlgmr.msra.gmra.mxu1 %vm1258_vm2, %v15197_v50 }
0x2f90   : > { %12078 = vmatprep.mubr.msk.bf16.mxu1 %vm13447_vm1, %v13446_v62 }
0x2f93   : > { %12073 = vmatmul.mubr.msk.bf16.vlgmr.msra.gmra.mxu0 %vm1258_vm2, %v15204_v26 }
0x2f94   : > { %12084 = vmatprep.mubr.msk.bf16.mxu0 %vm13447_vm1, %v13446_v62 }
0x3047   : > { %v8122_v58 = vpop.f32.mrf.mxu1 }
0x3048   : > { %v8123_v11 = vadd.f32 %v8122_v58, %v14396_v34 }
0x3049   : > { %v12056_v49 = vpop.f32.mrf.mxu1 }
0x304a   : > { %v8257_v30 = vsel %vm3682_vm14, %v8123_v11, -inf }
0x304b   : > { %v8165_v41 = vpop.f32.mrf.mxu0  ;;  %8258 = vmax.xlane.f32.xlu1 %v8257_v30  ;;  %v8125_v23 = vpop.f32.mrf.mxu1 }
0x304c   : > { %v8166_v51 = vadd.f32 %v8165_v41, %v14396_v34 }
0x304d   : > { %v12057_v2 = vpop.f32.mrf.mxu1  ;;  %v12062_v5 = vpop.f32.mrf.mxu0 }
0x304e   : > { %v8260_v43 = vsel %vm3682_vm14, %v8166_v51, -inf }
0x304f   : > { %8261 = vmax.xlane.f32.xlu0 %v8260_v43  ;;  %v8168_v6 = vpop.f32.mrf.mxu0  ;;  %v8208_v25 = vpop.f32.mrf.mxu1 }
0x3050   : > { %v8209_v18 = vadd.f32 %v8208_v25, %v14396_v34 }
0x3051   : > { %v12063_v52 = vpop.f32.mrf.mxu0  ;;  %v12068_v32 = vpop.f32.mrf.mxu1 }
0x3052   : > { %v8263_v53 = vsel %vm3682_vm14, %v8209_v18, -inf }
0x3053   : > { %v8251_v55 = vpop.f32.mrf.mxu0  ;;  %8264 = vmax.xlane.f32.xlu1 %v8263_v53  ;;  %v8211_v46 = vpop.f32.mrf.mxu1 }
0x3054   : > { %v8252_v45 = vadd.f32 %v8251_v55, %v14396_v34 }
0x3055   : > { %v12069_v22 = vpop.f32.mrf.mxu1  ;;  %v12074_v1 = vpop.f32.mrf.mxu0 }
0x3056   : > { %v8266_v19 = vsel %vm3682_vm14, %v8252_v45, -inf }
0x3057   : > { %8267 = vmax.xlane.f32.xlu0 %v8266_v19  ;;  %v8254_v0 = vpop.f32.mrf.mxu0 }
0x3059   : > { %v12075_v61 = vpop.f32.mrf.mxu0 }
0x30d4   : > { %v8259_v24 = vpop.xlane.xlu1 %8258 }
0x30d5   : > { %v8269_v14 = vsub.f32 %v8123_v11, %v8259_v24 }
0x30d7   : > { %v8273_v33 = vmul.f32 1.442695, %v8269_v14 }
0x30d8   : > { %v8262_v36 = vpop.xlane.xlu0 %8261 }
0x30d9   : > { %12792 = vpow2.f32 %v8273_v33  ;;  %v8270_v7 = vsub.f32 %v8166_v51, %v8262_v36 }
0x30db   : > { %v8275_v47 = vmul.f32 1.442695, %v8270_v7 }
0x30dc   : > { %v8265_v27 = vpop.xlane.xlu1 %8264 }
0x30dd   : > { %12794 = vpow2.f32 %v8275_v47  ;;  %v8271_v21 = vsub.f32 %v8209_v18, %v8265_v27 }
0x30df   : > { %v8277_v44 = vmul.f32 1.442695, %v8271_v21 }
0x30e0   : > { %v8268_v10 = vpop.xlane.xlu0 %8267 }
0x30e1   : > { %v8272_v9 = vsub.f32 %v8252_v45, %v8268_v10 }
0x30e3   : > { %v8279_v57 = vmul.f32 1.442695, %v8272_v9 }
0x30e5   : > { %12796 = vpow2.f32 %v8279_v57 }
0x30e6   : > { %v12793_v56 = vpop.eup %12792  ;;  %12798 = vpow2.f32 %v8277_v44 }
0x30e7   : > { %v8281_v17 = vsel %vm3682_vm14, %v12793_v56, 0.0 }
0x30e8   : > { %8282 = vadd.xlane.f32.xlu1 %v8281_v17 }
0x30ea   : > { %v12795_v4 = vpop.eup %12794 }
0x30eb   : > { %v8284_v63 = vsel %vm3682_vm14, %v12795_v4, 0.0 }
0x30ec   : > { %8285 = vadd.xlane.f32.xlu0 %v8284_v63 }
0x30f2   : > { %v12797_v60 = vpop.eup %12796 }
0x30f3   : > { %v8290_v54 = vsel %vm3682_vm14, %v12797_v60, 0.0  ;;  %v12799_v59 = vpop.eup %12798 }
0x30f4   : > { %8291 = vadd.xlane.f32.xlu0 %v8290_v54  ;;  %v8287_v16 = vsel %vm3682_vm14, %v12799_v59, 0.0 }
0x30f9   : > { %8306 = vrot.lane.b32.xlu1 %v15178_v37, %s13448_s10  ;;  %s1038_s10 = sand.u32 1, %s13414_s11  }
0x30fa   : > { %s15572_s28 = scalar_lea.sflag [#allocation7], %s1038_s10 }
0x310a   : > { %8486 = vrot.lane.b32.xlu0 %v15178_v37, %s13452_s13 }
0x310e   : > { %8581 = vrot.lane.b32.xlu0 %v15197_v50, %s13452_s13 }
0x311d   : > { %8288 = vadd.xlane.f32.xlu1 %v8287_v16 }
0x312e   : > { %8484 = vrot.lane.b32.xlu1 %v15184_v31, %s13452_s13 }
0x3132   : > { %8535 = vrot.lane.b32.xlu1 %v15190_v40, %s13452_s13 }
0x3136   : > { %8627 = vrot.lane.b32.xlu1 %v15204_v26, %s13452_s13 }
0x3171   : > { %v8283_v12 = vpop.xlane.xlu1 %8282 }
0x3172   : > { %12800 = vrcp.f32 %v8283_v12 }
0x3175   : > { %v8286_v13 = vpop.xlane.xlu0 %8285  ;;  %v8307_v29 = vpop.permute.xlu1 %8306 }
0x3176   : > { %12802 = vrcp.f32 %v8286_v13  ;;  %12077 = vmatpush3.bf16.msra.mxu1 %v8307_v29  ;;  %12083 = vmatpush3.bf16.msra.mxu0 %v8307_v29 }
0x3177   : > { %12088 = vmatprep.subr.bf16.mxu1 %v13446_v62  ;;  %12094 = vmatprep.subr.bf16.mxu0 %v13446_v62 }
0x317d   : > { %v8292_v28 = vpop.xlane.xlu0 %8291 }
0x317e   : > { %12804 = vrcp.f32 %v8292_v28 }
0x317f   : > { %v12801_v39 = vpop.eup %12800 }
0x3180   : > { %v8294_v38 = vmul.f32 %v12801_v39, %v12793_v56 }
0x3181   : > { %v8487_v30 = vpop.permute.xlu0 %8486 }
0x3182   : > { %v8301_v8 = vpack.c.bf16 %v8294_v38, %v8294_v38  ;;  %v8492_v23 = vsel %vm1258_vm2, %v8487_v30, 0 }
0x3183   : > { %v12803_v35 = vpop.eup %12802 }
0x3184   : > { %v8296_v42 = vmul.f32 %v12803_v35, %v12795_v4  ;;  %12079 = vmatmul.mubr.msk.bf16.vlgmr.msra.gmra.mxu1 %vm3682_vm14, %v8301_v8 }
0x3185   : > { %12089 = vmatpush3.bf16.msra.mxu1 %v8307_v29  ;;  %12090 = vmatprep.mubr.msk.bf16.mxu1 %vm13447_vm1, %v13446_v62  ;;  %v8582_v52 = vpop.permute.xlu0 %8581 }
0x3186   : > { %v8302_v58 = vpack.c.bf16 %v8296_v42, %v8296_v42  ;;  %12100 = vmatprep.subr.bf16.mxu1 %v13446_v62 }
0x3188   : > { %12085 = vmatmul.mubr.msk.bf16.vlgmr.msra.gmra.mxu0 %vm3682_vm14, %v8302_v58 }
0x3189   : > { %12095 = vmatpush3.bf16.msra.mxu0 %v8307_v29  ;;  %12096 = vmatprep.mubr.msk.bf16.mxu0 %vm13447_vm1, %v13446_v62 }
0x318a   : > { %12106 = vmatprep.subr.bf16.mxu0 %v13446_v62 }
0x318b   : > { %v12805_v11 = vpop.eup %12804 }
0x318c   : > { %v8300_v49 = vmul.f32 %v12805_v11, %v12797_v60 }
0x318e   : > { %v8304_v41 = vpack.c.bf16 %v8300_v49, %v8300_v49 }
0x3190   : > { %12097 = vmatmul.mubr.msk.bf16.vlgmr.msra.gmra.mxu0 %vm3682_vm14, %v8304_v41 }
0x3191   : > { %12107 = vmatpush3.bf16.xpose.msra.mxu0 %v8492_v23  ;;  %12108 = vmatprep.mubr.msk.bf16.mxu0 %vm13447_vm1, %v13446_v62 }
0x3192   : > { %12118 = vmatprep.subr.bf16.mxu0 %v13446_v62 }
0x31a6   : > { %v8289_v51 = vpop.xlane.xlu1 %8288 }
0x31a7   : > { %12806 = vrcp.f32 %v8289_v51 }
0x31aa   : > { %v8485_v2 = vpop.permute.xlu1 %8484 }
0x31ae   : > { %v8536_v5 = vpop.permute.xlu1 %8535 }
0x31af   : > { %12109 = vmatmul.mubr.msk.bf16.vlgmr.msra.gmra.mxu0 %vm1258_vm2, %v8536_v5 }
0x31b0   : > { %12119 = vmatpush3.bf16.xpose.msra.mxu0 %v8492_v23  ;;  %12120 = vmatprep.mubr.msk.bf16.mxu0 %vm13447_vm1, %v13446_v62 }
0x31b1   : > { %12130 = vmatprep.subr.bf16.mxu0 %v13446_v62 }
0x31b2   : > { %v8628_v25 = vpop.permute.xlu1 %8627 }
0x31b4   : > { %v12807_v43 = vpop.eup %12806 }
0x31b5   : > { %v8298_v6 = vmul.f32 %v12807_v43, %v12799_v59 }
0x31b7   : > { %v8303_v18 = vpack.c.bf16 %v8298_v6, %v8298_v6  ;;  %12121 = vmatmul.mubr.msk.bf16.vlgmr.msra.gmra.mxu0 %vm1258_vm2, %v8628_v25 }
0x31b8   : > { %12132 = vmatprep.mubr.msk.bf16.mxu0 %vm13447_vm1, %v13446_v62 }
0x31b9   : > { %12091 = vmatmul.mubr.msk.bf16.vlgmr.msra.gmra.mxu1 %vm3682_vm14, %v8303_v18 }
0x31ba   : > { %12101 = vmatpush3.bf16.xpose.msra.mxu1 %v8492_v23  ;;  %12102 = vmatprep.mubr.msk.bf16.mxu1 %vm13447_vm1, %v13446_v62 }
0x31bb   : > { %12112 = vmatprep.subr.bf16.mxu1 %v13446_v62 }
0x31c1   : > { %12103 = vmatmul.mubr.msk.bf16.vlgmr.msra.gmra.mxu1 %vm1258_vm2, %v8485_v2 }
0x31c2   : > { %12113 = vmatpush3.bf16.xpose.msra.mxu1 %v8492_v23  ;;  %12114 = vmatprep.mubr.msk.bf16.mxu1 %vm13447_vm1, %v13446_v62 }
0x31c3   : > { %12124 = vmatprep.subr.bf16.mxu1 %v13446_v62 }
0x31c9   : > { %12115 = vmatmul.mubr.msk.bf16.vlgmr.msra.gmra.mxu1 %vm1258_vm2, %v8582_v52 }
0x31ca   : > { %12126 = vmatprep.mubr.msk.bf16.mxu1 %vm13447_vm1, %v13446_v62 }
0x3244   : > { %v15267_v32 = vpop.f32.mrf.mxu1 }
0x3246   : > { %v12080_v53 = vpop.f32.mrf.mxu1 }
0x3248   : > { %v8349_v55 = vpop.f32.mrf.mxu1  ;;  %v15269_v46 = vpop.f32.mrf.mxu0 }
0x3249   : > { %v8481_v45 = vpack.c.bf16 %v15269_v46, %v15267_v32 }
0x324a   : > { %v12081_v22 = vpop.f32.mrf.mxu1  ;;  %v12086_v1 = vpop.f32.mrf.mxu0 }
0x324c   : > { %v8392_v19 = vpop.f32.mrf.mxu0 }
0x324e   : > { %v12087_v0 = vpop.f32.mrf.mxu0 }
0x3250   : > { %v15273_v61 = vpop.f32.mrf.mxu0 }
0x3252   : > { %v12098_v24 = vpop.f32.mrf.mxu0 }
0x3254   : > { %v8478_v14 = vpop.f32.mrf.mxu0 }
0x3256   : > { %v12099_v33 = vpop.f32.mrf.mxu0 }
0x326f   : > { %v8574_v36 = vpop.f32.mrf.mxu0 }
0x3270   : > { %v8575_v7 = vadd.f32 %v8574_v36, %v14396_v34 }
0x3271   : > { %v12110_v47 = vpop.f32.mrf.mxu0 }
0x3272   : > { %v8675_v10 = vsel %vm3682_vm14, %v8575_v7, -inf }
0x3273   : > { %8676 = vmax.xlane.f32.xlu1 %v8675_v10  ;;  %v8577_v9 = vpop.f32.mrf.mxu0 }
0x3275   : > { %v12111_v57 = vpop.f32.mrf.mxu0 }
0x3277   : > { %v8666_v56 = vpop.f32.mrf.mxu0 }
0x3278   : > { %v8667_v35 = vadd.f32 %v8666_v56, %v14396_v34 }
0x3279   : > { %v15277_v17 = vpop.f32.mrf.mxu1  ;;  %v12122_v4 = vpop.f32.mrf.mxu0 }
0x327a   : > { %v8482_v63 = vpack.c.bf16 %v15273_v61, %v15277_v17  ;;  %v8681_v49 = vsel %vm3682_vm14, %v8667_v35, -inf }
0x327b   : > { %v12092_v60 = vpop.f32.mrf.mxu1  ;;  %v8669_v54 = vpop.f32.mrf.mxu0 }
0x327d   : > { %v8435_v27 = vpop.f32.mrf.mxu1  ;;  %v12123_v21 = vpop.f32.mrf.mxu0 }
0x327e   : > { %v10901_v27 = vld [vmem:[%s15629_s18 + $0x10] sm:$0xf] }
0x327f   : > { %v12093_v44 = vpop.f32.mrf.mxu1 }
0x3281   : > { %v8528_v59 = vpop.f32.mrf.mxu1 }
0x3282   : > { %v8529_v16 = vadd.f32 %v8528_v59, %v14396_v34 }
0x3283   : > { %v12104_v12 = vpop.f32.mrf.mxu1 }
0x3284   : > { %v8672_v13 = vsel %vm3682_vm14, %v8529_v16, -inf }
0x3285   : > { %8673 = vmax.xlane.f32.xlu0 %v8672_v13  ;;  %v8531_v29 = vpop.f32.mrf.mxu1 }
0x3287   : > { %v12105_v28 = vpop.f32.mrf.mxu1 }
0x3288   : > { %v8962_v28 = vsel %vm1505_vm12, %v10901_v27, 0 }
0x3289   : > { %v8620_v39 = vpop.f32.mrf.mxu1 }
0x328a   : > { %v8621_v38 = vadd.f32 %v8620_v39, %v14396_v34 }
0x328b   : > { %v12116_v8 = vpop.f32.mrf.mxu1 }
0x328c   : > { %v8678_v42 = vsel %vm3682_vm14, %v8621_v38, -inf }
0x328d   : > { %8679 = vmax.xlane.f32.xlu0 %v8678_v42  ;;  %v8623_v58 = vpop.f32.mrf.mxu1 }
0x328f   : > { %v12117_v11 = vpop.f32.mrf.mxu1 }
0x3291   : > { %8682 = vmax.xlane.f32.xlu0 %v8681_v49 }
0x32fc   : > { %v8677_v30 = vpop.xlane.xlu1 %8676 }
0x32fd   : > { %v8685_v41 = vsub.f32 %v8575_v7, %v8677_v30 }
0x32ff   : > { %v8690_v23 = vmul.f32 1.442695, %v8685_v41 }
0x3301   : > { %12808 = vpow2.f32 %v8690_v23 }
0x330e   : > { %v12809_v51 = vpop.eup %12808  ;;  %v8674_v2 = vpop.xlane.xlu0 %8673 }
0x330f   : > { %v8684_v5 = vsub.f32 %v8529_v16, %v8674_v2  ;;  %v8699_v43 = vsel %vm3682_vm14, %v12809_v51, 0.0 }
0x3310   : > { %8700 = vadd.xlane.f32.xlu0 %v8699_v43 }
0x3311   : > { %v8688_v6 = vmul.f32 1.442695, %v8684_v5 }
0x3313   : > { %12810 = vpow2.f32 %v8688_v6 }
0x3316   : > { %v8680_v25 = vpop.xlane.xlu0 %8679 }
0x3317   : > { %v8686_v18 = vsub.f32 %v8621_v38, %v8680_v25 }
0x3319   : > { %v8692_v52 = vmul.f32 1.442695, %v8686_v18 }
0x331a   : > { %v8683_v53 = vpop.xlane.xlu0 %8682 }
0x331b   : > { %12812 = vpow2.f32 %v8692_v52  ;;  %v8687_v55 = vsub.f32 %v8667_v35, %v8683_v53 }
0x331d   : > { %v8694_v22 = vmul.f32 1.442695, %v8687_v55 }
0x331f   : > { %12814 = vpow2.f32 %v8694_v22 }
0x3320   : > { %v12811_v1 = vpop.eup %12810 }
0x3321   : > { %v8696_v19 = vsel %vm3682_vm14, %v12811_v1, 0.0 }
0x3322   : > { %8697 = vadd.xlane.f32.xlu1 %v8696_v19 }
0x3328   : > { %v12813_v0 = vpop.eup %12812 }
0x3329   : > { %v8702_v24 = vsel %vm3682_vm14, %v12813_v0, 0.0 }
0x332a   : > { %8703 = vadd.xlane.f32.xlu1 %v8702_v24 }
0x332c   : > { %v12815_v14 = vpop.eup %12814 }
0x332d   : > { %v8705_v33 = vsel %vm3682_vm14, %v12815_v14, 0.0 }
0x332e   : > { %8706 = vadd.xlane.f32.xlu0 %v8705_v33 }
0x333b   : > { %8720 = vrot.lane.b32.xlu1 %v15178_v37, %s13451_s4  ;;  %s10722_s4 = sshll.u32 %s1038_s10, 5 }
0x333c   : > { %s1040_s13 = scalar_lea.vmem [#allocation31], %s10722_s4 }
0x333f   : > { %9013 = vrot.lane.b32.xlu1 %v15184_v31, %s13455_s8 }
0x3343   : > { %9063 = vrot.lane.b32.xlu1 %v15190_v40, %s13455_s8 }
0x3344   : > { %9015 = vrot.lane.b32.xlu0 %v15178_v37, %s13455_s8 }
0x3347   : > { %9153 = vrot.lane.b32.xlu1 %v15204_v26, %s13455_s8 }
0x3348   : > { %9108 = vrot.lane.b32.xlu0 %v15197_v50, %s13455_s8  ;;  %s10985_s8 = sshll.u32 %s13635_s12, 9 }
0x3349   : > { %s15568_s29 = scalar_lea.hbm %s15714_s3, %s10985_s8 }
0x3399   : > { %v8701_v36 = vpop.xlane.xlu0 %8700 }
0x339a   : > { %12816 = vrcp.f32 %v8701_v36 }
0x33a7   : > { %v12817_v47 = vpop.eup %12816 }
0x33a8   : > { %v8711_v9 = vmul.f32 %v12817_v47, %v12809_v51 }
0x33aa   : > { %v8717_v60 = vpack.c.bf16 %v8711_v9, %v8711_v9 }
0x33ab   : > { %v8698_v7 = vpop.xlane.xlu1 %8697 }
0x33ac   : > { %12818 = vrcp.f32 %v8698_v7 }
0x33b3   : > { %v8704_v10 = vpop.xlane.xlu1 %8703 }
0x33b4   : > { %12820 = vrcp.f32 %v8704_v10 }
0x33b7   : > { %v8721_v57 = vpop.permute.xlu1 %8720  ;;  %v8707_v56 = vpop.xlane.xlu0 %8706 }
0x33b8   : > { %12822 = vrcp.f32 %v8707_v56  ;;  %12125 = vmatpush3.bf16.msra.mxu1 %v8721_v57  ;;  %12131 = vmatpush3.bf16.msra.mxu0 %v8721_v57 }
0x33b9   : > { %v12819_v4 = vpop.eup %12818  ;;  %12142 = vmatprep.subr.bf16.mxu0 %v13446_v62  ;;  %12136 = vmatprep.subr.bf16.mxu1 %v13446_v62 }
0x33ba   : > { %v8709_v54 = vmul.f32 %v12819_v4, %v12811_v1 }
0x33bb   : > { %12133 = vmatmul.mubr.msk.bf16.vlgmr.msra.gmra.mxu0 %vm3682_vm14, %v8717_v60  ;;  %v9016_v39 = vpop.permute.xlu0 %9015  ;;  %v9014_v8 = vpop.permute.xlu1 %9013 }
0x33bc   : > { %v8716_v21 = vpack.c.bf16 %v8709_v54, %v8709_v54  ;;  %12143 = vmatpush3.bf16.msra.mxu0 %v8721_v57  ;;  %12144 = vmatprep.mubr.msk.bf16.mxu0 %vm13447_vm1, %v13446_v62  ;;  %v9021_v38 = vsel %vm1258_vm2, %v9016_v39, 0 }
0x33bd   : > { %12309 = vmatprep.subr.msk.bf16.mxu0 %vm1505_vm12, %v10901_v27 }
0x33be   : > { %12127 = vmatmul.mubr.msk.bf16.vlgmr.msra.gmra.mxu1 %vm3682_vm14, %v8716_v21 }
0x33bf   : > { %12137 = vmatpush3.bf16.msra.mxu1 %v8721_v57  ;;  %12138 = vmatprep.mubr.msk.bf16.mxu1 %vm13447_vm1, %v13446_v62  ;;  %v9064_v32 = vpop.permute.xlu1 %9063  ;;  %v9109_v24 = vpop.permute.xlu0 %9108 }
0x33c1   : > { %v12821_v44 = vpop.eup %12820 }
0x33c2   : > { %v8713_v59 = vmul.f32 %v12821_v44, %v12813_v0 }
0x33c3   : > { %v9154_v46 = vpop.permute.xlu1 %9153 }
0x33c4   : > { %v8718_v16 = vpack.c.bf16 %v8713_v59, %v8713_v59 }
0x33c5   : > { %v12823_v12 = vpop.eup %12822 }
0x33c6   : > { %v8715_v13 = vmul.f32 %v12823_v12, %v12815_v14  ;;  %12139 = vmatmul.mubr.msk.bf16.vlgmr.msra.gmra.mxu1 %vm3682_vm14, %v8718_v16 }
0x33c8   : > { %v8719_v29 = vpack.c.bf16 %v8715_v13, %v8715_v13 }
0x33ca   : > { %12145 = vmatmul.mubr.msk.bf16.vlgmr.msra.gmra.mxu0 %vm3682_vm14, %v8719_v29 }
0x33cb   : > { %12156 = vmatprep.mubr.msk.bf16.mxu0 %vm1258_vm2, %v8481_v45  ;;  %12155 = vmatpush3.bf16.msra.mxu0 %v8962_v28  ;;  %v10902_v45 = vld [vmem:[%s15629_s18 + $0x14] sm:$0xf] }
0x33cc   : > { %12166 = vmatprep.subr.bf16.mxu0 %v13446_v62  ;;  %12308 = vmatprep.subr.msk.bf16.mxu1 %vm1505_vm12, %v10902_v45  ;;  %v8904_v61 = vsel %vm1505_vm12, %v10902_v45, 0 }
0x33cd   : > { %12149 = vmatpush3.bf16.msra.mxu1 %v8904_v61 }
0x33ce   : > { %12160 = vmatprep.subr.bf16.mxu1 %v13446_v62 }
0x33d2   : > { %12157 = vmatmul.mubr.msk.bf16.vlgmr.msra.gmra.mxu0 %vm1258_vm2, %v8482_v63 }
0x33d3   : > { %12167 = vmatpush3.bf16.xpose.msra.mxu0 %v9021_v38  ;;  %12168 = vmatprep.mubr.msk.bf16.mxu0 %vm13447_vm1, %v13446_v62 }
0x33d4   : > { %12178 = vmatprep.subr.bf16.mxu0 %v13446_v62 }
0x33da   : > { %12169 = vmatmul.mubr.msk.bf16.vlgmr.msra.gmra.mxu0 %vm1258_vm2, %v9064_v32 }
0x33db   : > { %12179 = vmatpush3.bf16.xpose.msra.mxu0 %v9021_v38  ;;  %12180 = vmatprep.mubr.msk.bf16.mxu0 %vm13447_vm1, %v13446_v62 }
0x33dc   : > { %12190 = vmatprep.subr.bf16.mxu0 %v13446_v62 }
0x33e2   : > { %12181 = vmatmul.mubr.msk.bf16.vlgmr.msra.gmra.mxu0 %vm1258_vm2, %v9154_v46 }
0x33e3   : > { %12192 = vmatprep.mubr.msk.bf16.mxu0 %vm13447_vm1, %v13446_v62 }
0x347b   : > { %v8803_v17 = vpop.f32.mrf.mxu0 }
0x347d   : > { %v12134_v63 = vpop.f32.mrf.mxu0 }
0x347e   : > { %v8760_v35 = vpop.f32.mrf.mxu1 }
0x347f   : > { %v8895_v42 = vpack.c.bf16 %v8803_v17, %v8760_v35  ;;  %v8806_v58 = vpop.f32.mrf.mxu0 }
0x3480   : > { %v12128_v11 = vpop.f32.mrf.mxu1 }
0x3481   : > { %v12135_v49 = vpop.f32.mrf.mxu0  ;;  %12150 = vmatprep.mubr.msk.bf16.mxu1 %vm1258_vm2, %v8895_v42 }
0x3482   : > { %v8763_v30 = vpop.f32.mrf.mxu1 }
0x3484   : > { %v12129_v41 = vpop.f32.mrf.mxu1 }
0x3486   : > { %v8846_v23 = vpop.f32.mrf.mxu1 }
0x3488   : > { %v12140_v51 = vpop.f32.mrf.mxu1 }
0x348a   : > { %v8849_v2 = vpop.f32.mrf.mxu1  ;;  %v8889_v5 = vpop.f32.mrf.mxu0 }
0x348b   : > { %v8896_v43 = vpack.c.bf16 %v8889_v5, %v8846_v23 }
0x348c   : > { %v12141_v6 = vpop.f32.mrf.mxu1  ;;  %v12146_v25 = vpop.f32.mrf.mxu0 }
0x348d   : > { %12151 = vmatmul.mubr.msk.bf16.vlgmr.msra.gmra.mxu1 %vm1258_vm2, %v8896_v43 }
0x348e   : > { %12161 = vmatpush3.bf16.xpose.msra.mxu1 %v9021_v38  ;;  %v8892_v18 = vpop.f32.mrf.mxu0  ;;  %12162 = vmatprep.mubr.msk.bf16.mxu1 %vm13447_vm1, %v13446_v62 }
0x348f   : > { %12172 = vmatprep.subr.bf16.mxu1 %v13446_v62 }
0x3490   : > { %v12147_v52 = vpop.f32.mrf.mxu0 }
0x3492   : > { %v15349_v53 = vpop.f32.mrf.mxu0 }
0x3494   : > { %v15351_v55 = vpop.f32.mrf.mxu0 }
0x3495   : > { %12163 = vmatmul.mubr.msk.bf16.vlgmr.msra.gmra.mxu1 %vm1258_vm2, %v9014_v8 }
0x3496   : > { %12173 = vmatpush3.bf16.xpose.msra.mxu1 %v9021_v38  ;;  %v15354_v22 = vpop.f32.mrf.mxu0  ;;  %12174 = vmatprep.mubr.msk.bf16.mxu1 %vm13447_vm1, %v13446_v62 }
0x3497   : > { %12184 = vmatprep.subr.bf16.mxu1 %v13446_v62 }
0x3498   : > { %v15359_v1 = vpop.f32.mrf.mxu0 }
0x349a   : > { %v9102_v19 = vpop.f32.mrf.mxu0 }
0x349b   : > { %v9103_v0 = vadd.f32 %v9102_v19, %v14396_v34 }
0x349c   : > { %v12170_v14 = vpop.f32.mrf.mxu0 }
0x349d   : > { %12175 = vmatmul.mubr.msk.bf16.vlgmr.msra.gmra.mxu1 %vm1258_vm2, %v9109_v24  ;;  %v9201_v33 = vsel %vm3682_vm14, %v9103_v0, -inf }
0x349e   : > { %9202 = vmax.xlane.f32.xlu1 %v9201_v33  ;;  %v9105_v36 = vpop.f32.mrf.mxu0  ;;  %12186 = vmatprep.mubr.msk.bf16.mxu1 %vm13447_vm1, %v13446_v62 }
0x34a0   : > { %v12171_v7 = vpop.f32.mrf.mxu0 }
0x34a2   : > { %v9192_v47 = vpop.f32.mrf.mxu0 }
0x34a3   : > { %v9193_v32 = vadd.f32 %v9192_v47, %v14396_v34 }
0x34a4   : > { %v12182_v10 = vpop.f32.mrf.mxu0 }
0x34a5   : > { %v9207_v17 = vsel %vm3682_vm14, %v9193_v32, -inf }
0x34a6   : > { %v9195_v9 = vpop.f32.mrf.mxu0 }
0x34a8   : > { %v12183_v57 = vpop.f32.mrf.mxu0 }
0x3527   : > { %v9203_v56 = vpop.xlane.xlu1 %9202 }
0x3528   : > { %v9211_v54 = vsub.f32 %v9103_v0, %v9203_v56 }
0x352a   : > { %v9216_v44 = vmul.f32 1.442695, %v9211_v54 }
0x352c   : > { %12824 = vpow2.f32 %v9216_v44 }
0x3539   : > { %v12825_v63 = vpop.eup %12824 }
0x353a   : > { %v9225_v35 = vsel %vm3682_vm14, %v12825_v63, 0.0 }
0x354d   : > { %v15366_v4 = vpop.f32.mrf.mxu1 }
0x354f   : > { %v15368_v60 = vpop.f32.mrf.mxu1 }
0x3551   : > { %v15370_v27 = vpop.f32.mrf.mxu1 }
0x3553   : > { %v15372_v21 = vpop.f32.mrf.mxu1 }
0x3555   : > { %v9057_v59 = vpop.f32.mrf.mxu1 }
0x3556   : > { %v9058_v16 = vadd.f32 %v9057_v59, %v14396_v34 }
0x3557   : > { %v12164_v12 = vpop.f32.mrf.mxu1 }
0x3558   : > { %v9198_v13 = vsel %vm3682_vm14, %v9058_v16, -inf }
0x3559   : > { %9199 = vmax.xlane.f32.xlu0 %v9198_v13  ;;  %v9060_v29 = vpop.f32.mrf.mxu1  ;;  %v10903_v13 = vld [vmem:[%s15629_s18 + $0x18] sm:$0xf] }
0x355a   : > { %v9430_v29 = vsel %vm1505_vm12, %v10903_v13, 0 }
0x355b   : > { %v12165_v28 = vpop.f32.mrf.mxu1 }
0x355d   : > { %v9147_v39 = vpop.f32.mrf.mxu1 }
0x355e   : > { %v9148_v38 = vadd.f32 %v9147_v39, %v14396_v34 }
0x355f   : > { %v12176_v8 = vpop.f32.mrf.mxu1 }
0x3560   : > { %v9204_v46 = vsel %vm3682_vm14, %v9148_v38, -inf }
0x3561   : > { %9205 = vmax.xlane.f32.xlu0 %v9204_v46  ;;  %v9150_v45 = vpop.f32.mrf.mxu1 }
0x3563   : > { %v12177_v61 = vpop.f32.mrf.mxu1 }
0x3565   : > { %9208 = vmax.xlane.f32.xlu0 %v9207_v17 }
0x3569   : > { %9226 = vadd.xlane.f32.xlu0 %v9225_v35 }
0x35e2   : > { %v9200_v42 = vpop.xlane.xlu0 %9199 }
0x35e3   : > { %v9210_v58 = vsub.f32 %v9058_v16, %v9200_v42 }
0x35e5   : > { %v9214_v11 = vmul.f32 1.442695, %v9210_v58 }
0x35e7   : > { %12826 = vpow2.f32 %v9214_v11 }
0x35ea   : > { %v9206_v49 = vpop.xlane.xlu0 %9205 }
0x35eb   : > { %v9212_v30 = vsub.f32 %v9148_v38, %v9206_v49 }
0x35ed   : > { %v9218_v41 = vmul.f32 1.442695, %v9212_v30 }
0x35ee   : > { %v9209_v23 = vpop.xlane.xlu0 %9208 }
0x35ef   : > { %12828 = vpow2.f32 %v9218_v41  ;;  %v9213_v51 = vsub.f32 %v9193_v32, %v9209_v23 }
0x35f1   : > { %v9220_v2 = vmul.f32 1.442695, %v9213_v51 }
0x35f2   : > { %v9227_v19 = vpop.xlane.xlu0 %9226 }
0x35f3   : > { %12830 = vpow2.f32 %v9220_v2 }
0x35f4   : > { %v12827_v5 = vpop.eup %12826  ;;  %12832 = vrcp.f32 %v9227_v19 }
0x35f5   : > { %v9222_v43 = vsel %vm3682_vm14, %v12827_v5, 0.0 }
0x35f6   : > { %9223 = vadd.xlane.f32.xlu1 %v9222_v43 }
0x35fc   : > { %v12829_v6 = vpop.eup %12828 }
0x35fd   : > { %v9228_v25 = vsel %vm3682_vm14, %v12829_v6, 0.0 }
0x35fe   : > { %9229 = vadd.xlane.f32.xlu1 %v9228_v25 }
0x3600   : > { %v12831_v18 = vpop.eup %12830 }
0x3601   : > { %v9231_v52 = vsel %vm3682_vm14, %v12831_v18, 0.0  ;;  %v12833_v24 = vpop.eup %12832 }
0x3602   : > { %9232 = vadd.xlane.f32.xlu0 %v9231_v52 }
0x360f   : > { %9246 = vrot.lane.b32.xlu1 %v15178_v37, %s13454_s7  ;;  %s10457_s7 = sshll.u32 %s1040_s13, 4  ;;  %s15570_s7 = int_to_ptr.vmem [resolvable:$true] %s10457_s7 }
0x3610   : > { %s13324_s12 = scalar_lea.vmem %s15570_s7, 512  ;;  %p13331_p4 = scmp.lt.s32.totalorder %s15570_s7, %s13329_s1 }
0x3611   : > { %p13325_p7 = scmp.ne.s32.totalorder %s15570_s7, %s13324_s12  ;;  %p13332_p9 = scmp.lt.s32.totalorder %s13330_s6, %s13324_s12 }
0x3613   : > { %9485 = vrot.lane.b32.xlu1 %v15184_v31, %s13458_s23  ;;  %v9237_v31 = vmul.f32 %v12833_v24, %v12825_v63  ;;  %p13326_p3 = pnand %p13325_p7, %p13652_p5  ;;  %p13333_p13 = por %p13332_p9, %p13331_p4 }
0x3615   : > { %v9243_v7 = vpack.c.bf16 %v9237_v31, %v9237_v31  ;;  %p13327_p2 = pneg %p13326_p3 }
0x3617   : > { %9535 = vrot.lane.b32.xlu1 %v15190_v40, %s13458_s23  ;;  %p13334_p1 = pnand %p13333_p13, %p13327_p2 }
0x3618   : > { %9487 = vrot.lane.b32.xlu0 %v15178_v37, %s13458_s23 }
0x361b   : > { %9625 = vrot.lane.b32.xlu1 %v15204_v26, %s13458_s23 }
0x361c   : > { %9580 = vrot.lane.b32.xlu0 %v15197_v50, %s13458_s23 }
0x367f   : > { %v9224_v0 = vpop.xlane.xlu1 %9223 }
0x3680   : > { %12834 = vrcp.f32 %v9224_v0 }
0x3687   : > { %v9230_v14 = vpop.xlane.xlu1 %9229 }
0x3688   : > { %12836 = vrcp.f32 %v9230_v14 }
0x368b   : > { %v9247_v33 = vpop.permute.xlu1 %9246  ;;  %v9233_v36 = vpop.xlane.xlu0 %9232 }
0x368c   : > { %12838 = vrcp.f32 %v9233_v36  ;;  %12185 = vmatpush3.bf16.msra.mxu1 %v9247_v33  ;;  %12191 = vmatpush3.bf16.msra.mxu0 %v9247_v33 }
0x368d   : > { %v12835_v40 = vpop.eup %12834  ;;  %12202 = vmatprep.subr.bf16.mxu0 %v13446_v62  ;;  %12196 = vmatprep.subr.bf16.mxu1 %v13446_v62 }
0x368e   : > { %v9235_v50 = vmul.f32 %v12835_v40, %v12827_v5 }
0x368f   : > { %12193 = vmatmul.mubr.msk.bf16.vlgmr.msra.gmra.mxu0 %vm3682_vm14, %v9243_v7  ;;  %v9488_v54 = vpop.permute.xlu0 %9487  ;;  %v9486_v16 = vpop.permute.xlu1 %9485 }
0x3690   : > { %v9242_v26 = vpack.c.bf16 %v9235_v50, %v9235_v50  ;;  %12203 = vmatpush3.bf16.msra.mxu0 %v9247_v33  ;;  %12204 = vmatprep.mubr.msk.bf16.mxu0 %vm13447_vm1, %v13446_v62  ;;  %v9493_v59 = vsel %vm1258_vm2, %v9488_v54, 0 }
0x3691   : > { %12214 = vmatprep.subr.bf16.mxu0 %v13446_v62 }
0x3692   : > { %12187 = vmatmul.mubr.msk.bf16.vlgmr.msra.gmra.mxu1 %vm3682_vm14, %v9242_v26 }
0x3693   : > { %12197 = vmatpush3.bf16.msra.mxu1 %v9247_v33  ;;  %12198 = vmatprep.mubr.msk.bf16.mxu1 %vm13447_vm1, %v13446_v62  ;;  %v9581_v12 = vpop.permute.xlu0 %9580  ;;  %v9536_v5 = vpop.permute.xlu1 %9535 }
0x3694   : > { %12310 = vmatprep.subr.msk.bf16.mxu1 %vm1505_vm12, %v10903_v13 }
0x3695   : > { %v12837_v47 = vpop.eup %12836 }
0x3696   : > { %v9239_v10 = vmul.f32 %v12837_v47, %v12829_v6  ;;  %v9007_v47 = vadd.f32 %v15349_v53, %v15366_v4 }
0x3697   : > { %v9626_v0 = vpop.permute.xlu1 %9625 }
0x3698   : > { %v9244_v9 = vpack.c.bf16 %v9239_v10, %v9239_v10 }
0x3699   : > { %v12839_v57 = vpop.eup %12838 }
0x369a   : > { %v9241_v56 = vmul.f32 %v12839_v57, %v12831_v18  ;;  %12199 = vmatmul.mubr.msk.bf16.vlgmr.msra.gmra.mxu1 %vm3682_vm14, %v9244_v9  ;;  %v8999_v57 = vadd.f32 %v15351_v55, %v15368_v60 }
0x369b   : > { %12209 = vmatpush3.bf16.msra.mxu1 %v9430_v29 }
0x369c   : > { %v9245_v44 = vpack.c.bf16 %v9241_v56, %v9241_v56  ;;  %12220 = vmatprep.subr.bf16.mxu1 %v13446_v62 }
0x369e   : > { %12205 = vmatmul.mubr.msk.bf16.vlgmr.msra.gmra.mxu0 %vm3682_vm14, %v9245_v44  ;;  %v9010_v44 = vadd.f32 %v15354_v22, %v15370_v27 }
0x369f   : > { %12215 = vmatpush3.bf16.xpose.msra.mxu0 %v9493_v59  ;;  %12216 = vmatprep.mubr.msk.bf16.mxu0 %vm13447_vm1, %v13446_v62 }
0x36a0   : > { %12226 = vmatprep.subr.bf16.mxu0 %v13446_v62 }
0x36a6   : > { %12217 = vmatmul.mubr.msk.bf16.vlgmr.msra.gmra.mxu0 %vm1258_vm2, %v9486_v16 }
0x36a7   : > { %12227 = vmatpush3.bf16.xpose.msra.mxu0 %v9493_v59  ;;  %12228 = vmatprep.mubr.msk.bf16.mxu0 %vm13447_vm1, %v13446_v62 }
0x36a8   : > { %12238 = vmatprep.subr.bf16.mxu0 %v13446_v62 }
0x36ae   : > { %12229 = vmatmul.mubr.msk.bf16.vlgmr.msra.gmra.mxu0 %vm1258_vm2, %v9581_v12  ;;  %v9002_v12 = vadd.f32 %v15359_v1, %v15372_v21 }
0x36af   : > { %12240 = vmatprep.mubr.msk.bf16.mxu0 %vm13447_vm1, %v13446_v62 }
0x374f   : > { %v9329_v28 = vpop.f32.mrf.mxu0 }
0x3751   : > { %v12194_v39 = vpop.f32.mrf.mxu0 }
0x3752   : > { %v9286_v38 = vpop.f32.mrf.mxu1 }
0x3753   : > { %v9421_v8 = vpack.c.bf16 %v9329_v28, %v9286_v38  ;;  %v9332_v32 = vpop.f32.mrf.mxu0 }
0x3754   : > { %v12188_v46 = vpop.f32.mrf.mxu1 }
0x3755   : > { %v12195_v45 = vpop.f32.mrf.mxu0  ;;  %12210 = vmatprep.mubr.msk.bf16.mxu1 %vm1258_vm2, %v9421_v8 }
0x3756   : > { %v9289_v61 = vpop.f32.mrf.mxu1 }
0x3758   : > { %v12189_v17 = vpop.f32.mrf.mxu1 }
0x375a   : > { %v9372_v63 = vpop.f32.mrf.mxu1 }
0x375c   : > { %v12200_v35 = vpop.f32.mrf.mxu1 }
0x375e   : > { %v9375_v42 = vpop.f32.mrf.mxu1  ;;  %v9415_v58 = vpop.f32.mrf.mxu0 }
0x375f   : > { %v9422_v11 = vpack.c.bf16 %v9415_v58, %v9372_v63 }
0x3760   : > { %v12201_v49 = vpop.f32.mrf.mxu1  ;;  %v12206_v30 = vpop.f32.mrf.mxu0 }
0x3761   : > { %12211 = vmatmul.mubr.msk.bf16.vlgmr.msra.gmra.mxu1 %vm1258_vm2, %v9422_v11 }
0x3762   : > { %12221 = vmatpush3.bf16.xpose.msra.mxu1 %v9493_v59  ;;  %v9418_v41 = vpop.f32.mrf.mxu0  ;;  %12222 = vmatprep.mubr.msk.bf16.mxu1 %vm13447_vm1, %v13446_v62 }
0x3763   : > { %12232 = vmatprep.subr.bf16.mxu1 %v13446_v62 }
0x3764   : > { %v12207_v23 = vpop.f32.mrf.mxu0 }
0x3766   : > { %v9529_v51 = vpop.f32.mrf.mxu0 }
0x3767   : > { %v9530_v2 = vadd.f32 %v9529_v51, %v14396_v34 }
0x3768   : > { %v12218_v43 = vpop.f32.mrf.mxu0 }
0x3769   : > { %12223 = vmatmul.mubr.msk.bf16.vlgmr.msra.gmra.mxu1 %vm1258_vm2, %v9536_v5  ;;  %v9670_v6 = vsel %vm3682_vm14, %v9530_v2, -inf }
0x376a   : > { %12233 = vmatpush3.bf16.xpose.msra.mxu1 %v9493_v59  ;;  %9671 = vmax.xlane.f32.xlu0 %v9670_v6  ;;  %v9532_v25 = vpop.f32.mrf.mxu0 }
0x376b   : > { %12234 = vmatprep.mubr.msk.bf16.mxu1 %vm13447_vm1, %v13446_v62  ;;  %12244 = vmatprep.subr.bf16.mxu1 %v13446_v62 }
0x376c   : > { %v12219_v18 = vpop.f32.mrf.mxu0 }
0x376e   : > { %v9619_v52 = vpop.f32.mrf.mxu0 }
0x376f   : > { %v9620_v19 = vadd.f32 %v9619_v52, %v14396_v34 }
0x3770   : > { %v12230_v24 = vpop.f32.mrf.mxu0 }
0x3771   : > { %12235 = vmatmul.mubr.msk.bf16.vlgmr.msra.gmra.mxu1 %vm1258_vm2, %v9626_v0  ;;  %v9676_v14 = vsel %vm3682_vm14, %v9620_v19, -inf }
0x3772   : > { %9677 = vmax.xlane.f32.xlu0 %v9676_v14  ;;  %v9622_v31 = vpop.f32.mrf.mxu0  ;;  %12246 = vmatprep.mubr.msk.bf16.mxu1 %vm13447_vm1, %v13446_v62 }
0x3774   : > { %v12231_v33 = vpop.f32.mrf.mxu0 }
0x37f3   : > { %v9672_v36 = vpop.xlane.xlu0 %9671 }
0x37f4   : > { %v9682_v40 = vsub.f32 %v9530_v2, %v9672_v36 }
0x37f6   : > { %v9686_v50 = vmul.f32 1.442695, %v9682_v40 }
0x37f8   : > { %12840 = vpow2.f32 %v9686_v50 }
0x37fb   : > { %v9678_v7 = vpop.xlane.xlu0 %9677 }
0x37fc   : > { %v9684_v26 = vsub.f32 %v9620_v19, %v9678_v7 }
0x37fe   : > { %v9690_v10 = vmul.f32 1.442695, %v9684_v26 }
0x3800   : > { %12842 = vpow2.f32 %v9690_v10 }
0x3805   : > { %v12841_v39 = vpop.eup %12840 }
0x3806   : > { %v9694_v38 = vsel %vm3682_vm14, %v12841_v39, 0.0 }
0x380d   : > { %v12843_v8 = vpop.eup %12842 }
0x380e   : > { %v9700_v46 = vsel %vm3682_vm14, %v12843_v8, 0.0 }
0x3821   : > { %v12212_v9 = vpop.f32.mrf.mxu1 }
0x3822   : > { %v15444_v56 = vadd.f32 %v12212_v9, %v9007_v47 }
0x3823   : > { %v9466_v54 = vpop.f32.mrf.mxu1 }
0x3824   : > { %v15448_v59 = vadd.f32 %v9466_v54, %v8999_v57 }
0x3825   : > { %v12213_v16 = vpop.f32.mrf.mxu1 }
0x3826   : > { %v15452_v53 = vadd.f32 %v12213_v16, %v9010_v44  ;;  %v10904_v44 = vld [vmem:[%s15629_s18 + $0x1c] sm:$0xf] }
0x3827   : > { %v9469_v4 = vpop.f32.mrf.mxu1 }
0x3828   : > { %v15454_v13 = vadd.f32 %v9469_v4, %v9002_v12 }
0x3829   : > { %v9574_v29 = vpop.f32.mrf.mxu1 }
0x382a   : > { %v9575_v55 = vadd.f32 %v9574_v29, %v14396_v34 }
0x382b   : > { %v12224_v60 = vpop.f32.mrf.mxu1 }
0x382c   : > { %v9673_v28 = vsel %vm3682_vm14, %v9575_v55, -inf }
0x382d   : > { %9674 = vmax.xlane.f32.xlu1 %v9673_v28  ;;  %v9577_v22 = vpop.f32.mrf.mxu1 }
0x382f   : > { %v12225_v27 = vpop.f32.mrf.mxu1 }
0x3831   : > { %9695 = vadd.xlane.f32.xlu1 %v9694_v38  ;;  %v9664_v1 = vpop.f32.mrf.mxu1 }
0x3832   : > { %v9665_v21 = vadd.f32 %v9664_v1, %v14396_v34  ;;  %v10946_v1 = vld [vmem:[%s15630_s19 + $0x1] ss:$0 sm:$0xff] }
0x3833   : > { %v12236_v32 = vpop.f32.mrf.mxu1 }
0x3834   : > { %v9679_v45 = vsel %vm3682_vm14, %v9665_v21, -inf }
0x3835   : > { %9701 = vadd.xlane.f32.xlu1 %v9700_v46  ;;  %9680 = vmax.xlane.f32.xlu0 %v9679_v45  ;;  %v9667_v61 = vpop.f32.mrf.mxu1 }
0x3837   : > { %v12237_v17 = vpop.f32.mrf.mxu1 }
0x3846   : > { %9718 = vrot.lane.b32.xlu1 %v15178_v37, %s13457_s9 }
0x38b6   : > { %v9675_v63 = vpop.xlane.xlu1 %9674 }
0x38b7   : > { %v9683_v35 = vsub.f32 %v9575_v55, %v9675_v63 }
0x38b9   : > { %v9688_v42 = vmul.f32 1.442695, %v9683_v35 }
0x38ba   : > { %v9696_v58 = vpop.xlane.xlu1 %9695 }
0x38bb   : > { %12844 = vpow2.f32 %v9688_v42 }
0x38bc   : > { %12846 = vrcp.f32 %v9696_v58 }
0x38be   : > { %v9702_v11 = vpop.xlane.xlu1 %9701  ;;  %v9681_v34 = vpop.xlane.xlu0 %9680 }
0x38bf   : > { %v9685_v49 = vsub.f32 %v9665_v21, %v9681_v34  ;;  %12848 = vrcp.f32 %v9702_v11 }
0x38c1   : > { %v9692_v30 = vmul.f32 1.442695, %v9685_v49 }
0x38c2   : > { %v9719_v41 = vpop.permute.xlu1 %9718 }
0x38c3   : > { %12850 = vpow2.f32 %v9692_v30  ;;  %12239 = vmatpush3.bf16.msra.mxu0 %v9719_v41  ;;  %12245 = vmatpush3.bf16.msra.mxu1 %v9719_v41 }
0x38c4   : > { %12250 = vmatprep.subr.bf16.mxu0 %v13446_v62  ;;  %12256 = vmatprep.subr.bf16.mxu1 %v13446_v62 }
0x38c8   : > { %v12845_v37 = vpop.eup %12844 }
0x38c9   : > { %v12847_v23 = vpop.eup %12846  ;;  %v9697_v51 = vsel %vm3682_vm14, %v12845_v37, 0.0 }
0x38ca   : > { %v9707_v2 = vmul.f32 %v12847_v23, %v12841_v39  ;;  %9698 = vadd.xlane.f32.xlu0 %v9697_v51 }
0x38cc   : > { %v9714_v5 = vpack.c.bf16 %v9707_v2, %v9707_v2  ;;  %v12849_v43 = vpop.eup %12848 }
0x38cd   : > { %v9711_v25 = vmul.f32 %v12849_v43, %v12843_v8 }
0x38ce   : > { %12241 = vmatmul.mubr.msk.bf16.vlgmr.msra.gmra.mxu0 %vm3682_vm14, %v9714_v5 }
0x38cf   : > { %12251 = vmatpush3.bf16.msra.mxu0 %v9719_v41  ;;  %12252 = vmatprep.mubr.msk.bf16.mxu0 %vm13447_vm1, %v13446_v62  ;;  %v9716_v52 = vpack.c.bf16 %v9711_v25, %v9711_v25 }
0x38d0   : > { %v12851_v6 = vpop.eup %12850  ;;  %12311 = vmatprep.subr.msk.bf16.mxu0 %vm1505_vm12, %v10904_v44 }
0x38d1   : > { %v9703_v18 = vsel %vm3682_vm14, %v12851_v6, 0.0 }
0x38d2   : > { %9704 = vadd.xlane.f32.xlu0 %v9703_v18 }
0x38d6   : > { %12253 = vmatmul.mubr.msk.bf16.vlgmr.msra.gmra.mxu0 %vm3682_vm14, %v9716_v52 }
0x3953   : > { %v9699_v19 = vpop.xlane.xlu0 %9698 }
0x3954   : > { %12852 = vrcp.f32 %v9699_v19 }
0x395b   : > { %v9705_v0 = vpop.xlane.xlu0 %9704 }
0x395c   : > { %12854 = vrcp.f32 %v9705_v0 }
0x3961   : > { %v12853_v24 = vpop.eup %12852 }
0x3962   : > { %v9709_v14 = vmul.f32 %v12853_v24, %v12845_v37 }
0x3964   : > { %v9715_v31 = vpack.c.bf16 %v9709_v14, %v9709_v14 }
0x3966   : > { %12247 = vmatmul.mubr.msk.bf16.vlgmr.msra.gmra.mxu1 %vm3682_vm14, %v9715_v31 }
0x3967   : > { %12257 = vmatpush3.bf16.msra.mxu1 %v9719_v41  ;;  %12258 = vmatprep.mubr.msk.bf16.mxu1 %vm13447_vm1, %v13446_v62  ;;  %v9902_v62 = vsel %vm1505_vm12, %v10904_v44, 0 }
0x3968   : > { %12263 = vmatpush3.bf16.msra.mxu0 %v9902_v62 }
0x3969   : > { %v12855_v33 = vpop.eup %12854 }
0x396a   : > { %v9713_v36 = vmul.f32 %v12855_v33, %v12851_v6  ;;  %v12552_v33 = vld [vmem:[#allocation28 + $0x18] sm:$0xff]  }
0x396b   : > { %12268 = vmatprep.subr.bf16.mxu1 %v12552_v33 }
0x396c   : > { %v9717_v40 = vpack.c.bf16 %v9713_v36, %v9713_v36  ;;  %v12553_v36 = vld [vmem:[#allocation28 + $0x10] sm:$0xff]  }
0x396e   : > { %12259 = vmatmul.mubr.msk.bf16.vlgmr.msra.gmra.mxu1 %vm3682_vm14, %v9717_v40  ;;  %v12554_v40 = vld [vmem:[%s15633_s22 + $0x38] sm:$0xff]  }
0x396f   : > { %12269 = vmatpush3.bf16.msra.mxu1 %v12552_v33  ;;  %12276 = vmatprep.subr.bf16.mxu0 %v12554_v40 }
0x3970   : > { %12270 = vmatprep.subr.bf16.mxu1 %v12553_v36 }
0x3973   : > { %12271 = vmatpush3.bf16.msra.mxu1 %v12553_v36 }
0x398e   : > { %v9758_v7 = vpop.f32.mrf.mxu0 }
0x3990   : > { %v12242_v50 = vpop.f32.mrf.mxu0 }
0x3992   : > { %v9761_v26 = vpop.f32.mrf.mxu0 }
0x3994   : > { %v12243_v47 = vpop.f32.mrf.mxu0 }
0x3996   : > { %v9844_v10 = vpop.f32.mrf.mxu0 }
0x3998   : > { %v12254_v9 = vpop.f32.mrf.mxu0 }
0x399a   : > { %v9847_v57 = vpop.f32.mrf.mxu0 }
0x399c   : > { %v12255_v54 = vpop.f32.mrf.mxu0 }
0x3a26   : > { %v9801_v16 = vpop.f32.mrf.mxu1 }
0x3a27   : > { %v9893_v12 = vpack.c.bf16 %v9801_v16, %v9758_v7 }
0x3a28   : > { %v12248_v4 = vpop.f32.mrf.mxu1 }
0x3a29   : > { %12264 = vmatprep.mubr.msk.bf16.mxu0 %vm1258_vm2, %v9893_v12 }
0x3a2a   : > { %v9804_v29 = vpop.f32.mrf.mxu1 }
0x3a2c   : > { %v12249_v55 = vpop.f32.mrf.mxu1 }
0x3a2d   : > { %v10947_v55 = vld [vmem:[#allocation13 + $0x1] ss:$0 sm:$0xff] }
0x3a2e   : > { %v9887_v60 = vpop.f32.mrf.mxu1 }
0x3a2f   : > { %v9894_v28 = vpack.c.bf16 %v9887_v60, %v9844_v10 }
0x3a30   : > { %v12260_v39 = vpop.f32.mrf.mxu1 }
0x3a31   : > { %12265 = vmatmul.mubr.msk.bf16.vlgmr.msra.gmra.mxu0 %vm1258_vm2, %v9894_v28 }
0x3a32   : > { %v9890_v22 = vpop.f32.mrf.mxu1  ;;  %12277 = vmatpush3.bf16.msra.mxu0 %v12554_v40 }
0x3a34   : > { %v12261_v27 = vpop.f32.mrf.mxu1 }
0x3af1   : > { %v12266_v38 = vpop.f32.mrf.mxu0 }
0x3af2   : > { %v9955_v8 = vadd.f32 %v12266_v38, %v15444_v56  ;;  %v10948_v38 = vld [vmem:[#allocation14 + $0x1] ss:$0 sm:$0xff] }
0x3af3   : > { %v9938_v21 = vpop.f32.mrf.mxu0 }
0x3af4   : > { %v9959_v32 = vadd.f32 %v9955_v8, %v15143_v20  ;;  %v9953_v46 = vadd.f32 %v9938_v21, %v15448_v59 }
0x3af5   : > { %v12267_v45 = vpop.f32.mrf.mxu0 }
0x3af6   : > { %v15489_v61 = vadd.f32 %v10946_v1, %v9959_v32  ;;  %v9957_v17 = vadd.f32 %v9953_v46, %v15141_v15  ;;  %v9956_v42 = vadd.f32 %v12267_v45, %v15452_v53 }
0x3af7   : > { %v9941_v63 = vpop.f32.mrf.mxu0 }
0x3af8   : > { %v15492_v35 = vadd.f32 %v10946_v1, %v9957_v17  ;;  %v9954_v56 = vadd.f32 %v9941_v63, %v15454_v13  ;;  %v9983_v58 = vsel %vm1093_vm0, %v15489_v61, 0.0  ;;  %v9960_v59 = vadd.f32 %v9956_v42, %v15151_v3 }
0x3af9   : > { %9984 = vadd.xlane.f32.xlu0 %v9983_v58 }
0x3afa   : > { %v9958_v20 = vadd.f32 %v9954_v56, %v15149_v48  ;;  %v9977_v15 = vsel %vm1093_vm0, %v15492_v35, 0.0  ;;  %v15504_v34 = vadd.f32 %v10946_v1, %v9960_v59  ;;  %v12556_v59 = vld [vmem:[%s15633_s22 + $0x28] sm:$0xff]  }
0x3afc   : > { %v15500_v11 = vadd.f32 %v10946_v1, %v9958_v20  ;;  %v9986_v13 = vsel %vm1093_vm0, %v15504_v34, 0.0  ;;  %v12555_v20 = vld [vmem:[%s15633_s22 + $0x30] sm:$0xff]  }
0x3afd   : > { %9978 = vadd.xlane.f32.xlu0 %v9977_v15  ;;  %12278 = vmatprep.subr.bf16.mxu0 %v12555_v20  ;;  %v12557_v15 = vld [vmem:[%s15633_s22 + $0x20] sm:$0xff]  }
0x3afe   : > { %v9980_v53 = vsel %vm1093_vm0, %v15500_v11, 0.0  ;;  %12279 = vmatpush3.bf16.msra.mxu0 %v12555_v20 }
0x3aff   : > { %12280 = vmatprep.subr.bf16.mxu0 %v12556_v59 }
0x3b01   : > { %9981 = vadd.xlane.f32.xlu0 %v9980_v53 }
0x3b02   : > { %12281 = vmatpush3.bf16.msra.mxu0 %v12556_v59 }
0x3b03   : > { %12282 = vmatprep.subr.bf16.mxu0 %v12557_v15 }
0x3b05   : > { %9987 = vadd.xlane.f32.xlu0 %v9986_v13 }
0x3b06   : > { %12283 = vmatpush3.bf16.msra.mxu0 %v12557_v15 }
0x3b82   : > { %v9985_v49 = vpop.xlane.xlu0 %9984 }
0x3b83   : > { %v9991_v48 = vmul.f32 0.03125, %v9985_v49  ;;  %v10950_v49 = vld [vmem:[%s15632_s21 + $0x1] ss:$0 sm:$0xff] }
0x3b85   : > { %v9995_v41 = vsub.f32 %v15489_v61, %v9991_v48 }
0x3b86   : > { %v9979_v30 = vpop.xlane.xlu0 %9978 }
0x3b87   : > { %v9989_v3 = vmul.f32 0.03125, %v9979_v30  ;;  %v9999_v6 = vmul.f32 %v9995_v41, %v9995_v41 }
0x3b89   : > { %v9993_v37 = vsub.f32 %v15492_v35, %v9989_v3  ;;  %v10007_v0 = vsel %vm1093_vm0, %v9999_v6, 0.0 }
0x3b8a   : > { %v9982_v23 = vpop.xlane.xlu0 %9981 }
0x3b8b   : > { %v9990_v51 = vmul.f32 0.03125, %v9982_v23  ;;  %v9997_v2 = vmul.f32 %v9993_v37, %v9993_v37 }
0x3b8d   : > { %v9994_v5 = vsub.f32 %v15500_v11, %v9990_v51  ;;  %v10001_v43 = vsel %vm1093_vm0, %v9997_v2, 0.0 }
0x3b8e   : > { %10002 = vadd.xlane.f32.xlu0 %v10001_v43  ;;  %v9988_v25 = vpop.xlane.xlu0 %9987 }
0x3b8f   : > { %v9992_v18 = vmul.f32 0.03125, %v9988_v25  ;;  %v9998_v52 = vmul.f32 %v9994_v5, %v9994_v5 }
0x3b91   : > { %v9996_v19 = vsub.f32 %v15504_v34, %v9992_v18  ;;  %v10004_v24 = vsel %vm1093_vm0, %v9998_v52, 0.0  ;;  %v10970_v52 = vld [vmem:[%s15711_s2 + $0x1] ss:$0 sm:$0xff] }
0x3b92   : > { %10008 = vadd.xlane.f32.xlu0 %v10007_v0  ;;  %10005 = vadd.xlane.f32.xlu1 %v10004_v24 }
0x3b93   : > { %v10000_v14 = vmul.f32 %v9996_v19, %v9996_v19 }
0x3b95   : > { %v10010_v31 = vsel %vm1093_vm0, %v10000_v14, 0.0 }
0x3b96   : > { %10011 = vadd.xlane.f32.xlu0 %v10010_v31 }
0x3c17   : > { %v10003_v7 = vpop.xlane.xlu0 %10002 }
0x3c18   : > { %v10013_v50 = vmul.f32 0.03125, %v10003_v7 }
0x3c1a   : > { %v10017_v26 = vadd.f32 1e-05, %v10013_v50 }
0x3c1b   : > { %v10006_v47 = vpop.xlane.xlu1 %10005  ;;  %v10009_v10 = vpop.xlane.xlu0 %10008 }
0x3c1c   : > { %12856 = vrsqrt.f32 %v10017_v26  ;;  %v10014_v9 = vmul.f32 0.03125, %v10006_v47  ;;  %v10015_v57 = vmul.f32 0.03125, %v10009_v10 }
0x3c1e   : > { %v10018_v54 = vadd.f32 1e-05, %v10014_v9  ;;  %v10019_v44 = vadd.f32 1e-05, %v10015_v57 }
0x3c1f   : > { %v10012_v62 = vpop.xlane.xlu0 %10011 }
0x3c20   : > { %12858 = vrsqrt.f32 %v10018_v54  ;;  %v10016_v16 = vmul.f32 0.03125, %v10012_v62 }
0x3c21   : > { %12860 = vrsqrt.f32 %v10019_v44 }
0x3c22   : > { %v10020_v12 = vadd.f32 1e-05, %v10016_v16 }
0x3c24   : > { %12862 = vrsqrt.f32 %v10020_v12 }
0x3c29   : > { %v12857_v4 = vpop.eup %12856 }
0x3c2a   : > { %v10025_v29 = vmul.f32 %v12857_v4, %v9993_v37 }
0x3c2c   : > { %v10035_v22 = vmul.f32 %v10947_v55, %v10025_v29 }
0x3c2d   : > { %v12859_v60 = vpop.eup %12858 }
0x3c2e   : > { %v12861_v28 = vpop.eup %12860  ;;  %v10026_v39 = vmul.f32 %v12859_v60, %v9994_v5  ;;  %v10045_v46 = vadd.f32 %v10948_v38, %v10035_v22 }
0x3c2f   : > { %v10027_v27 = vmul.f32 %v12861_v28, %v9995_v41 }
0x3c30   : > { %v10036_v8 = vmul.f32 %v10947_v55, %v10026_v39 }
0x3c31   : > { %v12863_v1 = vpop.eup %12862  ;;  %v10037_v32 = vmul.f32 %v10947_v55, %v10027_v27 }
0x3c32   : > { %v10028_v21 = vmul.f32 %v12863_v1, %v9996_v19  ;;  %v10046_v45 = vadd.f32 %v10948_v38, %v10036_v8 }
0x3c33   : > { %v10047_v42 = vadd.f32 %v10948_v38, %v10037_v32  ;;  %v12559_v32 = vld [vmem:[#allocation29] sm:$0xff]  }
0x3c34   : > { %v10038_v17 = vmul.f32 %v10947_v55, %v10028_v21  ;;  %v10049_v63 = vpack.c.bf16 %v10046_v45, %v10045_v46  ;;  %v12558_v21 = vld [vmem:[#allocation29 + $0x8] sm:$0xff]  }
0x3c35   : > { %12288 = vmatprep.subr.bf16.mxu1 %v12558_v21 }
0x3c36   : > { %v10048_v56 = vadd.f32 %v10948_v38, %v10038_v17  ;;  %12272 = vmatprep.mubr.msk.bf16.mxu1 %vm1093_vm0, %v10049_v63 }
0x3c38   : > { %v10050_v58 = vpack.c.bf16 %v10048_v56, %v10047_v42 }
0x3c3a   : > { %12273 = vmatmul.mubr.msk.bf16.vlgmr.msra.gmra.mxu1 %vm1093_vm0, %v10050_v58 }
0x3c3b   : > { %12289 = vmatpush3.bf16.msra.mxu1 %v12558_v21 }
0x3c3c   : > { %12290 = vmatprep.subr.bf16.mxu1 %v12559_v32 }
0x3c3f   : > { %12291 = vmatpush3.bf16.msra.mxu1 %v12559_v32 }
0x3cfa   : > { %v12274_v53 = vpop.f32.mrf.mxu1 }
0x3cfb   : > { %v10125_v41 = vadd.f32 %v12274_v53, %v10950_v49 }
0x3cfc   : > { %v10116_v13 = vpop.f32.mrf.mxu1 }
0x3cfd   : > { %v10117_v30 = vadd.f32 %v10950_v49, %v10116_v13  ;;  %v10133_v43 = vmax.f32 %v10125_v41, 0.0 }
0x3cfe   : > { %v12275_v48 = vpop.f32.mrf.mxu1 }
0x3cff   : > { %v10128_v3 = vadd.f32 %v12275_v48, %v10950_v49  ;;  %v10131_v2 = vmax.f32 %v10117_v30, 0.0  ;;  %v10971_v30 = vld [vmem:[%s15635_s24] ss:$0 sm:$0xff] }
0x3d00   : > { %v10119_v37 = vpop.f32.mrf.mxu1 }
0x3d01   : > { %v10120_v23 = vadd.f32 %v10950_v49, %v10119_v37  ;;  %v10134_v51 = vmax.f32 %v10128_v3, 0.0 }
0x3d03   : > { %v10132_v5 = vmax.f32 %v10120_v23, 0.0  ;;  %v10136_v25 = vpack.c.bf16 %v10134_v51, %v10133_v43  ;;  %v10972_v23 = vld [vmem:[%s15636_s25] ss:$0 sm:$0xff] }
0x3d05   : > { %v10135_v6 = vpack.c.bf16 %v10132_v5, %v10131_v2 }
0x3d07   : > { %12284 = vmatprep.mubr.msk.bf16.mxu0 %vm5590_vm15, %v10135_v6 }
0x3d08   : > { %12285 = vmatmul.mubr.msk.bf16.vlgmr.msra.gmra.mxu0 %vm5590_vm15, %v10136_v25 }
0x3dc8   : > { %v12286_v18 = vpop.f32.mrf.mxu0 }
0x3dc9   : > { %v10227_v19 = vadd.f32 %v12286_v18, %v15489_v61 }
0x3dca   : > { %v10210_v0 = vpop.f32.mrf.mxu0 }
0x3dcb   : > { %v10239_v24 = vadd.f32 %v10970_v52, %v10227_v19  ;;  %v10225_v14 = vadd.f32 %v10210_v0, %v15492_v35 }
0x3dcc   : > { %v12287_v31 = vpop.f32.mrf.mxu0 }
0x3dcd   : > { %v10237_v33 = vadd.f32 %v10970_v52, %v10225_v14  ;;  %v10249_v36 = vsel %vm1093_vm0, %v10239_v24, 0.0  ;;  %v10228_v50 = vadd.f32 %v12287_v31, %v15504_v34 }
0x3dce   : > { %10250 = vadd.xlane.f32.xlu0 %v10249_v36  ;;  %v10213_v40 = vpop.f32.mrf.mxu0  ;;  %v10973_v36 = vld [vmem:[%s15638_s27] ss:$0 sm:$0xff] }
0x3dcf   : > { %v10226_v7 = vadd.f32 %v10213_v40, %v15500_v11  ;;  %v10243_v47 = vsel %vm1093_vm0, %v10237_v33, 0.0  ;;  %v10240_v10 = vadd.f32 %v10970_v52, %v10228_v50 }
0x3dd1   : > { %v10238_v26 = vadd.f32 %v10970_v52, %v10226_v7  ;;  %v10252_v35 = vsel %vm1093_vm0, %v10240_v10, 0.0 }
0x3dd2   : > { %10244 = vadd.xlane.f32.xlu0 %v10243_v47 }
0x3dd3   : > { %v10246_v61 = vsel %vm1093_vm0, %v10238_v26, 0.0 }
0x3dd6   : > { %10247 = vadd.xlane.f32.xlu0 %v10246_v61 }
0x3dda   : > { %10253 = vadd.xlane.f32.xlu0 %v10252_v35 }
0x3e57   : > { %v10251_v9 = vpop.xlane.xlu0 %10250 }
0x3e58   : > { %v10257_v44 = vmul.f32 0.03125, %v10251_v9 }
0x3e5a   : > { %v10261_v34 = vsub.f32 %v10239_v24, %v10257_v44 }
0x3e5b   : > { %v10245_v57 = vpop.xlane.xlu0 %10244 }
0x3e5c   : > { %v10255_v54 = vmul.f32 0.03125, %v10245_v57  ;;  %v10265_v27 = vmul.f32 %v10261_v34, %v10261_v34 }
0x3e5e   : > { %v10259_v62 = vsub.f32 %v10237_v33, %v10255_v54  ;;  %v10273_v8 = vsel %vm1093_vm0, %v10265_v27, 0.0 }
0x3e5f   : > { %v10248_v16 = vpop.xlane.xlu0 %10247 }
0x3e60   : > { %v10256_v11 = vmul.f32 0.03125, %v10248_v16  ;;  %v10263_v12 = vmul.f32 %v10259_v62, %v10259_v62 }
0x3e62   : > { %v10260_v4 = vsub.f32 %v10238_v26, %v10256_v11  ;;  %v10267_v29 = vsel %vm1093_vm0, %v10263_v12, 0.0 }
0x3e63   : > { %10268 = vadd.xlane.f32.xlu0 %v10267_v29  ;;  %v10254_v55 = vpop.xlane.xlu0 %10253 }
0x3e64   : > { %v10258_v60 = vmul.f32 0.03125, %v10254_v55  ;;  %v10264_v28 = vmul.f32 %v10260_v4, %v10260_v4 }
0x3e66   : > { %v10262_v39 = vsub.f32 %v10240_v10, %v10258_v60  ;;  %v10270_v22 = vsel %vm1093_vm0, %v10264_v28, 0.0 }
0x3e67   : > { %10271 = vadd.xlane.f32.xlu0 %v10270_v22 }
0x3e68   : > { %v10266_v38 = vmul.f32 %v10262_v39, %v10262_v39 }
0x3e6a   : > { %v10276_v1 = vsel %vm1093_vm0, %v10266_v38, 0.0 }
0x3e6b   : > { %10274 = vadd.xlane.f32.xlu0 %v10273_v8  ;;  %10277 = vadd.xlane.f32.xlu1 %v10276_v1 }
0x3eec   : > { %v10269_v46 = vpop.xlane.xlu0 %10268 }
0x3eed   : > { %v10279_v45 = vmul.f32 0.03125, %v10269_v46 }
0x3eef   : > { %v10283_v17 = vadd.f32 1e-05, %v10279_v45 }
0x3ef0   : > { %v10272_v63 = vpop.xlane.xlu0 %10271 }
0x3ef1   : > { %12864 = vrsqrt.f32 %v10283_v17  ;;  %v10280_v42 = vmul.f32 0.03125, %v10272_v63 }
0x3ef3   : > { %v10284_v56 = vadd.f32 1e-05, %v10280_v42 }
0x3ef4   : > { %v10278_v58 = vpop.xlane.xlu1 %10277  ;;  %v10275_v20 = vpop.xlane.xlu0 %10274 }
0x3ef5   : > { %12866 = vrsqrt.f32 %v10284_v56  ;;  %v10282_v59 = vmul.f32 0.03125, %v10278_v58  ;;  %v10281_v15 = vmul.f32 0.03125, %v10275_v20 }
0x3ef7   : > { %v10286_v53 = vadd.f32 1e-05, %v10282_v59  ;;  %v10285_v13 = vadd.f32 1e-05, %v10281_v15 }
0x3ef9   : > { %12868 = vrsqrt.f32 %v10286_v53 }
0x3efa   : > { %12870 = vrsqrt.f32 %v10285_v13 }
0x3efe   : > { %v12865_v49 = vpop.eup %12864 }
0x3eff   : > { %v10291_v48 = vmul.f32 %v12865_v49, %v10259_v62 }
0x3f01   : > { %v10301_v37 = vmul.f32 %v10971_v30, %v10291_v48 }
0x3f02   : > { %v12867_v3 = vpop.eup %12866 }
0x3f03   : > { %v10292_v41 = vmul.f32 %v12867_v3, %v10260_v4  ;;  %v10311_v6 = vadd.f32 %v10972_v23, %v10301_v37 }
0x3f05   : > { %v10302_v51 = vmul.f32 %v10971_v30, %v10292_v41 }
0x3f06   : > { %v12869_v2 = vpop.eup %12868 }
0x3f07   : > { %v12871_v5 = vpop.eup %12870  ;;  %v10294_v43 = vmul.f32 %v12869_v2, %v10262_v39  ;;  %v10312_v25 = vadd.f32 %v10972_v23, %v10302_v51 }
0x3f08   : > { %v10293_v18 = vmul.f32 %v12871_v5, %v10261_v34 }
0x3f09   : > { %v10304_v52 = vmul.f32 %v10971_v30, %v10294_v43  ;;  %v10315_v19 = vpack.c.bf16 %v10312_v25, %v10311_v6 }
0x3f0a   : > { %v10303_v0 = vmul.f32 %v10971_v30, %v10293_v18 }
0x3f0b   : > { %v10314_v24 = vadd.f32 %v10972_v23, %v10304_v52  ;;  %12292 = vmatprep.mubr.msk.bf16.mxu1 %vm1093_vm0, %v10315_v19 }
0x3f0c   : > { %v10313_v14 = vadd.f32 %v10972_v23, %v10303_v0 }
0x3f0e   : > { %v10316_v31 = vpack.c.bf16 %v10314_v24, %v10313_v14 }
0x3f10   : > { %12293 = vmatmul.mubr.msk.bf16.vlgmr.msra.gmra.mxu1 %vm1093_vm0, %v10316_v31 }
0x3fd0   : > { %v12294_v33 = vpop.f32.mrf.mxu1 }
0x3fd1   : > { %v10389_v47 = vadd.f32 %v12294_v33, %v10973_v36 }
0x3fd2   : > { %v10380_v40 = vpop.f32.mrf.mxu1 }
0x3fd3   : > { %v10381_v7 = vadd.f32 %v10973_v36, %v10380_v40 }
0x3fd4   : > { %v12295_v50 = vpop.f32.mrf.mxu1 }
0x3fd5   : > { %10395 = vmax.xlane.f32.xlu0 %v10381_v7  ;;  %v10392_v61 = vadd.f32 %v12295_v50, %v10973_v36 }
0x3fd6   : > { %v10383_v26 = vpop.f32.mrf.mxu1 }
0x3fd7   : > { %v10384_v10 = vadd.f32 %v10973_v36, %v10383_v26 }
0x3fd9   : > { %10397 = vmax.xlane.f32.xlu1 %v10384_v10  ;;  %10399 = vmax.xlane.f32.xlu0 %v10389_v47 }
0x3fdd   : > { %10401 = vmax.xlane.f32.xlu1 %v10392_v61 }
0x405e   : > { %v10396_v35 = vpop.xlane.xlu0 %10395 }
0x405f   : > { %v10403_v9 = vsub.f32 %v10381_v7, %v10396_v35 }
0x4061   : > { %v10407_v57 = vmul.f32 1.442695, %v10403_v9 }
0x4062   : > { %v10398_v54 = vpop.xlane.xlu1 %10397  ;;  %v10400_v44 = vpop.xlane.xlu0 %10399 }
0x4063   : > { %12872 = vpow2.f32 %v10407_v57  ;;  %v10404_v62 = vsub.f32 %v10384_v10, %v10398_v54  ;;  %v10405_v16 = vsub.f32 %v10389_v47, %v10400_v44 }
0x4065   : > { %v10409_v11 = vmul.f32 1.442695, %v10404_v62  ;;  %v10411_v12 = vmul.f32 1.442695, %v10405_v16 }
0x4066   : > { %v10402_v34 = vpop.xlane.xlu1 %10401 }
0x4067   : > { %12874 = vpow2.f32 %v10409_v11  ;;  %v10406_v4 = vsub.f32 %v10392_v61, %v10402_v34 }
0x4068   : > { %12876 = vpow2.f32 %v10411_v12 }
0x4069   : > { %v10413_v29 = vmul.f32 1.442695, %v10406_v4 }
0x406b   : > { %12878 = vpow2.f32 %v10413_v29 }
0x4070   : > { %v12873_v55 = vpop.eup %12872 }
0x4071   : > { %10415 = vadd.xlane.f32.xlu0 %v12873_v55 }
0x4074   : > { %v12875_v60 = vpop.eup %12874 }
0x4075   : > { %v12877_v28 = vpop.eup %12876  ;;  %10417 = vadd.xlane.f32.xlu1 %v12875_v60 }
0x4076   : > { %10419 = vadd.xlane.f32.xlu0 %v12877_v28 }
0x4078   : > { %v12879_v39 = vpop.eup %12878 }
0x4079   : > { %10421 = vadd.xlane.f32.xlu1 %v12879_v39 }
0x40fa   : > { %v10416_v22 = vpop.xlane.xlu0 %10415 }
0x40fb   : > { %12880 = vlog2.f32 %v10416_v22 }
0x40fe   : > { %v10418_v27 = vpop.xlane.xlu1 %10417 }
0x40ff   : > { %12882 = vlog2.f32 %v10418_v27  ;;  %v10420_v38 = vpop.xlane.xlu0 %10419 }
0x4100   : > { %12884 = vlog2.f32 %v10420_v38 }
0x4102   : > { %v10422_v8 = vpop.xlane.xlu1 %10421 }
0x4103   : > { %12886 = vlog2.f32 %v10422_v8 }
0x4108   : > { %v12881_v1 = vpop.eup %12880 }
0x4109   : > { %v10424_v21 = vmul.f32 0.6931472, %v12881_v1 }
0x410b   : > { %v10431_v32 = vadd.f32 %v10424_v21, %v10396_v35 }
0x410c   : > { %v12883_v46 = vpop.eup %12882 }
0x410d   : > { %v12885_v45 = vpop.eup %12884  ;;  %v10435_v17 = vsub.f32 %v10381_v7, %v10431_v32  ;;  %v10426_v63 = vmul.f32 0.6931472, %v12883_v46 }
0x410e   : > { %v10428_v42 = vmul.f32 0.6931472, %v12885_v45 }
0x410f   : > { %10439 = vst [vmem:[%s1040_s13] sm:$0xff] %v10435_v17  ;;  %v10432_v56 = vadd.f32 %v10426_v63, %v10398_v54 }
0x4110   : > { %v12887_v58 = vpop.eup %12886  ;;  %v10433_v20 = vadd.f32 %v10428_v42, %v10400_v44 }
0x4111   : > { %v10436_v59 = vsub.f32 %v10384_v10, %v10432_v56  ;;  %v10430_v15 = vmul.f32 0.6931472, %v12887_v58 }
0x4112   : > { %v10437_v53 = vsub.f32 %v10389_v47, %v10433_v20 }
0x4113   : > { %10440 = vst [vmem:[%s1040_s13 + $0x8] sm:$0xff] %v10436_v59  ;;  %v10434_v13 = vadd.f32 %v10430_v15, %v10402_v34 }
0x4114   : > { %10441 = vst [vmem:[%s1040_s13 + $0x10] sm:$0xff] %v10437_v53 }
0x4115   : > { %v10438_v49 = vsub.f32 %v10392_v61, %v10434_v13 }
0x4117   : > { %10442 = vst [vmem:[%s1040_s13 + $0x18] sm:$0xff] %v10438_v49 }
0x4118   : > { %13337 = shalt.err (!%p13334_p1)
}
0x4119   : > { %s13338_s0 = scalar_lea.hbm %s15568_s29, 512  ;;  %s13342_s13 = scalar_lea.hbm %s15714_s3, 1024 }
0x411a   : > { %p13339_p8 = scmp.ne.s32.totalorder %s15568_s29, %s13338_s0  ;;  %p13343_p12 = scmp.lt.s32.totalorder %s15568_s29, %s15714_s3 }
0x411b   : > { %p13344_p10 = scmp.lt.s32.totalorder %s13342_s13, %s13338_s0 }
0x411c   : > { %p13340_p11 = pnand %p13339_p8, %p13652_p5 }
0x411d   : > { %p13345_p7 = por %p13344_p10, %p13343_p12 }
0x411e   : > { %p13341_p0 = pneg %p13340_p11 }
0x4120   : > { %p13346_p3 = pnand %p13345_p7, %p13341_p0 }
0x4122   : > { %13349 = shalt.err (!%p13346_p3)
}
0x4123   : > { %s13461_s9 = smov 128   ;;  %s13462_s12 = smov 8  }
0x4124   : > { %12376 = dma.vmem_to_hbm [thread:$0]  (%p13652_p5), %s15570_s7, 512, %s15568_s29, %s15572_s28, %s13461_s9, %s13461_s9, %s13462_s12  }
0x4125 PF: > { %s15715_s30 = sld [smem:[#allocation45_spill]] }
0x4126   : > { %s15716_s1 = sld [smem:[#allocation43_spill]] }
0x412b   : > { %p12463_p2 = scmp.ge.s32.totalorder %s15715_s30, 2 }
0x412c   : > { %s10472_s10 = sand.u32 1, %s15716_s1  }
0x412d   : > { %p12428_p4 = pnand %p12463_p2, %p13656_p6  ;;  %s10473_s0 = scalar_lea.sflag [#allocation7], %s10472_s10 }
0x412f   : > { %p12429_p9 = pneg %p12428_p4 }
0x4131   : > { %13405 = dma.done.wait (%p12429_p9), %s10473_s0, 512  }
0x4132   : > { %13407 = vsyncadd (%p12429_p9), %s10473_s0, 4294966784  ;;  %s15718_s1 = sld [smem:[#allocation46_spill]]  ;;  %s15721_s23 = smov %s13414_s11 }
0x4133   : > { %s15719_s4 = sld [smem:[#allocation44_spill]] }
0x4134   : > { %s15720_s0 = sld [smem:[#allocation47_spill]] }
0x4138   : > { %p53_p13 = scmp.ge.s32.totalorder %s15718_s1, 4  }
0x4139   : > { %s15722_s11 = smov %s15719_s4 }
0x413a   :  { %55 = sbr.rel (!%p53_p13) target bundleno = 39 (0x27), region = 247 }
0x413f   :  { %10478 = vsyncpa [#allocation6], 1 }
0x4140   :  { %10480 = vsyncpa [#allocation6 + $0x1], 1 }
0x4141   :  { %10481 = vsyncpa [#allocation9], 1 }
0x4142   :  { %10482 = vsyncpa [#allocation12], 1 }
0x4143   :  { %10483 = vsyncpa [#allocation15], 1 }
0x4144   :  { %10484 = vsyncpa [#allocation18], 1 }
0x4145   :  { %10485 = vsyncpa [#allocation21], 1 }
0x4146   :  { %10486 = vsyncpa [#allocation24], 1 }
0x4147   :  { %10487 = vsyncpa [#allocation27], 1 }
0x4148   :  { %10488 = vsyncpa [#allocation30], 1 }
0x4149   :  { %10489 = vsyncpa [#allocation7], 1 }
0x414a   :  { %10491 = vsyncpa [#allocation7 + $0x1], 1 }

</bundles_post_ra>
